<compile_context>
chip_gen: v6e
topology: v6e:2x2x1
jax: 0.10.0
libtpu: 0.0.40
codegen_flags: <defaults>
</compile_context>

<pallas_src>
import jax
import jax.numpy as jnp
from jax.experimental import pallas as pl
from jax.experimental.pallas import tpu as pltpu

C_IN = 16 * 5            # 80  (concat of 5 x 16 channels)
CP = 128                 # C_IN zero-padded to one full lane tile
C_MID = 64
C_OUT = 64
KS = 3
H = W = 16

H1 = H + 2                       # 18: layer-1 grid height (incl. zero ring for layer 2)
W1 = ((W + 2 + 7) // 8) * 8      # 24: layer-1 grid width, padded to a multiple of 8
HP = H1 + 2                      # 20: padded input height
WP = W1 + 2                      # 26: padded input width


def _fused_conv_kernel(x_ref, w1_ref, b1_ref, a1_ref, w2_ref, b2_ref, a2_ref,
                       mask_ref, out_ref):
    # x_ref   : (B, HP, WP, CP)      zero-padded channels-last input, f32
    # w1_ref  : (3, 3*CP, C_MID)     conv1 weights, kx folded into K, bf16
    # b1_ref  : (1, C_MID)  f32
    # a1_ref  : (1, 1)      f32      PReLU slope (shared, nn.PReLU default)
    # w2_ref  : (3, 3*C_MID, C_OUT)  conv2 weights, kx folded into K, bf16
    # b2_ref  : (1, C_OUT)  f32
    # a2_ref  : (1, 1)      f32
    # mask_ref: (B*H1*W1, 1) f32     1.0 on the true 16x16 grid, 0.0 on the ring
    # out_ref : (B, H*W, C_OUT) f32
    B = x_ref.shape[0]
    M1 = B * H1 * W1
    M2 = B * H * W

    # ---- layer 1: conv 80(->128 padded) -> 64, batch folded into M,
    #      kx folded into K (3 MXU dots, K = 384) -------------------------
    acc1 = None
    for ky in range(KS):
        lhs = jnp.concatenate(
            [x_ref[:, ky:ky + H1, kx:kx + W1, :].reshape(M1, CP)
             for kx in range(KS)],
            axis=1).astype(jnp.bfloat16)                       # (M1, 3*CP)
        d = jnp.dot(lhs, w1_ref[ky], preferred_element_type=jnp.float32)
        acc1 = d if acc1 is None else acc1 + d
    acc1 = acc1 + b1_ref[...]
    h = jnp.where(acc1 >= 0.0, acc1, a1_ref[...] * acc1) * mask_ref[...]
    hb = h.reshape(B, H1, W1, C_MID)       # f32; masked ring == conv2 zero pad

    # ---- layer 2: conv 64 -> 64 on the true 16x16 grid,
    #      kx folded into K (3 MXU dots, K = 192) -------------------------
    acc2 = None
    for ky in range(KS):
        lhs2 = jnp.concatenate(
            [hb[:, ky:ky + H, kx:kx + W, :].reshape(M2, C_MID)
             for kx in range(KS)],
            axis=1).astype(jnp.bfloat16)                       # (M2, 3*C_MID)
        d = jnp.dot(lhs2, w2_ref[ky], preferred_element_type=jnp.float32)
        acc2 = d if acc2 is None else acc2 + d
    acc2 = acc2 + b2_ref[...]
    z = jnp.where(acc2 >= 0.0, acc2, a2_ref[...] * acc2)       # PReLU
    out_ref[...] = z.reshape(B, H * W, C_OUT)


@jax.jit
def concat16_5_forward(x1, x2, x3, x4, x5, w1, b1, a1, w2, b2, a2):
    B = x1.shape[0]

    # channel concat + NHWC + zero pad (spatial ring + channels to 128):
    # cheap XLA prep, fused inside this jit, feeding ONE pallas_call.
    xcat = jnp.concatenate([x1, x2, x3, x4, x5], axis=1)            # (B, 80, H, W)
    xnhwc = jnp.transpose(xcat, (0, 2, 3, 1)).astype(jnp.float32)   # (B, H, W, 80)
    xpad = jnp.pad(xnhwc, ((0, 0), (2, 2), (2, WP - 2 - W), (0, CP - C_IN)))

    # conv1 weights as (ky, kx*CP + cin, cout) with cin zero-padded to 128
    w1t = jnp.transpose(w1, (2, 3, 1, 0))                            # (3,3,80,64)
    w1t = jnp.pad(w1t, ((0, 0), (0, 0), (0, CP - C_IN), (0, 0)))     # (3,3,128,64)
    w1k = w1t.reshape(KS, KS * CP, C_MID).astype(jnp.bfloat16)       # (3,384,64)

    # conv2 weights as (ky, kx*C_MID + cin, cout)
    w2k = jnp.transpose(w2, (2, 3, 1, 0)).reshape(KS, KS * C_MID, C_OUT)
    w2k = w2k.astype(jnp.bfloat16)                                   # (3,192,64)

    b1r = b1.reshape(1, C_MID).astype(jnp.float32)
    b2r = b2.reshape(1, C_OUT).astype(jnp.float32)
    a1r = jnp.full((1, 1), a1, jnp.float32)
    a2r = jnp.full((1, 1), a2, jnp.float32)

    # interior mask of the (H1, W1) layer-1 grid, tiled over batch
    yy = jnp.arange(H1)[:, None]
    xx = jnp.arange(W1)[None, :]
    m = (((yy >= 1) & (yy <= H)) & ((xx >= 1) & (xx <= W))).astype(jnp.float32)
    mask = jnp.broadcast_to(m.reshape(1, H1 * W1, 1), (B, H1 * W1, 1))
    mask = mask.reshape(B * H1 * W1, 1)

    out_flat = pl.pallas_call(
        _fused_conv_kernel,
        out_shape=jax.ShapeDtypeStruct((B, H * W, C_OUT), jnp.float32),
        compiler_params=pltpu.CompilerParams(vmem_limit_bytes=32 * 1024 * 1024),
    )(xpad, w1k, b1r, a1r, w2k, b2r, a2r, mask)

    # back to NCHW like the PyTorch module
    out = jnp.transpose(out_flat.reshape(B, H, W, C_OUT), (0, 3, 1, 2))
    return out


# --------------------------------- reference -----------------------------------
def reference(x1, x2, x3, x4, x5, w1, b1, a1, w2, b2, a2):
    x = jnp.concatenate([x1, x2, x3, x4, x5], axis=1)
    dn = ('NCHW', 'OIHW', 'NCHW')
    y = jax.lax.conv_general_dilated(x, w1, (1, 1), ((1, 1), (1, 1)),
                                     dimension_numbers=dn,
                                     precision=jax.lax.Precision.HIGHEST)
    y = y + b1[None, :, None, None]
    y = jnp.where(y >= 0.0, y, a1 * y)
    z = jax.lax.conv_general_dilated(y, w2, (1, 1), ((1, 1), (1, 1)),
                                     dimension_numbers=dn,
                                     precision=jax.lax.Precision.HIGHEST)
    z = z + b2[None, :, None, None]
    return jnp.where(z >= 0.0, z, a2 * z)


if __name__ == "__main__":
    key = jax.random.PRNGKey(0)
    ks = jax.random.split(key, 9)
    B = 2

    def q(v):  # snap values to the bf16 grid so operand rounding is lossless
        return v.astype(jnp.bfloat16).astype(jnp.float32)

    xs = [q(jax.random.normal(ks[i], (B, 16, H, W), dtype=jnp.float32))
          for i in range(5)]
    w1 = q(0.05 * jax.random.normal(ks[5], (C_MID, C_IN, KS, KS), jnp.float32))
    b1 = q(0.10 * jax.random.normal(ks[6], (C_MID,), jnp.float32))
    w2 = q(0.05 * jax.random.normal(ks[7], (C_OUT, C_MID, KS, KS), jnp.float32))
    b2 = q(0.10 * jax.random.normal(ks[8], (C_OUT,), jnp.float32))
    a1 = 0.25   # nn.PReLU() default init (single shared slope)
    a2 = 0.25

    out = concat16_5_forward(*xs, w1, b1, a1, w2, b2, a2)
    out = jax.block_until_ready(out)

    ref = reference(*xs, w1, b1, a1, w2, b2, a2)
    assert out.shape == (B, C_OUT, H, W), out.shape
    # Tolerance reflects bf16 MXU operands (f32 accumulation) — in particular
    # the bf16 rounding of the layer-1 activation fed into conv2 — vs the
    # full-f32 HIGHEST-precision reference.
    max_err = float(jnp.max(jnp.abs(out - ref)))
    assert jnp.allclose(out, ref, atol=2e-2, rtol=2e-2), max_err

    print("KERNEL_OK")
</pallas_src>

<mosaic_0001>
module attributes {stable_mosaic.version = 11 : i64} {
  func.func @_fused_conv_kernel(%arg0: memref<2x20x26x128xf32, #tpu.memory_space<vmem>>, %arg1: memref<3x384x64xbf16, #tpu.memory_space<vmem>>, %arg2: memref<1x64xf32, #tpu.memory_space<vmem>>, %arg3: memref<1x1xf32, #tpu.memory_space<vmem>>, %arg4: memref<3x192x64xbf16, #tpu.memory_space<vmem>>, %arg5: memref<1x64xf32, #tpu.memory_space<vmem>>, %arg6: memref<1x1xf32, #tpu.memory_space<vmem>>, %arg7: memref<864x1xf32, #tpu.memory_space<vmem>>, %arg8: memref<2x256x64xf32, #tpu.memory_space<vmem>>) attributes {dimension_semantics = [], scalar_prefetch = 0 : i64, scratch_operands = 0 : i64, tpu.core_type = #tpu.core_type<tc>} {
    %c0 = arith.constant 0 : index
    %c0_0 = arith.constant 0 : index
    %c0_1 = arith.constant 0 : index
    %c0_2 = arith.constant 0 : index
    %0 = vector.load %arg0[%c0, %c0_0, %c0_1, %c0_2] : memref<2x20x26x128xf32, #tpu.memory_space<vmem>>, vector<2x18x24x128xf32>
    %1 = vector.shape_cast %0 : vector<2x18x24x128xf32> to vector<864x128xf32>
    %c0_3 = arith.constant 0 : index
    %c0_4 = arith.constant 0 : index
    %c1 = arith.constant 1 : index
    %c0_5 = arith.constant 0 : index
    %2 = vector.load %arg0[%c0_3, %c0_4, %c1, %c0_5] : memref<2x20x26x128xf32, #tpu.memory_space<vmem>>, vector<2x18x24x128xf32>
    %3 = vector.shape_cast %2 : vector<2x18x24x128xf32> to vector<864x128xf32>
    %c0_6 = arith.constant 0 : index
    %c0_7 = arith.constant 0 : index
    %c2 = arith.constant 2 : index
    %c0_8 = arith.constant 0 : index
    %4 = vector.load %arg0[%c0_6, %c0_7, %c2, %c0_8] : memref<2x20x26x128xf32, #tpu.memory_space<vmem>>, vector<2x18x24x128xf32>
    %5 = vector.shape_cast %4 : vector<2x18x24x128xf32> to vector<864x128xf32>
    %6 = tpu.concatenate %1, %3, %5 in 1 : vector<864x128xf32>, vector<864x128xf32>, vector<864x128xf32> -> vector<864x384xf32>
    %7 = arith.truncf %6 : vector<864x384xf32> to vector<864x384xbf16>
    %c0_9 = arith.constant 0 : index
    %c0_10 = arith.constant 0 : index
    %c0_11 = arith.constant 0 : index
    %8 = vector.load %arg1[%c0_9, %c0_10, %c0_11] : memref<3x384x64xbf16, #tpu.memory_space<vmem>>, vector<1x384x64xbf16>
    %9 = vector.shape_cast %8 : vector<1x384x64xbf16> to vector<384x64xbf16>
    %cst = arith.constant dense<0.000000e+00> : vector<864x64xf32>
    %10 = tpu.matmul %7, %9, %cst {dimension_numbers = #tpu.dot_dimension_numbers<[1], [0], [0], [1], [0, 0, 1, 1], [], []>} : vector<864x384xbf16>, vector<384x64xbf16>, vector<864x64xf32> -> vector<864x64xf32>
    %c0_12 = arith.constant 0 : index
    %c1_13 = arith.constant 1 : index
    %c0_14 = arith.constant 0 : index
    %c0_15 = arith.constant 0 : index
    %11 = vector.load %arg0[%c0_12, %c1_13, %c0_14, %c0_15] : memref<2x20x26x128xf32, #tpu.memory_space<vmem>>, vector<2x18x24x128xf32>
    %12 = vector.shape_cast %11 : vector<2x18x24x128xf32> to vector<864x128xf32>
    %c0_16 = arith.constant 0 : index
    %c1_17 = arith.constant 1 : index
    %c1_18 = arith.constant 1 : index
    %c0_19 = arith.constant 0 : index
    %13 = vector.load %arg0[%c0_16, %c1_17, %c1_18, %c0_19] : memref<2x20x26x128xf32, #tpu.memory_space<vmem>>, vector<2x18x24x128xf32>
    %14 = vector.shape_cast %13 : vector<2x18x24x128xf32> to vector<864x128xf32>
    %c0_20 = arith.constant 0 : index
    %c1_21 = arith.constant 1 : index
    %c2_22 = arith.constant 2 : index
    %c0_23 = arith.constant 0 : index
    %15 = vector.load %arg0[%c0_20, %c1_21, %c2_22, %c0_23] : memref<2x20x26x128xf32, #tpu.memory_space<vmem>>, vector<2x18x24x128xf32>
    %16 = vector.shape_cast %15 : vector<2x18x24x128xf32> to vector<864x128xf32>
    %17 = tpu.concatenate %12, %14, %16 in 1 : vector<864x128xf32>, vector<864x128xf32>, vector<864x128xf32> -> vector<864x384xf32>
    %18 = arith.truncf %17 : vector<864x384xf32> to vector<864x384xbf16>
    %c1_24 = arith.constant 1 : index
    %c0_25 = arith.constant 0 : index
    %c0_26 = arith.constant 0 : index
    %19 = vector.load %arg1[%c1_24, %c0_25, %c0_26] : memref<3x384x64xbf16, #tpu.memory_space<vmem>>, vector<1x384x64xbf16>
    %20 = vector.shape_cast %19 : vector<1x384x64xbf16> to vector<384x64xbf16>
    %cst_27 = arith.constant dense<0.000000e+00> : vector<864x64xf32>
    %21 = tpu.matmul %18, %20, %cst_27 {dimension_numbers = #tpu.dot_dimension_numbers<[1], [0], [0], [1], [0, 0, 1, 1], [], []>} : vector<864x384xbf16>, vector<384x64xbf16>, vector<864x64xf32> -> vector<864x64xf32>
    %22 = arith.addf %10, %21 : vector<864x64xf32>
    %c0_28 = arith.constant 0 : index
    %c2_29 = arith.constant 2 : index
    %c0_30 = arith.constant 0 : index
    %c0_31 = arith.constant 0 : index
    %23 = vector.load %arg0[%c0_28, %c2_29, %c0_30, %c0_31] : memref<2x20x26x128xf32, #tpu.memory_space<vmem>>, vector<2x18x24x128xf32>
    %24 = vector.shape_cast %23 : vector<2x18x24x128xf32> to vector<864x128xf32>
    %c0_32 = arith.constant 0 : index
    %c2_33 = arith.constant 2 : index
    %c1_34 = arith.constant 1 : index
    %c0_35 = arith.constant 0 : index
    %25 = vector.load %arg0[%c0_32, %c2_33, %c1_34, %c0_35] : memref<2x20x26x128xf32, #tpu.memory_space<vmem>>, vector<2x18x24x128xf32>
    %26 = vector.shape_cast %25 : vector<2x18x24x128xf32> to vector<864x128xf32>
    %c0_36 = arith.constant 0 : index
    %c2_37 = arith.constant 2 : index
    %c2_38 = arith.constant 2 : index
    %c0_39 = arith.constant 0 : index
    %27 = vector.load %arg0[%c0_36, %c2_37, %c2_38, %c0_39] : memref<2x20x26x128xf32, #tpu.memory_space<vmem>>, vector<2x18x24x128xf32>
    %28 = vector.shape_cast %27 : vector<2x18x24x128xf32> to vector<864x128xf32>
    %29 = tpu.concatenate %24, %26, %28 in 1 : vector<864x128xf32>, vector<864x128xf32>, vector<864x128xf32> -> vector<864x384xf32>
    %30 = arith.truncf %29 : vector<864x384xf32> to vector<864x384xbf16>
    %c2_40 = arith.constant 2 : index
    %c0_41 = arith.constant 0 : index
    %c0_42 = arith.constant 0 : index
    %31 = vector.load %arg1[%c2_40, %c0_41, %c0_42] : memref<3x384x64xbf16, #tpu.memory_space<vmem>>, vector<1x384x64xbf16>
    %32 = vector.shape_cast %31 : vector<1x384x64xbf16> to vector<384x64xbf16>
    %cst_43 = arith.constant dense<0.000000e+00> : vector<864x64xf32>
    %33 = tpu.matmul %30, %32, %cst_43 {dimension_numbers = #tpu.dot_dimension_numbers<[1], [0], [0], [1], [0, 0, 1, 1], [], []>} : vector<864x384xbf16>, vector<384x64xbf16>, vector<864x64xf32> -> vector<864x64xf32>
    %34 = arith.addf %22, %33 : vector<864x64xf32>
    %c0_44 = arith.constant 0 : index
    %c0_45 = arith.constant 0 : index
    %35 = vector.load %arg2[%c0_44, %c0_45] : memref<1x64xf32, #tpu.memory_space<vmem>>, vector<1x64xf32>
    %36 = vector.broadcast %35 : vector<1x64xf32> to vector<864x64xf32>
    %37 = arith.addf %34, %36 : vector<864x64xf32>
    %cst_46 = arith.constant 0.000000e+00 : f32
    %38 = vector.broadcast %cst_46 : f32 to vector<864x64xf32>
    %39 = arith.cmpf oge, %37, %38 : vector<864x64xf32>
    %c0_47 = arith.constant 0 : index
    %c0_48 = arith.constant 0 : index
    %40 = vector.load %arg3[%c0_47, %c0_48] : memref<1x1xf32, #tpu.memory_space<vmem>>, vector<1x1xf32>
    %41 = vector.broadcast %40 : vector<1x1xf32> to vector<864x64xf32>
    %42 = arith.mulf %41, %37 : vector<864x64xf32>
    %43 = arith.select %39, %37, %42 : vector<864x64xi1>, vector<864x64xf32>
    %c0_49 = arith.constant 0 : index
    %c0_50 = arith.constant 0 : index
    %44 = vector.load %arg7[%c0_49, %c0_50] : memref<864x1xf32, #tpu.memory_space<vmem>>, vector<864x1xf32>
    %45 = vector.broadcast %44 : vector<864x1xf32> to vector<864x64xf32>
    %46 = arith.mulf %43, %45 : vector<864x64xf32>
    %47 = vector.shape_cast %46 : vector<864x64xf32> to vector<2x18x24x64xf32>
    %48 = vector.extract_strided_slice %47 {offsets = [0, 0, 0, 0], sizes = [2, 16, 16, 64], strides = [1, 1, 1, 1]} : vector<2x18x24x64xf32> to vector<2x16x16x64xf32>
    %49 = vector.shape_cast %48 : vector<2x16x16x64xf32> to vector<512x64xf32>
    %50 = vector.extract_strided_slice %47 {offsets = [0, 0, 1, 0], sizes = [2, 16, 16, 64], strides = [1, 1, 1, 1]} : vector<2x18x24x64xf32> to vector<2x16x16x64xf32>
    %51 = vector.shape_cast %50 : vector<2x16x16x64xf32> to vector<512x64xf32>
    %52 = vector.extract_strided_slice %47 {offsets = [0, 0, 2, 0], sizes = [2, 16, 16, 64], strides = [1, 1, 1, 1]} : vector<2x18x24x64xf32> to vector<2x16x16x64xf32>
    %53 = vector.shape_cast %52 : vector<2x16x16x64xf32> to vector<512x64xf32>
    %54 = tpu.concatenate %49, %51, %53 in 1 : vector<512x64xf32>, vector<512x64xf32>, vector<512x64xf32> -> vector<512x192xf32>
    %55 = arith.truncf %54 : vector<512x192xf32> to vector<512x192xbf16>
    %c0_51 = arith.constant 0 : index
    %c0_52 = arith.constant 0 : index
    %c0_53 = arith.constant 0 : index
    %56 = vector.load %arg4[%c0_51, %c0_52, %c0_53] : memref<3x192x64xbf16, #tpu.memory_space<vmem>>, vector<1x192x64xbf16>
    %57 = vector.shape_cast %56 : vector<1x192x64xbf16> to vector<192x64xbf16>
    %cst_54 = arith.constant dense<0.000000e+00> : vector<512x64xf32>
    %58 = tpu.matmul %55, %57, %cst_54 {dimension_numbers = #tpu.dot_dimension_numbers<[1], [0], [0], [1], [0, 0, 1, 1], [], []>} : vector<512x192xbf16>, vector<192x64xbf16>, vector<512x64xf32> -> vector<512x64xf32>
    %59 = vector.extract_strided_slice %47 {offsets = [0, 1, 0, 0], sizes = [2, 16, 16, 64], strides = [1, 1, 1, 1]} : vector<2x18x24x64xf32> to vector<2x16x16x64xf32>
    %60 = vector.shape_cast %59 : vector<2x16x16x64xf32> to vector<512x64xf32>
    %61 = vector.extract_strided_slice %47 {offsets = [0, 1, 1, 0], sizes = [2, 16, 16, 64], strides = [1, 1, 1, 1]} : vector<2x18x24x64xf32> to vector<2x16x16x64xf32>
    %62 = vector.shape_cast %61 : vector<2x16x16x64xf32> to vector<512x64xf32>
    %63 = vector.extract_strided_slice %47 {offsets = [0, 1, 2, 0], sizes = [2, 16, 16, 64], strides = [1, 1, 1, 1]} : vector<2x18x24x64xf32> to vector<2x16x16x64xf32>
    %64 = vector.shape_cast %63 : vector<2x16x16x64xf32> to vector<512x64xf32>
    %65 = tpu.concatenate %60, %62, %64 in 1 : vector<512x64xf32>, vector<512x64xf32>, vector<512x64xf32> -> vector<512x192xf32>
    %66 = arith.truncf %65 : vector<512x192xf32> to vector<512x192xbf16>
    %c1_55 = arith.constant 1 : index
    %c0_56 = arith.constant 0 : index
    %c0_57 = arith.constant 0 : index
    %67 = vector.load %arg4[%c1_55, %c0_56, %c0_57] : memref<3x192x64xbf16, #tpu.memory_space<vmem>>, vector<1x192x64xbf16>
    %68 = vector.shape_cast %67 : vector<1x192x64xbf16> to vector<192x64xbf16>
    %cst_58 = arith.constant dense<0.000000e+00> : vector<512x64xf32>
    %69 = tpu.matmul %66, %68, %cst_58 {dimension_numbers = #tpu.dot_dimension_numbers<[1], [0], [0], [1], [0, 0, 1, 1], [], []>} : vector<512x192xbf16>, vector<192x64xbf16>, vector<512x64xf32> -> vector<512x64xf32>
    %70 = arith.addf %58, %69 : vector<512x64xf32>
    %71 = vector.extract_strided_slice %47 {offsets = [0, 2, 0, 0], sizes = [2, 16, 16, 64], strides = [1, 1, 1, 1]} : vector<2x18x24x64xf32> to vector<2x16x16x64xf32>
    %72 = vector.shape_cast %71 : vector<2x16x16x64xf32> to vector<512x64xf32>
    %73 = vector.extract_strided_slice %47 {offsets = [0, 2, 1, 0], sizes = [2, 16, 16, 64], strides = [1, 1, 1, 1]} : vector<2x18x24x64xf32> to vector<2x16x16x64xf32>
    %74 = vector.shape_cast %73 : vector<2x16x16x64xf32> to vector<512x64xf32>
    %75 = vector.extract_strided_slice %47 {offsets = [0, 2, 2, 0], sizes = [2, 16, 16, 64], strides = [1, 1, 1, 1]} : vector<2x18x24x64xf32> to vector<2x16x16x64xf32>
    %76 = vector.shape_cast %75 : vector<2x16x16x64xf32> to vector<512x64xf32>
    %77 = tpu.concatenate %72, %74, %76 in 1 : vector<512x64xf32>, vector<512x64xf32>, vector<512x64xf32> -> vector<512x192xf32>
    %78 = arith.truncf %77 : vector<512x192xf32> to vector<512x192xbf16>
    %c2_59 = arith.constant 2 : index
    %c0_60 = arith.constant 0 : index
    %c0_61 = arith.constant 0 : index
    %79 = vector.load %arg4[%c2_59, %c0_60, %c0_61] : memref<3x192x64xbf16, #tpu.memory_space<vmem>>, vector<1x192x64xbf16>
    %80 = vector.shape_cast %79 : vector<1x192x64xbf16> to vector<192x64xbf16>
    %cst_62 = arith.constant dense<0.000000e+00> : vector<512x64xf32>
    %81 = tpu.matmul %78, %80, %cst_62 {dimension_numbers = #tpu.dot_dimension_numbers<[1], [0], [0], [1], [0, 0, 1, 1], [], []>} : vector<512x192xbf16>, vector<192x64xbf16>, vector<512x64xf32> -> vector<512x64xf32>
    %82 = arith.addf %70, %81 : vector<512x64xf32>
    %c0_63 = arith.constant 0 : index
    %c0_64 = arith.constant 0 : index
    %83 = vector.load %arg5[%c0_63, %c0_64] : memref<1x64xf32, #tpu.memory_space<vmem>>, vector<1x64xf32>
    %84 = vector.broadcast %83 : vector<1x64xf32> to vector<512x64xf32>
    %85 = arith.addf %82, %84 : vector<512x64xf32>
    %cst_65 = arith.constant 0.000000e+00 : f32
    %86 = vector.broadcast %cst_65 : f32 to vector<512x64xf32>
    %87 = arith.cmpf oge, %85, %86 : vector<512x64xf32>
    %c0_66 = arith.constant 0 : index
    %c0_67 = arith.constant 0 : index
    %88 = vector.load %arg6[%c0_66, %c0_67] : memref<1x1xf32, #tpu.memory_space<vmem>>, vector<1x1xf32>
    %89 = vector.broadcast %88 : vector<1x1xf32> to vector<512x64xf32>
    %90 = arith.mulf %89, %85 : vector<512x64xf32>
    %91 = arith.select %87, %85, %90 : vector<512x64xi1>, vector<512x64xf32>
    %92 = vector.shape_cast %91 : vector<512x64xf32> to vector<2x256x64xf32>
    %c0_68 = arith.constant 0 : index
    %c0_69 = arith.constant 0 : index
    %c0_70 = arith.constant 0 : index
    %93 = vector.load %arg8[%c0_68, %c0_69, %c0_70] : memref<2x256x64xf32, #tpu.memory_space<vmem>>, vector<2x256x64xf32>
    tpu.vector_store %arg8[%c0_68, %c0_69, %c0_70], %92 {strides = array<i32>} : memref<2x256x64xf32, #tpu.memory_space<vmem>>, vector<2x256x64xf32>,
    return
  }
}

</mosaic_0001>

<bundles_post_ra>
// kernel: concat16_5_forward.1
= control target key start
LH: loop header
LB: loop body
LE: loop exit
PB: predicated region body
PF: predicated region fallthrough
CT: control target
= control target key end

     0   :  { %s18297_s0 = inlined_call_operand.vmem [shape: f32[2,20,26,128], index: 0, kind: input, shape index: {}]   ;;  %s18298_s1 = inlined_call_operand.vmem [shape: bf16[3,384,64], index: 1, kind: input, shape index: {}]   ;;  %s18299_s2 = inlined_call_operand.vmem [shape: f32[1,64], index: 2, kind: input, shape index: {}]   ;;  %s18300_s3 = inlined_call_operand.<no memory space> [shape: f32[1,1], index: 3, kind: input, shape index: {}]   ;;  %s18301_s4 = inlined_call_operand.vmem [shape: bf16[3,192,64], index: 4, kind: input, shape index: {}]   ;;  %s18302_s5 = inlined_call_operand.vmem [shape: f32[1,64], index: 5, kind: input, shape index: {}]   ;;  %s18303_s7 = inlined_call_operand.vmem [shape: f32[864,1], index: 7, kind: input, shape index: {}]   ;;  %s18304_s8 = inlined_call_operand.hbm [shape: f32[2,256,64], index: 8, kind: output, shape index: {}]   ;;  %s18305_s6 = inlined_call_operand.<no memory space> [shape: f32[1,1], index: 6, kind: input, shape index: {}]  }
   0x1   :  { %v13_v0 = vstv %s18300_s3  ;;  %v15_v1 = vstv %s18305_s6 }
   0x2   :  { %14 = vst [vmem:[#allocation2] sm:$0x1] %v13_v0  ;;  %16 = vst [vmem:[#allocation3] sm:$0x1] %v15_v1 }
   0x3   :  { %v10530_v2 = vld [vmem:[%s18298_s1 + $0xf8] sm:$0xff]   ;;  %v18306_v3 = vmov 0   ;;  %v10532_v5 = vld [vmem:[%s18298_s1 + $0xf0] sm:$0xff]   ;;  %v10535_v7 = vld [vmem:[%s18298_s1 + $0x168] sm:$0xff]  }
   0x4   :  { %1249 = vmatprep.subr.bf16.mxu0 %v18306_v3  ;;  %v10531_v4 = vld [vmem:[%s18298_s1 + $0x178] sm:$0xff]   ;;  %10349 = vset.pattern.permute.xlu1 %v18306_v3  ;;  %v10533_v6 = vld [vmem:[%s18298_s1 + $0x170] sm:$0xff]   ;;  %v10534_v8 = vld [vmem:[%s18298_s1 + $0xe8] sm:$0xff]  }
   0x5   :  { %1250 = vmatpush1.bf16.msra.mxu0 %v10530_v2  ;;  %10348 = vset.pattern.permute.xlu0 %v18306_v3  ;;  %v10537_v9 = vld [vmem:[%s18298_s1 + $0x160] sm:$0xff]   ;;  %v10539_v11 = vld [vmem:[%s18298_s1 + $0x158] sm:$0xff]   ;;  %v8978_v14 = vld [vmem:[%s18297_s0 + $0x2a] sm:$0xff] }
   0x6   :  { %9947 = vmatprep.subr.bf16.mxu1 %v10531_v4  ;;  %1251 = vmatprep.subr.bf16.mxu0 %v18306_v3  ;;  %v10536_v10 = vld [vmem:[%s18298_s1 + $0xe0] sm:$0xff]   ;;  %v10538_v12 = vld [vmem:[%s18298_s1 + $0xd8] sm:$0xff]   ;;  %v10541_v15 = vld [vmem:[%s18298_s1 + $0x150] sm:$0xff]  }
   0x7   :  { %9948 = vmatpush3.bf16.msra.mxu1 %v10531_v4  ;;  %v8977_v13 = vld [vmem:[%s18297_s0 + $0x22] sm:$0xff]  ;;  %v10540_v17 = vld [vmem:[%s18298_s1 + $0xd0] sm:$0xff]   ;;  %v10546_v26 = vld [vmem:[%s18298_s1 + $0x138] sm:$0xff]  }
   0x8   :  { %9949 = vmatprep.subr.bf16.mxu1 %v10533_v6  ;;  %v896_v16 = vpack.c.bf16 %v8978_v14, %v8977_v13  ;;  %v10543_v18 = vld [vmem:[%s18298_s1 + $0x148] sm:$0xff]   ;;  %v10545_v20 = vld [vmem:[%s18298_s1 + $0x140] sm:$0xff]   ;;  %v8979_v22 = vld [vmem:[%s18297_s0 + $0x32] sm:$0xff] }
   0x9   :  { %1252 = vmatpush1.bf16.msra.mxu0 %v10532_v5  ;;  %v10542_v19 = vld [vmem:[%s18298_s1 + $0xc8] sm:$0xff]   ;;  %v10544_v21 = vld [vmem:[%s18298_s1 + $0xc0] sm:$0xff]   ;;  %v8982_v25 = vld [vmem:[%s18297_s0 + $0x52] sm:$0xff] }
   0xa   :  { %1253 = vmatprep.subr.bf16.mxu0 %v18306_v3  ;;  %9963 = vmatprep.mubr.bf16.mxu1 %v896_v16  ;;  %v8980_v23 = vld [vmem:[%s18297_s0 + $0x42] sm:$0xff]  ;;  %v8981_v24 = vld [vmem:[%s18297_s0 + $0x4a] sm:$0xff]  ;;  %v10549_v31 = vld [vmem:[%s18298_s1 + $0x38] sm:$0xff]  }
   0xb   :  { %9950 = vmatpush3.bf16.msra.mxu1 %v10533_v6  ;;  %v899_v27 = vpack.c.bf16 %v8980_v23, %v8979_v22  ;;  %v8869_v28 = vld [vmem:[%s18297_s0 + $0x21] sm:$0xff]  ;;  %v8870_v29 = vld [vmem:[%s18297_s0 + $0x29] sm:$0xff]  ;;  %v902_v30 = vpack.c.bf16 %v8982_v25, %v8981_v24  ;;  %v8985_v37 = vld [vmem:[%s18297_s0 + $0x72] sm:$0xff] }
   0xc   :  { %9951 = vmatprep.subr.bf16.mxu1 %v10535_v7  ;;  %v895_v32 = vpack.c.bf16 %v8870_v29, %v8869_v28  ;;  %v10547_v33 = vld [vmem:[%s18298_s1 + $0x130] sm:$0xff]   ;;  %v8983_v34 = vld [vmem:[%s18297_s0 + $0x62] sm:$0xff]  ;;  %v10551_v49 = vld [vmem:[%s18298_s1 + $0x118] sm:$0xff]  }
   0xd   :  { %1254 = vmatpush1.bf16.msra.mxu0 %v10534_v8  ;;  %v8984_v35 = vld [vmem:[%s18297_s0 + $0x6a] sm:$0xff]  ;;  %v8986_v38 = vld [vmem:[%s18297_s0 + $0x82] sm:$0xff]  ;;  %v8988_v45 = vld [vmem:[%s18297_s0 + $0x92] sm:$0xff] }
   0xe   :  { %1255 = vmatprep.subr.bf16.mxu0 %v18306_v3  ;;  %1281 = vmatprep.mubr.bf16.mxu0 %v895_v32  ;;  %v10553_v36 = vld [vmem:[%s18298_s1 + $0x30] sm:$0xff]   ;;  %v10548_v39 = vld [vmem:[%s18298_s1 + $0x128] sm:$0xff]   ;;  %v905_v40 = vpack.c.bf16 %v8984_v35, %v8983_v34  ;;  %v908_v41 = vpack.c.bf16 %v8986_v38, %v8985_v37  ;;  %v10550_v43 = vld [vmem:[%s18298_s1 + $0x120] sm:$0xff]  }
   0xf   :  { %9952 = vmatpush3.bf16.msra.mxu1 %v10535_v7  ;;  %v10557_v42 = vld [vmem:[%s18298_s1 + $0x28] sm:$0xff]   ;;  %v10558_v46 = vld [vmem:[%s18298_s1 + $0x20] sm:$0xff]   ;;  %v10559_v52 = vld [vmem:[%s18298_s1 + $0x18] sm:$0xff]  }
  0x10   :  { %9953 = vmatprep.subr.bf16.mxu1 %v10537_v9  ;;  %v8987_v44 = vld [vmem:[%s18297_s0 + $0x8a] sm:$0xff]  ;;  %v8989_v47 = vld [vmem:[%s18297_s0 + $0xa2] sm:$0xff]  ;;  %v8991_v54 = vld [vmem:[%s18297_s0 + $0xb2] sm:$0xff] }
  0x11   :  { %1256 = vmatpush1.bf16.msra.mxu0 %v10536_v10  ;;  %v8990_v48 = vld [vmem:[%s18297_s0 + $0xaa] sm:$0xff]  ;;  %v911_v50 = vpack.c.bf16 %v8988_v45, %v8987_v44  ;;  %v8992_v55 = vld [vmem:[%s18297_s0 + $0xc2] sm:$0xff]  ;;  %v8994_v58 = vld [vmem:[%s18297_s0 + $0xd2] sm:$0xff] }
  0x12   :  { %1257 = vmatprep.subr.bf16.mxu0 %v18306_v3  ;;  %v914_v51 = vpack.c.bf16 %v8990_v48, %v8989_v47  ;;  %v10552_v53 = vld [vmem:[%s18298_s1 + $0x110] sm:$0xff]   ;;  %v10554_v59 = vld [vmem:[%s18298_s1 + $0x108] sm:$0xff]   ;;  %v917_v60 = vpack.c.bf16 %v8992_v55, %v8991_v54  ;;  %v10555_v62 = vld [vmem:[%s18298_s1 + $0x100] sm:$0xff]  }
  0x13   :  { %9954 = vmatpush3.bf16.msra.mxu1 %v10537_v9  ;;  %v10560_v56 = vld [vmem:[%s18298_s1 + $0x10] sm:$0xff]   ;;  %v8761_v63 = vld [vmem:[%s18297_s0 + $0x20] sm:$0xff]  ;;  %v8762_v0 = vld [vmem:[%s18297_s0 + $0x28] sm:$0xff] }
  0x14   :  { %9955 = vmatprep.subr.bf16.mxu1 %v10539_v11  ;;  %v8993_v57 = vld [vmem:[%s18297_s0 + $0xca] sm:$0xff]  ;;  %v10556_v1 = vld [vmem:[%s18298_s1 + $0xb8] sm:$0xff]   ;;  %v8872_v4 = vld [vmem:[%s18297_s0 + $0x41] sm:$0xff]  ;;  %v894_v8 = vpack.c.bf16 %v8762_v0, %v8761_v63 }
  0x15   :  { %1258 = vmatpush1.bf16.msra.mxu0 %v10538_v12  ;;  %v920_v61 = vpack.c.bf16 %v8994_v58, %v8993_v57  ;;  %v8871_v2 = vld [vmem:[%s18297_s0 + $0x31] sm:$0xff]  ;;  %v10562_v5 = vld [vmem:[%s18298_s1 + $0x8] sm:$0xff]   ;;  %v10568_v54 = vld [vmem:[%s18298_s1 + $0x60] sm:$0xff]  }
  0x16   :  { %1259 = vmatprep.subr.bf16.mxu0 %v18306_v3  ;;  %v8995_v6 = vld [vmem:[%s18297_s0 + $0xe2] sm:$0xff]  ;;  %v8996_v7 = vld [vmem:[%s18297_s0 + $0xea] sm:$0xff]  ;;  %v8997_v9 = vld [vmem:[%s18297_s0 + $0xf2] sm:$0xff] }
  0x17   :  { %9956 = vmatpush3.bf16.msra.mxu1 %v10539_v11  ;;  %v8998_v10 = vld [vmem:[%s18297_s0 + $0x102] sm:$0xff]  ;;  %v898_v11 = vpack.c.bf16 %v8872_v4, %v8871_v2  ;;  %v923_v12 = vpack.c.bf16 %v8996_v7, %v8995_v6  ;;  %v10561_v13 = vld [vmem:[%s18298_s1 + $0xb0] sm:$0xff]   ;;  %v10564_v25 = vld [vmem:[%s18298_s1 + $0x78] sm:$0xff]  }
  0x18   :  { %9957 = vmatprep.subr.bf16.mxu1 %v10541_v15  ;;  %v926_v14 = vpack.c.bf16 %v8998_v10, %v8997_v9  ;;  %v8763_v16 = vld [vmem:[%s18297_s0 + $0x30] sm:$0xff]  ;;  %v9001_v22 = vld [vmem:[%s18297_s0 + $0x122] sm:$0xff]  ;;  %v10569_v2 = vld [vmem:[%s18298_s1 + $0x58] sm:$0xff]  }
  0x19   :  { %1260 = vmatpush1.bf16.msra.mxu0 %v10540_v17  ;;  %v8764_v17 = vld [vmem:[%s18297_s0 + $0x40] sm:$0xff]  ;;  %v9002_v24 = vld [vmem:[%s18297_s0 + $0x12a] sm:$0xff]  ;;  %v9003_v34 = vld [vmem:[%s18297_s0 + $0x132] sm:$0xff] }
  0x1a   :  { %1261 = vmatprep.subr.bf16.mxu0 %v18306_v3  ;;  %v897_v23 = vpack.c.bf16 %v8764_v17, %v8763_v16  ;;  %v932_v28 = vpack.c.bf16 %v9002_v24, %v9001_v22  ;;  %v8765_v29 = vld [vmem:[%s18297_s0 + $0x48] sm:$0xff]  ;;  %v9006_v38 = vld [vmem:[%s18297_s0 + $0x152] sm:$0xff]  ;;  %v8770_v58 = vld [vmem:[%s18297_s0 + $0x80] sm:$0xff] }
  0x1b   :  { %9958 = vmatpush3.bf16.msra.mxu1 %v10541_v15  ;;  %v10563_v15 = vld [vmem:[%s18298_s1] sm:$0xff]   ;;  %v8876_v32 = vld [vmem:[%s18297_s0 + $0x69] sm:$0xff]  ;;  %v9018_v16 = vld [vmem:[%s18297_s0 + $0x1d2] sm:$0xff] }
  0x1c   :  { %9959 = vmatprep.subr.bf16.mxu1 %v10543_v18  ;;  %v9004_v35 = vld [vmem:[%s18297_s0 + $0x142] sm:$0xff]  ;;  %v9005_v37 = vld [vmem:[%s18297_s0 + $0x14a] sm:$0xff] }
  0x1d   :  { %1262 = vmatpush1.bf16.msra.mxu0 %v10542_v19  ;;  %v8873_v19 = vld [vmem:[%s18297_s0 + $0x49] sm:$0xff]  ;;  %v8878_v47 = vld [vmem:[%s18297_s0 + $0x81] sm:$0xff] }
  0x1e   :  { %1263 = vmatprep.subr.bf16.mxu0 %v18306_v3  ;;  %v8768_v44 = vld [vmem:[%s18297_s0 + $0x68] sm:$0xff]  ;;  %v8769_v57 = vld [vmem:[%s18297_s0 + $0x70] sm:$0xff]  ;;  %v8773_v22 = vld [vmem:[%s18297_s0 + $0xa0] sm:$0xff] }
  0x1f   :  { %9960 = vmatpush3.bf16.msra.mxu1 %v10543_v18  ;;  %v8999_v18 = vld [vmem:[%s18297_s0 + $0x10a] sm:$0xff]  ;;  %v9007_v48 = vld [vmem:[%s18297_s0 + $0x162] sm:$0xff]  ;;  %v906_v63 = vpack.c.bf16 %v8770_v58, %v8769_v57 }
  0x20   :  { %9961 = vmatprep.subr.bf16.mxu1 %v10545_v20  ;;  %v10567_v45 = vld [vmem:[%s18298_s1 + $0x68] sm:$0xff]   ;;  %v8779_v58 = vld [vmem:[%s18297_s0 + $0xe0] sm:$0xff] }
  0x21   :  { %1264 = vmatpush1.bf16.msra.mxu0 %v10544_v21  ;;  %v9000_v21 = vld [vmem:[%s18297_s0 + $0x112] sm:$0xff]  ;;  %v9013_v0 = vld [vmem:[%s18297_s0 + $0x1a2] sm:$0xff] }
  0x22   :  { %1265 = vmatprep.subr.bf16.mxu0 %v18306_v3  ;;  %v8771_v7 = vld [vmem:[%s18297_s0 + $0x88] sm:$0xff] }
  0x23   :  { %9962 = vmatpush3.bf16.msra.mxu1 %v10545_v20  ;;  %v8874_v20 = vld [vmem:[%s18297_s0 + $0x51] sm:$0xff]  ;;  %v8881_v9 = vld [vmem:[%s18297_s0 + $0xa1] sm:$0xff]  ;;  %v8882_v10 = vld [vmem:[%s18297_s0 + $0xa9] sm:$0xff] }
  0x24   :  { %2323 = vmatprep.subr.bf16.mxu1 %v18306_v3  ;;  %v913_v17 = vpack.c.bf16 %v8882_v10, %v8881_v9  ;;  %v9019_v24 = vld [vmem:[%s18297_s0 + $0x1e2] sm:$0xff] }
  0x25   :  { %1266 = vmatpush2.bf16.msra.mxu0 %v10546_v26  ;;  %v901_v26 = vpack.c.bf16 %v8874_v20, %v8873_v19  ;;  %v10571_v19 = vld [vmem:[%s18298_s1 + $0xa0] sm:$0xff]   ;;  %v8891_v10 = vld [vmem:[%s18297_s0 + $0x109] sm:$0xff] }
  0x26   :  { %9964 = vmatmul.mubr.bf16.vlgmr.msra.gmra.mxu1 %v899_v27  ;;  %1267 = vmatprep.subr.bf16.mxu0 %v18306_v3  ;;  %v929_v27 = vpack.c.bf16 %v9000_v21, %v8999_v18  ;;  %v10572_v21 = vld [vmem:[%s18298_s1 + $0x48] sm:$0xff]  }
  0x27   :  { %9967 = vmatprep.mubr.bf16.mxu1 %v902_v30  ;;  %2324 = vmatpush1.bf16.msra.mxu1 %v10549_v31  ;;  %v8766_v30 = vld [vmem:[%s18297_s0 + $0x50] sm:$0xff]  ;;  %v8875_v31 = vld [vmem:[%s18297_s0 + $0x61] sm:$0xff] }
  0x28   :  { %2325 = vmatprep.subr.bf16.mxu1 %v18306_v3 }
  0x29   :  { %1268 = vmatpush2.bf16.msra.mxu0 %v10547_v33  ;;  %v10565_v33 = vld [vmem:[%s18298_s1 + $0x70] sm:$0xff]  }
  0x2a   :  { %1269 = vmatprep.subr.bf16.mxu0 %v18306_v3 }
  0x2b   :  { %2326 = vmatpush1.bf16.msra.mxu1 %v10553_v36  ;;  %v900_v36 = vpack.c.bf16 %v8766_v30, %v8765_v29  ;;  %v9022_v29 = vld [vmem:[%s18297_s0 + $0x202] sm:$0xff] }
  0x2c   :  { %2327 = vmatprep.subr.bf16.mxu1 %v18306_v3 }
  0x2d   :  { %1270 = vmatpush2.bf16.msra.mxu0 %v10548_v39  ;;  %v904_v39 = vpack.c.bf16 %v8876_v32, %v8875_v31 }
  0x2e   :  { %9968 = vmatmul.mubr.bf16.gmra.mxu1 %v905_v40  ;;  %1271 = vmatprep.subr.bf16.mxu0 %v18306_v3  ;;  %v935_v40 = vpack.c.bf16 %v9004_v35, %v9003_v34  ;;  %v8776_v34 = vld [vmem:[%s18297_s0 + $0xc0] sm:$0xff] }
  0x2f   :  { %9971 = vmatprep.mubr.bf16.mxu1 %v908_v41  ;;  %2328 = vmatpush1.bf16.msra.mxu1 %v10557_v42  ;;  %v10566_v41 = vld [vmem:[%s18298_s1 + $0xa8] sm:$0xff]   ;;  %v938_v42 = vpack.c.bf16 %v9006_v38, %v9005_v37  ;;  %v8886_v37 = vld [vmem:[%s18297_s0 + $0xd1] sm:$0xff] }
  0x30   :  { %2329 = vmatprep.subr.bf16.mxu1 %v18306_v3  ;;  %v9023_v38 = vld [vmem:[%s18297_s0 + $0x20a] sm:$0xff] }
  0x31   :  { %1272 = vmatpush2.bf16.msra.mxu0 %v10550_v43  ;;  %v8767_v43 = vld [vmem:[%s18297_s0 + $0x60] sm:$0xff] }
  0x32   :  { %1273 = vmatprep.subr.bf16.mxu0 %v18306_v3 }
  0x33   :  { %2330 = vmatpush1.bf16.msra.mxu1 %v10558_v46  ;;  %v8877_v46 = vld [vmem:[%s18297_s0 + $0x71] sm:$0xff] }
  0x34   :  { %2331 = vmatprep.subr.bf16.mxu1 %v18306_v3 }
  0x35   :  { %1274 = vmatpush2.bf16.msra.mxu0 %v10551_v49  ;;  %v9008_v49 = vld [vmem:[%s18297_s0 + $0x16a] sm:$0xff] }
  0x36   :  { %9972 = vmatmul.mubr.bf16.gmra.mxu1 %v911_v50  ;;  %1275 = vmatprep.subr.bf16.mxu0 %v18306_v3  ;;  %v903_v50 = vpack.c.bf16 %v8768_v44, %v8767_v43  ;;  %v941_v55 = vpack.c.bf16 %v9008_v49, %v9007_v48  ;;  %v10573_v43 = vld [vmem:[%s18298_s1 + $0x40] sm:$0xff]  }
  0x37   :  { %9975 = vmatprep.mubr.bf16.mxu1 %v914_v51  ;;  %2332 = vmatpush1.bf16.msra.mxu1 %v10559_v52  ;;  %v9009_v51 = vld [vmem:[%s18297_s0 + $0x172] sm:$0xff]  ;;  %v9010_v52 = vld [vmem:[%s18297_s0 + $0x182] sm:$0xff] }
  0x38   :  { %2333 = vmatprep.subr.bf16.mxu1 %v18306_v3  ;;  %v8887_v49 = vld [vmem:[%s18297_s0 + $0xe1] sm:$0xff] }
  0x39   :  { %1276 = vmatpush2.bf16.msra.mxu0 %v10552_v53  ;;  %v907_v53 = vpack.c.bf16 %v8878_v47, %v8877_v46  ;;  %v8777_v46 = vld [vmem:[%s18297_s0 + $0xc8] sm:$0xff]  ;;  %v8778_v47 = vld [vmem:[%s18297_s0 + $0xd0] sm:$0xff] }
  0x3a   :  { %1277 = vmatprep.subr.bf16.mxu0 %v18306_v3 }
  0x3b   :  { %2334 = vmatpush1.bf16.msra.mxu1 %v10560_v56  ;;  %v944_v56 = vpack.c.bf16 %v9010_v52, %v9009_v51  ;;  %v9027_v51 = vld [vmem:[%s18297_s0 + $0x232] sm:$0xff]  ;;  %v9028_v52 = vld [vmem:[%s18297_s0 + $0x242] sm:$0xff] }
  0x3c   :  { %2335 = vmatprep.subr.bf16.mxu1 %v18306_v3  ;;  %v971_v57 = vpack.c.bf16 %v9028_v52, %v9027_v51  ;;  %v9049_v51 = vld [vmem:[%s18297_s0 + $0x362] sm:$0xff]  ;;  %v9050_v52 = vld [vmem:[%s18297_s0 + $0x36a] sm:$0xff] }
  0x3d   :  { %1278 = vmatpush2.bf16.msra.mxu0 %v10554_v59  ;;  %v9011_v59 = vld [vmem:[%s18297_s0 + $0x18a] sm:$0xff] }
  0x3e   :  { %9976 = vmatmul.mubr.bf16.gmra.mxu1 %v917_v60  ;;  %1279 = vmatprep.subr.bf16.mxu0 %v18306_v3  ;;  %v8879_v60 = vld [vmem:[%s18297_s0 + $0x89] sm:$0xff] }
  0x3f   :  { %9979 = vmatprep.mubr.bf16.mxu1 %v920_v61  ;;  %2336 = vmatpush1.bf16.msra.mxu1 %v10562_v5  ;;  %v8880_v61 = vld [vmem:[%s18297_s0 + $0x91] sm:$0xff] }
  0x40   :  { %2337 = vmatprep.subr.bf16.mxu1 %v18306_v3  ;;  %v910_v4 = vpack.c.bf16 %v8880_v61, %v8879_v60  ;;  %v8889_v61 = vld [vmem:[%s18297_s0 + $0xf1] sm:$0xff] }
  0x41   :  { %1280 = vmatpush2.bf16.msra.mxu0 %v10555_v62  ;;  %v9012_v62 = vld [vmem:[%s18297_s0 + $0x192] sm:$0xff] }
  0x42   :  { %10071 = vmatprep.subr.bf16.mxu0 %v10556_v1  ;;  %v947_v5 = vpack.c.bf16 %v9012_v62, %v9011_v59  ;;  %v8780_v59 = vld [vmem:[%s18297_s0 + $0xe8] sm:$0xff] }
  0x43   :  { %2338 = vmatpush1.bf16.msra.mxu1 %v10563_v15  ;;  %v9017_v15 = vld [vmem:[%s18297_s0 + $0x1ca] sm:$0xff]  ;;  %v8890_v62 = vld [vmem:[%s18297_s0 + $0x101] sm:$0xff] }
  0x44   :  { %1282 = vmatmul.mubr.bf16.vlgmr.msra.gmra.mxu0 %v894_v8  ;;  %2339 = vmatprep.subr.bf16.mxu1 %v18306_v3  ;;  %v8772_v8 = vld [vmem:[%s18297_s0 + $0x90] sm:$0xff]  ;;  %v956_v20 = vpack.c.bf16 %v9018_v16, %v9017_v15 }
  0x45   :  { %10072 = vmatpush3.bf16.msra.mxu0 %v10556_v1  ;;  %1289 = vmatprep.mubr.bf16.mxu0 %v898_v11  ;;  %v9014_v1 = vld [vmem:[%s18297_s0 + $0x1aa] sm:$0xff] }
  0x46   :  { %9980 = vmatmul.mubr.bf16.gmra.mxu1 %v923_v12  ;;  %10073 = vmatprep.subr.bf16.mxu0 %v10561_v13  ;;  %v950_v6 = vpack.c.bf16 %v9014_v1, %v9013_v0  ;;  %v10570_v11 = vld [vmem:[%s18298_s1 + $0x50] sm:$0xff]  }
  0x47   :  { %9983 = vmatprep.mubr.bf16.mxu1 %v926_v14  ;;  %2340 = vmatpush2.bf16.msra.mxu1 %v10564_v25  ;;  %v9015_v12 = vld [vmem:[%s18297_s0 + $0x1b2] sm:$0xff]  ;;  %v909_v14 = vpack.c.bf16 %v8772_v8, %v8771_v7  ;;  %v9020_v25 = vld [vmem:[%s18297_s0 + $0x1ea] sm:$0xff]  ;;  %v8782_v8 = vld [vmem:[%s18297_s0 + $0x100] sm:$0xff] }
  0x48   :  { %2341 = vmatprep.subr.bf16.mxu1 %v18306_v3  ;;  %v959_v32 = vpack.c.bf16 %v9020_v25, %v9019_v24  ;;  %v9032_v0 = vld [vmem:[%s18297_s0 + $0x2aa] sm:$0xff]  ;;  %v9033_v1 = vld [vmem:[%s18297_s0 + $0x2b2] sm:$0xff]  ;;  %v9040_v25 = vld [vmem:[%s18297_s0 + $0x302] sm:$0xff] }
  0x49   :  { %10074 = vmatpush3.bf16.msra.mxu0 %v10561_v13  ;;  %v9016_v13 = vld [vmem:[%s18297_s0 + $0x1c2] sm:$0xff]  ;;  %v8781_v7 = vld [vmem:[%s18297_s0 + $0xf0] sm:$0xff] }
  0x4a   :  { %10075 = vmatprep.subr.bf16.mxu0 %v10566_v41  ;;  %v953_v18 = vpack.c.bf16 %v9016_v13, %v9015_v12  ;;  %v9035_v12 = vld [vmem:[%s18297_s0 + $0x2ca] sm:$0xff]  ;;  %v9036_v13 = vld [vmem:[%s18297_s0 + $0x2d2] sm:$0xff]  ;;  %v924_v16 = vpack.c.bf16 %v8782_v8, %v8781_v7 }
  0x4b   :  { %2342 = vmatpush2.bf16.msra.mxu1 %v10565_v33  ;;  %v8775_v33 = vld [vmem:[%s18297_s0 + $0xb0] sm:$0xff] }
  0x4c   :  { %1290 = vmatmul.mubr.bf16.gmra.mxu0 %v897_v23  ;;  %2343 = vmatprep.subr.bf16.mxu1 %v18306_v3  ;;  %v8774_v23 = vld [vmem:[%s18297_s0 + $0xa8] sm:$0xff]  ;;  %v9039_v24 = vld [vmem:[%s18297_s0 + $0x2f2] sm:$0xff] }
  0x4d   :  { %1297 = vmatprep.mubr.bf16.mxu0 %v901_v26  ;;  %10076 = vmatpush3.bf16.msra.mxu0 %v10566_v41  ;;  %v8883_v26 = vld [vmem:[%s18297_s0 + $0xb1] sm:$0xff]  ;;  %v912_v30 = vpack.c.bf16 %v8774_v23, %v8773_v22  ;;  %v8893_v22 = vld [vmem:[%s18297_s0 + $0x121] sm:$0xff]  ;;  %v8894_v23 = vld [vmem:[%s18297_s0 + $0x129] sm:$0xff] }
  0x4e   :  { %9984 = vmatmul.mubr.bf16.gmra.mxu1 %v929_v27  ;;  %10077 = vmatprep.subr.bf16.mxu0 %v10571_v19  ;;  %v8884_v27 = vld [vmem:[%s18297_s0 + $0xc1] sm:$0xff]  ;;  %v9026_v41 = vld [vmem:[%s18297_s0 + $0x22a] sm:$0xff] }
  0x4f   :  { %9987 = vmatprep.mubr.bf16.mxu1 %v932_v28  ;;  %2344 = vmatpush2.bf16.msra.mxu1 %v10567_v45  ;;  %v9021_v28 = vld [vmem:[%s18297_s0 + $0x1f2] sm:$0xff]  ;;  %v916_v31 = vpack.c.bf16 %v8884_v27, %v8883_v26  ;;  %v9038_v15 = vld [vmem:[%s18297_s0 + $0x2ea] sm:$0xff] }
  0x50   :  { %2345 = vmatprep.subr.bf16.mxu1 %v18306_v3  ;;  %v962_v35 = vpack.c.bf16 %v9022_v29, %v9021_v28  ;;  %v9041_v26 = vld [vmem:[%s18297_s0 + $0x30a] sm:$0xff]  ;;  %v9042_v27 = vld [vmem:[%s18297_s0 + $0x312] sm:$0xff]  ;;  %v931_v29 = vpack.c.bf16 %v8894_v23, %v8893_v22 }
  0x51   :  { %10078 = vmatpush3.bf16.msra.mxu0 %v10571_v19  ;;  %v8783_v19 = vld [vmem:[%s18297_s0 + $0x108] sm:$0xff] }
  0x53   :  { %2346 = vmatpush2.bf16.msra.mxu1 %v10568_v54  ;;  %v9030_v54 = vld [vmem:[%s18297_s0 + $0x252] sm:$0xff] }
  0x54   :  { %1298 = vmatmul.mubr.bf16.gmra.mxu0 %v900_v36  ;;  %2347 = vmatprep.subr.bf16.mxu1 %v18306_v3  ;;  %v8885_v36 = vld [vmem:[%s18297_s0 + $0xc9] sm:$0xff] }
  0x55   :  { %1305 = vmatprep.mubr.bf16.mxu0 %v904_v39  ;;  %v9024_v39 = vld [vmem:[%s18297_s0 + $0x212] sm:$0xff]  ;;  %v919_v44 = vpack.c.bf16 %v8886_v37, %v8885_v36  ;;  %v9043_v36 = vld [vmem:[%s18297_s0 + $0x322] sm:$0xff]  ;;  %v9044_v37 = vld [vmem:[%s18297_s0 + $0x32a] sm:$0xff] }
  0x56   :  { %9988 = vmatmul.mubr.bf16.gmra.mxu1 %v935_v40  ;;  %v9025_v40 = vld [vmem:[%s18297_s0 + $0x222] sm:$0xff]  ;;  %v965_v45 = vpack.c.bf16 %v9024_v39, %v9023_v38  ;;  %v10575_v38 = vld [vmem:[%s18298_s1 + $0x98] sm:$0xff]  }
  0x57   :  { %9991 = vmatprep.mubr.bf16.mxu1 %v938_v42  ;;  %2348 = vmatpush2.bf16.msra.mxu1 %v10569_v2  ;;  %v915_v42 = vpack.c.bf16 %v8776_v34, %v8775_v33  ;;  %v968_v48 = vpack.c.bf16 %v9026_v41, %v9025_v40  ;;  %v9034_v2 = vld [vmem:[%s18297_s0 + $0x2c2] sm:$0xff]  ;;  %v992_v33 = vpack.c.bf16 %v9042_v27, %v9041_v26  ;;  %v8895_v34 = vld [vmem:[%s18297_s0 + $0x131] sm:$0xff] }
  0x58   :  { %2349 = vmatprep.subr.bf16.mxu1 %v18306_v3  ;;  %v980_v9 = vpack.c.bf16 %v9034_v2, %v9033_v1  ;;  %v9045_v39 = vld [vmem:[%s18297_s0 + $0x332] sm:$0xff]  ;;  %v9046_v40 = vld [vmem:[%s18297_s0 + $0x342] sm:$0xff]  ;;  %10079 = vmatprep.subr.bf16.mxu0 %v10575_v38 }
  0x59   :  { %10080 = vmatpush3.bf16.msra.mxu0 %v10575_v38 }
  0x5b   :  { %2350 = vmatpush2.bf16.msra.mxu1 %v10570_v11  ;;  %v8892_v11 = vld [vmem:[%s18297_s0 + $0x111] sm:$0xff] }
  0x5c   :  { %1306 = vmatmul.mubr.bf16.gmra.mxu0 %v903_v50  ;;  %2351 = vmatprep.subr.bf16.mxu1 %v18306_v3  ;;  %v8888_v50 = vld [vmem:[%s18297_s0 + $0xe9] sm:$0xff] }
  0x5d   :  { %1313 = vmatprep.mubr.bf16.mxu0 %v907_v53  ;;  %v9029_v53 = vld [vmem:[%s18297_s0 + $0x24a] sm:$0xff] }
  0x5e   :  { %9992 = vmatmul.mubr.bf16.gmra.mxu1 %v941_v55  ;;  %v918_v55 = vpack.c.bf16 %v8778_v47, %v8777_v46  ;;  %v974_v60 = vpack.c.bf16 %v9030_v54, %v9029_v53  ;;  %v998_v46 = vpack.c.bf16 %v9046_v40, %v9045_v39  ;;  %v8897_v47 = vld [vmem:[%s18297_s0 + $0x149] sm:$0xff] }
  0x5f   :  { %9995 = vmatprep.mubr.bf16.mxu1 %v944_v56  ;;  %2352 = vmatpush2.bf16.msra.mxu1 %v10572_v21  ;;  %v922_v56 = vpack.c.bf16 %v8888_v50, %v8887_v49  ;;  %v9047_v49 = vld [vmem:[%s18297_s0 + $0x34a] sm:$0xff]  ;;  %v9048_v50 = vld [vmem:[%s18297_s0 + $0x352] sm:$0xff] }
  0x60   :  { %2353 = vmatprep.subr.bf16.mxu1 %v18306_v3 }
  0x63   :  { %2354 = vmatpush2.bf16.msra.mxu1 %v10573_v43  ;;  %v995_v43 = vpack.c.bf16 %v9044_v37, %v9043_v36 }
  0x64   :  { %1314 = vmatmul.mubr.bf16.gmra.mxu0 %v906_v63  ;;  %3933 = vmatprep.subr.bf16.mxu1 %v18306_v3  ;;  %v9031_v63 = vld [vmem:[%s18297_s0 + $0x2a2] sm:$0xff] }
  0x65   :  { %1321 = vmatprep.mubr.bf16.mxu0 %v910_v4  ;;  %v921_v4 = vpack.c.bf16 %v8780_v59, %v8779_v58  ;;  %v1004_v58 = vpack.c.bf16 %v9050_v52, %v9049_v51  ;;  %v8899_v59 = vld [vmem:[%s18297_s0 + $0x161] sm:$0xff] }
  0x66   :  { %9996 = vmatmul.mubr.bf16.gmra.mxu1 %v947_v5  ;;  %v925_v5 = vpack.c.bf16 %v8890_v62, %v8889_v61 }
  0x67   :  { %9999 = vmatprep.mubr.bf16.mxu1 %v950_v6  ;;  %v977_v6 = vpack.c.bf16 %v9032_v0, %v9031_v63 }
  0x6c   :  { %1322 = vmatmul.mubr.bf16.gmra.mxu0 %v909_v14  ;;  %v9037_v14 = vld [vmem:[%s18297_s0 + $0x2e2] sm:$0xff] }
  0x6d   :  { %1329 = vmatprep.mubr.bf16.mxu0 %v913_v17  ;;  %v928_v17 = vpack.c.bf16 %v8892_v11, %v8891_v10  ;;  %v986_v21 = vpack.c.bf16 %v9038_v15, %v9037_v14 }
  0x6e   :  { %10000 = vmatmul.mubr.bf16.gmra.mxu1 %v953_v18  ;;  %v983_v18 = vpack.c.bf16 %v9036_v13, %v9035_v12 }
  0x6f   :  { %10003 = vmatprep.mubr.bf16.mxu1 %v956_v20  ;;  %v8784_v20 = vld [vmem:[%s18297_s0 + $0x110] sm:$0xff] }
  0x70   :  { %v927_v28 = vpack.c.bf16 %v8784_v20, %v8783_v19 }
  0x74   :  { %1330 = vmatmul.mubr.bf16.gmra.mxu0 %v912_v30  ;;  %v989_v30 = vpack.c.bf16 %v9040_v25, %v9039_v24 }
  0x75   :  { %1337 = vmatprep.mubr.bf16.mxu0 %v916_v31  ;;  %v8785_v31 = vld [vmem:[%s18297_s0 + $0x120] sm:$0xff] }
  0x76   :  { %10004 = vmatmul.mubr.bf16.gmra.mxu1 %v959_v32  ;;  %v8786_v32 = vld [vmem:[%s18297_s0 + $0x128] sm:$0xff] }
  0x77   :  { %10007 = vmatprep.mubr.bf16.mxu1 %v962_v35  ;;  %v8896_v35 = vld [vmem:[%s18297_s0 + $0x141] sm:$0xff]  ;;  %v930_v41 = vpack.c.bf16 %v8786_v32, %v8785_v31 }
  0x7c   :  { %1338 = vmatmul.mubr.bf16.gmra.mxu0 %v915_v42  ;;  %v934_v42 = vpack.c.bf16 %v8896_v35, %v8895_v34 }
  0x7d   :  { %1345 = vmatprep.mubr.bf16.mxu0 %v919_v44  ;;  %v8787_v44 = vld [vmem:[%s18297_s0 + $0x130] sm:$0xff] }
  0x7e   :  { %10008 = vmatmul.mubr.bf16.gmra.mxu1 %v965_v45  ;;  %v8788_v45 = vld [vmem:[%s18297_s0 + $0x140] sm:$0xff] }
  0x7f   :  { %10011 = vmatprep.mubr.bf16.mxu1 %v968_v48  ;;  %v8898_v48 = vld [vmem:[%s18297_s0 + $0x151] sm:$0xff]  ;;  %v933_v53 = vpack.c.bf16 %v8788_v45, %v8787_v44 }
  0x80   :  { %v937_v54 = vpack.c.bf16 %v8898_v48, %v8897_v47 }
  0x84   :  { %1346 = vmatmul.mubr.bf16.gmra.mxu0 %v918_v55  ;;  %v1001_v55 = vpack.c.bf16 %v9048_v50, %v9047_v49 }
  0x85   :  { %1353 = vmatprep.mubr.bf16.mxu0 %v922_v56  ;;  %v8789_v56 = vld [vmem:[%s18297_s0 + $0x148] sm:$0xff] }
  0x86   :  { %10012 = vmatmul.mubr.bf16.gmra.mxu1 %v971_v57  ;;  %v8790_v57 = vld [vmem:[%s18297_s0 + $0x150] sm:$0xff] }
  0x87   :  { %10015 = vmatprep.mubr.bf16.mxu1 %v974_v60  ;;  %v8900_v60 = vld [vmem:[%s18297_s0 + $0x169] sm:$0xff] }
  0x8c   :  { %1354 = vmatmul.mubr.bf16.gmra.mxu0 %v921_v4 }
  0x8d   :  { %1361 = vmatprep.mubr.bf16.mxu0 %v925_v5 }
  0x8e   :  { %10016 = vmatmul.mubr.bf16.gmra.mxu1 %v977_v6 }
  0x8f   :  { %10019 = vmatprep.mubr.bf16.mxu1 %v980_v9 }
  0x94   :  { %1362 = vmatmul.mubr.bf16.gmra.mxu0 %v924_v16 }
  0x95   :  { %1369 = vmatprep.mubr.bf16.mxu0 %v928_v17 }
  0x96   :  { %10020 = vmatmul.mubr.bf16.gmra.mxu1 %v983_v18 }
  0x97   :  { %10023 = vmatprep.mubr.bf16.mxu1 %v986_v21 }
  0x9c   :  { %1370 = vmatmul.mubr.bf16.gmra.mxu0 %v927_v28 }
  0x9d   :  { %1377 = vmatprep.mubr.bf16.mxu0 %v931_v29 }
  0x9e   :  { %10024 = vmatmul.mubr.bf16.gmra.mxu1 %v989_v30 }
  0x9f   :  { %10027 = vmatprep.mubr.bf16.mxu1 %v992_v33 }
  0xa4   :  { %1378 = vmatmul.mubr.bf16.gmra.mxu0 %v930_v41 }
  0xa5   :  { %1385 = vmatprep.mubr.bf16.mxu0 %v934_v42 }
  0xa6   :  { %10028 = vmatmul.mubr.bf16.gmra.mxu1 %v995_v43 }
  0xa7   :  { %10031 = vmatprep.mubr.bf16.mxu1 %v998_v46 }
  0xac   :  { %1386 = vmatmul.mubr.bf16.gmra.mxu0 %v933_v53 }
  0xad   :  { %1393 = vmatprep.mubr.bf16.mxu0 %v937_v54 }
  0xae   :  { %10032 = vmatmul.mubr.bf16.gmra.mxu1 %v1001_v55 }
  0xaf   :  { %17 = vsyncpa [#allocation5], 0  ;;  %10035 = vmatprep.mubr.bf16.mxu1 %v1004_v58  ;;  %v9051_v61 = vld [vmem:[%s18297_s0 + $0x372] sm:$0xff]  ;;  %v9052_v62 = vld [vmem:[%s18297_s0 + $0x382] sm:$0xff]  ;;  %v936_v63 = vpack.c.bf16 %v8790_v57, %v8789_v56  ;;  %v940_v2 = vpack.c.bf16 %v8900_v60, %v8899_v59  ;;  %vm6433_vm4 = vcmask 1045504   ;;  %vm6272_vm6 = vcmask 1046528  }
  0xb0   :  { %v9053_v0 = vld [vmem:[%s18297_s0 + $0x38a] sm:$0xff]  ;;  %v9054_v1 = vld [vmem:[%s18297_s0 + $0x392] sm:$0xff]  ;;  %v1007_v4 = vpack.c.bf16 %v9052_v62, %v9051_v61  ;;  %v8791_v6 = vld [vmem:[%s18297_s0 + $0x160] sm:$0xff]  ;;  %vm6850_vm8 = vcmask 523264   ;;  %s10674_s20 = smov 64  }
  0xb1   :  { %v1010_v5 = vpack.c.bf16 %v9054_v1, %v9053_v0  ;;  %v8792_v7 = vld [vmem:[%s18297_s0 + $0x168] sm:$0xff]  ;;  %v8901_v8 = vld [vmem:[%s18297_s0 + $0x171] sm:$0xff]  ;;  %v8794_v19 = vld [vmem:[%s18297_s0 + $0x180] sm:$0xff] }
  0xb2   :  { %v8902_v9 = vld [vmem:[%s18297_s0 + $0x181] sm:$0xff]  ;;  %v9056_v11 = vld [vmem:[%s18297_s0 + $0x3aa] sm:$0xff]  ;;  %v939_v12 = vpack.c.bf16 %v8792_v7, %v8791_v6  ;;  %v9057_v13 = vld [vmem:[%s18297_s0 + $0x3b2] sm:$0xff] }
  0xb3   :  { %v9055_v10 = vld [vmem:[%s18297_s0 + $0x3a2] sm:$0xff]  ;;  %v943_v15 = vpack.c.bf16 %v8902_v9, %v8901_v8  ;;  %v8793_v18 = vld [vmem:[%s18297_s0 + $0x170] sm:$0xff] }
  0xb4   :  { %1394 = vmatmul.mubr.bf16.gmra.mxu0 %v936_v63  ;;  %v9058_v14 = vld [vmem:[%s18297_s0 + $0x3c2] sm:$0xff]  ;;  %v1013_v16 = vpack.c.bf16 %v9056_v11, %v9055_v10  ;;  %v8904_v21 = vld [vmem:[%s18297_s0 + $0x191] sm:$0xff]  ;;  %v942_v24 = vpack.c.bf16 %v8794_v19, %v8793_v18 }
  0xb5   :  { %1401 = vmatprep.mubr.bf16.mxu0 %v940_v2  ;;  %v1016_v17 = vpack.c.bf16 %v9058_v14, %v9057_v13  ;;  %v8903_v20 = vld [vmem:[%s18297_s0 + $0x189] sm:$0xff]  ;;  %v9060_v23 = vld [vmem:[%s18297_s0 + $0x3d2] sm:$0xff]  ;;  %v8905_v32 = vld [vmem:[%s18297_s0 + $0x1a1] sm:$0xff] }
  0xb6   :  { %10036 = vmatmul.mubr.bf16.gmra.mxu1 %v1007_v4  ;;  %v9059_v22 = vld [vmem:[%s18297_s0 + $0x3ca] sm:$0xff]  ;;  %v9061_v25 = vld [vmem:[%s18297_s0 + $0x3e2] sm:$0xff]  ;;  %v946_v27 = vpack.c.bf16 %v8904_v21, %v8903_v20  ;;  %v9063_v34 = vld [vmem:[%s18297_s0 + $0x3f2] sm:$0xff] }
  0xb7   :  { %10039 = vmatprep.mubr.bf16.mxu1 %v1010_v5  ;;  %v9062_v26 = vld [vmem:[%s18297_s0 + $0x3ea] sm:$0xff]  ;;  %v1019_v28 = vpack.c.bf16 %v9060_v23, %v9059_v22  ;;  %v9064_v35 = vld [vmem:[%s18297_s0 + $0x402] sm:$0xff]  ;;  %v9066_v38 = vld [vmem:[%s18297_s0 + $0x412] sm:$0xff] }
  0xb8   :  { %v1022_v29 = vpack.c.bf16 %v9062_v26, %v9061_v25  ;;  %v8795_v30 = vld [vmem:[%s18297_s0 + $0x188] sm:$0xff]  ;;  %v8796_v31 = vld [vmem:[%s18297_s0 + $0x190] sm:$0xff]  ;;  %v1025_v40 = vpack.c.bf16 %v9064_v35, %v9063_v34  ;;  %v8797_v42 = vld [vmem:[%s18297_s0 + $0x1a0] sm:$0xff] }
  0xb9   :  { %v8906_v33 = vld [vmem:[%s18297_s0 + $0x1a9] sm:$0xff]  ;;  %v945_v36 = vpack.c.bf16 %v8796_v31, %v8795_v30  ;;  %v8907_v44 = vld [vmem:[%s18297_s0 + $0x1b1] sm:$0xff]  ;;  %v8908_v45 = vld [vmem:[%s18297_s0 + $0x1c1] sm:$0xff] }
  0xba   :  { %v9065_v37 = vld [vmem:[%s18297_s0 + $0x40a] sm:$0xff]  ;;  %v949_v39 = vpack.c.bf16 %v8906_v33, %v8905_v32  ;;  %v9067_v46 = vld [vmem:[%s18297_s0 + $0x422] sm:$0xff]  ;;  %v9069_v49 = vld [vmem:[%s18297_s0 + $0x432] sm:$0xff]  ;;  %v952_v51 = vpack.c.bf16 %v8908_v45, %v8907_v44 }
  0xbb   :  { %v1028_v41 = vpack.c.bf16 %v9066_v38, %v9065_v37  ;;  %v8798_v43 = vld [vmem:[%s18297_s0 + $0x1a8] sm:$0xff]  ;;  %v10578_v53 = vld [vmem:[%s18298_s1 + $0x90] sm:$0xff]   ;;  %v8800_v56 = vld [vmem:[%s18297_s0 + $0x1c0] sm:$0xff] }
  0xbc   :  { %1402 = vmatmul.mubr.bf16.gmra.mxu0 %v939_v12  ;;  %v9068_v47 = vld [vmem:[%s18297_s0 + $0x42a] sm:$0xff]  ;;  %v948_v48 = vpack.c.bf16 %v8798_v43, %v8797_v42  ;;  %v9070_v50 = vld [vmem:[%s18297_s0 + $0x442] sm:$0xff]  ;;  %10081 = vmatprep.subr.bf16.mxu0 %v10578_v53  ;;  %v9072_v60 = vld [vmem:[%s18297_s0 + $0x452] sm:$0xff] }
  0xbd   :  { %1409 = vmatprep.mubr.bf16.mxu0 %v943_v15  ;;  %v1031_v52 = vpack.c.bf16 %v9068_v47, %v9067_v46  ;;  %v1034_v54 = vpack.c.bf16 %v9070_v50, %v9069_v49  ;;  %v8799_v55 = vld [vmem:[%s18297_s0 + $0x1b0] sm:$0xff]  ;;  %10082 = vmatpush3.bf16.msra.mxu0 %v10578_v53  ;;  %v9073_v62 = vld [vmem:[%s18297_s0 + $0x462] sm:$0xff] }
  0xbe   :  { %10040 = vmatmul.mubr.bf16.gmra.mxu1 %v1013_v16  ;;  %v8909_v57 = vld [vmem:[%s18297_s0 + $0x1c9] sm:$0xff]  ;;  %v8910_v58 = vld [vmem:[%s18297_s0 + $0x1d1] sm:$0xff]  ;;  %v951_v61 = vpack.c.bf16 %v8800_v56, %v8799_v55  ;;  %v8911_v6 = vld [vmem:[%s18297_s0 + $0x1e1] sm:$0xff] }
  0xbf   :  { %10043 = vmatprep.mubr.bf16.mxu1 %v1016_v17  ;;  %v9071_v59 = vld [vmem:[%s18297_s0 + $0x44a] sm:$0xff]  ;;  %v955_v0 = vpack.c.bf16 %v8910_v58, %v8909_v57  ;;  %v9075_v8 = vld [vmem:[%s18297_s0 + $0x472] sm:$0xff]  ;;  %v9076_v9 = vld [vmem:[%s18297_s0 + $0x482] sm:$0xff] }
  0xc0   :  { %v9074_v63 = vld [vmem:[%s18297_s0 + $0x46a] sm:$0xff]  ;;  %v1037_v1 = vpack.c.bf16 %v9072_v60, %v9071_v59  ;;  %v9078_v12 = vld [vmem:[%s18297_s0 + $0x492] sm:$0xff]  ;;  %v1043_v14 = vpack.c.bf16 %v9076_v9, %v9075_v8  ;;  %v8803_v16 = vld [vmem:[%s18297_s0 + $0x1e0] sm:$0xff] }
  0xc1   :  { %v1040_v2 = vpack.c.bf16 %v9074_v63, %v9073_v62  ;;  %v8801_v4 = vld [vmem:[%s18297_s0 + $0x1c8] sm:$0xff]  ;;  %v8802_v5 = vld [vmem:[%s18297_s0 + $0x1d0] sm:$0xff]  ;;  %v8806_v33 = vld [vmem:[%s18297_s0 + $0x200] sm:$0xff] }
  0xc2   :  { %v8912_v7 = vld [vmem:[%s18297_s0 + $0x1e9] sm:$0xff]  ;;  %v954_v10 = vpack.c.bf16 %v8802_v5, %v8801_v4  ;;  %v8913_v19 = vld [vmem:[%s18297_s0 + $0x1f1] sm:$0xff]  ;;  %v8914_v20 = vld [vmem:[%s18297_s0 + $0x201] sm:$0xff] }
  0xc3   :  { %v9077_v11 = vld [vmem:[%s18297_s0 + $0x48a] sm:$0xff]  ;;  %v958_v13 = vpack.c.bf16 %v8912_v7, %v8911_v6  ;;  %v9079_v21 = vld [vmem:[%s18297_s0 + $0x4a2] sm:$0xff]  ;;  %v9081_v25 = vld [vmem:[%s18297_s0 + $0x4b2] sm:$0xff] }
  0xc4   :  { %1410 = vmatmul.mubr.bf16.gmra.mxu0 %v942_v24  ;;  %v1046_v15 = vpack.c.bf16 %v9078_v12, %v9077_v11  ;;  %v8804_v17 = vld [vmem:[%s18297_s0 + $0x1e8] sm:$0xff]  ;;  %v8805_v32 = vld [vmem:[%s18297_s0 + $0x1f0] sm:$0xff]  ;;  %v35_v53 = vld [vmem:[%s18297_s0] sm:$0xff] }
  0xc5   :  { %1417 = vmatprep.mubr.bf16.mxu0 %v946_v27  ;;  %v9080_v22 = vld [vmem:[%s18297_s0 + $0x4aa] sm:$0xff]  ;;  %v957_v24 = vpack.c.bf16 %v8804_v17, %v8803_v16  ;;  %v9082_v26 = vld [vmem:[%s18297_s0 + $0x4c2] sm:$0xff]  ;;  %v961_v27 = vpack.c.bf16 %v8914_v20, %v8913_v19  ;;  %v9084_v38 = vld [vmem:[%s18297_s0 + $0x4d2] sm:$0xff] }
  0xc6   :  { %10044 = vmatmul.mubr.bf16.gmra.mxu1 %v1019_v28  ;;  %v1052_v30 = vpack.c.bf16 %v9082_v26, %v9081_v25  ;;  %v8915_v35 = vld [vmem:[%s18297_s0 + $0x209] sm:$0xff]  ;;  %v145_v57 = vld [vmem:[%s18297_s0 + $0x11] sm:$0xff]  ;;  %v8920_v6 = vld [vmem:[%s18297_s0 + $0x241] sm:$0xff] }
  0xc7   :  { %10047 = vmatprep.mubr.bf16.mxu1 %v1022_v29  ;;  %v1049_v29 = vpack.c.bf16 %v9080_v22, %v9079_v21  ;;  %v9083_v37 = vld [vmem:[%s18297_s0 + $0x4ca] sm:$0xff]  ;;  %v10574_v63 = vld [vmem:[%s18298_s1 + $0x1b8] sm:$0xff]   ;;  %v8812_v25 = vld [vmem:[%s18297_s0 + $0x240] sm:$0xff] }
  0xc8   :  { %v144_v42 = vld [vmem:[%s18297_s0 + $0x9] sm:$0xff]  ;;  %v1055_v45 = vpack.c.bf16 %v9084_v38, %v9083_v37  ;;  %v8919_v5 = vld [vmem:[%s18297_s0 + $0x231] sm:$0xff]  ;;  %v149_v37 = vld [vmem:[%s18297_s0 + $0x41] sm:$0xff] }
  0xc9   :  { %v8808_v49 = vld [vmem:[%s18297_s0 + $0x210] sm:$0xff]  ;;  %v970_v12 = vpack.c.bf16 %v8920_v6, %v8919_v5  ;;  %v10577_v19 = vld [vmem:[%s18298_s1 + $0x1a8] sm:$0xff]  }
  0xca   :  { %v37_v7 = vld [vmem:[%s18297_s0 + $0x10] sm:$0xff] }
  0xcb   :  { %v10576_v8 = vld [vmem:[%s18298_s1 + $0x1b0] sm:$0xff]  }
  0xcc   :  { %1418 = vmatmul.mubr.bf16.gmra.mxu0 %v945_v36  ;;  %v8916_v36 = vld [vmem:[%s18297_s0 + $0x211] sm:$0xff]  ;;  %v147_v11 = vld [vmem:[%s18297_s0 + $0x29] sm:$0xff] }
  0xcd   :  { %1425 = vmatprep.mubr.bf16.mxu0 %v949_v39  ;;  %v964_v43 = vpack.c.bf16 %v8916_v36, %v8915_v35  ;;  %v10640_v16 = vld [vmem:[%s18297_s0 + $0x31] sm:$0xff]  ;;  %v150_v38 = vld [vmem:[%s18297_s0 + $0x49] sm:$0xff] }
  0xce   :  { %10048 = vmatmul.mubr.bf16.gmra.mxu1 %v1025_v40  ;;  %v960_v40 = vpack.c.bf16 %v8806_v33, %v8805_v32  ;;  %v366_v17 = vpack.c.bf16 %v10640_v16, %v147_v11  ;;  %v10579_v32 = vld [vmem:[%s18298_s1 + $0x1a0] sm:$0xff]   ;;  %v151_v6 = vld [vmem:[%s18297_s0 + $0x51] sm:$0xff] }
  0xcf   :  { %10051 = vmatprep.mubr.bf16.mxu1 %v1028_v41  ;;  %v143_v41 = vld [vmem:[%s18297_s0 + $0x1] sm:$0xff] }
  0xd0   :  { %v360_v46 = vpack.c.bf16 %v144_v42, %v143_v41  ;;  %v10581_v42 = vld [vmem:[%s18298_s1 + $0x88] sm:$0xff]  }
  0xd1   :  { %10083 = vmatprep.subr.bf16.mxu0 %v10581_v42 }
  0xd2   :  { %10084 = vmatpush3.bf16.msra.mxu0 %v10581_v42 }
  0xd4   :  { %1426 = vmatmul.mubr.bf16.gmra.mxu0 %v948_v48  ;;  %v8807_v48 = vld [vmem:[%s18297_s0 + $0x208] sm:$0xff] }
  0xd5   :  { %1433 = vmatprep.mubr.bf16.mxu0 %v952_v51  ;;  %v8917_v51 = vld [vmem:[%s18297_s0 + $0x221] sm:$0xff]  ;;  %v963_v56 = vpack.c.bf16 %v8808_v49, %v8807_v48  ;;  %v369_v49 = vpack.c.bf16 %v150_v38, %v149_v37  ;;  %v154_v37 = vld [vmem:[%s18297_s0 + $0x71] sm:$0xff] }
  0xd6   :  { %10052 = vmatmul.mubr.bf16.gmra.mxu1 %v1031_v52  ;;  %v8918_v52 = vld [vmem:[%s18297_s0 + $0x229] sm:$0xff] }
  0xd7   :  { %10055 = vmatprep.mubr.bf16.mxu1 %v1034_v54  ;;  %v36_v54 = vld [vmem:[%s18297_s0 + $0x8] sm:$0xff]  ;;  %v967_v58 = vpack.c.bf16 %v8918_v52, %v8917_v51 }
  0xd8   :  { %v359_v60 = vpack.c.bf16 %v36_v54, %v35_v53  ;;  %v8813_v54 = vld [vmem:[%s18297_s0 + $0x248] sm:$0xff] }
  0xdc   :  { %1434 = vmatmul.mubr.bf16.gmra.mxu0 %v951_v61  ;;  %v10638_v61 = vld [vmem:[%s18297_s0 + $0x21] sm:$0xff] }
  0xdd   :  { %1441 = vmatprep.mubr.bf16.mxu0 %v955_v0  ;;  %v363_v62 = vpack.c.bf16 %v10638_v61, %v145_v57  ;;  %v41_v61 = vld [vmem:[%s18297_s0 + $0x40] sm:$0xff] }
  0xde   :  { %10056 = vmatmul.mubr.bf16.gmra.mxu1 %v1037_v1  ;;  %v8809_v1 = vld [vmem:[%s18297_s0 + $0x220] sm:$0xff] }
  0xdf   :  { %10059 = vmatprep.mubr.bf16.mxu1 %v1040_v2  ;;  %v8810_v2 = vld [vmem:[%s18297_s0 + $0x228] sm:$0xff] }
  0xe4   :  { %1442 = vmatmul.mubr.bf16.gmra.mxu0 %v954_v10  ;;  %v966_v10 = vpack.c.bf16 %v8810_v2, %v8809_v1 }
  0xe5   :  { %1449 = vmatprep.mubr.bf16.mxu0 %v958_v13 }
  0xe6   :  { %v11472_v18 = vpop.f32.mrf.mxu1  ;;  %10060 = vmatmul.mubr.bf16.gmra.mxu1 %v1043_v14  ;;  %v10639_v14 = vld [vmem:[%s18297_s0 + $0x20] sm:$0xff] }
  0xe7   :  { %10063 = vmatprep.mubr.bf16.mxu1 %v1046_v15  ;;  %v362_v15 = vpack.c.bf16 %v10639_v14, %v37_v7  ;;  %v152_v7 = vld [vmem:[%s18297_s0 + $0x61] sm:$0xff] }
  0xe8   :  { %v11486_v23 = vpop.f32.mrf.mxu1 }
  0xea   :  { %v11494_v28 = vpop.f32.mrf.mxu1 }
  0xec   :  { %v11496_v31 = vpop.f32.mrf.mxu1  ;;  %1450 = vmatmul.mubr.bf16.gmra.mxu0 %v957_v24  ;;  %v8811_v24 = vld [vmem:[%s18297_s0 + $0x230] sm:$0xff] }
  0xed   :  { %1457 = vmatprep.mubr.bf16.mxu0 %v961_v27  ;;  %v969_v36 = vpack.c.bf16 %v8812_v25, %v8811_v24 }
  0xee   :  { %v11504_v34 = vpop.f32.mrf.mxu1  ;;  %10064 = vmatmul.mubr.bf16.gmra.mxu1 %v1049_v29  ;;  %v8921_v29 = vld [vmem:[%s18297_s0 + $0x249] sm:$0xff] }
  0xef   :  { %10067 = vmatprep.mubr.bf16.mxu1 %v1052_v30  ;;  %v39_v30 = vld [vmem:[%s18297_s0 + $0x28] sm:$0xff] }
  0xf0   :  { %v11518_v39 = vpop.f32.mrf.mxu1 }
  0xf2   :  { %v11526_v44 = vpop.f32.mrf.mxu1 }
  0xf4   :  { %v11528_v47 = vpop.f32.mrf.mxu1  ;;  %1458 = vmatmul.mubr.bf16.gmra.mxu0 %v960_v40 }
  0xf5   :  { %1465 = vmatprep.mubr.bf16.mxu0 %v964_v43 }
  0xf6   :  { %v11536_v50 = vpop.f32.mrf.mxu1  ;;  %10068 = vmatmul.mubr.bf16.gmra.mxu1 %v1055_v45 }
  0xf7   :  { %2355 = vmatprep.mubr.bf16.mxu1 %v360_v46  ;;  %v10641_v46 = vld [vmem:[%s18297_s0 + $0x30] sm:$0xff] }
  0xf8   :  { %v11550_v55 = vpop.f32.mrf.mxu1  ;;  %v365_v48 = vpack.c.bf16 %v10641_v46, %v39_v30 }
  0xfa   :  { %v11555_v59 = vpop.f32.mrf.mxu1 }
  0xfc   :  { %v11563_v0 = vpop.f32.mrf.mxu1  ;;  %1466 = vmatmul.mubr.bf16.gmra.mxu0 %v963_v56  ;;  %v8814_v56 = vld [vmem:[%s18297_s0 + $0x250] sm:$0xff] }
  0xfd   :  { %1473 = vmatprep.mubr.bf16.mxu0 %v967_v58  ;;  %v972_v5 = vpack.c.bf16 %v8814_v56, %v8813_v54  ;;  %v8817_v54 = vld [vmem:[%s18297_s0 + $0x2b0] sm:$0xff] }
  0xfe   :  { %v11571_v4 = vpop.f32.mrf.mxu1  ;;  %2356 = vmatmul.mubr.bf16.vlgmr.msra.gmra.mxu1 %v359_v60  ;;  %v8923_v60 = vld [vmem:[%s18297_s0 + $0x2a1] sm:$0xff] }
  0xff   :  { %2363 = vmatprep.mubr.bf16.mxu1 %v363_v62  ;;  %3934 = vmatpush1.bf16.msra.mxu1 %v10574_v63  ;;  %v42_v62 = vld [vmem:[%s18297_s0 + $0x48] sm:$0xff]  ;;  %v10582_v63 = vld [vmem:[%s18298_s1 + $0x190] sm:$0xff]  }
 0x100   :  { %v11585_v9 = vpop.f32.mrf.mxu1  ;;  %3935 = vmatprep.subr.bf16.mxu1 %v18306_v3  ;;  %v368_v14 = vpack.c.bf16 %v42_v62, %v41_v61  ;;  %v46_v61 = vld [vmem:[%s18297_s0 + $0x70] sm:$0xff] }
 0x102   :  { %v11591_v13 = vpop.f32.mrf.mxu1 }
 0x103   :  { %3936 = vmatpush1.bf16.msra.mxu1 %v10576_v8 }
 0x104   :  { %v11602_v20 = vpop.f32.mrf.mxu1  ;;  %v1283_v21 = vpop.f32.mrf.mxu0  ;;  %1474 = vmatmul.mubr.bf16.gmra.mxu0 %v966_v10  ;;  %3937 = vmatprep.subr.bf16.mxu1 %v18306_v3 }
 0x105   :  { %v11606_v22 = vadd.f32 %v11486_v23, %v1283_v21  ;;  %1481 = vmatprep.mubr.bf16.mxu0 %v970_v12  ;;  %v8922_v23 = vld [vmem:[%s18297_s0 + $0x251] sm:$0xff]  ;;  %v8816_v21 = vld [vmem:[%s18297_s0 + $0x2a8] sm:$0xff] }
 0x106   :  { %v11614_v26 = vpop.f32.mrf.mxu1  ;;  %2364 = vmatmul.mubr.bf16.gmra.mxu1 %v362_v15  ;;  %v1285_v27 = vpop.f32.mrf.mxu0  ;;  %v973_v41 = vpack.c.bf16 %v8922_v23, %v8921_v29  ;;  %v372_v15 = vpack.c.bf16 %v152_v7, %v151_v6  ;;  %v43_v29 = vld [vmem:[%s18297_s0 + $0x50] sm:$0xff]  ;;  %v44_v23 = vld [vmem:[%s18297_s0 + $0x60] sm:$0xff] }
 0x107   :  { %2371 = vmatprep.mubr.bf16.mxu1 %v366_v17  ;;  %3938 = vmatpush1.bf16.msra.mxu1 %v10577_v19  ;;  %v8925_v27 = vld [vmem:[%s18297_s0 + $0x2b1] sm:$0xff]  ;;  %v371_v46 = vpack.c.bf16 %v44_v23, %v43_v29  ;;  %v156_v6 = vld [vmem:[%s18297_s0 + $0x89] sm:$0xff]  ;;  %v8929_v23 = vld [vmem:[%s18297_s0 + $0x2e1] sm:$0xff] }
 0x108   :  { %v11628_v33 = vpop.f32.mrf.mxu1  ;;  %v1286_v35 = vpop.f32.mrf.mxu0  ;;  %3939 = vmatprep.subr.bf16.mxu1 %v18306_v3 }
 0x109   :  { %v11638_v40 = vadd.f32 %v11496_v31, %v1286_v35  ;;  %v10580_v31 = vld [vmem:[%s18298_s1 + $0x198] sm:$0xff]  }
 0x10a   :  { %v11643_v43 = vpop.f32.mrf.mxu1  ;;  %v1288_v45 = vpop.f32.mrf.mxu0 }
 0x10b   :  { %3940 = vmatpush1.bf16.msra.mxu1 %v10579_v32 }
 0x10c   :  { %v11651_v51 = vpop.f32.mrf.mxu1  ;;  %v1291_v52 = vpop.f32.mrf.mxu0  ;;  %1482 = vmatmul.mubr.bf16.gmra.mxu0 %v969_v36  ;;  %3941 = vmatprep.subr.bf16.mxu1 %v18306_v3  ;;  %v153_v36 = vld [vmem:[%s18297_s0 + $0x69] sm:$0xff] }
 0x10d   :  { %v11655_v53 = vadd.f32 %v11472_v18, %v1291_v52  ;;  %1489 = vmatprep.mubr.bf16.mxu0 %v973_v41  ;;  %v8924_v18 = vld [vmem:[%s18297_s0 + $0x2a9] sm:$0xff] }
 0x10e   :  { %v11663_v57 = vpop.f32.mrf.mxu1  ;;  %2372 = vmatmul.mubr.bf16.gmra.mxu1 %v365_v48  ;;  %v1293_v58 = vpop.f32.mrf.mxu0  ;;  %v976_v10 = vpack.c.bf16 %v8924_v18, %v8923_v60  ;;  %v375_v48 = vpack.c.bf16 %v154_v37, %v153_v36  ;;  %v8927_v60 = vld [vmem:[%s18297_s0 + $0x2c9] sm:$0xff] }
 0x10f   :  { %2379 = vmatprep.mubr.bf16.mxu1 %v369_v49  ;;  %3942 = vmatpush1.bf16.msra.mxu1 %v10580_v31  ;;  %v45_v18 = vld [vmem:[%s18297_s0 + $0x68] sm:$0xff] }
 0x110   :  { %v11680_v1 = vpop.f32.mrf.mxu1  ;;  %v1294_v2 = vpop.f32.mrf.mxu0  ;;  %3943 = vmatprep.subr.bf16.mxu1 %v18306_v3 }
 0x111   :  { %v11690_v8 = vadd.f32 %v11494_v28, %v1294_v2  ;;  %v8815_v28 = vld [vmem:[%s18297_s0 + $0x2a0] sm:$0xff] }
 0x112   :  { %v11692_v11 = vpop.f32.mrf.mxu1  ;;  %v1296_v12 = vpop.f32.mrf.mxu0  ;;  %v975_v35 = vpack.c.bf16 %v8816_v21, %v8815_v28 }
 0x113   :  { %3944 = vmatpush1.bf16.msra.mxu1 %v10582_v63 }
 0x114   :  { %v11694_v16 = vpop.f32.mrf.mxu1  ;;  %v1299_v17 = vpop.f32.mrf.mxu0  ;;  %1490 = vmatmul.mubr.bf16.gmra.mxu0 %v972_v5  ;;  %3945 = vmatprep.subr.bf16.mxu1 %v18306_v3  ;;  %v155_v5 = vld [vmem:[%s18297_s0 + $0x81] sm:$0xff] }
 0x115   :  { %v11698_v19 = vadd.f32 %v11518_v39, %v1299_v17  ;;  %1497 = vmatprep.mubr.bf16.mxu0 %v976_v10  ;;  %v8926_v39 = vld [vmem:[%s18297_s0 + $0x2c1] sm:$0xff]  ;;  %v378_v17 = vpack.c.bf16 %v156_v6, %v155_v5 }
 0x116   :  { %v11706_v24 = vpop.f32.mrf.mxu1  ;;  %2380 = vmatmul.mubr.bf16.gmra.mxu1 %v368_v14  ;;  %v1301_v25 = vpop.f32.mrf.mxu0  ;;  %v979_v41 = vpack.c.bf16 %v8926_v39, %v8925_v27  ;;  %v8819_v27 = vld [vmem:[%s18297_s0 + $0x2c8] sm:$0xff] }
 0x117   :  { %2387 = vmatprep.mubr.bf16.mxu1 %v372_v15  ;;  %v374_v15 = vpack.c.bf16 %v46_v61, %v45_v18 }
 0x118   :  { %v11720_v30 = vpop.f32.mrf.mxu1  ;;  %v1302_v32 = vpop.f32.mrf.mxu0 }
 0x119   :  { %v11729_v38 = vadd.f32 %v11528_v47, %v1302_v32  ;;  %v8818_v47 = vld [vmem:[%s18297_s0 + $0x2c0] sm:$0xff] }
 0x11a   :  { %v11731_v42 = vpop.f32.mrf.mxu1  ;;  %v1304_v45 = vpop.f32.mrf.mxu0  ;;  %v978_v2 = vpack.c.bf16 %v8818_v47, %v8817_v54  ;;  %v47_v32 = vld [vmem:[%s18297_s0 + $0x80] sm:$0xff] }
 0x11b   :  { %v157_v45 = vld [vmem:[%s18297_s0 + $0x91] sm:$0xff] }
 0x11c   :  { %v11733_v49 = vpop.f32.mrf.mxu1  ;;  %v1307_v31 = vpop.f32.mrf.mxu0  ;;  %1498 = vmatmul.mubr.bf16.gmra.mxu0 %v975_v35  ;;  %v48_v35 = vld [vmem:[%s18297_s0 + $0x88] sm:$0xff] }
 0x11d   :  { %v11736_v52 = vadd.f32 %v11504_v34, %v1307_v31  ;;  %1505 = vmatprep.mubr.bf16.mxu0 %v979_v41  ;;  %v8928_v34 = vld [vmem:[%s18297_s0 + $0x2d1] sm:$0xff] }
 0x11e   :  { %v11744_v56 = vpop.f32.mrf.mxu1  ;;  %2388 = vmatmul.mubr.bf16.gmra.mxu1 %v371_v46  ;;  %v1309_v58 = vpop.f32.mrf.mxu0  ;;  %v982_v10 = vpack.c.bf16 %v8928_v34, %v8927_v60  ;;  %v158_v46 = vld [vmem:[%s18297_s0 + $0xa1] sm:$0xff]  ;;  %v377_v60 = vpack.c.bf16 %v48_v35, %v47_v32 }
 0x11f   :  { %2395 = vmatprep.mubr.bf16.mxu1 %v375_v48  ;;  %v10583_v48 = vld [vmem:[%s18298_s1 + $0x188] sm:$0xff]   ;;  %v381_v34 = vpack.c.bf16 %v158_v46, %v157_v45 }
 0x120   :  { %v11758_v62 = vpop.f32.mrf.mxu1  ;;  %v1310_v63 = vpop.f32.mrf.mxu0  ;;  %3946 = vmatpush1.bf16.msra.mxu1 %v10583_v48 }
 0x121   :  { %v11767_v7 = vadd.f32 %v11526_v44, %v1310_v63  ;;  %v8820_v44 = vld [vmem:[%s18297_s0 + $0x2d0] sm:$0xff]  ;;  %3947 = vmatprep.subr.bf16.mxu1 %v18306_v3 }
 0x122   :  { %v11769_v12 = vpop.f32.mrf.mxu1  ;;  %v1312_v14 = vpop.f32.mrf.mxu0  ;;  %v981_v41 = vpack.c.bf16 %v8820_v44, %v8819_v27  ;;  %v159_v44 = vld [vmem:[%s18297_s0 + $0xa9] sm:$0xff] }
 0x123   :  { %18483 = vst [vmem:[#allocation7_spill] sm:$0xff] %v11769_v12  ;;  %v49_v14 = vld [vmem:[%s18297_s0 + $0x90] sm:$0xff] }
 0x124   :  { %v11771_v28 = vpop.f32.mrf.mxu1  ;;  %v1315_v21 = vpop.f32.mrf.mxu0  ;;  %1506 = vmatmul.mubr.bf16.gmra.mxu0 %v978_v2  ;;  %v8822_v2 = vld [vmem:[%s18297_s0 + $0x2e8] sm:$0xff] }
 0x125   :  { %v11774_v25 = vadd.f32 %v11550_v55, %v1315_v21  ;;  %1513 = vmatprep.mubr.bf16.mxu0 %v982_v10  ;;  %v8930_v55 = vld [vmem:[%s18297_s0 + $0x2e9] sm:$0xff]  ;;  %v8931_v10 = vld [vmem:[%s18297_s0 + $0x2f1] sm:$0xff] }
 0x126   :  { %v11782_v39 = vpop.f32.mrf.mxu1  ;;  %2396 = vmatmul.mubr.bf16.gmra.mxu1 %v374_v15  ;;  %v1317_v29 = vpop.f32.mrf.mxu0  ;;  %v985_v54 = vpack.c.bf16 %v8930_v55, %v8929_v23  ;;  %v50_v15 = vld [vmem:[%s18297_s0 + $0xa0] sm:$0xff] }
 0x127   :  { %18484 = vst [vmem:[#allocation8_spill] sm:$0xff] %v11782_v39  ;;  %2403 = vmatprep.mubr.bf16.mxu1 %v378_v17  ;;  %v160_v29 = vld [vmem:[%s18297_s0 + $0xb1] sm:$0xff] }
 0x128   :  { %v11796_v36 = vpop.f32.mrf.mxu1  ;;  %v1318_v37 = vpop.f32.mrf.mxu0 }
 0x129   :  { %18485 = vst [vmem:[#allocation9_spill] sm:$0xff] %v11796_v36  ;;  %v11808_v31 = vadd.f32 %v11563_v0, %v1318_v37  ;;  %v8821_v0 = vld [vmem:[%s18297_s0 + $0x2e0] sm:$0xff]  ;;  %v380_v37 = vpack.c.bf16 %v50_v15, %v49_v14  ;;  %v162_v14 = vld [vmem:[%s18297_s0 + $0xc9] sm:$0xff] }
 0x12a   :  { %v11810_v47 = vpop.f32.mrf.mxu1  ;;  %v1320_v58 = vpop.f32.mrf.mxu0  ;;  %v984_v27 = vpack.c.bf16 %v8822_v2, %v8821_v0  ;;  %v52_v0 = vld [vmem:[%s18297_s0 + $0xb0] sm:$0xff] }
 0x12b   :  { %18486 = vst [vmem:[#allocation10_spill] sm:$0xff] %v11810_v47 }
 0x12c   :  { %v11813_v18 = vpop.f32.mrf.mxu1  ;;  %v1323_v61 = vpop.f32.mrf.mxu0  ;;  %1514 = vmatmul.mubr.bf16.gmra.mxu0 %v981_v41  ;;  %v384_v41 = vpack.c.bf16 %v160_v29, %v159_v44 }
 0x12d   :  { %18487 = vst [vmem:[#allocation11_spill] sm:$0xff] %v11813_v18  ;;  %v11816_v63 = vadd.f32 %v11536_v50, %v1323_v61  ;;  %1521 = vmatprep.mubr.bf16.mxu0 %v985_v54  ;;  %v8932_v50 = vld [vmem:[%s18297_s0 + $0x301] sm:$0xff]  ;;  %v8823_v54 = vld [vmem:[%s18297_s0 + $0x2f0] sm:$0xff] }
 0x12e   :  { %v11824_v5 = vpop.f32.mrf.mxu1  ;;  %2404 = vmatmul.mubr.bf16.gmra.mxu1 %v377_v60  ;;  %v1325_v6 = vpop.f32.mrf.mxu0  ;;  %v988_v55 = vpack.c.bf16 %v8932_v50, %v8931_v10  ;;  %v51_v61 = vld [vmem:[%s18297_s0 + $0xa8] sm:$0xff] }
 0x12f   :  { %18488 = vst [vmem:[#allocation12_spill] sm:$0xff] %v11824_v5  ;;  %2411 = vmatprep.mubr.bf16.mxu1 %v381_v34  ;;  %v8933_v34 = vld [vmem:[%s18297_s0 + $0x309] sm:$0xff]  ;;  %v161_v50 = vld [vmem:[%s18297_s0 + $0xc1] sm:$0xff]  ;;  %v383_v29 = vpack.c.bf16 %v52_v0, %v51_v61 }
 0x130   :  { %v11838_v17 = vpop.f32.mrf.mxu1  ;;  %v1326_v21 = vpop.f32.mrf.mxu0  ;;  %v10584_v61 = vld [vmem:[%s18298_s1 + $0x80] sm:$0xff]  }
 0x131   :  { %18489 = vst [vmem:[#allocation13_spill] sm:$0xff] %v11838_v17  ;;  %v11847_v23 = vadd.f32 %v11555_v59, %v1326_v21  ;;  %v8824_v59 = vld [vmem:[%s18297_s0 + $0x300] sm:$0xff]  ;;  %10085 = vmatprep.subr.bf16.mxu0 %v10584_v61 }
 0x132   :  { %v11849_v32 = vpop.f32.mrf.mxu1  ;;  %v1328_v35 = vpop.f32.mrf.mxu0  ;;  %v987_v10 = vpack.c.bf16 %v8824_v59, %v8823_v54  ;;  %10086 = vmatpush3.bf16.msra.mxu0 %v10584_v61  ;;  %v55_v61 = vld [vmem:[%s18297_s0 + $0xd0] sm:$0xff] }
 0x133   :  { %18490 = vst [vmem:[#allocation14_spill] sm:$0xff] %v11849_v32 }
 0x134   :  { %v11851_v45 = vpop.f32.mrf.mxu1  ;;  %v1331_v46 = vpop.f32.mrf.mxu0  ;;  %1522 = vmatmul.mubr.bf16.gmra.mxu0 %v984_v27 }
 0x135   :  { %18491 = vst [vmem:[#allocation15_spill] sm:$0xff] %v11851_v45  ;;  %v11854_v48 = vadd.f32 %v11585_v9, %v1331_v46  ;;  %1529 = vmatprep.mubr.bf16.mxu0 %v988_v55  ;;  %v8934_v9 = vld [vmem:[%s18297_s0 + $0x311] sm:$0xff]  ;;  %v387_v55 = vpack.c.bf16 %v162_v14, %v161_v50  ;;  %v8825_v46 = vld [vmem:[%s18297_s0 + $0x308] sm:$0xff] }
 0x136   :  { %v11862_v58 = vpop.f32.mrf.mxu1  ;;  %2412 = vmatmul.mubr.bf16.gmra.mxu1 %v380_v37  ;;  %v1333_v60 = vpop.f32.mrf.mxu0  ;;  %v991_v21 = vpack.c.bf16 %v8934_v9, %v8933_v34  ;;  %v53_v34 = vld [vmem:[%s18297_s0 + $0xc0] sm:$0xff]  ;;  %v54_v9 = vld [vmem:[%s18297_s0 + $0xc8] sm:$0xff]  ;;  %v163_v50 = vld [vmem:[%s18297_s0 + $0xd1] sm:$0xff] }
 0x137   :  { %18492 = vst [vmem:[#allocation16_spill] sm:$0xff] %v11862_v58  ;;  %2419 = vmatprep.mubr.bf16.mxu1 %v384_v41  ;;  %v8935_v60 = vld [vmem:[%s18297_s0 + $0x321] sm:$0xff] }
 0x138   :  { %v11876_v2 = vpop.f32.mrf.mxu1  ;;  %v1334_v6 = vpop.f32.mrf.mxu0  ;;  %v164_v14 = vld [vmem:[%s18297_s0 + $0xe1] sm:$0xff] }
 0x139   :  { %18493 = vst [vmem:[#allocation17_spill] sm:$0xff] %v11876_v2  ;;  %v11885_v15 = vadd.f32 %v11602_v20, %v1334_v6  ;;  %v8826_v20 = vld [vmem:[%s18297_s0 + $0x310] sm:$0xff] }
 0x13a   :  { %v11887_v27 = vpop.f32.mrf.mxu1  ;;  %v1336_v44 = vpop.f32.mrf.mxu0 }
 0x13b   :  { %18494 = vst [vmem:[#allocation18_spill] sm:$0xff] %v11887_v27 }
 0x13c   :  { %v11889_v35 = vpop.f32.mrf.mxu1  ;;  %v1339_v37 = vpop.f32.mrf.mxu0  ;;  %1530 = vmatmul.mubr.bf16.gmra.mxu0 %v987_v10  ;;  %v990_v10 = vpack.c.bf16 %v8826_v20, %v8825_v46  ;;  %v10585_v46 = vld [vmem:[%s18298_s1 + $0x180] sm:$0xff]  }
 0x13d   :  { %18495 = vst [vmem:[#allocation19_spill] sm:$0xff] %v11889_v35  ;;  %v11892_v41 = vadd.f32 %v11571_v4, %v1339_v37  ;;  %1537 = vmatprep.mubr.bf16.mxu0 %v991_v21  ;;  %v8936_v4 = vld [vmem:[%s18297_s0 + $0x329] sm:$0xff]  ;;  %v386_v37 = vpack.c.bf16 %v54_v9, %v53_v34  ;;  %3948 = vmatpush1.bf16.msra.mxu1 %v10585_v46  ;;  %v8937_v9 = vld [vmem:[%s18297_s0 + $0x331] sm:$0xff] }
 0x13e   :  { %v11900_v54 = vpop.f32.mrf.mxu1  ;;  %2420 = vmatmul.mubr.bf16.gmra.mxu1 %v383_v29  ;;  %v1341_v59 = vpop.f32.mrf.mxu0  ;;  %v994_v44 = vpack.c.bf16 %v8936_v4, %v8935_v60  ;;  %v8828_v60 = vld [vmem:[%s18297_s0 + $0x328] sm:$0xff] }
 0x13f   :  { %18496 = vst [vmem:[#allocation20_spill] sm:$0xff] %v11900_v54  ;;  %2427 = vmatprep.mubr.bf16.mxu1 %v387_v55  ;;  %v390_v59 = vpack.c.bf16 %v164_v14, %v163_v50 }
 0x140   :  { %v11917_v0 = vpop.f32.mrf.mxu1  ;;  %v1342_v6 = vpop.f32.mrf.mxu0 }
 0x141   :  { %18497 = vst [vmem:[#allocation21_spill] sm:$0xff] %v11917_v0  ;;  %v11926_v21 = vadd.f32 %v11591_v13, %v1342_v6  ;;  %v8827_v13 = vld [vmem:[%s18297_s0 + $0x320] sm:$0xff] }
 0x142   :  { %v11928_v29 = vpop.f32.mrf.mxu1  ;;  %v1344_v55 = vpop.f32.mrf.mxu0  ;;  %v56_v6 = vld [vmem:[%s18297_s0 + $0xe0] sm:$0xff]  ;;  %v993_v14 = vpack.c.bf16 %v8828_v60, %v8827_v13  ;;  %v8829_v60 = vld [vmem:[%s18297_s0 + $0x330] sm:$0xff] }
 0x143   :  { %18498 = vst [vmem:[#allocation22_spill] sm:$0xff] %v11928_v29  ;;  %v166_v55 = vld [vmem:[%s18297_s0 + $0xf1] sm:$0xff] }
 0x144   :  { %v11933_v20 = vpop.f32.mrf.mxu1  ;;  %v1347_v3 = vpop.f32.mrf.mxu0  ;;  %1538 = vmatmul.mubr.bf16.gmra.mxu0 %v990_v10 }
 0x145   :  { %18499 = vst [vmem:[#allocation23_spill] sm:$0xff] %v11933_v20  ;;  %v11936_v54 = vadd.f32 %v11628_v33, %v1347_v3  ;;  %1545 = vmatprep.mubr.bf16.mxu0 %v994_v44  ;;  %v8938_v3 = vld [vmem:[%s18297_s0 + $0x341] sm:$0xff]  ;;  %v18501_v33 = vmov 0   ;;  %v165_v44 = vld [vmem:[%s18297_s0 + $0xe9] sm:$0xff] }
 0x146   :  { %v11944_v4 = vpop.f32.mrf.mxu1  ;;  %2428 = vmatmul.mubr.bf16.gmra.mxu1 %v386_v37  ;;  %v1349_v34 = vpop.f32.mrf.mxu0  ;;  %3949 = vmatprep.subr.bf16.mxu1 %v18501_v33  ;;  %v393_v29 = vpack.c.bf16 %v166_v55, %v165_v44 }
 0x147   :  { %18500 = vst [vmem:[#allocation24_spill] sm:$0xff] %v11944_v4  ;;  %2435 = vmatprep.mubr.bf16.mxu1 %v390_v59  ;;  %v997_v59 = vpack.c.bf16 %v8938_v3, %v8937_v9  ;;  %v389_v4 = vpack.c.bf16 %v56_v6, %v55_v61  ;;  %v8939_v61 = vld [vmem:[%s18297_s0 + $0x349] sm:$0xff]  ;;  %v8940_v6 = vld [vmem:[%s18297_s0 + $0x351] sm:$0xff] }
 0x148   :  { %v11959_v10 = vpop.f32.mrf.mxu1  ;;  %v1350_v50 = vpop.f32.mrf.mxu0 }
 0x149   :  { %18502 = vst [vmem:[#allocation25_spill] sm:$0xff] %v11959_v10  ;;  %v11968_v37 = vadd.f32 %v11651_v51, %v1350_v50  ;;  %v8830_v51 = vld [vmem:[%s18297_s0 + $0x340] sm:$0xff]  ;;  %v57_v50 = vld [vmem:[%s18297_s0 + $0xe8] sm:$0xff] }
 0x14a   :  { %v11970_v46 = vpop.f32.mrf.mxu1  ;;  %v1352_v34 = vpop.f32.mrf.mxu0  ;;  %v996_v55 = vpack.c.bf16 %v8830_v51, %v8829_v60  ;;  %v8831_v60 = vld [vmem:[%s18297_s0 + $0x348] sm:$0xff]  ;;  %v8832_v51 = vld [vmem:[%s18297_s0 + $0x350] sm:$0xff] }
 0x14b   :  { %18503 = vst [vmem:[#allocation26_spill] sm:$0xff] %v11970_v46  ;;  %v1000_v34 = vpack.c.bf16 %v8940_v6, %v8939_v61  ;;  %v8941_v6 = vld [vmem:[%s18297_s0 + $0x361] sm:$0xff] }
 0x14c   :  { %v11972_v10 = vpop.f32.mrf.mxu1  ;;  %v11974_v13 = vpop.f32.mrf.mxu0  ;;  %1546 = vmatmul.mubr.bf16.gmra.mxu0 %v993_v14  ;;  %v58_v14 = vld [vmem:[%s18297_s0 + $0xf0] sm:$0xff] }
 0x14d   :  { %18504 = vst [vmem:[#allocation27_spill] sm:$0xff] %v11972_v10  ;;  %1553 = vmatprep.mubr.bf16.mxu0 %v997_v59  ;;  %v167_v59 = vld [vmem:[%s18297_s0 + $0x101] sm:$0xff]  ;;  %v392_v46 = vpack.c.bf16 %v58_v14, %v57_v50  ;;  %v8942_v50 = vld [vmem:[%s18297_s0 + $0x369] sm:$0xff] }
 0x14e   :  { %v11982_v9 = vpop.f32.mrf.mxu1  ;;  %2436 = vmatmul.mubr.bf16.gmra.mxu1 %v389_v4  ;;  %v1357_v3 = vpop.f32.mrf.mxu0  ;;  %v59_v14 = vld [vmem:[%s18297_s0 + $0x100] sm:$0xff] }
 0x14f   :  { %18505 = vst [vmem:[#allocation28_spill] sm:$0xff] %v11982_v9  ;;  %2443 = vmatprep.mubr.bf16.mxu1 %v393_v29  ;;  %v168_v29 = vld [vmem:[%s18297_s0 + $0x109] sm:$0xff] }
 0x150   :  { %v11996_v44 = vpop.f32.mrf.mxu1  ;;  %v11998_v4 = vpop.f32.mrf.mxu0  ;;  %v396_v10 = vpack.c.bf16 %v168_v29, %v167_v59  ;;  %v999_v29 = vpack.c.bf16 %v8832_v51, %v8831_v60  ;;  %v8833_v60 = vld [vmem:[%s18297_s0 + $0x360] sm:$0xff]  ;;  %v8834_v51 = vld [vmem:[%s18297_s0 + $0x368] sm:$0xff] }
 0x151   :  { %18506 = vst [vmem:[#allocation29_spill] sm:$0xff] %v11996_v44 }
 0x152   :  { %v12006_v3 = vpop.f32.mrf.mxu1  ;;  %v1360_v9 = vpop.f32.mrf.mxu0 }
 0x153   :  { %18507 = vst [vmem:[#allocation30_spill] sm:$0xff] %v12006_v3 }
 0x154   :  { %v12008_v20 = vpop.f32.mrf.mxu1  ;;  %v12010_v44 = vpop.f32.mrf.mxu0  ;;  %1554 = vmatmul.mubr.bf16.gmra.mxu0 %v996_v55  ;;  %v60_v55 = vld [vmem:[%s18297_s0 + $0x108] sm:$0xff] }
 0x155   :  { %18508 = vst [vmem:[#allocation31_spill] sm:$0xff] %v12008_v20  ;;  %1561 = vmatprep.mubr.bf16.mxu0 %v1000_v34  ;;  %v169_v34 = vld [vmem:[%s18297_s0 + $0x111] sm:$0xff]  ;;  %v395_v20 = vpack.c.bf16 %v60_v55, %v59_v14  ;;  %v8944_v14 = vld [vmem:[%s18297_s0 + $0x381] sm:$0xff] }
 0x156   :  { %v12018_v61 = vpop.f32.mrf.mxu1  ;;  %2444 = vmatmul.mubr.bf16.gmra.mxu1 %v392_v46  ;;  %v1365_v9 = vpop.f32.mrf.mxu0  ;;  %v61_v55 = vld [vmem:[%s18297_s0 + $0x110] sm:$0xff] }
 0x157   :  { %18509 = vst [vmem:[#allocation32_spill] sm:$0xff] %v12018_v61  ;;  %2451 = vmatprep.mubr.bf16.mxu1 %v396_v10  ;;  %v170_v10 = vld [vmem:[%s18297_s0 + $0x121] sm:$0xff]  ;;  %v1003_v9 = vpack.c.bf16 %v8942_v50, %v8941_v6  ;;  %v8943_v50 = vld [vmem:[%s18297_s0 + $0x371] sm:$0xff] }
 0x158   :  { %v12032_v59 = vpop.f32.mrf.mxu1  ;;  %v12034_v46 = vpop.f32.mrf.mxu0  ;;  %v399_v0 = vpack.c.bf16 %v170_v10, %v169_v34 }
 0x159   :  { %18510 = vst [vmem:[#allocation33_spill] sm:$0xff] %v12032_v59 }
 0x15a   :  { %v12042_v61 = vpop.f32.mrf.mxu1  ;;  %v1368_v3 = vpop.f32.mrf.mxu0 }
 0x15b   :  { %18511 = vst [vmem:[#allocation34_spill] sm:$0xff] %v12042_v61 }
 0x15c   :  { %v12044_v27 = vpop.f32.mrf.mxu1  ;;  %v12046_v59 = vpop.f32.mrf.mxu0  ;;  %1562 = vmatmul.mubr.bf16.gmra.mxu0 %v999_v29  ;;  %v62_v29 = vld [vmem:[%s18297_s0 + $0x120] sm:$0xff] }
 0x15d   :  { %18512 = vst [vmem:[#allocation35_spill] sm:$0xff] %v12044_v27  ;;  %1569 = vmatprep.mubr.bf16.mxu0 %v1003_v9  ;;  %v1002_v9 = vpack.c.bf16 %v8834_v51, %v8833_v60  ;;  %v398_v58 = vpack.c.bf16 %v62_v29, %v61_v55  ;;  %v8835_v51 = vld [vmem:[%s18297_s0 + $0x370] sm:$0xff]  ;;  %v63_v29 = vld [vmem:[%s18297_s0 + $0x128] sm:$0xff] }
 0x15e   :  { %v12054_v6 = vpop.f32.mrf.mxu1  ;;  %2452 = vmatmul.mubr.bf16.gmra.mxu1 %v395_v20  ;;  %v1373_v3 = vpop.f32.mrf.mxu0  ;;  %v10586_v20 = vld [vmem:[%s18298_s1 + $0x1f8] sm:$0xff]   ;;  %v8945_v55 = vld [vmem:[%s18297_s0 + $0x389] sm:$0xff] }
 0x15f   :  { %18513 = vst [vmem:[#allocation36_spill] sm:$0xff] %v12054_v6  ;;  %2459 = vmatprep.mubr.bf16.mxu1 %v399_v0  ;;  %v171_v0 = vld [vmem:[%s18297_s0 + $0x129] sm:$0xff]  ;;  %v172_v3 = vld [vmem:[%s18297_s0 + $0x131] sm:$0xff]  ;;  %v1006_v6 = vpack.c.bf16 %v8944_v14, %v8943_v50  ;;  %3950 = vmatpush2.bf16.msra.mxu1 %v10586_v20  ;;  %v8836_v50 = vld [vmem:[%s18297_s0 + $0x380] sm:$0xff] }
 0x160   :  { %v12071_v34 = vpop.f32.mrf.mxu1  ;;  %v12073_v10 = vpop.f32.mrf.mxu0  ;;  %3951 = vmatprep.subr.bf16.mxu1 %v18501_v33  ;;  %v64_v20 = vld [vmem:[%s18297_s0 + $0x130] sm:$0xff] }
 0x161   :  { %18514 = vst [vmem:[#allocation37_spill] sm:$0xff] %v12071_v34  ;;  %v402_v34 = vpack.c.bf16 %v172_v3, %v171_v0  ;;  %v1005_v0 = vpack.c.bf16 %v8836_v50, %v8835_v51  ;;  %v173_v3 = vld [vmem:[%s18297_s0 + $0x141] sm:$0xff]  ;;  %v8838_v50 = vld [vmem:[%s18297_s0 + $0x390] sm:$0xff] }
 0x162   :  { %v12081_v61 = vpop.f32.mrf.mxu1  ;;  %v1376_v27 = vpop.f32.mrf.mxu0  ;;  %v8837_v51 = vld [vmem:[%s18297_s0 + $0x388] sm:$0xff] }
 0x163   :  { %18515 = vst [vmem:[#allocation38_spill] sm:$0xff] %v12081_v61 }
 0x164   :  { %v12084_v35 = vpop.f32.mrf.mxu1  ;;  %v12086_v60 = vpop.f32.mrf.mxu0  ;;  %1570 = vmatmul.mubr.bf16.gmra.mxu0 %v1002_v9 }
 0x165   :  { %18516 = vst [vmem:[#allocation39_spill] sm:$0xff] %v12084_v35  ;;  %1577 = vmatprep.mubr.bf16.mxu0 %v1006_v6  ;;  %v8946_v6 = vld [vmem:[%s18297_s0 + $0x391] sm:$0xff]  ;;  %v401_v35 = vpack.c.bf16 %v64_v20, %v63_v29  ;;  %v8948_v29 = vld [vmem:[%s18297_s0 + $0x3a9] sm:$0xff]  ;;  %v65_v20 = vld [vmem:[%s18297_s0 + $0x140] sm:$0xff] }
 0x166   :  { %v12094_v14 = vpop.f32.mrf.mxu1  ;;  %2460 = vmatmul.mubr.bf16.gmra.mxu1 %v398_v58  ;;  %v1381_v27 = vpop.f32.mrf.mxu0 }
 0x167   :  { %18517 = vst [vmem:[#allocation40_spill] sm:$0xff] %v12094_v14  ;;  %2467 = vmatprep.mubr.bf16.mxu1 %v402_v34  ;;  %v174_v34 = vld [vmem:[%s18297_s0 + $0x149] sm:$0xff]  ;;  %v1009_v27 = vpack.c.bf16 %v8946_v6, %v8945_v55  ;;  %v8947_v6 = vld [vmem:[%s18297_s0 + $0x3a1] sm:$0xff] }
 0x168   :  { %v12108_v9 = vpop.f32.mrf.mxu1  ;;  %v12110_v58 = vpop.f32.mrf.mxu0  ;;  %v405_v2 = vpack.c.bf16 %v174_v34, %v173_v3  ;;  %v1008_v34 = vpack.c.bf16 %v8838_v50, %v8837_v51  ;;  %v8839_v51 = vld [vmem:[%s18297_s0 + $0x3a0] sm:$0xff]  ;;  %v8840_v50 = vld [vmem:[%s18297_s0 + $0x3a8] sm:$0xff] }
 0x169   :  { %18518 = vst [vmem:[#allocation41_spill] sm:$0xff] %v12108_v9 }
 0x16a   :  { %v12118_v14 = vpop.f32.mrf.mxu1  ;;  %v1384_v61 = vpop.f32.mrf.mxu0 }
 0x16b   :  { %18519 = vst [vmem:[#allocation42_spill] sm:$0xff] %v12118_v14 }
 0x16c   :  { %v12120_v32 = vpop.f32.mrf.mxu1  ;;  %v12122_v9 = vpop.f32.mrf.mxu0  ;;  %1578 = vmatmul.mubr.bf16.gmra.mxu0 %v1005_v0  ;;  %v66_v0 = vld [vmem:[%s18297_s0 + $0x148] sm:$0xff] }
 0x16d   :  { %18520 = vst [vmem:[#allocation43_spill] sm:$0xff] %v12120_v32  ;;  %1585 = vmatprep.mubr.bf16.mxu0 %v1009_v27  ;;  %v175_v27 = vld [vmem:[%s18297_s0 + $0x151] sm:$0xff]  ;;  %v404_v32 = vpack.c.bf16 %v66_v0, %v65_v20  ;;  %v8950_v0 = vld [vmem:[%s18297_s0 + $0x3c1] sm:$0xff] }
 0x16e   :  { %v12130_v55 = vpop.f32.mrf.mxu1  ;;  %2468 = vmatmul.mubr.bf16.gmra.mxu1 %v401_v35  ;;  %v1389_v61 = vpop.f32.mrf.mxu0  ;;  %v8949_v20 = vld [vmem:[%s18297_s0 + $0x3b1] sm:$0xff] }
 0x16f   :  { %18521 = vst [vmem:[#allocation44_spill] sm:$0xff] %v12130_v55  ;;  %2475 = vmatprep.mubr.bf16.mxu1 %v405_v2  ;;  %v176_v2 = vld [vmem:[%s18297_s0 + $0x161] sm:$0xff]  ;;  %v1012_v61 = vpack.c.bf16 %v8948_v29, %v8947_v6 }
 0x170   :  { %v12144_v3 = vpop.f32.mrf.mxu1  ;;  %v12146_v35 = vpop.f32.mrf.mxu0  ;;  %v408_v5 = vpack.c.bf16 %v176_v2, %v175_v27  ;;  %v68_v27 = vld [vmem:[%s18297_s0 + $0x160] sm:$0xff] }
 0x171   :  { %18522 = vst [vmem:[#allocation45_spill] sm:$0xff] %v12144_v3 }
 0x172   :  { %v12154_v55 = vpop.f32.mrf.mxu1  ;;  %v1392_v14 = vpop.f32.mrf.mxu0 }
 0x173   :  { %18523 = vst [vmem:[#allocation46_spill] sm:$0xff] %v12154_v55  ;;  %v12169_v14 = vld [vmem:[%s18298_s1 + $0x238] sm:$0xff]   ;;  %v10588_v55 = vld [vmem:[%s18298_s1 + $0x1f0] sm:$0xff]  }
 0x174   :  { %v12156_v45 = vpop.f32.mrf.mxu1  ;;  %v12158_v3 = vpop.f32.mrf.mxu0  ;;  %1586 = vmatmul.mubr.bf16.gmra.mxu0 %v1008_v34  ;;  %v67_v34 = vld [vmem:[%s18297_s0 + $0x150] sm:$0xff]  ;;  %10195 = vmatprep.subr.bf16.mxu0 %v12169_v14 }
 0x175   :  { %18524 = vst [vmem:[#allocation47_spill] sm:$0xff] %v12156_v45  ;;  %1593 = vmatprep.mubr.bf16.mxu0 %v1012_v61  ;;  %v1011_v61 = vpack.c.bf16 %v8840_v50, %v8839_v51  ;;  %3952 = vmatpush2.bf16.msra.mxu1 %v10588_v55 }
 0x176   :  { %v12171_v6 = vpop.f32.mrf.mxu1  ;;  %2476 = vmatmul.mubr.bf16.gmra.mxu1 %v404_v32  ;;  %v1397_v29 = vpop.f32.mrf.mxu0  ;;  %3953 = vmatprep.subr.bf16.mxu1 %v18501_v33 }
 0x177   :  { %18525 = vst [vmem:[#allocation48_spill] sm:$0xff] %v12171_v6  ;;  %2483 = vmatprep.mubr.bf16.mxu1 %v408_v5  ;;  %v177_v29 = vld [vmem:[%s18297_s0 + $0x169] sm:$0xff]  ;;  %v178_v5 = vld [vmem:[%s18297_s0 + $0x171] sm:$0xff]  ;;  %v1015_v6 = vpack.c.bf16 %v8950_v0, %v8949_v20  ;;  %v8842_v0 = vld [vmem:[%s18297_s0 + $0x3c0] sm:$0xff] }
 0x178   :  { %v12186_v32 = vpop.f32.mrf.mxu1  ;;  %v12188_v2 = vpop.f32.mrf.mxu0  ;;  %v411_v47 = vpack.c.bf16 %v178_v5, %v177_v29  ;;  %v8841_v20 = vld [vmem:[%s18297_s0 + $0x3b0] sm:$0xff] }
 0x179   :  { %18526 = vst [vmem:[#allocation49_spill] sm:$0xff] %v12186_v32  ;;  %v407_v32 = vpack.c.bf16 %v68_v27, %v67_v34  ;;  %v8951_v34 = vld [vmem:[%s18297_s0 + $0x3c9] sm:$0xff]  ;;  %v1014_v5 = vpack.c.bf16 %v8842_v0, %v8841_v20 }
 0x17a   :  { %v12199_v45 = vpop.f32.mrf.mxu1  ;;  %v1400_v17 = vpop.f32.mrf.mxu0  ;;  %v69_v27 = vld [vmem:[%s18297_s0 + $0x168] sm:$0xff]  ;;  %v8844_v0 = vld [vmem:[%s18297_s0 + $0x3d0] sm:$0xff] }
 0x17b   :  { %18527 = vst [vmem:[#allocation50_spill] sm:$0xff] %v12199_v45  ;;  %v8843_v20 = vld [vmem:[%s18297_s0 + $0x3c8] sm:$0xff] }
 0x17c   :  { %v12201_v51 = vpop.f32.mrf.mxu1  ;;  %v12203_v50 = vpop.f32.mrf.mxu0  ;;  %1594 = vmatmul.mubr.bf16.gmra.mxu0 %v1011_v61  ;;  %v70_v61 = vld [vmem:[%s18297_s0 + $0x170] sm:$0xff] }
 0x17d   :  { %18528 = vst [vmem:[#allocation51_spill] sm:$0xff] %v12201_v51  ;;  %1601 = vmatprep.mubr.bf16.mxu0 %v1015_v6  ;;  %v8952_v6 = vld [vmem:[%s18297_s0 + $0x3d1] sm:$0xff]  ;;  %v410_v39 = vpack.c.bf16 %v70_v61, %v69_v27  ;;  %v71_v27 = vld [vmem:[%s18297_s0 + $0x180] sm:$0xff]  ;;  %v72_v61 = vld [vmem:[%s18297_s0 + $0x188] sm:$0xff] }
 0x17e   :  { %v12212_v17 = vpop.f32.mrf.mxu1  ;;  %2484 = vmatmul.mubr.bf16.gmra.mxu1 %v407_v32  ;;  %v1405_v55 = vpop.f32.mrf.mxu0 }
 0x17f   :  { %18529 = vst [vmem:[#allocation52_spill] sm:$0xff] %v12212_v17  ;;  %2491 = vmatprep.mubr.bf16.mxu1 %v411_v47  ;;  %v179_v55 = vld [vmem:[%s18297_s0 + $0x181] sm:$0xff]  ;;  %v180_v47 = vld [vmem:[%s18297_s0 + $0x189] sm:$0xff]  ;;  %v1018_v17 = vpack.c.bf16 %v8952_v6, %v8951_v34 }
 0x180   :  { %v12226_v29 = vpop.f32.mrf.mxu1  ;;  %v12228_v32 = vpop.f32.mrf.mxu0  ;;  %v414_v18 = vpack.c.bf16 %v180_v47, %v179_v55  ;;  %v8953_v6 = vld [vmem:[%s18297_s0 + $0x3e1] sm:$0xff]  ;;  %v1017_v55 = vpack.c.bf16 %v8844_v0, %v8843_v20  ;;  %v181_v47 = vld [vmem:[%s18297_s0 + $0x191] sm:$0xff] }
 0x181   :  { %18530 = vst [vmem:[#allocation53_spill] sm:$0xff] %v12226_v29  ;;  %v8845_v20 = vld [vmem:[%s18297_s0 + $0x3e0] sm:$0xff]  ;;  %v8846_v0 = vld [vmem:[%s18297_s0 + $0x3e8] sm:$0xff] }
 0x182   :  { %v12236_v45 = vpop.f32.mrf.mxu1  ;;  %v1408_v51 = vpop.f32.mrf.mxu0 }
 0x183   :  { %18531 = vst [vmem:[#allocation54_spill] sm:$0xff] %v12236_v45 }
 0x184   :  { %v12238_v36 = vpop.f32.mrf.mxu1  ;;  %v12240_v29 = vpop.f32.mrf.mxu0  ;;  %1602 = vmatmul.mubr.bf16.gmra.mxu0 %v1014_v5 }
 0x185   :  { %18532 = vst [vmem:[#allocation55_spill] sm:$0xff] %v12238_v36  ;;  %18533 = vst [vmem:[#allocation56_spill] sm:$0xff] %v12240_v29  ;;  %1609 = vmatprep.mubr.bf16.mxu0 %v1018_v17  ;;  %v8954_v17 = vld [vmem:[%s18297_s0 + $0x3e9] sm:$0xff]  ;;  %v413_v36 = vpack.c.bf16 %v72_v61, %v71_v27  ;;  %v8956_v27 = vld [vmem:[%s18297_s0 + $0x401] sm:$0xff] }
 0x186   :  { %v12248_v34 = vpop.f32.mrf.mxu1  ;;  %2492 = vmatmul.mubr.bf16.gmra.mxu1 %v410_v39  ;;  %v1413_v51 = vpop.f32.mrf.mxu0  ;;  %v73_v61 = vld [vmem:[%s18297_s0 + $0x190] sm:$0xff] }
 0x187   :  { %18534 = vst [vmem:[#allocation57_spill] sm:$0xff] %v12248_v34  ;;  %2499 = vmatprep.mubr.bf16.mxu1 %v414_v18  ;;  %v182_v18 = vld [vmem:[%s18297_s0 + $0x1a1] sm:$0xff]  ;;  %v1021_v51 = vpack.c.bf16 %v8954_v17, %v8953_v6  ;;  %v8955_v17 = vld [vmem:[%s18297_s0 + $0x3f1] sm:$0xff] }
 0x188   :  { %v12262_v5 = vpop.f32.mrf.mxu1  ;;  %v12264_v39 = vpop.f32.mrf.mxu0  ;;  %v417_v29 = vpack.c.bf16 %v182_v18, %v181_v47  ;;  %v1020_v18 = vpack.c.bf16 %v8846_v0, %v8845_v20  ;;  %v10590_v20 = vld [vmem:[%s18298_s1 + $0x1e8] sm:$0xff]   ;;  %v8847_v0 = vld [vmem:[%s18297_s0 + $0x3f0] sm:$0xff] }
 0x189   :  { %18535 = vst [vmem:[#allocation58_spill] sm:$0xff] %v12262_v5  ;;  %18536 = vst [vmem:[#allocation59_spill] sm:$0xff] %v12264_v39  ;;  %3954 = vmatpush2.bf16.msra.mxu1 %v10590_v20 }
 0x18a   :  { %v12272_v34 = vpop.f32.mrf.mxu1  ;;  %v1416_v45 = vpop.f32.mrf.mxu0  ;;  %3955 = vmatprep.subr.bf16.mxu1 %v18501_v33 }
 0x18b   :  { %18537 = vst [vmem:[#allocation60_spill] sm:$0xff] %v12272_v34 }
 0x18c   :  { %v12274_v12 = vpop.f32.mrf.mxu1  ;;  %v12276_v5 = vpop.f32.mrf.mxu0  ;;  %1610 = vmatmul.mubr.bf16.gmra.mxu0 %v1017_v55  ;;  %v74_v55 = vld [vmem:[%s18297_s0 + $0x1a0] sm:$0xff] }
 0x18d   :  { %18538 = vst [vmem:[#allocation61_spill] sm:$0xff] %v12274_v12  ;;  %18539 = vst [vmem:[#allocation62_spill] sm:$0xff] %v12276_v5  ;;  %1617 = vmatprep.mubr.bf16.mxu0 %v1021_v51  ;;  %v183_v51 = vld [vmem:[%s18297_s0 + $0x1a9] sm:$0xff]  ;;  %v416_v12 = vpack.c.bf16 %v74_v55, %v73_v61  ;;  %v8958_v55 = vld [vmem:[%s18297_s0 + $0x411] sm:$0xff] }
 0x18e   :  { %v12284_v6 = vpop.f32.mrf.mxu1  ;;  %2500 = vmatmul.mubr.bf16.gmra.mxu1 %v413_v36  ;;  %v1421_v45 = vpop.f32.mrf.mxu0  ;;  %v8957_v61 = vld [vmem:[%s18297_s0 + $0x409] sm:$0xff] }
 0x18f   :  { %18540 = vst [vmem:[#allocation63_spill] sm:$0xff] %v12284_v6  ;;  %2507 = vmatprep.mubr.bf16.mxu1 %v417_v29  ;;  %v184_v29 = vld [vmem:[%s18297_s0 + $0x1b1] sm:$0xff]  ;;  %v1024_v45 = vpack.c.bf16 %v8956_v27, %v8955_v17 }
 0x190   :  { %v12298_v47 = vpop.f32.mrf.mxu1  ;;  %v12300_v36 = vpop.f32.mrf.mxu0  ;;  %v420_v5 = vpack.c.bf16 %v184_v29, %v183_v51  ;;  %v76_v51 = vld [vmem:[%s18297_s0 + $0x1b0] sm:$0xff] }
 0x191   :  { %18541 = vst [vmem:[#allocation64_spill] sm:$0xff] %v12298_v47  ;;  %18542 = vst [vmem:[#allocation65_spill] sm:$0xff] %v12300_v36 }
 0x192   :  { %v12308_v6 = vpop.f32.mrf.mxu1  ;;  %v1424_v34 = vpop.f32.mrf.mxu0 }
 0x193   :  { %18543 = vst [vmem:[#allocation66_spill] sm:$0xff] %v12308_v6  ;;  %v8848_v34 = vld [vmem:[%s18297_s0 + $0x400] sm:$0xff] }
 0x194   :  { %v12310_v39 = vpop.f32.mrf.mxu1  ;;  %v12312_v47 = vpop.f32.mrf.mxu0  ;;  %1618 = vmatmul.mubr.bf16.gmra.mxu0 %v1020_v18  ;;  %v75_v18 = vld [vmem:[%s18297_s0 + $0x1a8] sm:$0xff] }
 0x195   :  { %18544 = vst [vmem:[#allocation67_spill] sm:$0xff] %v12310_v39  ;;  %18545 = vst [vmem:[#allocation68_spill] sm:$0xff] %v12312_v47  ;;  %1625 = vmatprep.mubr.bf16.mxu0 %v1024_v45  ;;  %v1023_v45 = vpack.c.bf16 %v8848_v34, %v8847_v0  ;;  %v419_v20 = vpack.c.bf16 %v76_v51, %v75_v18  ;;  %v8849_v0 = vld [vmem:[%s18297_s0 + $0x408] sm:$0xff]  ;;  %v8850_v34 = vld [vmem:[%s18297_s0 + $0x410] sm:$0xff] }
 0x196   :  { %v12323_v17 = vpop.f32.mrf.mxu1  ;;  %2508 = vmatmul.mubr.bf16.gmra.mxu1 %v416_v12  ;;  %v1429_v27 = vpop.f32.mrf.mxu0  ;;  %v77_v18 = vld [vmem:[%s18297_s0 + $0x1c0] sm:$0xff]  ;;  %v78_v51 = vld [vmem:[%s18297_s0 + $0x1c8] sm:$0xff] }
 0x197   :  { %18546 = vst [vmem:[#allocation69_spill] sm:$0xff] %v12323_v17  ;;  %2515 = vmatprep.mubr.bf16.mxu1 %v420_v5  ;;  %v185_v27 = vld [vmem:[%s18297_s0 + $0x1c1] sm:$0xff]  ;;  %v186_v5 = vld [vmem:[%s18297_s0 + $0x1c9] sm:$0xff]  ;;  %v1027_v17 = vpack.c.bf16 %v8958_v55, %v8957_v61 }
 0x198   :  { %v12337_v12 = vpop.f32.mrf.mxu1  ;;  %v12339_v29 = vpop.f32.mrf.mxu0  ;;  %v423_v47 = vpack.c.bf16 %v186_v5, %v185_v27  ;;  %v8959_v55 = vld [vmem:[%s18297_s0 + $0x421] sm:$0xff]  ;;  %v1026_v5 = vpack.c.bf16 %v8850_v34, %v8849_v0 }
 0x199   :  { %18547 = vst [vmem:[#allocation70_spill] sm:$0xff] %v12337_v12  ;;  %18548 = vst [vmem:[#allocation71_spill] sm:$0xff] %v12339_v29  ;;  %v8851_v0 = vld [vmem:[%s18297_s0 + $0x420] sm:$0xff]  ;;  %v8852_v34 = vld [vmem:[%s18297_s0 + $0x428] sm:$0xff] }
 0x19a   :  { %v12348_v6 = vpop.f32.mrf.mxu1  ;;  %v1432_v39 = vpop.f32.mrf.mxu0 }
 0x19b   :  { %18549 = vst [vmem:[#allocation72_spill] sm:$0xff] %v12348_v6 }
 0x19c   :  { %v12350_v12 = vpop.f32.mrf.mxu1  ;;  %v12352_v29 = vpop.f32.mrf.mxu0  ;;  %1626 = vmatmul.mubr.bf16.gmra.mxu0 %v1023_v45 }
 0x19d   :  { %18550 = vst [vmem:[#allocation73_spill] sm:$0xff] %v12350_v12  ;;  %18551 = vst [vmem:[#allocation74_spill] sm:$0xff] %v12352_v29  ;;  %1633 = vmatprep.mubr.bf16.mxu0 %v1027_v17  ;;  %v8960_v17 = vld [vmem:[%s18297_s0 + $0x429] sm:$0xff]  ;;  %v422_v12 = vpack.c.bf16 %v78_v51, %v77_v18  ;;  %v8962_v18 = vld [vmem:[%s18297_s0 + $0x441] sm:$0xff] }
 0x19e   :  { %v12360_v61 = vpop.f32.mrf.mxu1  ;;  %2516 = vmatmul.mubr.bf16.gmra.mxu1 %v419_v20  ;;  %v1437_v39 = vpop.f32.mrf.mxu0  ;;  %v187_v20 = vld [vmem:[%s18297_s0 + $0x1d1] sm:$0xff] }
 0x19f   :  { %18552 = vst [vmem:[#allocation75_spill] sm:$0xff] %v12360_v61  ;;  %2523 = vmatprep.mubr.bf16.mxu1 %v423_v47  ;;  %v188_v47 = vld [vmem:[%s18297_s0 + $0x1e1] sm:$0xff]  ;;  %v1030_v39 = vpack.c.bf16 %v8960_v17, %v8959_v55  ;;  %v8961_v17 = vld [vmem:[%s18297_s0 + $0x431] sm:$0xff] }
 0x1a0   :  { %v12374_v45 = vpop.f32.mrf.mxu1  ;;  %v12376_v27 = vpop.f32.mrf.mxu0  ;;  %v426_v29 = vpack.c.bf16 %v188_v47, %v187_v20  ;;  %v79_v51 = vld [vmem:[%s18297_s0 + $0x1d0] sm:$0xff]  ;;  %v1029_v47 = vpack.c.bf16 %v8852_v34, %v8851_v0  ;;  %v8854_v34 = vld [vmem:[%s18297_s0 + $0x440] sm:$0xff] }
 0x1a1   :  { %18553 = vst [vmem:[#allocation76_spill] sm:$0xff] %v12374_v45  ;;  %18554 = vst [vmem:[#allocation77_spill] sm:$0xff] %v12376_v27  ;;  %v8853_v0 = vld [vmem:[%s18297_s0 + $0x430] sm:$0xff] }
 0x1a2   :  { %v12384_v61 = vpop.f32.mrf.mxu1  ;;  %v1440_v6 = vpop.f32.mrf.mxu0 }
 0x1a3   :  { %18555 = vst [vmem:[#allocation78_spill] sm:$0xff] %v12384_v61 }
 0x1a4   :  { %v12386_v36 = vpop.f32.mrf.mxu1  ;;  %v12388_v45 = vpop.f32.mrf.mxu0  ;;  %1634 = vmatmul.mubr.bf16.gmra.mxu0 %v1026_v5  ;;  %v80_v5 = vld [vmem:[%s18297_s0 + $0x1e0] sm:$0xff] }
 0x1a5   :  { %18556 = vst [vmem:[#allocation79_spill] sm:$0xff] %v12386_v36  ;;  %18557 = vst [vmem:[#allocation80_spill] sm:$0xff] %v12388_v45  ;;  %1641 = vmatprep.mubr.bf16.mxu0 %v1030_v39  ;;  %v189_v39 = vld [vmem:[%s18297_s0 + $0x1e9] sm:$0xff]  ;;  %v425_v36 = vpack.c.bf16 %v80_v5, %v79_v51  ;;  %v8964_v51 = vld [vmem:[%s18297_s0 + $0x451] sm:$0xff] }
 0x1a6   :  { %v12396_v55 = vpop.f32.mrf.mxu1  ;;  %2524 = vmatmul.mubr.bf16.gmra.mxu1 %v422_v12  ;;  %v1445_v6 = vpop.f32.mrf.mxu0  ;;  %v81_v5 = vld [vmem:[%s18297_s0 + $0x1e8] sm:$0xff] }
 0x1a7   :  { %18558 = vst [vmem:[#allocation81_spill] sm:$0xff] %v12396_v55  ;;  %2531 = vmatprep.mubr.bf16.mxu1 %v426_v29  ;;  %v190_v29 = vld [vmem:[%s18297_s0 + $0x1f1] sm:$0xff]  ;;  %v1033_v6 = vpack.c.bf16 %v8962_v18, %v8961_v17  ;;  %v8963_v18 = vld [vmem:[%s18297_s0 + $0x449] sm:$0xff] }
 0x1a8   :  { %v12410_v20 = vpop.f32.mrf.mxu1  ;;  %v12412_v12 = vpop.f32.mrf.mxu0  ;;  %v429_v45 = vpack.c.bf16 %v190_v29, %v189_v39 }
 0x1a9   :  { %18559 = vst [vmem:[#allocation82_spill] sm:$0xff] %v12410_v20  ;;  %18560 = vst [vmem:[#allocation83_spill] sm:$0xff] %v12412_v12 }
 0x1aa   :  { %v12420_v55 = vpop.f32.mrf.mxu1  ;;  %v1448_v61 = vpop.f32.mrf.mxu0 }
 0x1ab   :  { %18561 = vst [vmem:[#allocation84_spill] sm:$0xff] %v12420_v55 }
 0x1ac   :  { %v12422_v27 = vpop.f32.mrf.mxu1  ;;  %v12424_v20 = vpop.f32.mrf.mxu0  ;;  %1642 = vmatmul.mubr.bf16.gmra.mxu0 %v1029_v47  ;;  %v82_v47 = vld [vmem:[%s18297_s0 + $0x1f0] sm:$0xff] }
 0x1ad   :  { %18562 = vst [vmem:[#allocation85_spill] sm:$0xff] %v12422_v27  ;;  %18563 = vst [vmem:[#allocation86_spill] sm:$0xff] %v12424_v20  ;;  %1649 = vmatprep.mubr.bf16.mxu0 %v1033_v6  ;;  %v1032_v6 = vpack.c.bf16 %v8854_v34, %v8853_v0  ;;  %v428_v20 = vpack.c.bf16 %v82_v47, %v81_v5  ;;  %v8855_v34 = vld [vmem:[%s18297_s0 + $0x448] sm:$0xff]  ;;  %v83_v47 = vld [vmem:[%s18297_s0 + $0x200] sm:$0xff] }
 0x1ae   :  { %v12432_v17 = vpop.f32.mrf.mxu1  ;;  %2532 = vmatmul.mubr.bf16.gmra.mxu1 %v425_v36  ;;  %v1453_v61 = vpop.f32.mrf.mxu0  ;;  %v10592_v36 = vld [vmem:[%s18298_s1 + $0x1e0] sm:$0xff]  }
 0x1af   :  { %18564 = vst [vmem:[#allocation87_spill] sm:$0xff] %v12432_v17  ;;  %2539 = vmatprep.mubr.bf16.mxu1 %v429_v45  ;;  %v191_v45 = vld [vmem:[%s18297_s0 + $0x201] sm:$0xff]  ;;  %v192_v61 = vld [vmem:[%s18297_s0 + $0x209] sm:$0xff]  ;;  %v1036_v17 = vpack.c.bf16 %v8964_v51, %v8963_v18  ;;  %3956 = vmatpush2.bf16.msra.mxu1 %v10592_v36 }
 0x1b0   :  { %v12449_v39 = vpop.f32.mrf.mxu1  ;;  %v12451_v29 = vpop.f32.mrf.mxu0  ;;  %3957 = vmatprep.subr.bf16.mxu1 %v18501_v33  ;;  %v8856_v18 = vld [vmem:[%s18297_s0 + $0x450] sm:$0xff]  ;;  %v8965_v5 = vld [vmem:[%s18297_s0 + $0x461] sm:$0xff] }
 0x1b1   :  { %18565 = vst [vmem:[#allocation88_spill] sm:$0xff] %v12449_v39  ;;  %18566 = vst [vmem:[#allocation89_spill] sm:$0xff] %v12451_v29  ;;  %v432_v39 = vpack.c.bf16 %v192_v61, %v191_v45  ;;  %v84_v36 = vld [vmem:[%s18297_s0 + $0x208] sm:$0xff]  ;;  %v1035_v45 = vpack.c.bf16 %v8856_v18, %v8855_v34  ;;  %v193_v61 = vld [vmem:[%s18297_s0 + $0x211] sm:$0xff] }
 0x1b2   :  { %v12459_v55 = vpop.f32.mrf.mxu1  ;;  %v1456_v27 = vpop.f32.mrf.mxu0  ;;  %v8857_v34 = vld [vmem:[%s18297_s0 + $0x460] sm:$0xff]  ;;  %v8858_v18 = vld [vmem:[%s18297_s0 + $0x468] sm:$0xff] }
 0x1b3   :  { %18567 = vst [vmem:[#allocation90_spill] sm:$0xff] %v12459_v55 }
 0x1b4   :  { %v12462_v12 = vpop.f32.mrf.mxu1  ;;  %v12464_v0 = vpop.f32.mrf.mxu0  ;;  %1650 = vmatmul.mubr.bf16.gmra.mxu0 %v1032_v6 }
 0x1b5   :  { %18568 = vst [vmem:[#allocation91_spill] sm:$0xff] %v12462_v12  ;;  %18569 = vst [vmem:[#allocation92_spill] sm:$0xff] %v12464_v0  ;;  %1657 = vmatprep.mubr.bf16.mxu0 %v1036_v17  ;;  %v8966_v17 = vld [vmem:[%s18297_s0 + $0x469] sm:$0xff]  ;;  %v431_v12 = vpack.c.bf16 %v84_v36, %v83_v47  ;;  %v8968_v47 = vld [vmem:[%s18297_s0 + $0x481] sm:$0xff] }
 0x1b6   :  { %v12472_v51 = vpop.f32.mrf.mxu1  ;;  %2540 = vmatmul.mubr.bf16.gmra.mxu1 %v428_v20  ;;  %v1461_v27 = vpop.f32.mrf.mxu0 }
 0x1b7   :  { %18570 = vst [vmem:[#allocation93_spill] sm:$0xff] %v12472_v51  ;;  %2547 = vmatprep.mubr.bf16.mxu1 %v432_v39  ;;  %v194_v39 = vld [vmem:[%s18297_s0 + $0x221] sm:$0xff]  ;;  %v1039_v27 = vpack.c.bf16 %v8966_v17, %v8965_v5 }
 0x1b8   :  { %v12486_v6 = vpop.f32.mrf.mxu1  ;;  %v12488_v20 = vpop.f32.mrf.mxu0  ;;  %v435_v0 = vpack.c.bf16 %v194_v39, %v193_v61 }
 0x1b9   :  { %18571 = vst [vmem:[#allocation94_spill] sm:$0xff] %v12486_v6  ;;  %18572 = vst [vmem:[#allocation95_spill] sm:$0xff] %v12488_v20 }
 0x1ba   :  { %v12496_v51 = vpop.f32.mrf.mxu1  ;;  %v1464_v55 = vpop.f32.mrf.mxu0 }
 0x1bb   :  { %18573 = vst [vmem:[#allocation96_spill] sm:$0xff] %v12496_v51  ;;  %v8967_v55 = vld [vmem:[%s18297_s0 + $0x471] sm:$0xff] }
 0x1bc   :  { %v12498_v29 = vpop.f32.mrf.mxu1  ;;  %v12500_v6 = vpop.f32.mrf.mxu0  ;;  %1658 = vmatmul.mubr.bf16.gmra.mxu0 %v1035_v45  ;;  %v85_v45 = vld [vmem:[%s18297_s0 + $0x210] sm:$0xff] }
 0x1bd   :  { %18574 = vst [vmem:[#allocation97_spill] sm:$0xff] %v12498_v29  ;;  %18575 = vst [vmem:[#allocation98_spill] sm:$0xff] %v12500_v6  ;;  %1665 = vmatprep.mubr.bf16.mxu0 %v1039_v27  ;;  %v1038_v27 = vpack.c.bf16 %v8858_v18, %v8857_v34  ;;  %v8859_v34 = vld [vmem:[%s18297_s0 + $0x470] sm:$0xff]  ;;  %v8860_v18 = vld [vmem:[%s18297_s0 + $0x480] sm:$0xff] }
 0x1be   :  { %v2357_v5 = vpop.f32.mrf.mxu1  ;;  %2548 = vmatmul.mubr.bf16.gmra.mxu1 %v431_v12  ;;  %v1469_v17 = vpop.f32.mrf.mxu0  ;;  %v86_v12 = vld [vmem:[%s18297_s0 + $0x220] sm:$0xff] }
 0x1bf   :  { %v12515_v36 = vadd.f32 %v2357_v5, %v11606_v22  ;;  %2555 = vmatprep.mubr.bf16.mxu1 %v435_v0  ;;  %v195_v17 = vld [vmem:[%s18297_s0 + $0x229] sm:$0xff]  ;;  %v196_v22 = vld [vmem:[%s18297_s0 + $0x231] sm:$0xff]  ;;  %v1042_v0 = vpack.c.bf16 %v8968_v47, %v8967_v55  ;;  %v434_v29 = vpack.c.bf16 %v86_v12, %v85_v45 }
 0x1c0   :  { %v2359_v61 = vpop.f32.mrf.mxu1  ;;  %v12523_v39 = vpop.f32.mrf.mxu0  ;;  %v438_v6 = vpack.c.bf16 %v196_v22, %v195_v17  ;;  %v8970_v47 = vld [vmem:[%s18297_s0 + $0x491] sm:$0xff]  ;;  %v87_v12 = vld [vmem:[%s18297_s0 + $0x228] sm:$0xff]  ;;  %v1041_v22 = vpack.c.bf16 %v8860_v18, %v8859_v34 }
 0x1c1   :  { %18576 = vst [vmem:[#allocation99_spill] sm:$0xff] %v12515_v36  ;;  %v10594_v34 = vld [vmem:[%s18298_s1 + $0x1d8] sm:$0xff]  }
 0x1c2   :  { %v2360_v5 = vpop.f32.mrf.mxu1  ;;  %v1472_v51 = vpop.f32.mrf.mxu0  ;;  %3958 = vmatpush2.bf16.msra.mxu1 %v10594_v34  ;;  %v199_v34 = vld [vmem:[%s18297_s0 + $0x291] sm:$0xff] }
 0x1c3   :  { %v12532_v36 = vadd.f32 %v2360_v5, %v11638_v40  ;;  %v8969_v40 = vld [vmem:[%s18297_s0 + $0x489] sm:$0xff]  ;;  %3959 = vmatprep.subr.bf16.mxu1 %v18501_v33 }
 0x1c4   :  { %v2362_v61 = vpop.f32.mrf.mxu1  ;;  %v12534_v20 = vpop.f32.mrf.mxu0  ;;  %1666 = vmatmul.mubr.bf16.gmra.mxu0 %v1038_v27 }
 0x1c5   :  { %18577 = vst [vmem:[#allocation100_spill] sm:$0xff] %v12532_v36  ;;  %1673 = vmatprep.mubr.bf16.mxu0 %v1042_v0  ;;  %v197_v0 = vld [vmem:[%s18297_s0 + $0x281] sm:$0xff] }
 0x1c6   :  { %v2365_v55 = vpop.f32.mrf.mxu1  ;;  %2556 = vmatmul.mubr.bf16.gmra.mxu1 %v434_v29  ;;  %v1477_v51 = vpop.f32.mrf.mxu0  ;;  %v88_v29 = vld [vmem:[%s18297_s0 + $0x230] sm:$0xff] }
 0x1c7   :  { %v12549_v45 = vadd.f32 %v2365_v55, %v11655_v53  ;;  %2563 = vmatprep.mubr.bf16.mxu1 %v438_v6  ;;  %v198_v53 = vld [vmem:[%s18297_s0 + $0x289] sm:$0xff]  ;;  %v1045_v6 = vpack.c.bf16 %v8970_v47, %v8969_v40  ;;  %v437_v55 = vpack.c.bf16 %v88_v29, %v87_v12  ;;  %v8971_v29 = vld [vmem:[%s18297_s0 + $0x4a1] sm:$0xff] }
 0x1c8   :  { %v2367_v27 = vpop.f32.mrf.mxu1  ;;  %v12557_v17 = vpop.f32.mrf.mxu0  ;;  %v441_v36 = vpack.c.bf16 %v198_v53, %v197_v0  ;;  %v8861_v40 = vld [vmem:[%s18297_s0 + $0x488] sm:$0xff]  ;;  %v8862_v47 = vld [vmem:[%s18297_s0 + $0x490] sm:$0xff]  ;;  %v89_v53 = vld [vmem:[%s18297_s0 + $0x280] sm:$0xff] }
 0x1c9   :  { %18578 = vst [vmem:[#allocation101_spill] sm:$0xff] %v12549_v45 }
 0x1ca   :  { %v2368_v5 = vpop.f32.mrf.mxu1  ;;  %v1480_v61 = vpop.f32.mrf.mxu0 }
 0x1cb   :  { %v12566_v51 = vadd.f32 %v2368_v5, %v11690_v8 }
 0x1cc   :  { %v2370_v18 = vpop.f32.mrf.mxu1  ;;  %v12571_v27 = vpop.f32.mrf.mxu0  ;;  %1674 = vmatmul.mubr.bf16.gmra.mxu0 %v1041_v22  ;;  %v8972_v22 = vld [vmem:[%s18297_s0 + $0x4a9] sm:$0xff] }
 0x1cd   :  { %18579 = vst [vmem:[#allocation102_spill] sm:$0xff] %v12566_v51  ;;  %1681 = vmatprep.mubr.bf16.mxu0 %v1045_v6  ;;  %v90_v6 = vld [vmem:[%s18297_s0 + $0x288] sm:$0xff] }
 0x1ce   :  { %v2373_v8 = vpop.f32.mrf.mxu1  ;;  %2564 = vmatmul.mubr.bf16.gmra.mxu1 %v437_v55  ;;  %v1485_v12 = vpop.f32.mrf.mxu0  ;;  %v1044_v55 = vpack.c.bf16 %v8862_v47, %v8861_v40  ;;  %v8863_v40 = vld [vmem:[%s18297_s0 + $0x4a0] sm:$0xff]  ;;  %v8864_v47 = vld [vmem:[%s18297_s0 + $0x4a8] sm:$0xff] }
 0x1cf   :  { %v12587_v0 = vadd.f32 %v2373_v8, %v11698_v19  ;;  %2571 = vmatprep.mubr.bf16.mxu1 %v441_v36  ;;  %v200_v19 = vld [vmem:[%s18297_s0 + $0x2a1] sm:$0xff]  ;;  %v1048_v36 = vpack.c.bf16 %v8972_v22, %v8971_v29  ;;  %v440_v12 = vpack.c.bf16 %v90_v6, %v89_v53 }
 0x1d0   :  { %v2375_v5 = vpop.f32.mrf.mxu1  ;;  %v12595_v61 = vpop.f32.mrf.mxu0  ;;  %v444_v51 = vpack.c.bf16 %v200_v19, %v199_v34  ;;  %v8974_v53 = vld [vmem:[%s18297_s0 + $0x4c1] sm:$0xff] }
 0x1d1   :  { %18580 = vst [vmem:[#allocation103_spill] sm:$0xff] %v12587_v0  ;;  %v92_v34 = vld [vmem:[%s18297_s0 + $0x2a0] sm:$0xff] }
 0x1d2   :  { %v2376_v18 = vpop.f32.mrf.mxu1  ;;  %v1488_v8 = vpop.f32.mrf.mxu0 }
 0x1d3   :  { %v12604_v0 = vadd.f32 %v2376_v18, %v11729_v38  ;;  %v8973_v38 = vld [vmem:[%s18297_s0 + $0x4b1] sm:$0xff]  ;;  %v1047_v18 = vpack.c.bf16 %v8864_v47, %v8863_v40  ;;  %v201_v8 = vld [vmem:[%s18297_s0 + $0x2a9] sm:$0xff]  ;;  %v8866_v47 = vld [vmem:[%s18297_s0 + $0x4c0] sm:$0xff] }
 0x1d4   :  { %v2378_v5 = vpop.f32.mrf.mxu1  ;;  %v12606_v45 = vpop.f32.mrf.mxu0  ;;  %1682 = vmatmul.mubr.bf16.gmra.mxu0 %v1044_v55  ;;  %v91_v55 = vld [vmem:[%s18297_s0 + $0x290] sm:$0xff] }
 0x1d5   :  { %18581 = vst [vmem:[#allocation104_spill] sm:$0xff] %v12604_v0  ;;  %1689 = vmatprep.mubr.bf16.mxu0 %v1048_v36  ;;  %v8865_v40 = vld [vmem:[%s18297_s0 + $0x4b0] sm:$0xff] }
 0x1d6   :  { %v2381_v29 = vpop.f32.mrf.mxu1  ;;  %2572 = vmatmul.mubr.bf16.gmra.mxu1 %v440_v12  ;;  %v1493_v22 = vpop.f32.mrf.mxu0 }
 0x1d7   :  { %v12621_v6 = vadd.f32 %v2381_v29, %v11736_v52  ;;  %2579 = vmatprep.mubr.bf16.mxu1 %v444_v51  ;;  %v202_v52 = vld [vmem:[%s18297_s0 + $0x2b1] sm:$0xff]  ;;  %v1051_v51 = vpack.c.bf16 %v8974_v53, %v8973_v38  ;;  %v443_v29 = vpack.c.bf16 %v92_v34, %v91_v55 }
 0x1d8   :  { %v2383_v19 = vpop.f32.mrf.mxu1  ;;  %v12629_v36 = vpop.f32.mrf.mxu0  ;;  %v447_v0 = vpack.c.bf16 %v202_v52, %v201_v8  ;;  %v8976_v55 = vld [vmem:[%s18297_s0 + $0x4d1] sm:$0xff] }
 0x1d9   :  { %18582 = vst [vmem:[#allocation105_spill] sm:$0xff] %v12621_v6  ;;  %v94_v8 = vld [vmem:[%s18297_s0 + $0x2b0] sm:$0xff] }
 0x1da   :  { %v2384_v12 = vpop.f32.mrf.mxu1  ;;  %v1496_v5 = vpop.f32.mrf.mxu0 }
 0x1db   :  { %v12638_v22 = vadd.f32 %v2384_v12, %v11767_v7  ;;  %v8975_v7 = vld [vmem:[%s18297_s0 + $0x4c9] sm:$0xff]  ;;  %v1050_v12 = vpack.c.bf16 %v8866_v47, %v8865_v40  ;;  %v203_v5 = vld [vmem:[%s18297_s0 + $0x2c1] sm:$0xff] }
 0x1dc   :  { %v2386_v19 = vpop.f32.mrf.mxu1  ;;  %v12640_v6 = vpop.f32.mrf.mxu0  ;;  %1690 = vmatmul.mubr.bf16.gmra.mxu0 %v1047_v18  ;;  %v93_v18 = vld [vmem:[%s18297_s0 + $0x2a8] sm:$0xff]  ;;  %v8868_v47 = vld [vmem:[%s18297_s0 + $0x4d0] sm:$0xff] }
 0x1dd   :  { %18583 = vst [vmem:[#allocation106_spill] sm:$0xff] %v12638_v22  ;;  %1697 = vmatprep.mubr.bf16.mxu0 %v1051_v51  ;;  %v8867_v40 = vld [vmem:[%s18297_s0 + $0x4c8] sm:$0xff] }
 0x1de   :  { %v2389_v38 = vpop.f32.mrf.mxu1  ;;  %2580 = vmatmul.mubr.bf16.gmra.mxu1 %v443_v29  ;;  %v1501_v53 = vpop.f32.mrf.mxu0 }
 0x1df   :  { %v12655_v34 = vadd.f32 %v2389_v38, %v11774_v25  ;;  %2587 = vmatprep.mubr.bf16.mxu1 %v447_v0  ;;  %v204_v25 = vld [vmem:[%s18297_s0 + $0x2c9] sm:$0xff]  ;;  %v1054_v0 = vpack.c.bf16 %v8976_v55, %v8975_v7  ;;  %v446_v38 = vpack.c.bf16 %v94_v8, %v93_v18 }
 0x1e0   :  { %v2391_v52 = vpop.f32.mrf.mxu1  ;;  %v12663_v51 = vpop.f32.mrf.mxu0  ;;  %v10596_v7 = vld [vmem:[%s18298_s1 + $0x1d0] sm:$0xff]   ;;  %v251_v18 = vld [vmem:[%s18297_s0 + $0x2] sm:$0xff] }
 0x1e1   :  { %18584 = vst [vmem:[#allocation107_spill] sm:$0xff] %v12655_v34  ;;  %v450_v34 = vpack.c.bf16 %v204_v25, %v203_v5  ;;  %v252_v8 = vld [vmem:[%s18297_s0 + $0xa] sm:$0xff]  ;;  %v95_v25 = vld [vmem:[%s18297_s0 + $0x2c0] sm:$0xff]  ;;  %3960 = vmatpush2.bf16.msra.mxu1 %v10596_v7 }
 0x1e2   :  { %v2392_v29 = vpop.f32.mrf.mxu1  ;;  %v1504_v19 = vpop.f32.mrf.mxu0  ;;  %3961 = vmatprep.subr.bf16.mxu1 %v18501_v33  ;;  %v5425_v7 = vld [vmem:[%s18303_s7 + $0x28] sm:$0xff] }
 0x1e3   :  { %v12672_v53 = vadd.f32 %v2392_v29, %v11808_v31 }
 0x1e4   :  { %v2394_v52 = vpop.f32.mrf.mxu1  ;;  %v12674_v22 = vpop.f32.mrf.mxu0  ;;  %1698 = vmatmul.mubr.bf16.gmra.mxu0 %v1050_v12  ;;  %v5424_v12 = vld [vmem:[%s18303_s7 + $0x20] sm:$0xff] }
 0x1e5   :  { %18585 = vst [vmem:[#allocation108_spill] sm:$0xff] %v12672_v53  ;;  %1705 = vmatprep.mubr.bf16.mxu0 %v1054_v0  ;;  %v96_v0 = vld [vmem:[%s18297_s0 + $0x2c8] sm:$0xff]  ;;  %v205_v52 = vld [vmem:[%s18297_s0 + $0x2d1] sm:$0xff]  ;;  %5550 = vperm.xlu1 %10349, %v5424_v12  }
 0x1e6   :  { %v2397_v31 = vpop.f32.mrf.mxu1  ;;  %2588 = vmatmul.mubr.bf16.gmra.mxu1 %v446_v38  ;;  %v1509_v55 = vpop.f32.mrf.mxu0  ;;  %v1053_v38 = vpack.c.bf16 %v8868_v47, %v8867_v40  ;;  %v449_v53 = vpack.c.bf16 %v96_v0, %v95_v25  ;;  %v256_v0 = vld [vmem:[%s18297_s0 + $0x32] sm:$0xff] }
 0x1e7   :  { %v12695_v5 = vadd.f32 %v2397_v31, %v11816_v63  ;;  %2595 = vmatprep.mubr.bf16.mxu1 %v450_v34  ;;  %v206_v63 = vld [vmem:[%s18297_s0 + $0x2e1] sm:$0xff]  ;;  %v361_v34 = vpack.c.bf16 %v252_v8, %v251_v18  ;;  %v253_v18 = vld [vmem:[%s18297_s0 + $0x12] sm:$0xff] }
 0x1e8   :  { %v2399_v29 = vpop.f32.mrf.mxu1  ;;  %v12703_v19 = vpop.f32.mrf.mxu0  ;;  %v453_v47 = vpack.c.bf16 %v206_v63, %v205_v52  ;;  %v254_v8 = vld [vmem:[%s18297_s0 + $0x22] sm:$0xff] }
 0x1e9   :  { %18586 = vst [vmem:[#allocation109_spill] sm:$0xff] %v12695_v5  ;;  %5555 = vperm.xlu1 %10349, %v5425_v7   ;;  %v98_v63 = vld [vmem:[%s18297_s0 + $0x2e0] sm:$0xff]  ;;  %v207_v7 = vld [vmem:[%s18297_s0 + $0x2e9] sm:$0xff] }
 0x1ea   :  { %v2400_v31 = vpop.f32.mrf.mxu1  ;;  %v1512_v55 = vpop.f32.mrf.mxu0 }
 0x1eb   :  { %v12716_v40 = vadd.f32 %v2400_v31, %v11847_v23  ;;  %v255_v23 = vld [vmem:[%s18297_s0 + $0x2a] sm:$0xff]  ;;  %v364_v55 = vpack.c.bf16 %v254_v8, %v253_v18 }
 0x1ec   :  { %v2402_v29 = vpop.f32.mrf.mxu1  ;;  %v12718_v5 = vpop.f32.mrf.mxu0  ;;  %1706 = vmatmul.mubr.bf16.gmra.mxu0 %v1053_v38  ;;  %v5427_v38 = vld [vmem:[%s18303_s7 + $0x38] sm:$0xff]  ;;  %v5429_v18 = vld [vmem:[%s18303_s7 + $0x48] sm:$0xff] }
 0x1ed   :  { %18587 = vst [vmem:[#allocation110_spill] sm:$0xff] %v12716_v40  ;;  %10087 = vmatprep.mubr.bf16.mxu0 %v361_v34  ;;  %5565 = vperm.xlu1 %10349, %v5427_v38  }
 0x1ee   :  { %v2405_v12 = vpop.f32.mrf.mxu1  ;;  %2596 = vmatmul.mubr.bf16.gmra.mxu1 %v449_v53  ;;  %v1517_v25 = vpop.f32.mrf.mxu0  ;;  %v97_v53 = vld [vmem:[%s18297_s0 + $0x2d0] sm:$0xff] }
 0x1ef   :  { %v12736_v52 = vadd.f32 %v2405_v12, %v11854_v48  ;;  %2603 = vmatprep.mubr.bf16.mxu1 %v453_v47  ;;  %v208_v48 = vld [vmem:[%s18297_s0 + $0x2f1] sm:$0xff]  ;;  %v367_v47 = vpack.c.bf16 %v256_v0, %v255_v23  ;;  %v452_v25 = vpack.c.bf16 %v98_v63, %v97_v53  ;;  %v257_v23 = vld [vmem:[%s18297_s0 + $0x42] sm:$0xff] }
 0x1f0   :  { %v2407_v34 = vpop.f32.mrf.mxu1  ;;  %v12744_v31 = vpop.f32.mrf.mxu0  ;;  %v258_v0 = vld [vmem:[%s18297_s0 + $0x4a] sm:$0xff]  ;;  %v5431_v63 = vld [vmem:[%s18303_s7 + $0x58] sm:$0xff] }
 0x1f1   :  { %18588 = vst [vmem:[#allocation111_spill] sm:$0xff] %v12736_v52  ;;  %18589 = vst [vmem:[#allocation112_spill] sm:$0xff] %v12744_v31  ;;  %v10589_v34 = vld [vmem:[%s18298_s1 + $0x230] sm:$0xff]   ;;  %v456_v52 = vpack.c.bf16 %v208_v48, %v207_v7  ;;  %5575 = vperm.xlu1 %10349, %v5429_v18   ;;  %v10591_v53 = vld [vmem:[%s18298_s1 + $0x228] sm:$0xff]  }
 0x1f2   :  { %v2408_v29 = vpop.f32.mrf.mxu1  ;;  %v1520_v12 = vpop.f32.mrf.mxu0  ;;  %v99_v7 = vld [vmem:[%s18297_s0 + $0x2e8] sm:$0xff]  ;;  %v100_v48 = vld [vmem:[%s18297_s0 + $0x2f0] sm:$0xff] }
 0x1f3   :  { %v12759_v8 = vadd.f32 %v2408_v29, %v11885_v15  ;;  %v259_v15 = vld [vmem:[%s18297_s0 + $0x52] sm:$0xff]  ;;  %v370_v12 = vpack.c.bf16 %v258_v0, %v257_v23  ;;  %v5433_v23 = vld [vmem:[%s18303_s7 + $0x68] sm:$0xff] }
 0x1f4   :  { %v2410_v40 = vpop.f32.mrf.mxu1  ;;  %v12761_v31 = vpop.f32.mrf.mxu0  ;;  %10088 = vmatmul.mubr.bf16.vlgmr.msra.gmra.mxu0 %v364_v55 }
 0x1f5   :  { %18590 = vst [vmem:[#allocation113_spill] sm:$0xff] %v12759_v8  ;;  %10196 = vmatpush3.bf16.msra.mxu0 %v12169_v14  ;;  %10091 = vmatprep.mubr.bf16.mxu0 %v367_v47  ;;  %v260_v14 = vld [vmem:[%s18297_s0 + $0x62] sm:$0xff] }
 0x1f6   :  { %v2413_v40 = vpop.f32.mrf.mxu1  ;;  %2604 = vmatmul.mubr.bf16.gmra.mxu1 %v452_v25  ;;  %v1525_v38 = vpop.f32.mrf.mxu0  ;;  %10197 = vmatprep.subr.bf16.mxu0 %v10589_v34  ;;  %v209_v25 = vld [vmem:[%s18297_s0 + $0x301] sm:$0xff] }
 0x1f7   :  { %v12783_v55 = vadd.f32 %v2413_v40, %v11892_v41  ;;  %2611 = vmatprep.mubr.bf16.mxu1 %v456_v52  ;;  %v210_v41 = vld [vmem:[%s18297_s0 + $0x309] sm:$0xff]  ;;  %5585 = vperm.xlu1 %10349, %v5431_v63   ;;  %v373_v52 = vpack.c.bf16 %v260_v14, %v259_v15  ;;  %v455_v38 = vpack.c.bf16 %v100_v48, %v99_v7  ;;  %v262_v15 = vld [vmem:[%s18297_s0 + $0x72] sm:$0xff] }
 0x1f8   :  { %v2415_v47 = vpop.f32.mrf.mxu1  ;;  %v12791_v29 = vpop.f32.mrf.mxu0  ;;  %v459_v8 = vpack.c.bf16 %v210_v41, %v209_v25  ;;  %v264_v7 = vld [vmem:[%s18297_s0 + $0x8a] sm:$0xff]  ;;  %v10595_v48 = vld [vmem:[%s18298_s1 + $0x218] sm:$0xff]  }
 0x1f9   :  { %18591 = vst [vmem:[#allocation114_spill] sm:$0xff] %v12783_v55  ;;  %10198 = vmatpush3.bf16.msra.mxu0 %v10589_v34  ;;  %v10593_v47 = vld [vmem:[%s18298_s1 + $0x220] sm:$0xff]   ;;  %v261_v34 = vld [vmem:[%s18297_s0 + $0x6a] sm:$0xff] }
 0x1fa   :  { %v2416_v18 = vpop.f32.mrf.mxu1  ;;  %v1528_v40 = vpop.f32.mrf.mxu0  ;;  %10199 = vmatprep.subr.bf16.mxu0 %v10591_v53  ;;  %v102_v41 = vld [vmem:[%s18297_s0 + $0x308] sm:$0xff] }
 0x1fb   :  { %v12806_v0 = vadd.f32 %v2416_v18, %v11926_v21  ;;  %5595 = vperm.xlu1 %10349, %v5433_v23   ;;  %v263_v21 = vld [vmem:[%s18297_s0 + $0x82] sm:$0xff]  ;;  %v376_v40 = vpack.c.bf16 %v262_v15, %v261_v34  ;;  %v10597_v34 = vld [vmem:[%s18298_s1 + $0x210] sm:$0xff]  }
 0x1fc   :  { %v2418_v55 = vpop.f32.mrf.mxu1  ;;  %v12808_v63 = vpop.f32.mrf.mxu0  ;;  %10092 = vmatmul.mubr.bf16.gmra.mxu0 %v370_v12  ;;  %v5435_v12 = vld [vmem:[%s18303_s7 + $0x78] sm:$0xff]  ;;  %v379_v23 = vpack.c.bf16 %v264_v7, %v263_v21  ;;  %v5437_v15 = vld [vmem:[%s18303_s7 + $0x88] sm:$0xff]  ;;  %v1821_v7 = vadd.f32 %v11614_v26, %v11974_v13 }
 0x1fd   :  { %10095 = vmatprep.mubr.bf16.mxu0 %v373_v52  ;;  %10200 = vmatpush3.bf16.msra.mxu0 %v10591_v53  ;;  %v101_v53 = vld [vmem:[%s18297_s0 + $0x300] sm:$0xff]  ;;  %v268_v26 = vld [vmem:[%s18297_s0 + $0xb2] sm:$0xff] }
 0x1fe   :  { %v2421_v14 = vpop.f32.mrf.mxu1  ;;  %2612 = vmatmul.mubr.bf16.gmra.mxu1 %v455_v38  ;;  %v1533_v55 = vpop.f32.mrf.mxu0  ;;  %10201 = vmatprep.subr.bf16.mxu0 %v10593_v47  ;;  %v211_v38 = vld [vmem:[%s18297_s0 + $0x311] sm:$0xff] }
 0x1ff   :  { %v12829_v25 = vadd.f32 %v2421_v14, %v11936_v54  ;;  %2619 = vmatprep.mubr.bf16.mxu1 %v459_v8  ;;  %v212_v54 = vld [vmem:[%s18297_s0 + $0x321] sm:$0xff]  ;;  %5605 = vperm.xlu1 %10349, %v5435_v12   ;;  %v5439_v13 = vld [vmem:[%s18303_s7 + $0x98] sm:$0xff] }
 0x200   :  { %v2423_v52 = vpop.f32.mrf.mxu1  ;;  %v12837_v18 = vpop.f32.mrf.mxu0  ;;  %v10598_v8 = vld [vmem:[%s18298_s1 + $0x1c8] sm:$0xff]  }
 0x201   :  { %18592 = vst [vmem:[#allocation115_spill] sm:$0xff] %v12829_v25  ;;  %10202 = vmatpush3.bf16.msra.mxu0 %v10593_v47  ;;  %v458_v52 = vpack.c.bf16 %v102_v41, %v101_v53  ;;  %3962 = vmatpush2.bf16.msra.mxu1 %v10598_v8  ;;  %v462_v25 = vpack.c.bf16 %v212_v54, %v211_v38  ;;  %v265_v53 = vld [vmem:[%s18297_s0 + $0x92] sm:$0xff]  ;;  %v104_v8 = vld [vmem:[%s18297_s0 + $0x320] sm:$0xff] }
 0x202   :  { %v2424_v14 = vpop.f32.mrf.mxu1  ;;  %v1536_v55 = vpop.f32.mrf.mxu0  ;;  %10203 = vmatprep.subr.bf16.mxu0 %v10595_v48  ;;  %3963 = vmatprep.subr.bf16.mxu1 %v18501_v33 }
 0x203   :  { %v12855_v12 = vadd.f32 %v2424_v14, %v11968_v37  ;;  %5615 = vperm.xlu1 %10349, %v5437_v15   ;;  %v266_v37 = vld [vmem:[%s18297_s0 + $0xa2] sm:$0xff]  ;;  %v1824_v15 = vadd.f32 %v11643_v43, %v11998_v4  ;;  %v1829_v43 = vadd.f32 %v11680_v1, %v12010_v44  ;;  %v5443_v44 = vld [vmem:[%s18303_s7 + $0xb8] sm:$0xff] }
 0x204   :  { %v2426_v47 = vpop.f32.mrf.mxu1  ;;  %v12858_v21 = vpop.f32.mrf.mxu0  ;;  %10096 = vmatmul.mubr.bf16.gmra.mxu0 %v376_v40  ;;  %v267_v40 = vld [vmem:[%s18297_s0 + $0xaa] sm:$0xff]  ;;  %v382_v55 = vpack.c.bf16 %v266_v37, %v265_v53  ;;  %v269_v4 = vld [vmem:[%s18297_s0 + $0xc2] sm:$0xff] }
 0x205   :  { %18593 = vst [vmem:[#allocation116_spill] sm:$0xff] %v12855_v12  ;;  %10099 = vmatprep.mubr.bf16.mxu0 %v379_v23  ;;  %10204 = vmatpush3.bf16.msra.mxu0 %v10595_v48  ;;  %v103_v48 = vld [vmem:[%s18297_s0 + $0x310] sm:$0xff]  ;;  %v385_v47 = vpack.c.bf16 %v268_v26, %v267_v40  ;;  %v5441_v53 = vld [vmem:[%s18303_s7 + $0xa8] sm:$0xff] }
 0x206   :  { %v2429_v41 = vpop.f32.mrf.mxu1  ;;  %2620 = vmatmul.mubr.bf16.gmra.mxu1 %v458_v52  ;;  %v1541_v38 = vpop.f32.mrf.mxu0  ;;  %10205 = vmatprep.subr.bf16.mxu0 %v10597_v34  ;;  %v213_v52 = vld [vmem:[%s18297_s0 + $0x329] sm:$0xff] }
 0x207   :  { %v12877_v54 = vadd.f32 %v2429_v41, %v1821_v7  ;;  %2627 = vmatprep.mubr.bf16.mxu1 %v462_v25  ;;  %v214_v25 = vld [vmem:[%s18297_s0 + $0x331] sm:$0xff]  ;;  %5625 = vperm.xlu1 %10349, %v5439_v13   ;;  %v461_v38 = vpack.c.bf16 %v104_v8, %v103_v48  ;;  %v272_v1 = vld [vmem:[%s18297_s0 + $0xe2] sm:$0xff] }
 0x208   :  { %v2431_v23 = vpop.f32.mrf.mxu1  ;;  %v12885_v14 = vpop.f32.mrf.mxu0  ;;  %v105_v48 = vld [vmem:[%s18297_s0 + $0x328] sm:$0xff]  ;;  %v106_v8 = vld [vmem:[%s18297_s0 + $0x330] sm:$0xff] }
 0x209   :  { %18594 = vst [vmem:[#allocation117_spill] sm:$0xff] %v12877_v54  ;;  %10206 = vmatpush3.bf16.msra.mxu0 %v10597_v34  ;;  %v465_v23 = vpack.c.bf16 %v214_v25, %v213_v52  ;;  %v270_v34 = vld [vmem:[%s18297_s0 + $0xca] sm:$0xff] }
 0x20a   :  { %v2432_v7 = vpop.f32.mrf.mxu1  ;;  %v1544_v41 = vpop.f32.mrf.mxu0  ;;  %v388_v25 = vpack.c.bf16 %v270_v34, %v269_v4 }
 0x20b   :  { %v12898_v37 = vadd.f32 %v2432_v7, %v1824_v15  ;;  %5635 = vperm.xlu1 %10349, %v5441_v53   ;;  %v215_v15 = vld [vmem:[%s18297_s0 + $0x341] sm:$0xff]  ;;  %v1832_v7 = vadd.f32 %v11694_v16, %v12034_v46  ;;  %v273_v16 = vld [vmem:[%s18297_s0 + $0xea] sm:$0xff]  ;;  %v274_v46 = vld [vmem:[%s18297_s0 + $0xf2] sm:$0xff] }
 0x20c   :  { %v2434_v12 = vpop.f32.mrf.mxu1  ;;  %v12900_v54 = vpop.f32.mrf.mxu0  ;;  %10100 = vmatmul.mubr.bf16.gmra.mxu0 %v382_v55 }
 0x20d   :  { %10103 = vmatprep.mubr.bf16.mxu0 %v385_v47  ;;  %v271_v12 = vld [vmem:[%s18297_s0 + $0xd2] sm:$0xff]  ;;  %v216_v47 = vld [vmem:[%s18297_s0 + $0x349] sm:$0xff] }
 0x20e   :  { %v2437_v40 = vpop.f32.mrf.mxu1  ;;  %2628 = vmatmul.mubr.bf16.gmra.mxu1 %v461_v38  ;;  %v1549_v26 = vpop.f32.mrf.mxu0  ;;  %v391_v41 = vpack.c.bf16 %v272_v1, %v271_v12  ;;  %v468_v34 = vpack.c.bf16 %v216_v47, %v215_v15  ;;  %v10599_v15 = vld [vmem:[%s18298_s1 + $0x208] sm:$0xff]  }
 0x20f   :  { %v12919_v13 = vadd.f32 %v2437_v40, %v1829_v43  ;;  %2635 = vmatprep.mubr.bf16.mxu1 %v465_v23  ;;  %5645 = vperm.xlu1 %10349, %v5443_v44   ;;  %v464_v23 = vpack.c.bf16 %v106_v8, %v105_v48  ;;  %v5445_v43 = vld [vmem:[%s18303_s7 + $0xc8] sm:$0xff]  ;;  %v1837_v44 = vadd.f32 %v11663_v57, %v12046_v59  ;;  %v5447_v59 = vld [vmem:[%s18303_s7 + $0xd8] sm:$0xff] }
 0x210   :  { %v2439_v55 = vpop.f32.mrf.mxu1  ;;  %v12927_v52 = vpop.f32.mrf.mxu0  ;;  %v275_v48 = vld [vmem:[%s18297_s0 + $0x102] sm:$0xff]  ;;  %v276_v57 = vld [vmem:[%s18297_s0 + $0x10a] sm:$0xff]  ;;  %10207 = vmatprep.subr.bf16.mxu0 %v10599_v15 }
 0x211   :  { %v107_v55 = vld [vmem:[%s18297_s0 + $0x340] sm:$0xff]  ;;  %10208 = vmatpush3.bf16.msra.mxu0 %v10599_v15 }
 0x212   :  { %v2440_v38 = vpop.f32.mrf.mxu1  ;;  %v1552_v53 = vpop.f32.mrf.mxu0 }
 0x213   :  { %v12940_v4 = vadd.f32 %v2440_v38, %v1832_v7  ;;  %5655 = vperm.xlu1 %10349, %v5445_v43   ;;  %v217_v38 = vld [vmem:[%s18297_s0 + $0x351] sm:$0xff]  ;;  %v218_v53 = vld [vmem:[%s18297_s0 + $0x361] sm:$0xff]  ;;  %v397_v43 = vpack.c.bf16 %v276_v57, %v275_v48 }
 0x214   :  { %v2442_v40 = vpop.f32.mrf.mxu1  ;;  %v12942_v26 = vpop.f32.mrf.mxu0  ;;  %10104 = vmatmul.mubr.bf16.gmra.mxu0 %v388_v25  ;;  %v108_v25 = vld [vmem:[%s18297_s0 + $0x348] sm:$0xff] }
 0x215   :  { %10107 = vmatprep.mubr.bf16.mxu0 %v391_v41  ;;  %v394_v41 = vpack.c.bf16 %v274_v46, %v273_v16  ;;  %v5449_v16 = vld [vmem:[%s18303_s7 + $0xe8] sm:$0xff] }
 0x216   :  { %v2445_v12 = vpop.f32.mrf.mxu1  ;;  %2636 = vmatmul.mubr.bf16.gmra.mxu1 %v464_v23  ;;  %v1557_v1 = vpop.f32.mrf.mxu0  ;;  %v1840_v23 = vadd.f32 %v11692_v11, %v12073_v10  ;;  %v1845_v11 = vadd.f32 %v11720_v30, %v12086_v60  ;;  %v277_v10 = vld [vmem:[%s18297_s0 + $0x112] sm:$0xff]  ;;  %v278_v48 = vld [vmem:[%s18297_s0 + $0x122] sm:$0xff] }
 0x217   :  { %v12961_v8 = vadd.f32 %v2445_v12, %v1837_v44  ;;  %2643 = vmatprep.mubr.bf16.mxu1 %v468_v34  ;;  %5665 = vperm.xlu1 %10349, %v5447_v59   ;;  %v467_v44 = vpack.c.bf16 %v108_v25, %v107_v55  ;;  %v471_v12 = vpack.c.bf16 %v218_v53, %v217_v38  ;;  %v10600_v1 = vld [vmem:[%s18298_s1 + $0x1c0] sm:$0xff]   ;;  %v279_v25 = vld [vmem:[%s18297_s0 + $0x12a] sm:$0xff]  ;;  %v280_v30 = vld [vmem:[%s18297_s0 + $0x132] sm:$0xff] }
 0x218   :  { %v2447_v47 = vpop.f32.mrf.mxu1  ;;  %v12972_v7 = vpop.f32.mrf.mxu0  ;;  %3964 = vmatpush2.bf16.msra.mxu1 %v10600_v1  ;;  %v5450_v60 = vld [vmem:[%s18303_s7 + $0xf0] sm:$0xff]  ;;  %v110_v38 = vld [vmem:[%s18297_s0 + $0x360] sm:$0xff] }
 0x219   :  { %7613 = vmatprep.subr.bf16.mxu1 %v18501_v33 }
 0x21a   :  { %v2448_v34 = vpop.f32.mrf.mxu1  ;;  %v1560_v40 = vpop.f32.mrf.mxu0 }
 0x21b   :  { %v12985_v46 = vadd.f32 %v2448_v34, %v1840_v23  ;;  %5675 = vperm.xlu1 %10349, %v5449_v16   ;;  %v219_v34 = vld [vmem:[%s18297_s0 + $0x369] sm:$0xff]  ;;  %v220_v40 = vld [vmem:[%s18297_s0 + $0x371] sm:$0xff]  ;;  %v403_v16 = vpack.c.bf16 %v280_v30, %v279_v25 }
 0x21c   :  { %v2450_v59 = vpop.f32.mrf.mxu1  ;;  %v12990_v47 = vpop.f32.mrf.mxu0  ;;  %10108 = vmatmul.mubr.bf16.gmra.mxu0 %v394_v41  ;;  %v109_v41 = vld [vmem:[%s18297_s0 + $0x350] sm:$0xff] }
 0x21d   :  { %10111 = vmatprep.mubr.bf16.mxu0 %v397_v43  ;;  %v400_v43 = vpack.c.bf16 %v278_v48, %v277_v10  ;;  %v470_v59 = vpack.c.bf16 %v110_v38, %v109_v41  ;;  %v474_v48 = vpack.c.bf16 %v220_v40, %v219_v34  ;;  %v283_v41 = vld [vmem:[%s18297_s0 + $0x152] sm:$0xff] }
 0x21e   :  { %v2453_v57 = vpop.f32.mrf.mxu1  ;;  %2644 = vmatmul.mubr.bf16.gmra.mxu1 %v467_v44  ;;  %v1565_v55 = vpop.f32.mrf.mxu0  ;;  %v1848_v44 = vadd.f32 %v11733_v49, %v12110_v58  ;;  %v281_v49 = vld [vmem:[%s18297_s0 + $0x142] sm:$0xff]  ;;  %v282_v58 = vld [vmem:[%s18297_s0 + $0x14a] sm:$0xff] }
 0x21f   :  { %v13010_v15 = vadd.f32 %v2453_v57, %v1845_v11  ;;  %2651 = vmatprep.mubr.bf16.mxu1 %v471_v12  ;;  %5680 = vperm.xlu1 %10349, %v5450_v60   ;;  %v5452_v11 = vld [vmem:[%s18303_s7 + $0x100] sm:$0xff]  ;;  %v1853_v60 = vadd.f32 %v11706_v24, %v12122_v9  ;;  %v5453_v9 = vld [vmem:[%s18303_s7 + $0x108] sm:$0xff] }
 0x220   :  { %v2455_v53 = vpop.f32.mrf.mxu1  ;;  %v13018_v23 = vpop.f32.mrf.mxu0  ;;  %v284_v24 = vld [vmem:[%s18297_s0 + $0x162] sm:$0xff] }
 0x221   :  { %v111_v53 = vld [vmem:[%s18297_s0 + $0x368] sm:$0xff] }
 0x222   :  { %v2456_v12 = vpop.f32.mrf.mxu1  ;;  %v1568_v1 = vpop.f32.mrf.mxu0 }
 0x223   :  { %v13031_v10 = vadd.f32 %v2456_v12, %v1848_v44  ;;  %5690 = vperm.xlu1 %10349, %v5452_v11   ;;  %v406_v44 = vpack.c.bf16 %v282_v58, %v281_v49  ;;  %v222_v12 = vld [vmem:[%s18297_s0 + $0x389] sm:$0xff]  ;;  %v1856_v1 = vadd.f32 %v11731_v42, %v12146_v35  ;;  %v286_v35 = vld [vmem:[%s18297_s0 + $0x172] sm:$0xff] }
 0x224   :  { %v2458_v57 = vpop.f32.mrf.mxu1  ;;  %v13033_v55 = vpop.f32.mrf.mxu0  ;;  %10112 = vmatmul.mubr.bf16.gmra.mxu0 %v400_v43  ;;  %v112_v43 = vld [vmem:[%s18297_s0 + $0x370] sm:$0xff] }
 0x225   :  { %10115 = vmatprep.mubr.bf16.mxu0 %v403_v16  ;;  %v221_v16 = vld [vmem:[%s18297_s0 + $0x381] sm:$0xff]  ;;  %v473_v57 = vpack.c.bf16 %v112_v43, %v111_v53  ;;  %v285_v42 = vld [vmem:[%s18297_s0 + $0x16a] sm:$0xff] }
 0x226   :  { %v2461_v25 = vpop.f32.mrf.mxu1  ;;  %2652 = vmatmul.mubr.bf16.gmra.mxu1 %v470_v59  ;;  %v1573_v30 = vpop.f32.mrf.mxu0  ;;  %v409_v59 = vpack.c.bf16 %v284_v24, %v283_v41  ;;  %v477_v58 = vpack.c.bf16 %v222_v12, %v221_v16  ;;  %v287_v53 = vld [vmem:[%s18297_s0 + $0x182] sm:$0xff] }
 0x227   :  { %v13052_v38 = vadd.f32 %v2461_v25, %v1853_v60  ;;  %2659 = vmatprep.mubr.bf16.mxu1 %v474_v48  ;;  %5695 = vperm.xlu1 %10349, %v5453_v9   ;;  %v5455_v60 = vld [vmem:[%s18303_s7 + $0x118] sm:$0xff]  ;;  %v1861_v9 = vadd.f32 %v11758_v62, %v12158_v3  ;;  %v288_v62 = vld [vmem:[%s18297_s0 + $0x18a] sm:$0xff]  ;;  %v5456_v3 = vld [vmem:[%s18303_s7 + $0x120] sm:$0xff] }
 0x228   :  { %v2463_v34 = vpop.f32.mrf.mxu1  ;;  %v13060_v40 = vpop.f32.mrf.mxu0 }
 0x229   :  { %v113_v34 = vld [vmem:[%s18297_s0 + $0x380] sm:$0xff] }
 0x22a   :  { %v2464_v11 = vpop.f32.mrf.mxu1  ;;  %v1576_v48 = vpop.f32.mrf.mxu0 }
 0x22b   :  { %v13073_v49 = vadd.f32 %v2464_v11, %v1856_v1  ;;  %5705 = vperm.xlu1 %10349, %v5455_v60   ;;  %v412_v1 = vpack.c.bf16 %v286_v35, %v285_v42  ;;  %v224_v11 = vld [vmem:[%s18297_s0 + $0x3a1] sm:$0xff]  ;;  %v1864_v48 = vadd.f32 %v11771_v28, %v12188_v2  ;;  %v1869_v28 = vadd.f32 %v11744_v56, %v12203_v50  ;;  %v289_v2 = vld [vmem:[%s18297_s0 + $0x192] sm:$0xff] }
 0x22c   :  { %v2466_v25 = vpop.f32.mrf.mxu1  ;;  %v13075_v30 = vpop.f32.mrf.mxu0  ;;  %10116 = vmatmul.mubr.bf16.gmra.mxu0 %v406_v44  ;;  %v114_v44 = vld [vmem:[%s18297_s0 + $0x388] sm:$0xff]  ;;  %v292_v56 = vld [vmem:[%s18297_s0 + $0x1b2] sm:$0xff] }
 0x22d   :  { %10119 = vmatprep.mubr.bf16.mxu0 %v409_v59  ;;  %v223_v59 = vld [vmem:[%s18297_s0 + $0x391] sm:$0xff]  ;;  %v476_v25 = vpack.c.bf16 %v114_v44, %v113_v34 }
 0x22e   :  { %v2469_v41 = vpop.f32.mrf.mxu1  ;;  %2660 = vmatmul.mubr.bf16.gmra.mxu1 %v473_v57  ;;  %v1581_v24 = vpop.f32.mrf.mxu0  ;;  %v415_v57 = vpack.c.bf16 %v288_v62, %v287_v53  ;;  %v480_v35 = vpack.c.bf16 %v224_v11, %v223_v59  ;;  %v290_v53 = vld [vmem:[%s18297_s0 + $0x1a2] sm:$0xff]  ;;  %v291_v44 = vld [vmem:[%s18297_s0 + $0x1aa] sm:$0xff]  ;;  %v5459_v50 = vld [vmem:[%s18303_s7 + $0x138] sm:$0xff] }
 0x22f   :  { %v13094_v43 = vadd.f32 %v2469_v41, %v1861_v9  ;;  %2667 = vmatprep.mubr.bf16.mxu1 %v477_v58  ;;  %5710 = vperm.xlu1 %10349, %v5456_v3   ;;  %v5458_v9 = vld [vmem:[%s18303_s7 + $0x130] sm:$0xff]  ;;  %v10601_v41 = vld [vmem:[%s18298_s1 + $0x200] sm:$0xff]  }
 0x230   :  { %v2471_v16 = vpop.f32.mrf.mxu1  ;;  %v13102_v12 = vpop.f32.mrf.mxu0  ;;  %10209 = vmatprep.subr.bf16.mxu0 %v10601_v41  ;;  %v116_v59 = vld [vmem:[%s18297_s0 + $0x3a0] sm:$0xff] }
 0x231   :  { %10210 = vmatpush3.bf16.msra.mxu0 %v10601_v41 }
 0x232   :  { %v2472_v60 = vpop.f32.mrf.mxu1  ;;  %v1584_v58 = vpop.f32.mrf.mxu0  ;;  %7246 = vmatprep.subr.bf16.mxu0 %v18501_v33  ;;  %v18600_v33 = vld [vmem:[#allocation9_spill] sm:$0xff] }
 0x233   :  { %v13115_v42 = vadd.f32 %v2472_v60, %v1864_v48  ;;  %5720 = vperm.xlu1 %10349, %v5458_v9   ;;  %v225_v60 = vld [vmem:[%s18297_s0 + $0x3a9] sm:$0xff]  ;;  %v226_v58 = vld [vmem:[%s18297_s0 + $0x3b1] sm:$0xff] }
 0x234   :  { %v2474_v24 = vpop.f32.mrf.mxu1  ;;  %v13120_v3 = vpop.f32.mrf.mxu0  ;;  %10120 = vmatmul.mubr.bf16.gmra.mxu0 %v412_v1  ;;  %v115_v1 = vld [vmem:[%s18297_s0 + $0x390] sm:$0xff] }
 0x235   :  { %18595 = vst [vmem:[#allocation118_spill] sm:$0xff] %v13115_v42  ;;  %10123 = vmatprep.mubr.bf16.mxu0 %v415_v57  ;;  %v418_v57 = vpack.c.bf16 %v290_v53, %v289_v2  ;;  %v5461_v2 = vld [vmem:[%s18303_s7 + $0x148] sm:$0xff] }
 0x236   :  { %v2477_v62 = vpop.f32.mrf.mxu1  ;;  %2668 = vmatmul.mubr.bf16.gmra.mxu1 %v476_v25  ;;  %v1589_v34 = vpop.f32.mrf.mxu0  ;;  %v18596_v25 = vld [vmem:[#allocation7_spill] sm:$0xff] }
 0x237   :  { %v13139_v16 = vadd.f32 %v2477_v62, %v1869_v28  ;;  %2675 = vmatprep.mubr.bf16.mxu1 %v480_v35  ;;  %5725 = vperm.xlu1 %10349, %v5459_v50   ;;  %v1872_v9 = vadd.f32 %v18596_v25, %v12228_v32  ;;  %v421_v35 = vpack.c.bf16 %v292_v56, %v291_v44  ;;  %v18599_v50 = vld [vmem:[#allocation56_spill] sm:$0xff]  ;;  %v293_v32 = vld [vmem:[%s18297_s0 + $0x1c2] sm:$0xff] }
 0x238   :  { %v2479_v11 = vpop.f32.mrf.mxu1  ;;  %v13148_v48 = vpop.f32.mrf.mxu0  ;;  %v479_v28 = vpack.c.bf16 %v116_v59, %v115_v1  ;;  %v483_v62 = vpack.c.bf16 %v226_v58, %v225_v60  ;;  %v1877_v42 = vadd.f32 %v18600_v33, %v18599_v50  ;;  %v294_v44 = vld [vmem:[%s18297_s0 + $0x1ca] sm:$0xff]  ;;  %v295_v59 = vld [vmem:[%s18297_s0 + $0x1d2] sm:$0xff]  ;;  %v296_v33 = vld [vmem:[%s18297_s0 + $0x1e2] sm:$0xff] }
 0x239   :  { %v117_v58 = vld [vmem:[%s18297_s0 + $0x3a8] sm:$0xff]  ;;  %v118_v25 = vld [vmem:[%s18297_s0 + $0x3b0] sm:$0xff] }
 0x23a   :  { %v2480_v41 = vpop.f32.mrf.mxu1  ;;  %v1592_v24 = vpop.f32.mrf.mxu0 }
 0x23b   :  { %v13161_v53 = vadd.f32 %v2480_v41, %v1872_v9  ;;  %5735 = vperm.xlu1 %10349, %v5461_v2   ;;  %v424_v41 = vpack.c.bf16 %v294_v44, %v293_v32  ;;  %v227_v24 = vld [vmem:[%s18297_s0 + $0x3c1] sm:$0xff] }
 0x23c   :  { %v2482_v34 = vpop.f32.mrf.mxu1  ;;  %v13163_v11 = vpop.f32.mrf.mxu0  ;;  %10124 = vmatmul.mubr.bf16.gmra.mxu0 %v418_v57  ;;  %v5462_v57 = vld [vmem:[%s18303_s7 + $0x150] sm:$0xff]  ;;  %v18604_v2 = vld [vmem:[#allocation11_spill] sm:$0xff] }
 0x23d   :  { %18597 = vst [vmem:[#allocation7_spill] sm:$0xff] %v13161_v53  ;;  %18598 = vst [vmem:[#allocation119_spill] sm:$0xff] %v13163_v11  ;;  %10127 = vmatprep.mubr.bf16.mxu0 %v421_v35  ;;  %v427_v34 = vpack.c.bf16 %v296_v33, %v295_v59  ;;  %v5464_v32 = vld [vmem:[%s18303_s7 + $0x160] sm:$0xff]  ;;  %v18608_v11 = vld [vmem:[#allocation8_spill] sm:$0xff] }
 0x23e   :  { %v2485_v56 = vpop.f32.mrf.mxu1  ;;  %2676 = vmatmul.mubr.bf16.gmra.mxu1 %v479_v28  ;;  %v1597_v1 = vpop.f32.mrf.mxu0  ;;  %v18603_v28 = vld [vmem:[#allocation59_spill] sm:$0xff]  ;;  %v297_v59 = vld [vmem:[%s18297_s0 + $0x1ea] sm:$0xff]  ;;  %v298_v33 = vld [vmem:[%s18297_s0 + $0x1f2] sm:$0xff] }
 0x23f   :  { %v13182_v60 = vadd.f32 %v2485_v56, %v1877_v42  ;;  %2683 = vmatprep.mubr.bf16.mxu1 %v483_v62  ;;  %v228_v42 = vld [vmem:[%s18297_s0 + $0x3c9] sm:$0xff]  ;;  %5740 = vperm.xlu1 %10349, %v5462_v57   ;;  %v1880_v62 = vadd.f32 %v18604_v2, %v18603_v28  ;;  %v482_v1 = vpack.c.bf16 %v118_v25, %v117_v58  ;;  %v18607_v57 = vld [vmem:[#allocation62_spill] sm:$0xff] }
 0x240   :  { %v2487_v9 = vpop.f32.mrf.mxu1  ;;  %v13190_v35 = vpop.f32.mrf.mxu0  ;;  %v1885_v53 = vadd.f32 %v18608_v11, %v18607_v57  ;;  %v300_v11 = vld [vmem:[%s18297_s0 + $0x20a] sm:$0xff] }
 0x241   :  { %18601 = vst [vmem:[#allocation56_spill] sm:$0xff] %v13182_v60  ;;  %18602 = vst [vmem:[#allocation9_spill] sm:$0xff] %v13190_v35  ;;  %v486_v9 = vpack.c.bf16 %v228_v42, %v227_v24  ;;  %v119_v42 = vld [vmem:[%s18297_s0 + $0x3c0] sm:$0xff]  ;;  %v120_v28 = vld [vmem:[%s18297_s0 + $0x3c8] sm:$0xff] }
 0x242   :  { %v2488_v50 = vpop.f32.mrf.mxu1  ;;  %v1600_v56 = vpop.f32.mrf.mxu0 }
 0x243   :  { %v13203_v44 = vadd.f32 %v2488_v50, %v1880_v62  ;;  %5750 = vperm.xlu1 %10349, %v5464_v32   ;;  %v229_v50 = vld [vmem:[%s18297_s0 + $0x3d1] sm:$0xff] }
 0x244   :  { %v2490_v35 = vpop.f32.mrf.mxu1  ;;  %v13205_v60 = vpop.f32.mrf.mxu0  ;;  %10128 = vmatmul.mubr.bf16.gmra.mxu0 %v424_v41  ;;  %v5465_v41 = vld [vmem:[%s18303_s7 + $0x168] sm:$0xff]  ;;  %v18611_v56 = vld [vmem:[#allocation65_spill] sm:$0xff] }
 0x245   :  { %18605 = vst [vmem:[#allocation59_spill] sm:$0xff] %v13203_v44  ;;  %18606 = vst [vmem:[#allocation11_spill] sm:$0xff] %v13205_v60  ;;  %10131 = vmatprep.mubr.bf16.mxu0 %v427_v34  ;;  %v299_v35 = vld [vmem:[%s18297_s0 + $0x202] sm:$0xff]  ;;  %v430_v34 = vpack.c.bf16 %v298_v33, %v297_v59  ;;  %v5467_v59 = vld [vmem:[%s18303_s7 + $0x178] sm:$0xff] }
 0x246   :  { %v2493_v58 = vpop.f32.mrf.mxu1  ;;  %2684 = vmatmul.mubr.bf16.gmra.mxu1 %v482_v1  ;;  %v1605_v25 = vpop.f32.mrf.mxu0  ;;  %v18612_v1 = vld [vmem:[#allocation10_spill] sm:$0xff]  ;;  %v18616_v44 = vld [vmem:[#allocation13_spill] sm:$0xff] }
 0x247   :  { %v13224_v24 = vadd.f32 %v2493_v58, %v1885_v53  ;;  %2691 = vmatprep.mubr.bf16.mxu1 %v486_v9  ;;  %v230_v53 = vld [vmem:[%s18297_s0 + $0x3e1] sm:$0xff]  ;;  %5755 = vperm.xlu1 %10349, %v5465_v41   ;;  %v1888_v32 = vadd.f32 %v18612_v1, %v18611_v56  ;;  %v433_v9 = vpack.c.bf16 %v300_v11, %v299_v35  ;;  %v18615_v41 = vld [vmem:[#allocation68_spill] sm:$0xff]  ;;  %v301_v35 = vld [vmem:[%s18297_s0 + $0x212] sm:$0xff] }
 0x248   :  { %v2495_v2 = vpop.f32.mrf.mxu1  ;;  %v13232_v62 = vpop.f32.mrf.mxu0  ;;  %v485_v25 = vpack.c.bf16 %v120_v28, %v119_v42  ;;  %v302_v11 = vld [vmem:[%s18297_s0 + $0x222] sm:$0xff] }
 0x249   :  { %18609 = vst [vmem:[#allocation62_spill] sm:$0xff] %v13224_v24  ;;  %18610 = vst [vmem:[#allocation8_spill] sm:$0xff] %v13232_v62  ;;  %v489_v2 = vpack.c.bf16 %v230_v53, %v229_v50  ;;  %v1893_v24 = vadd.f32 %v18616_v44, %v18615_v41  ;;  %v304_v44 = vld [vmem:[%s18297_s0 + $0x232] sm:$0xff]  ;;  %v122_v56 = vld [vmem:[%s18297_s0 + $0x3e0] sm:$0xff] }
 0x24a   :  { %v2496_v57 = vpop.f32.mrf.mxu1  ;;  %v1608_v58 = vpop.f32.mrf.mxu0  ;;  %v121_v53 = vld [vmem:[%s18297_s0 + $0x3d0] sm:$0xff] }
 0x24b   :  { %v13245_v33 = vadd.f32 %v2496_v57, %v1888_v32  ;;  %5765 = vperm.xlu1 %10349, %v5467_v59   ;;  %v231_v57 = vld [vmem:[%s18297_s0 + $0x3e9] sm:$0xff] }
 0x24c   :  { %v2498_v62 = vpop.f32.mrf.mxu1  ;;  %v13247_v60 = vpop.f32.mrf.mxu0  ;;  %10132 = vmatmul.mubr.bf16.gmra.mxu0 %v430_v34  ;;  %v5468_v34 = vld [vmem:[%s18303_s7 + $0x180] sm:$0xff] }
 0x24d   :  { %18613 = vst [vmem:[#allocation65_spill] sm:$0xff] %v13245_v33  ;;  %18614 = vst [vmem:[#allocation10_spill] sm:$0xff] %v13247_v60  ;;  %10135 = vmatprep.mubr.bf16.mxu0 %v433_v9  ;;  %v303_v62 = vld [vmem:[%s18297_s0 + $0x22a] sm:$0xff]  ;;  %v436_v9 = vpack.c.bf16 %v302_v11, %v301_v35  ;;  %v18619_v58 = vld [vmem:[#allocation71_spill] sm:$0xff] }
 0x24e   :  { %v2501_v42 = vpop.f32.mrf.mxu1  ;;  %2692 = vmatmul.mubr.bf16.gmra.mxu1 %v485_v25  ;;  %v1613_v28 = vpop.f32.mrf.mxu0  ;;  %v18620_v25 = vld [vmem:[#allocation15_spill] sm:$0xff]  ;;  %v5470_v35 = vld [vmem:[%s18303_s7 + $0x190] sm:$0xff] }
 0x24f   :  { %v13266_v50 = vadd.f32 %v2501_v42, %v1893_v24  ;;  %2699 = vmatprep.mubr.bf16.mxu1 %v489_v2  ;;  %v232_v24 = vld [vmem:[%s18297_s0 + $0x3f1] sm:$0xff]  ;;  %5770 = vperm.xlu1 %10349, %v5468_v34   ;;  %v1896_v59 = vadd.f32 %v18620_v25, %v18619_v58  ;;  %v439_v2 = vpack.c.bf16 %v304_v44, %v303_v62  ;;  %v18623_v34 = vld [vmem:[#allocation74_spill] sm:$0xff]  ;;  %v305_v62 = vld [vmem:[%s18297_s0 + $0x282] sm:$0xff] }
 0x250   :  { %v2503_v1 = vpop.f32.mrf.mxu1  ;;  %v13274_v32 = vpop.f32.mrf.mxu0  ;;  %v488_v28 = vpack.c.bf16 %v122_v56, %v121_v53  ;;  %v306_v44 = vld [vmem:[%s18297_s0 + $0x28a] sm:$0xff] }
 0x251   :  { %18617 = vst [vmem:[#allocation68_spill] sm:$0xff] %v13266_v50  ;;  %18618 = vst [vmem:[#allocation13_spill] sm:$0xff] %v13274_v32  ;;  %v492_v1 = vpack.c.bf16 %v232_v24, %v231_v57  ;;  %v18624_v50 = vld [vmem:[#allocation12_spill] sm:$0xff] }
 0x252   :  { %v2504_v41 = vpop.f32.mrf.mxu1  ;;  %v1616_v42 = vpop.f32.mrf.mxu0  ;;  %v1901_v33 = vadd.f32 %v18624_v50, %v18623_v34  ;;  %v308_v50 = vld [vmem:[%s18297_s0 + $0x2a2] sm:$0xff]  ;;  %v124_v58 = vld [vmem:[%s18297_s0 + $0x3f0] sm:$0xff] }
 0x253   :  { %v13287_v11 = vadd.f32 %v2504_v41, %v1896_v59  ;;  %5780 = vperm.xlu1 %10349, %v5470_v35   ;;  %v123_v24 = vld [vmem:[%s18297_s0 + $0x3e8] sm:$0xff]  ;;  %v18627_v42 = vld [vmem:[#allocation77_spill] sm:$0xff] }
 0x254   :  { %v2506_v32 = vpop.f32.mrf.mxu1  ;;  %v13289_v60 = vpop.f32.mrf.mxu0  ;;  %10136 = vmatmul.mubr.bf16.gmra.mxu0 %v436_v9  ;;  %v5477_v9 = vld [vmem:[%s18303_s7 + $0x1c8] sm:$0xff] }
 0x255   :  { %18621 = vst [vmem:[#allocation71_spill] sm:$0xff] %v13287_v11  ;;  %18622 = vst [vmem:[#allocation15_spill] sm:$0xff] %v13289_v60  ;;  %10139 = vmatprep.mubr.bf16.mxu0 %v439_v2  ;;  %v307_v32 = vld [vmem:[%s18297_s0 + $0x292] sm:$0xff]  ;;  %v442_v2 = vpack.c.bf16 %v306_v44, %v305_v62  ;;  %v233_v41 = vld [vmem:[%s18297_s0 + $0x401] sm:$0xff] }
 0x256   :  { %v2509_v53 = vpop.f32.mrf.mxu1  ;;  %2700 = vmatmul.mubr.bf16.gmra.mxu1 %v488_v28  ;;  %v1621_v56 = vpop.f32.mrf.mxu0  ;;  %v18628_v28 = vld [vmem:[#allocation14_spill] sm:$0xff]  ;;  %v18632_v11 = vld [vmem:[#allocation17_spill] sm:$0xff] }
 0x257   :  { %v13308_v57 = vadd.f32 %v2509_v53, %v1901_v33  ;;  %2707 = vmatprep.mubr.bf16.mxu1 %v492_v1  ;;  %v234_v33 = vld [vmem:[%s18297_s0 + $0x409] sm:$0xff]  ;;  %5815 = vperm.xlu1 %10349, %v5477_v9   ;;  %v1904_v35 = vadd.f32 %v18628_v28, %v18627_v42  ;;  %v445_v1 = vpack.c.bf16 %v308_v50, %v307_v32  ;;  %v5479_v62 = vld [vmem:[%s18303_s7 + $0x1d8] sm:$0xff] }
 0x258   :  { %v2511_v25 = vpop.f32.mrf.mxu1  ;;  %v13316_v59 = vpop.f32.mrf.mxu0  ;;  %v491_v56 = vpack.c.bf16 %v124_v58, %v123_v24  ;;  %v18631_v9 = vld [vmem:[#allocation80_spill] sm:$0xff]  ;;  %v310_v50 = vld [vmem:[%s18297_s0 + $0x2b2] sm:$0xff] }
 0x259   :  { %18625 = vst [vmem:[#allocation74_spill] sm:$0xff] %v13308_v57  ;;  %18626 = vst [vmem:[#allocation12_spill] sm:$0xff] %v13316_v59  ;;  %v495_v25 = vpack.c.bf16 %v234_v33, %v233_v41  ;;  %v1909_v57 = vadd.f32 %v18632_v11, %v18631_v9  ;;  %v309_v32 = vld [vmem:[%s18297_s0 + $0x2aa] sm:$0xff]  ;;  %v125_v33 = vld [vmem:[%s18297_s0 + $0x400] sm:$0xff] }
 0x25a   :  { %v2512_v34 = vpop.f32.mrf.mxu1  ;;  %v1624_v53 = vpop.f32.mrf.mxu0  ;;  %v312_v11 = vld [vmem:[%s18297_s0 + $0x2ca] sm:$0xff] }
 0x25b   :  { %v13329_v44 = vadd.f32 %v2512_v34, %v1904_v35  ;;  %5825 = vperm.xlu1 %10349, %v5479_v62   ;;  %v126_v42 = vld [vmem:[%s18297_s0 + $0x408] sm:$0xff]  ;;  %v235_v34 = vld [vmem:[%s18297_s0 + $0x411] sm:$0xff] }
 0x25c   :  { %v2514_v59 = vpop.f32.mrf.mxu1  ;;  %v13331_v60 = vpop.f32.mrf.mxu0  ;;  %10140 = vmatmul.mubr.bf16.gmra.mxu0 %v442_v2  ;;  %v5480_v2 = vld [vmem:[%s18303_s7 + $0x1e0] sm:$0xff] }
 0x25d   :  { %18629 = vst [vmem:[#allocation77_spill] sm:$0xff] %v13329_v44  ;;  %18630 = vst [vmem:[#allocation14_spill] sm:$0xff] %v13331_v60  ;;  %10143 = vmatprep.mubr.bf16.mxu0 %v445_v1  ;;  %v311_v59 = vld [vmem:[%s18297_s0 + $0x2c2] sm:$0xff]  ;;  %v448_v1 = vpack.c.bf16 %v310_v50, %v309_v32  ;;  %v5482_v32 = vld [vmem:[%s18303_s7 + $0x1f0] sm:$0xff] }
 0x25e   :  { %v2517_v24 = vpop.f32.mrf.mxu1  ;;  %2708 = vmatmul.mubr.bf16.gmra.mxu1 %v491_v56  ;;  %v1629_v58 = vpop.f32.mrf.mxu0  ;;  %v18635_v53 = vld [vmem:[#allocation83_spill] sm:$0xff] }
 0x25f   :  { %v13350_v41 = vadd.f32 %v2517_v24, %v1909_v57  ;;  %2715 = vmatprep.mubr.bf16.mxu1 %v495_v25  ;;  %v236_v57 = vld [vmem:[%s18297_s0 + $0x421] sm:$0xff]  ;;  %5830 = vperm.xlu1 %10349, %v5480_v2   ;;  %v451_v25 = vpack.c.bf16 %v312_v11, %v311_v59  ;;  %v494_v58 = vpack.c.bf16 %v126_v42, %v125_v33  ;;  %v313_v59 = vld [vmem:[%s18297_s0 + $0x2d2] sm:$0xff] }
 0x260   :  { %v2519_v28 = vpop.f32.mrf.mxu1  ;;  %v13358_v35 = vpop.f32.mrf.mxu0  ;;  %v18636_v56 = vld [vmem:[#allocation19_spill] sm:$0xff]  ;;  %v18639_v2 = vld [vmem:[#allocation86_spill] sm:$0xff] }
 0x261   :  { %18633 = vst [vmem:[#allocation80_spill] sm:$0xff] %v13350_v41  ;;  %18634 = vst [vmem:[#allocation17_spill] sm:$0xff] %v13358_v35  ;;  %v1912_v62 = vadd.f32 %v18636_v56, %v18635_v53  ;;  %v498_v28 = vpack.c.bf16 %v236_v57, %v235_v34  ;;  %v18640_v41 = vld [vmem:[#allocation16_spill] sm:$0xff]  ;;  %v314_v11 = vld [vmem:[%s18297_s0 + $0x2e2] sm:$0xff] }
 0x262   :  { %v2520_v9 = vpop.f32.mrf.mxu1  ;;  %v1632_v24 = vpop.f32.mrf.mxu0  ;;  %v1917_v44 = vadd.f32 %v18640_v41, %v18639_v2  ;;  %v316_v41 = vld [vmem:[%s18297_s0 + $0x2f2] sm:$0xff]  ;;  %v128_v53 = vld [vmem:[%s18297_s0 + $0x420] sm:$0xff] }
 0x263   :  { %v13371_v50 = vadd.f32 %v2520_v9, %v1912_v62  ;;  %5840 = vperm.xlu1 %10349, %v5482_v32   ;;  %v127_v57 = vld [vmem:[%s18297_s0 + $0x410] sm:$0xff]  ;;  %v9578_v24 = vld [vmem:[#allocation2] ss:$0 sm:$0xff] }
 0x264   :  { %v2522_v35 = vpop.f32.mrf.mxu1  ;;  %v13373_v60 = vpop.f32.mrf.mxu0  ;;  %10144 = vmatmul.mubr.bf16.gmra.mxu0 %v448_v1  ;;  %v5483_v1 = vld [vmem:[%s18303_s7 + $0x1f8] sm:$0xff]  ;;  %v237_v9 = vld [vmem:[%s18297_s0 + $0x429] sm:$0xff]  ;;  %5201 = vperm.xlu0 %10348, %v9578_v24  }
 0x265   :  { %18637 = vst [vmem:[#allocation83_spill] sm:$0xff] %v13371_v50  ;;  %18638 = vst [vmem:[#allocation19_spill] sm:$0xff] %v13373_v60  ;;  %10147 = vmatprep.mubr.bf16.mxu0 %v451_v25  ;;  %v315_v35 = vld [vmem:[%s18297_s0 + $0x2ea] sm:$0xff]  ;;  %v454_v25 = vpack.c.bf16 %v314_v11, %v313_v59  ;;  %v18643_v32 = vld [vmem:[#allocation18_spill] sm:$0xff] }
 0x266   :  { %v2525_v33 = vpop.f32.mrf.mxu1  ;;  %2716 = vmatmul.mubr.bf16.gmra.mxu1 %v494_v58  ;;  %v1637_v42 = vpop.f32.mrf.mxu0  ;;  %v18642_v58 = vld [vmem:[#allocation89_spill] sm:$0xff]  ;;  %v457_v2 = vpack.c.bf16 %v316_v41, %v315_v35  ;;  %v5485_v59 = vld [vmem:[%s18303_s7 + $0x208] sm:$0xff] }
 0x267   :  { %v13392_v34 = vadd.f32 %v2525_v33, %v1917_v44  ;;  %2723 = vmatprep.mubr.bf16.mxu1 %v498_v28  ;;  %v238_v44 = vld [vmem:[%s18297_s0 + $0x431] sm:$0xff]  ;;  %5845 = vperm.xlu1 %10349, %v5483_v1   ;;  %v1920_v28 = vadd.f32 %v18643_v32, %v18642_v58 }
 0x268   :  { %v2527_v56 = vpop.f32.mrf.mxu1  ;;  %v13400_v62 = vpop.f32.mrf.mxu0  ;;  %v5423_v35 = vld [vmem:[%s18303_s7 + $0x18] sm:$0xff]  ;;  %v18645_v41 = vld [vmem:[#allocation92_spill] sm:$0xff] }
 0x269   :  { %18641 = vst [vmem:[#allocation86_spill] sm:$0xff] %v13400_v62  ;;  %v497_v56 = vpack.c.bf16 %v128_v53, %v127_v57  ;;  %v501_v62 = vpack.c.bf16 %v238_v44, %v237_v9  ;;  %v18646_v1 = vld [vmem:[#allocation21_spill] sm:$0xff]  ;;  %v317_v57 = vld [vmem:[%s18297_s0 + $0x302] sm:$0xff]  ;;  %5545 = vperm.xlu0 %10348, %v5423_v35  }
 0x26a   :  { %v2528_v33 = vpop.f32.mrf.mxu1  ;;  %v1640_v42 = vpop.f32.mrf.mxu0  ;;  %v1925_v24 = vadd.f32 %v18646_v1, %v18645_v41  ;;  %v319_v9 = vld [vmem:[%s18297_s0 + $0x312] sm:$0xff]  ;;  %v320_v44 = vld [vmem:[%s18297_s0 + $0x322] sm:$0xff] }
 0x26b   :  { %v13413_v11 = vadd.f32 %v2528_v33, %v1920_v28  ;;  %5855 = vperm.xlu1 %10349, %v5485_v59   ;;  %v5486_v58 = vld [vmem:[%s18303_s7 + $0x210] sm:$0xff]  ;;  %v129_v28 = vld [vmem:[%s18297_s0 + $0x428] sm:$0xff] }
 0x26c   :  { %v2530_v60 = vpop.f32.mrf.mxu1  ;;  %v13415_v50 = vpop.f32.mrf.mxu0  ;;  %10148 = vmatmul.mubr.bf16.gmra.mxu0 %v454_v25  ;;  %v239_v59 = vld [vmem:[%s18297_s0 + $0x441] sm:$0xff]  ;;  %v5426_v35 = vld [vmem:[%s18303_s7 + $0x30] sm:$0xff] }
 0x26d   :  { %18644 = vst [vmem:[#allocation16_spill] sm:$0xff] %v13415_v50  ;;  %10151 = vmatprep.mubr.bf16.mxu0 %v457_v2  ;;  %v318_v60 = vld [vmem:[%s18297_s0 + $0x30a] sm:$0xff]  ;;  %v18649_v41 = vld [vmem:[#allocation95_spill] sm:$0xff]  ;;  %5560 = vperm.xlu0 %10348, %v5426_v35  }
 0x26e   :  { %v2533_v53 = vpop.f32.mrf.mxu1  ;;  %2724 = vmatmul.mubr.bf16.gmra.mxu1 %v497_v56  ;;  %v1645_v25 = vpop.f32.mrf.mxu0  ;;  %v130_v2 = vld [vmem:[%s18297_s0 + $0x430] sm:$0xff]  ;;  %v460_v56 = vpack.c.bf16 %v318_v60, %v317_v57  ;;  %v18650_v1 = vld [vmem:[#allocation23_spill] sm:$0xff] }
 0x26f   :  { %v13437_v32 = vadd.f32 %v2533_v53, %v1925_v24  ;;  %2731 = vmatprep.mubr.bf16.mxu1 %v501_v62  ;;  %v240_v62 = vld [vmem:[%s18297_s0 + $0x449] sm:$0xff]  ;;  %5860 = vperm.xlu1 %10349, %v5486_v58   ;;  %v1928_v24 = vadd.f32 %v18650_v1, %v18649_v41  ;;  %v463_v53 = vpack.c.bf16 %v320_v44, %v319_v9  ;;  %v5428_v9 = vld [vmem:[%s18303_s7 + $0x40] sm:$0xff] }
 0x270   :  { %v2535_v33 = vpop.f32.mrf.mxu1  ;;  %v13445_v42 = vpop.f32.mrf.mxu0  ;;  %v500_v60 = vpack.c.bf16 %v130_v2, %v129_v28  ;;  %v504_v50 = vpack.c.bf16 %v240_v62, %v239_v59  ;;  %v18653_v44 = vld [vmem:[#allocation98_spill] sm:$0xff]  ;;  %v18654_v35 = vld [vmem:[#allocation20_spill] sm:$0xff]  ;;  %v322_v2 = vld [vmem:[%s18297_s0 + $0x332] sm:$0xff] }
 0x271   :  { %18647 = vst [vmem:[#allocation89_spill] sm:$0xff] %v13437_v32  ;;  %18648 = vst [vmem:[#allocation18_spill] sm:$0xff] %v13445_v42  ;;  %v5488_v33 = vld [vmem:[%s18303_s7 + $0x220] sm:$0xff]  ;;  %v1933_v41 = vadd.f32 %v18654_v35, %v18653_v44  ;;  %v321_v28 = vld [vmem:[%s18297_s0 + $0x32a] sm:$0xff]  ;;  %5570 = vperm.xlu0 %10348, %v5428_v9  }
 0x272   :  { %v2536_v25 = vpop.f32.mrf.mxu1  ;;  %v1648_v57 = vpop.f32.mrf.mxu0  ;;  %v323_v62 = vld [vmem:[%s18297_s0 + $0x342] sm:$0xff]  ;;  %v324_v1 = vld [vmem:[%s18297_s0 + $0x34a] sm:$0xff]  ;;  %v18656_v35 = vld [vmem:[#allocation22_spill] sm:$0xff] }
 0x273   :  { %v13461_v42 = vadd.f32 %v2536_v25, %v1928_v24  ;;  %5870 = vperm.xlu1 %10349, %v5488_v33   ;;  %v5489_v24 = vld [vmem:[%s18303_s7 + $0x228] sm:$0xff]  ;;  %v131_v25 = vld [vmem:[%s18297_s0 + $0x440] sm:$0xff]  ;;  %v241_v9 = vld [vmem:[%s18297_s0 + $0x451] sm:$0xff] }
 0x274   :  { %v2538_v58 = vpop.f32.mrf.mxu1  ;;  %v13463_v32 = vpop.f32.mrf.mxu0  ;;  %10152 = vmatmul.mubr.bf16.gmra.mxu0 %v460_v56  ;;  %v132_v57 = vld [vmem:[%s18297_s0 + $0x448] sm:$0xff]  ;;  %v5430_v44 = vld [vmem:[%s18303_s7 + $0x50] sm:$0xff] }
 0x275   :  { %18651 = vst [vmem:[#allocation92_spill] sm:$0xff] %v13461_v42  ;;  %18652 = vst [vmem:[#allocation21_spill] sm:$0xff] %v13463_v32  ;;  %10155 = vmatprep.mubr.bf16.mxu0 %v463_v53  ;;  %v466_v58 = vpack.c.bf16 %v322_v2, %v321_v28  ;;  %5580 = vperm.xlu0 %10348, %v5430_v44   ;;  %v503_v2 = vpack.c.bf16 %v132_v57, %v131_v25  ;;  %v325_v25 = vld [vmem:[%s18297_s0 + $0x352] sm:$0xff]  ;;  %v326_v57 = vld [vmem:[%s18297_s0 + $0x362] sm:$0xff] }
 0x276   :  { %v2541_v59 = vpop.f32.mrf.mxu1  ;;  %2732 = vmatmul.mubr.bf16.gmra.mxu1 %v500_v60  ;;  %v1653_v56 = vpop.f32.mrf.mxu0  ;;  %v5492_v44 = vld [vmem:[%s18303_s7 + $0x240] sm:$0xff] }
 0x277   :  { %v13485_v53 = vadd.f32 %v2541_v59, %v1933_v41  ;;  %2739 = vmatprep.mubr.bf16.mxu1 %v504_v50  ;;  %v242_v50 = vld [vmem:[%s18297_s0 + $0x461] sm:$0xff]  ;;  %5875 = vperm.xlu1 %10349, %v5489_v24   ;;  %v1936_v41 = vadd.f32 %v18656_v35, %v12523_v39  ;;  %v469_v59 = vpack.c.bf16 %v324_v1, %v323_v62  ;;  %v18658_v62 = vld [vmem:[#allocation25_spill] sm:$0xff] }
 0x278   :  { %v2543_v60 = vpop.f32.mrf.mxu1  ;;  %v13493_v33 = vpop.f32.mrf.mxu0  ;;  %v507_v32 = vpack.c.bf16 %v242_v50, %v241_v9  ;;  %v5432_v39 = vld [vmem:[%s18303_s7 + $0x60] sm:$0xff]  ;;  %v1941_v1 = vadd.f32 %v18658_v62, %v12534_v20  ;;  %v327_v50 = vld [vmem:[%s18297_s0 + $0x36a] sm:$0xff]  ;;  %v328_v20 = vld [vmem:[%s18297_s0 + $0x372] sm:$0xff] }
 0x279   :  { %18655 = vst [vmem:[#allocation95_spill] sm:$0xff] %v13493_v33  ;;  %v5491_v60 = vld [vmem:[%s18303_s7 + $0x238] sm:$0xff]  ;;  %5590 = vperm.xlu0 %10348, %v5432_v39   ;;  %v18660_v39 = vld [vmem:[#allocation27_spill] sm:$0xff] }
 0x27a   :  { %v2544_v56 = vpop.f32.mrf.mxu1  ;;  %v1656_v28 = vpop.f32.mrf.mxu0  ;;  %v1944_v62 = vadd.f32 %v18660_v39, %v12557_v17  ;;  %v5436_v17 = vld [vmem:[%s18303_s7 + $0x80] sm:$0xff] }
 0x27b   :  { %v13509_v33 = vadd.f32 %v2544_v56, %v1936_v41  ;;  %5885 = vperm.xlu1 %10349, %v5491_v60   ;;  %v133_v41 = vld [vmem:[%s18297_s0 + $0x450] sm:$0xff] }
 0x27c   :  { %v2546_v24 = vpop.f32.mrf.mxu1  ;;  %v13511_v42 = vpop.f32.mrf.mxu0  ;;  %10156 = vmatmul.mubr.bf16.gmra.mxu0 %v466_v58  ;;  %v243_v60 = vld [vmem:[%s18297_s0 + $0x469] sm:$0xff] }
 0x27d   :  { %18657 = vst [vmem:[#allocation23_spill] sm:$0xff] %v13511_v42  ;;  %10159 = vmatprep.mubr.bf16.mxu0 %v469_v59  ;;  %v134_v59 = vld [vmem:[%s18297_s0 + $0x460] sm:$0xff]  ;;  %v5434_v24 = vld [vmem:[%s18303_s7 + $0x70] sm:$0xff] }
 0x27e   :  { %v2549_v9 = vpop.f32.mrf.mxu1  ;;  %2740 = vmatmul.mubr.bf16.gmra.mxu1 %v503_v2  ;;  %v1661_v58 = vpop.f32.mrf.mxu0  ;;  %v472_v2 = vpack.c.bf16 %v326_v57, %v325_v25  ;;  %5600 = vperm.xlu0 %10348, %v5434_v24   ;;  %v506_v57 = vpack.c.bf16 %v134_v59, %v133_v41  ;;  %v329_v41 = vld [vmem:[%s18297_s0 + $0x382] sm:$0xff]  ;;  %v330_v59 = vld [vmem:[%s18297_s0 + $0x38a] sm:$0xff]  ;;  %v5495_v24 = vld [vmem:[%s18303_s7 + $0x258] sm:$0xff] }
 0x27f   :  { %v13533_v35 = vadd.f32 %v2549_v9, %v1941_v1  ;;  %2747 = vmatprep.mubr.bf16.mxu1 %v507_v32  ;;  %v244_v32 = vld [vmem:[%s18297_s0 + $0x471] sm:$0xff]  ;;  %5890 = vperm.xlu1 %10349, %v5492_v44   ;;  %v475_v1 = vpack.c.bf16 %v328_v20, %v327_v50 }
 0x280   :  { %v2551_v56 = vpop.f32.mrf.mxu1  ;;  %v13541_v28 = vpop.f32.mrf.mxu0  ;;  %v5494_v58 = vld [vmem:[%s18303_s7 + $0x250] sm:$0xff] }
 0x281   :  { %18659 = vst [vmem:[#allocation98_spill] sm:$0xff] %v13541_v28  ;;  %v510_v28 = vpack.c.bf16 %v244_v32, %v243_v60  ;;  %v18662_v50 = vld [vmem:[#allocation24_spill] sm:$0xff]  ;;  %v331_v32 = vld [vmem:[%s18297_s0 + $0x392] sm:$0xff] }
 0x282   :  { %v2552_v9 = vpop.f32.mrf.mxu1  ;;  %v1664_v25 = vpop.f32.mrf.mxu0  ;;  %v1949_v20 = vadd.f32 %v18662_v50, %v12571_v27  ;;  %5610 = vperm.xlu0 %10348, %v5436_v17   ;;  %v332_v27 = vld [vmem:[%s18297_s0 + $0x3a2] sm:$0xff]  ;;  %v18664_v17 = vld [vmem:[#allocation26_spill] sm:$0xff] }
 0x283   :  { %v13557_v56 = vadd.f32 %v2552_v9, %v1944_v62  ;;  %5900 = vperm.xlu1 %10349, %v5494_v58   ;;  %v135_v62 = vld [vmem:[%s18297_s0 + $0x468] sm:$0xff]  ;;  %v1952_v50 = vadd.f32 %v18664_v17, %v12595_v61  ;;  %v5440_v61 = vld [vmem:[%s18303_s7 + $0xa0] sm:$0xff] }
 0x284   :  { %v2554_v44 = vpop.f32.mrf.mxu1  ;;  %v13559_v42 = vpop.f32.mrf.mxu0  ;;  %10160 = vmatmul.mubr.bf16.gmra.mxu0 %v472_v2  ;;  %v245_v58 = vld [vmem:[%s18297_s0 + $0x481] sm:$0xff] }
 0x285   :  { %18661 = vst [vmem:[#allocation20_spill] sm:$0xff] %v13559_v42  ;;  %10163 = vmatprep.mubr.bf16.mxu0 %v475_v1  ;;  %v136_v1 = vld [vmem:[%s18297_s0 + $0x470] sm:$0xff] }
 0x286   :  { %v2557_v60 = vpop.f32.mrf.mxu1  ;;  %2748 = vmatmul.mubr.bf16.gmra.mxu1 %v506_v57  ;;  %v1669_v2 = vpop.f32.mrf.mxu0  ;;  %v478_v57 = vpack.c.bf16 %v330_v59, %v329_v41  ;;  %v5438_v44 = vld [vmem:[%s18303_s7 + $0x90] sm:$0xff]  ;;  %v509_v59 = vpack.c.bf16 %v136_v1, %v135_v62 }
 0x287   :  { %v13581_v39 = vadd.f32 %v2557_v60, %v1949_v20  ;;  %2755 = vmatprep.mubr.bf16.mxu1 %v510_v28  ;;  %v246_v28 = vld [vmem:[%s18297_s0 + $0x489] sm:$0xff]  ;;  %5905 = vperm.xlu1 %10349, %v5495_v24   ;;  %v481_v20 = vpack.c.bf16 %v332_v27, %v331_v32  ;;  %v18666_v32 = vld [vmem:[#allocation29_spill] sm:$0xff] }
 0x288   :  { %v2559_v9 = vpop.f32.mrf.mxu1  ;;  %v13589_v25 = vpop.f32.mrf.mxu0  ;;  %5620 = vperm.xlu0 %10348, %v5438_v44   ;;  %v5497_v2 = vld [vmem:[%s18303_s7 + $0x268] sm:$0xff]  ;;  %v1957_v27 = vadd.f32 %v18666_v32, %v12606_v45  ;;  %v334_v1 = vld [vmem:[%s18297_s0 + $0x3b2] sm:$0xff] }
 0x289   :  { %18663 = vst [vmem:[#allocation22_spill] sm:$0xff] %v13589_v25  ;;  %v513_v25 = vpack.c.bf16 %v246_v28, %v245_v58  ;;  %v333_v62 = vld [vmem:[%s18297_s0 + $0x3aa] sm:$0xff]  ;;  %v335_v28 = vld [vmem:[%s18297_s0 + $0x3c2] sm:$0xff] }
 0x28a   :  { %v2560_v60 = vpop.f32.mrf.mxu1  ;;  %v1672_v41 = vpop.f32.mrf.mxu0  ;;  %v336_v45 = vld [vmem:[%s18297_s0 + $0x3ca] sm:$0xff] }
 0x28b   :  { %v13605_v9 = vadd.f32 %v2560_v60, %v1952_v50  ;;  %5915 = vperm.xlu1 %10349, %v5497_v2   ;;  %v5498_v44 = vld [vmem:[%s18303_s7 + $0x270] sm:$0xff]  ;;  %v137_v50 = vld [vmem:[%s18297_s0 + $0x480] sm:$0xff] }
 0x28c   :  { %v2562_v24 = vpop.f32.mrf.mxu1  ;;  %v13607_v42 = vpop.f32.mrf.mxu0  ;;  %10164 = vmatmul.mubr.bf16.gmra.mxu0 %v478_v57  ;;  %5630 = vperm.xlu0 %10348, %v5440_v61   ;;  %v247_v2 = vld [vmem:[%s18297_s0 + $0x491] sm:$0xff]  ;;  %v18668_v61 = vld [vmem:[#allocation31_spill] sm:$0xff] }
 0x28d   :  { %18665 = vst [vmem:[#allocation25_spill] sm:$0xff] %v13607_v42  ;;  %10167 = vmatprep.mubr.bf16.mxu0 %v481_v20  ;;  %v138_v20 = vld [vmem:[%s18297_s0 + $0x488] sm:$0xff]  ;;  %v5442_v24 = vld [vmem:[%s18303_s7 + $0xb0] sm:$0xff]  ;;  %v1960_v32 = vadd.f32 %v18668_v61, %v12629_v36  ;;  %v5444_v36 = vld [vmem:[%s18303_s7 + $0xc0] sm:$0xff] }
 0x28e   :  { %v2565_v58 = vpop.f32.mrf.mxu1  ;;  %2756 = vmatmul.mubr.bf16.gmra.mxu1 %v509_v59  ;;  %v1677_v57 = vpop.f32.mrf.mxu0  ;;  %v484_v59 = vpack.c.bf16 %v334_v1, %v333_v62  ;;  %v512_v1 = vpack.c.bf16 %v138_v20, %v137_v50  ;;  %v337_v50 = vld [vmem:[%s18297_s0 + $0x3d2] sm:$0xff]  ;;  %v338_v20 = vld [vmem:[%s18297_s0 + $0x3e2] sm:$0xff] }
 0x28f   :  { %v13629_v17 = vadd.f32 %v2565_v58, %v1957_v27  ;;  %2763 = vmatprep.mubr.bf16.mxu1 %v513_v25  ;;  %v248_v25 = vld [vmem:[%s18297_s0 + $0x4a1] sm:$0xff]  ;;  %5920 = vperm.xlu1 %10349, %v5498_v44   ;;  %v487_v27 = vpack.c.bf16 %v336_v45, %v335_v28  ;;  %v18670_v28 = vld [vmem:[#allocation28_spill] sm:$0xff] }
 0x290   :  { %v2567_v60 = vpop.f32.mrf.mxu1  ;;  %v13637_v41 = vpop.f32.mrf.mxu0  ;;  %5640 = vperm.xlu0 %10348, %v5442_v24   ;;  %v5500_v57 = vld [vmem:[%s18303_s7 + $0x280] sm:$0xff]  ;;  %v1965_v45 = vadd.f32 %v18670_v28, %v12640_v6  ;;  %v340_v6 = vld [vmem:[%s18297_s0 + $0x3f2] sm:$0xff] }
 0x291   :  { %18667 = vst [vmem:[#allocation27_spill] sm:$0xff] %v13637_v41  ;;  %v516_v41 = vpack.c.bf16 %v248_v25, %v247_v2  ;;  %v339_v25 = vld [vmem:[%s18297_s0 + $0x3ea] sm:$0xff]  ;;  %v5420_v24 = vld [vmem:[%s18303_s7] sm:$0xff] }
 0x292   :  { %v2568_v58 = vpop.f32.mrf.mxu1  ;;  %v1680_v62 = vpop.f32.mrf.mxu0 }
 0x293   :  { %v13653_v60 = vadd.f32 %v2568_v58, %v1960_v32  ;;  %5930 = vperm.xlu1 %10349, %v5500_v57   ;;  %v139_v32 = vld [vmem:[%s18297_s0 + $0x490] sm:$0xff] }
 0x294   :  { %v2570_v44 = vpop.f32.mrf.mxu1  ;;  %v13655_v42 = vpop.f32.mrf.mxu0  ;;  %10168 = vmatmul.mubr.bf16.gmra.mxu0 %v484_v59  ;;  %5650 = vperm.xlu0 %10348, %v5444_v36   ;;  %v249_v57 = vld [vmem:[%s18297_s0 + $0x4a9] sm:$0xff]  ;;  %v18672_v36 = vld [vmem:[#allocation30_spill] sm:$0xff] }
 0x295   :  { %18669 = vst [vmem:[#allocation24_spill] sm:$0xff] %v13655_v42  ;;  %10171 = vmatprep.mubr.bf16.mxu0 %v487_v27  ;;  %v140_v27 = vld [vmem:[%s18297_s0 + $0x4a0] sm:$0xff]  ;;  %v5446_v44 = vld [vmem:[%s18303_s7 + $0xd0] sm:$0xff]  ;;  %v1968_v28 = vadd.f32 %v18672_v36, %v12663_v51  ;;  %v141_v36 = vld [vmem:[%s18297_s0 + $0x4a8] sm:$0xff] }
 0x296   :  { %v2573_v2 = vpop.f32.mrf.mxu1  ;;  %2764 = vmatmul.mubr.bf16.gmra.mxu1 %v512_v1  ;;  %v1685_v59 = vpop.f32.mrf.mxu0  ;;  %v490_v1 = vpack.c.bf16 %v338_v20, %v337_v50  ;;  %v515_v20 = vpack.c.bf16 %v140_v27, %v139_v32  ;;  %v5448_v51 = vld [vmem:[%s18303_s7 + $0xe0] sm:$0xff]  ;;  %v342_v27 = vld [vmem:[%s18297_s0 + $0x40a] sm:$0xff] }
 0x297   :  { %v13677_v61 = vadd.f32 %v2573_v2, %v1965_v45  ;;  %2771 = vmatprep.mubr.bf16.mxu1 %v516_v41  ;;  %v250_v41 = vld [vmem:[%s18297_s0 + $0x4b1] sm:$0xff]  ;;  %5530 = vperm.xlu1 %10349, %v5420_v24   ;;  %v493_v45 = vpack.c.bf16 %v340_v6, %v339_v25  ;;  %v341_v32 = vld [vmem:[%s18297_s0 + $0x402] sm:$0xff] }
 0x298   :  { %v2575_v58 = vpop.f32.mrf.mxu1  ;;  %v13685_v62 = vpop.f32.mrf.mxu0  ;;  %5660 = vperm.xlu0 %10348, %v5446_v44   ;;  %v5422_v59 = vld [vmem:[%s18303_s7 + $0x10] sm:$0xff] }
 0x299   :  { %18671 = vst [vmem:[#allocation26_spill] sm:$0xff] %v13685_v62  ;;  %v519_v62 = vpack.c.bf16 %v250_v41, %v249_v57  ;;  %v18674_v25 = vld [vmem:[#allocation33_spill] sm:$0xff] }
 0x29a   :  { %v2576_v2 = vpop.f32.mrf.mxu1  ;;  %v1688_v50 = vpop.f32.mrf.mxu0  ;;  %v1973_v6 = vadd.f32 %v18674_v25, %v12674_v22  ;;  %v343_v41 = vld [vmem:[%s18297_s0 + $0x412] sm:$0xff]  ;;  %v344_v22 = vld [vmem:[%s18297_s0 + $0x422] sm:$0xff] }
 0x29b   :  { %v13701_v58 = vadd.f32 %v2576_v2, %v1968_v28  ;;  %5540 = vperm.xlu1 %10349, %v5422_v59   ;;  %v142_v28 = vld [vmem:[%s18297_s0 + $0x4b0] sm:$0xff]  ;;  %v496_v50 = vpack.c.bf16 %v342_v27, %v341_v32  ;;  %v5451_v59 = vld [vmem:[%s18303_s7 + $0xf8] sm:$0xff]  ;;  %v499_v25 = vpack.c.bf16 %v344_v22, %v343_v41 }
 0x29c   :  { %v2578_v24 = vpop.f32.mrf.mxu1  ;;  %v13703_v42 = vpop.f32.mrf.mxu0  ;;  %10172 = vmatmul.mubr.bf16.gmra.mxu0 %v490_v1  ;;  %5670 = vperm.xlu0 %10348, %v5448_v51   ;;  %v518_v32 = vpack.c.bf16 %v142_v28, %v141_v36  ;;  %v18680_v41 = vld [vmem:[#allocation32_spill] sm:$0xff]  ;;  %v346_v28 = vld [vmem:[%s18297_s0 + $0x432] sm:$0xff] }
 0x29d   :  { %18673 = vst [vmem:[#allocation29_spill] sm:$0xff] %v13703_v42  ;;  %10175 = vmatprep.mubr.bf16.mxu0 %v493_v45  ;;  %v18677_v24 = vld [vmem:[#allocation35_spill] sm:$0xff]  ;;  %v5502_v42 = vld [vmem:[%s18303_s7 + $0x290] sm:$0xff]  ;;  %v1981_v22 = vadd.f32 %v18680_v41, %v12718_v5 }
 0x29e   :  { %v2581_v57 = vpop.f32.mrf.mxu1  ;;  %2772 = vmatmul.mubr.bf16.gmra.mxu1 %v515_v20  ;;  %v1693_v1 = vpop.f32.mrf.mxu0  ;;  %v9289_v20 = vld [vmem:[%s18297_s0 + $0x41] sm:$0xff]  ;;  %v1976_v51 = vadd.f32 %v18677_v24, %v12703_v19  ;;  %v5454_v19 = vld [vmem:[%s18303_s7 + $0x110] sm:$0xff] }
 0x29f   :  { %v13722_v44 = vadd.f32 %v2581_v57, %v1973_v6  ;;  %2779 = vmatprep.mubr.bf16.mxu1 %v519_v62  ;;  %v9290_v62 = vld [vmem:[%s18297_s0 + $0x49] sm:$0xff]  ;;  %5940 = vperm.xlu1 %10349, %v5502_v42   ;;  %v9181_v24 = vld [vmem:[%s18297_s0 + $0x40] sm:$0xff] }
 0x2a0   :  { %v2583_v45 = vpop.f32.mrf.mxu1  ;;  %v13730_v2 = vpop.f32.mrf.mxu0  ;;  %5685 = vperm.xlu0 %10348, %v5451_v59   ;;  %v3579_v1 = vpack.c.bf16 %v9290_v62, %v9289_v20  ;;  %v345_v36 = vld [vmem:[%s18297_s0 + $0x42a] sm:$0xff]  ;;  %v347_v62 = vld [vmem:[%s18297_s0 + $0x442] sm:$0xff] }
 0x2a1   :  { %18675 = vst [vmem:[#allocation31_spill] sm:$0xff] %v13722_v44  ;;  %18676 = vst [vmem:[#allocation28_spill] sm:$0xff] %v13730_v2  ;;  %v348_v5 = vld [vmem:[%s18297_s0 + $0x44a] sm:$0xff]  ;;  %v349_v44 = vld [vmem:[%s18297_s0 + $0x452] sm:$0xff] }
 0x2a2   :  { %v2584_v6 = vpop.f32.mrf.mxu1  ;;  %v1696_v57 = vpop.f32.mrf.mxu0  ;;  %v9182_v42 = vld [vmem:[%s18297_s0 + $0x48] sm:$0xff]  ;;  %v505_v41 = vpack.c.bf16 %v348_v5, %v347_v62 }
 0x2a3   :  { %v13743_v27 = vadd.f32 %v2584_v6, %v1976_v51  ;;  %v502_v6 = vpack.c.bf16 %v346_v28, %v345_v36  ;;  %v9291_v57 = vld [vmem:[%s18297_s0 + $0x51] sm:$0xff]  ;;  %v350_v62 = vld [vmem:[%s18297_s0 + $0x462] sm:$0xff] }
 0x2a4   :  { %v2586_v45 = vpop.f32.mrf.mxu1  ;;  %v13745_v2 = vpop.f32.mrf.mxu0  ;;  %10176 = vmatmul.mubr.bf16.gmra.mxu0 %v496_v50  ;;  %5700 = vperm.xlu0 %10348, %v5454_v19   ;;  %v18686_v28 = vld [vmem:[#allocation37_spill] sm:$0xff] }
 0x2a5   :  { %18678 = vst [vmem:[#allocation30_spill] sm:$0xff] %v13743_v27  ;;  %18679 = vst [vmem:[#allocation33_spill] sm:$0xff] %v13745_v2  ;;  %10179 = vmatprep.mubr.bf16.mxu0 %v499_v25  ;;  %v18683_v45 = vld [vmem:[#allocation34_spill] sm:$0xff]  ;;  %v1989_v27 = vadd.f32 %v18686_v28, %v12761_v31  ;;  %v352_v31 = vld [vmem:[%s18297_s0 + $0x472] sm:$0xff] }
 0x2a6   :  { %v2589_v50 = vpop.f32.mrf.mxu1  ;;  %2780 = vmatmul.mubr.bf16.gmra.mxu1 %v518_v32  ;;  %v1701_v20 = vpop.f32.mrf.mxu0  ;;  %v9292_v32 = vld [vmem:[%s18297_s0 + $0x61] sm:$0xff] }
 0x2a7   :  { %v13767_v59 = vadd.f32 %v2589_v50, %v1981_v22  ;;  %3965 = vmatprep.mubr.bf16.mxu1 %v3579_v1  ;;  %v18682_v1 = vld [vmem:[#allocation112_spill] sm:$0xff]  ;;  %v3578_v20 = vpack.c.bf16 %v9182_v42, %v9181_v24 }
 0x2a8   :  { %v2591_v51 = vpop.f32.mrf.mxu1  ;;  %v13775_v25 = vpop.f32.mrf.mxu0  ;;  %v1984_v19 = vadd.f32 %v18683_v45, %v18682_v1  ;;  %v351_v42 = vld [vmem:[%s18297_s0 + $0x46a] sm:$0xff]  ;;  %v508_v45 = vpack.c.bf16 %v350_v62, %v349_v44 }
 0x2a9   :  { %18681 = vst [vmem:[#allocation35_spill] sm:$0xff] %v13775_v25  ;;  %v3582_v51 = vpack.c.bf16 %v9292_v32, %v9291_v57  ;;  %v9184_v57 = vld [vmem:[%s18297_s0 + $0x60] sm:$0xff]  ;;  %v18691_v62 = vld [vmem:[#allocation36_spill] sm:$0xff] }
 0x2aa   :  { %v2592_v22 = vpop.f32.mrf.mxu1  ;;  %v1704_v50 = vpop.f32.mrf.mxu0 }
 0x2ab   :  { %v13785_v2 = vadd.f32 %v2592_v22, %v1984_v19  ;;  %v9293_v19 = vld [vmem:[%s18297_s0 + $0x69] sm:$0xff]  ;;  %v511_v50 = vpack.c.bf16 %v352_v31, %v351_v42 }
 0x2ac   :  { %v2594_v25 = vpop.f32.mrf.mxu1  ;;  %v13787_v36 = vpop.f32.mrf.mxu0  ;;  %10180 = vmatmul.mubr.bf16.gmra.mxu0 %v502_v6  ;;  %v9183_v6 = vld [vmem:[%s18297_s0 + $0x50] sm:$0xff] }
 0x2ad   :  { %18684 = vst [vmem:[#allocation32_spill] sm:$0xff] %v13785_v2  ;;  %18685 = vst [vmem:[#allocation112_spill] sm:$0xff] %v13787_v36  ;;  %10183 = vmatprep.mubr.bf16.mxu0 %v505_v41  ;;  %v18689_v41 = vld [vmem:[#allocation39_spill] sm:$0xff]  ;;  %v3581_v28 = vpack.c.bf16 %v9184_v57, %v9183_v6  ;;  %v18692_v36 = vld [vmem:[#allocation101_spill] sm:$0xff] }
 0x2ae   :  { %v2597_v5 = vpop.f32.mrf.mxu1  ;;  %3966 = vmatmul.mubr.bf16.vlgmr.msra.gmra.mxu1 %v3578_v20  ;;  %v1709_v24 = vpop.f32.mrf.mxu0  ;;  %v1992_v22 = vadd.f32 %v18689_v41, %v12791_v29  ;;  %v353_v29 = vld [vmem:[%s18297_s0 + $0x482] sm:$0xff]  ;;  %v354_v42 = vld [vmem:[%s18297_s0 + $0x48a] sm:$0xff]  ;;  %v355_v57 = vld [vmem:[%s18297_s0 + $0x492] sm:$0xff] }
 0x2af   :  { %v13803_v25 = vadd.f32 %v2597_v5, %v1989_v27  ;;  %3973 = vmatprep.mubr.bf16.mxu1 %v3582_v51  ;;  %v9294_v27 = vld [vmem:[%s18297_s0 + $0x71] sm:$0xff] }
 0x2b0   :  { %v2599_v32 = vpop.f32.mrf.mxu1  ;;  %v13811_v1 = vpop.f32.mrf.mxu0  ;;  %v3585_v24 = vpack.c.bf16 %v9294_v27, %v9293_v19  ;;  %v9185_v27 = vld [vmem:[%s18297_s0 + $0x68] sm:$0xff]  ;;  %v9186_v41 = vld [vmem:[%s18297_s0 + $0x70] sm:$0xff] }
 0x2b1   :  { %18687 = vst [vmem:[#allocation34_spill] sm:$0xff] %v13803_v25  ;;  %18688 = vst [vmem:[#allocation37_spill] sm:$0xff] %v13811_v1  ;;  %v1997_v1 = vadd.f32 %v18691_v62, %v12808_v63  ;;  %v356_v63 = vld [vmem:[%s18297_s0 + $0x4a2] sm:$0xff] }
 0x2b2   :  { %v2600_v20 = vpop.f32.mrf.mxu1  ;;  %v1712_v51 = vpop.f32.mrf.mxu0  ;;  %v517_v62 = vpack.c.bf16 %v356_v63, %v355_v57  ;;  %v357_v57 = vld [vmem:[%s18297_s0 + $0x4aa] sm:$0xff]  ;;  %v358_v63 = vld [vmem:[%s18297_s0 + $0x4b2] sm:$0xff] }
 0x2b3   :  { %v13821_v5 = vadd.f32 %v2600_v20, %v1992_v22  ;;  %v514_v20 = vpack.c.bf16 %v354_v42, %v353_v29  ;;  %v9296_v51 = vld [vmem:[%s18297_s0 + $0x89] sm:$0xff] }
 0x2b4   :  { %v2602_v32 = vpop.f32.mrf.mxu1  ;;  %v10089_v44 = vpop.f32.mrf.mxu0  ;;  %10184 = vmatmul.mubr.bf16.gmra.mxu0 %v508_v45  ;;  %v18695_v45 = vld [vmem:[#allocation99_spill] sm:$0xff]  ;;  %v18700_v29 = vld [vmem:[#allocation100_spill] sm:$0xff] }
 0x2b5   :  { %18690 = vst [vmem:[#allocation39_spill] sm:$0xff] %v13821_v5  ;;  %v13826_v25 = vadd.f32 %v10089_v44, %v18692_v36  ;;  %10187 = vmatprep.mubr.bf16.mxu0 %v511_v50  ;;  %v18698_v32 = vld [vmem:[#allocation102_spill] sm:$0xff] }
 0x2b6   :  { %v2605_v31 = vpop.f32.mrf.mxu1  ;;  %3974 = vmatmul.mubr.bf16.gmra.mxu1 %v3581_v28  ;;  %v2822_v6 = vpop.f32.mrf.mxu0  ;;  %v18697_v28 = vld [vmem:[#allocation38_spill] sm:$0xff] }
 0x2b7   :  { %18693 = vst [vmem:[#allocation36_spill] sm:$0xff] %v13826_v25  ;;  %v13840_v36 = vadd.f32 %v2605_v31, %v1997_v1  ;;  %v13843_v19 = vadd.f32 %v2822_v6, %v18695_v45  ;;  %3981 = vmatprep.mubr.bf16.mxu1 %v3585_v24  ;;  %v9295_v1 = vld [vmem:[%s18297_s0 + $0x81] sm:$0xff]  ;;  %v2000_v24 = vadd.f32 %v18697_v28, %v12837_v18  ;;  %v18703_v18 = vld [vmem:[#allocation105_spill] sm:$0xff] }
 0x2b8   :  { %v2607_v22 = vpop.f32.mrf.mxu1  ;;  %v10090_v50 = vpop.f32.mrf.mxu0  ;;  %v3584_v45 = vpack.c.bf16 %v9186_v41, %v9185_v27  ;;  %v9397_v41 = vld [vmem:[%s18297_s0 + $0x42] sm:$0xff] }
 0x2b9   :  { %18694 = vst [vmem:[#allocation101_spill] sm:$0xff] %v13840_v36  ;;  %18696 = vst [vmem:[#allocation99_spill] sm:$0xff] %v13843_v19  ;;  %v13860_v44 = vadd.f32 %v10090_v50, %v18698_v32  ;;  %v3588_v19 = vpack.c.bf16 %v9296_v51, %v9295_v1  ;;  %v18702_v36 = vld [vmem:[#allocation41_spill] sm:$0xff]  ;;  %v9188_v1 = vld [vmem:[%s18297_s0 + $0x88] sm:$0xff]  ;;  %v520_v32 = vpack.c.bf16 %v358_v63, %v357_v57 }
 0x2ba   :  { %v2608_v31 = vpop.f32.mrf.mxu1  ;;  %v2825_v6 = vpop.f32.mrf.mxu0  ;;  %v2005_v2 = vadd.f32 %v18702_v36, %v12858_v21  ;;  %v9398_v21 = vld [vmem:[%s18297_s0 + $0x4a] sm:$0xff]  ;;  %v18705_v36 = vld [vmem:[#allocation103_spill] sm:$0xff] }
 0x2bb   :  { %18699 = vst [vmem:[#allocation38_spill] sm:$0xff] %v13860_v44  ;;  %v13862_v22 = vadd.f32 %v2608_v31, %v2000_v24  ;;  %v13865_v42 = vadd.f32 %v2825_v6, %v18700_v29  ;;  %v18708_v6 = vld [vmem:[#allocation106_spill] sm:$0xff]  ;;  %v3580_v29 = vpack.c.bf16 %v9398_v21, %v9397_v41  ;;  %v18710_v57 = vld [vmem:[#allocation104_spill] sm:$0xff]  ;;  %v9399_v41 = vld [vmem:[%s18297_s0 + $0x52] sm:$0xff] }
 0x2bc   :  { %v2610_v25 = vpop.f32.mrf.mxu1  ;;  %v10093_v5 = vpop.f32.mrf.mxu0  ;;  %10188 = vmatmul.mubr.bf16.gmra.mxu0 %v514_v20  ;;  %v9187_v20 = vld [vmem:[%s18297_s0 + $0x80] sm:$0xff]  ;;  %v18712_v44 = vld [vmem:[#allocation40_spill] sm:$0xff] }
 0x2bd   :  { %18701 = vst [vmem:[#allocation102_spill] sm:$0xff] %v13865_v42  ;;  %v13870_v28 = vadd.f32 %v10093_v5, %v18703_v18  ;;  %10191 = vmatprep.mubr.bf16.mxu0 %v517_v62  ;;  %v9298_v62 = vld [vmem:[%s18297_s0 + $0xa1] sm:$0xff]  ;;  %v2013_v42 = vadd.f32 %v18712_v44, %v12900_v54  ;;  %v9402_v54 = vld [vmem:[%s18297_s0 + $0x72] sm:$0xff] }
 0x2be   :  { %v2613_v27 = vpop.f32.mrf.mxu1  ;;  %3982 = vmatmul.mubr.bf16.gmra.mxu1 %v3584_v45  ;;  %v2838_v25 = vpop.f32.mrf.mxu0  ;;  %v9400_v21 = vld [vmem:[%s18297_s0 + $0x62] sm:$0xff] }
 0x2bf   :  { %18704 = vst [vmem:[#allocation100_spill] sm:$0xff] %v13870_v28  ;;  %v13884_v5 = vadd.f32 %v2613_v27, %v2005_v2  ;;  %v13887_v50 = vadd.f32 %v2838_v25, %v18705_v36  ;;  %3989 = vmatprep.mubr.bf16.mxu1 %v3588_v19  ;;  %v9297_v2 = vld [vmem:[%s18297_s0 + $0x91] sm:$0xff]  ;;  %v18707_v19 = vld [vmem:[#allocation43_spill] sm:$0xff]  ;;  %v3587_v25 = vpack.c.bf16 %v9188_v1, %v9187_v20 }
 0x2c0   :  { %v2615_v51 = vpop.f32.mrf.mxu1  ;;  %v10094_v24 = vpop.f32.mrf.mxu0  ;;  %v2008_v31 = vadd.f32 %v18707_v19, %v12885_v14  ;;  %v18713_v14 = vld [vmem:[#allocation109_spill] sm:$0xff]  ;;  %v9401_v1 = vld [vmem:[%s18297_s0 + $0x6a] sm:$0xff] }
 0x2c1   :  { %18706 = vst [vmem:[#allocation41_spill] sm:$0xff] %v13887_v50  ;;  %v13904_v45 = vadd.f32 %v10094_v24, %v18708_v6  ;;  %v3591_v51 = vpack.c.bf16 %v9298_v62, %v9297_v2  ;;  %v9190_v2 = vld [vmem:[%s18297_s0 + $0xa0] sm:$0xff]  ;;  %v3583_v6 = vpack.c.bf16 %v9400_v21, %v9399_v41  ;;  %v18720_v41 = vld [vmem:[#allocation108_spill] sm:$0xff] }
 0x2c2   :  { %v2616_v18 = vpop.f32.mrf.mxu1  ;;  %v2841_v27 = vpop.f32.mrf.mxu0 }
 0x2c3   :  { %18709 = vst [vmem:[#allocation105_spill] sm:$0xff] %v13904_v45  ;;  %v13906_v36 = vadd.f32 %v2616_v18, %v2008_v31  ;;  %v13909_v63 = vadd.f32 %v2841_v27, %v18710_v57  ;;  %v18717_v18 = vld [vmem:[#allocation42_spill] sm:$0xff]  ;;  %v18721_v45 = vld [vmem:[#allocation45_spill] sm:$0xff] }
 0x2c4   :  { %v2618_v28 = vpop.f32.mrf.mxu1  ;;  %v10097_v50 = vpop.f32.mrf.mxu0  ;;  %10192 = vmatmul.mubr.bf16.gmra.mxu0 %v520_v32  ;;  %v9189_v32 = vld [vmem:[%s18297_s0 + $0x90] sm:$0xff]  ;;  %v2016_v27 = vadd.f32 %v18717_v18, %v12927_v52  ;;  %v18722_v52 = vld [vmem:[#allocation114_spill] sm:$0xff] }
 0x2c5   :  { %18711 = vst [vmem:[#allocation103_spill] sm:$0xff] %v13909_v63  ;;  %v13914_v19 = vadd.f32 %v10097_v50, %v18713_v14  ;;  %10211 = vmatprep.mubr.bf16.mxu0 %v3580_v29  ;;  %v18715_v50 = vld [vmem:[#allocation107_spill] sm:$0xff]  ;;  %v9300_v29 = vld [vmem:[%s18297_s0 + $0xb1] sm:$0xff]  ;;  %v2021_v63 = vadd.f32 %v18721_v45, %v12942_v26 }
 0x2c6   :  { %v2621_v20 = vpop.f32.mrf.mxu1  ;;  %3990 = vmatmul.mubr.bf16.gmra.mxu1 %v3587_v25  ;;  %v2854_v28 = vpop.f32.mrf.mxu0  ;;  %v18718_v25 = vld [vmem:[#allocation110_spill] sm:$0xff]  ;;  %v9406_v26 = vld [vmem:[%s18297_s0 + $0xa2] sm:$0xff] }
 0x2c7   :  { %18714 = vst [vmem:[#allocation43_spill] sm:$0xff] %v13914_v19  ;;  %v13928_v44 = vadd.f32 %v2621_v20, %v2013_v42  ;;  %v13931_v24 = vadd.f32 %v2854_v28, %v18715_v50  ;;  %3997 = vmatprep.mubr.bf16.mxu1 %v3591_v51  ;;  %v9299_v42 = vld [vmem:[%s18297_s0 + $0xa9] sm:$0xff]  ;;  %v3586_v51 = vpack.c.bf16 %v9402_v54, %v9401_v1 }
 0x2c8   :  { %v2623_v62 = vpop.f32.mrf.mxu1  ;;  %v10098_v31 = vpop.f32.mrf.mxu0  ;;  %v3590_v28 = vpack.c.bf16 %v9190_v2, %v9189_v32  ;;  %v9403_v1 = vld [vmem:[%s18297_s0 + $0x82] sm:$0xff]  ;;  %v9404_v54 = vld [vmem:[%s18297_s0 + $0x8a] sm:$0xff]  ;;  %v9405_v2 = vld [vmem:[%s18297_s0 + $0x92] sm:$0xff] }
 0x2c9   :  { %18716 = vst [vmem:[#allocation106_spill] sm:$0xff] %v13931_v24  ;;  %v13948_v57 = vadd.f32 %v10098_v31, %v18718_v25  ;;  %v3594_v62 = vpack.c.bf16 %v9300_v29, %v9299_v42  ;;  %v9192_v42 = vld [vmem:[%s18297_s0 + $0xb0] sm:$0xff]  ;;  %v3589_v25 = vpack.c.bf16 %v9404_v54, %v9403_v1 }
 0x2ca   :  { %v2624_v14 = vpop.f32.mrf.mxu1  ;;  %v2857_v20 = vpop.f32.mrf.mxu0  ;;  %v18728_v1 = vld [vmem:[#allocation113_spill] sm:$0xff] }
 0x2cb   :  { %18719 = vst [vmem:[#allocation104_spill] sm:$0xff] %v13948_v57  ;;  %v13950_v50 = vadd.f32 %v2624_v14, %v2016_v27  ;;  %v13953_v21 = vadd.f32 %v2857_v20, %v18720_v41  ;;  %v18726_v14 = vld [vmem:[#allocation47_spill] sm:$0xff]  ;;  %v3592_v41 = vpack.c.bf16 %v9406_v26, %v9405_v2  ;;  %v9408_v2 = vld [vmem:[%s18297_s0 + $0xb2] sm:$0xff] }
 0x2cc   :  { %v2626_v19 = vpop.f32.mrf.mxu1  ;;  %v10101_v24 = vpop.f32.mrf.mxu0  ;;  %10212 = vmatmul.mubr.bf16.vlgmr.msra.gmra.mxu0 %v3583_v6  ;;  %v9191_v6 = vld [vmem:[%s18297_s0 + $0xa8] sm:$0xff]  ;;  %v2024_v20 = vadd.f32 %v18726_v14, %v12972_v7  ;;  %v18730_v7 = vld [vmem:[#allocation117_spill] sm:$0xff] }
 0x2cd   :  { %v13958_v18 = vadd.f32 %v10101_v24, %v18722_v52  ;;  %10215 = vmatprep.mubr.bf16.mxu0 %v3586_v51  ;;  %v18724_v24 = vld [vmem:[#allocation111_spill] sm:$0xff] }
 0x2ce   :  { %v2629_v32 = vpop.f32.mrf.mxu1  ;;  %3998 = vmatmul.mubr.bf16.gmra.mxu1 %v3590_v28  ;;  %v2870_v19 = vpop.f32.mrf.mxu0  ;;  %v9302_v51 = vld [vmem:[%s18297_s0 + $0xc9] sm:$0xff] }
 0x2cf   :  { %18723 = vst [vmem:[#allocation40_spill] sm:$0xff] %v13958_v18  ;;  %v13972_v45 = vadd.f32 %v2629_v32, %v2021_v63  ;;  %v13975_v31 = vadd.f32 %v2870_v19, %v18724_v24  ;;  %4005 = vmatprep.mubr.bf16.mxu1 %v3594_v62  ;;  %v9301_v63 = vld [vmem:[%s18297_s0 + $0xc1] sm:$0xff]  ;;  %v3593_v32 = vpack.c.bf16 %v9192_v42, %v9191_v6  ;;  %v18729_v18 = vld [vmem:[#allocation44_spill] sm:$0xff] }
 0x2d0   :  { %v2631_v29 = vpop.f32.mrf.mxu1  ;;  %v10102_v27 = vpop.f32.mrf.mxu0  ;;  %v3597_v24 = vpack.c.bf16 %v9302_v51, %v9301_v63  ;;  %v2029_v57 = vadd.f32 %v18729_v18, %v12990_v47  ;;  %v9409_v42 = vld [vmem:[%s18297_s0 + $0xc2] sm:$0xff]  ;;  %v9410_v47 = vld [vmem:[%s18297_s0 + $0xca] sm:$0xff] }
 0x2d1   :  { %18725 = vst [vmem:[#allocation109_spill] sm:$0xff] %v13975_v31  ;;  %v13992_v28 = vadd.f32 %v10102_v27, %v12806_v0  ;;  %v9407_v0 = vld [vmem:[%s18297_s0 + $0xaa] sm:$0xff] }
 0x2d2   :  { %v2632_v62 = vpop.f32.mrf.mxu1  ;;  %v2873_v52 = vpop.f32.mrf.mxu0  ;;  %v9194_v63 = vld [vmem:[%s18297_s0 + $0xc8] sm:$0xff] }
 0x2d3   :  { %18727 = vst [vmem:[#allocation107_spill] sm:$0xff] %v13992_v28  ;;  %v13994_v19 = vadd.f32 %v2632_v62, %v2024_v20  ;;  %v13997_v54 = vadd.f32 %v2873_v52, %v18728_v1  ;;  %v9304_v62 = vld [vmem:[%s18297_s0 + $0xe1] sm:$0xff]  ;;  %v18736_v28 = vld [vmem:[#allocation49_spill] sm:$0xff] }
 0x2d4   :  { %v2634_v29 = vpop.f32.mrf.mxu1  ;;  %v10105_v31 = vpop.f32.mrf.mxu0  ;;  %10216 = vmatmul.mubr.bf16.gmra.mxu0 %v3589_v25  ;;  %v9193_v25 = vld [vmem:[%s18297_s0 + $0xc0] sm:$0xff] }
 0x2d5   :  { %v14002_v14 = vadd.f32 %v10105_v31, %v18730_v7  ;;  %10219 = vmatprep.mubr.bf16.mxu0 %v3592_v41  ;;  %v18732_v31 = vld [vmem:[#allocation115_spill] sm:$0xff]  ;;  %v3595_v41 = vpack.c.bf16 %v9408_v2, %v9407_v0  ;;  %v18734_v52 = vld [vmem:[#allocation46_spill] sm:$0xff]  ;;  %v18735_v0 = vld [vmem:[#allocation116_spill] sm:$0xff] }
 0x2d6   :  { %v2637_v26 = vpop.f32.mrf.mxu1  ;;  %4006 = vmatmul.mubr.bf16.gmra.mxu1 %v3593_v32  ;;  %v2886_v6 = vpop.f32.mrf.mxu0  ;;  %v2032_v32 = vadd.f32 %v18734_v52, %v13018_v23  ;;  %v18737_v52 = vld [vmem:[#allocation51_spill] sm:$0xff] }
 0x2d7   :  { %18731 = vst [vmem:[#allocation42_spill] sm:$0xff] %v14002_v14  ;;  %v14016_v18 = vadd.f32 %v2637_v26, %v2029_v57  ;;  %v14019_v27 = vadd.f32 %v2886_v6, %v18732_v31  ;;  %4013 = vmatprep.mubr.bf16.mxu1 %v3597_v24  ;;  %v9303_v57 = vld [vmem:[%s18297_s0 + $0xd1] sm:$0xff]  ;;  %v3598_v24 = vpack.c.bf16 %v9410_v47, %v9409_v42  ;;  %v9412_v42 = vld [vmem:[%s18297_s0 + $0xe2] sm:$0xff] }
 0x2d8   :  { %v2639_v51 = vpop.f32.mrf.mxu1  ;;  %v10106_v20 = vpop.f32.mrf.mxu0  ;;  %v3596_v26 = vpack.c.bf16 %v9194_v63, %v9193_v25  ;;  %v3600_v31 = vpack.c.bf16 %v9304_v62, %v9303_v57  ;;  %v9413_v63 = vld [vmem:[%s18297_s0 + $0xea] sm:$0xff] }
 0x2d9   :  { %18733 = vst [vmem:[#allocation110_spill] sm:$0xff] %v14019_v27  ;;  %v14036_v1 = vadd.f32 %v10106_v20, %v12898_v37  ;;  %v2037_v27 = vadd.f32 %v18736_v28, %v13033_v55  ;;  %v9411_v37 = vld [vmem:[%s18297_s0 + $0xd2] sm:$0xff]  ;;  %v9196_v20 = vld [vmem:[%s18297_s0 + $0xe0] sm:$0xff] }
 0x2da   :  { %v2640_v29 = vpop.f32.mrf.mxu1  ;;  %v2889_v7 = vpop.f32.mrf.mxu0  ;;  %v3601_v62 = vpack.c.bf16 %v9412_v42, %v9411_v37 }
 0x2db   :  { %v14038_v6 = vadd.f32 %v2640_v29, %v2032_v32  ;;  %v14041_v2 = vadd.f32 %v2889_v7, %v18735_v0  ;;  %v2040_v32 = vadd.f32 %v18737_v52, %v13060_v40 }
 0x2dc   :  { %v2642_v51 = vpop.f32.mrf.mxu1  ;;  %v10109_v14 = vpop.f32.mrf.mxu0  ;;  %10220 = vmatmul.mubr.bf16.gmra.mxu0 %v3595_v41 }
 0x2dd   :  { %v14046_v23 = vadd.f32 %v10109_v14, %v12961_v8  ;;  %10223 = vmatprep.mubr.bf16.mxu0 %v3598_v24  ;;  %v9414_v8 = vld [vmem:[%s18297_s0 + $0xf2] sm:$0xff] }
 0x2de   :  { %v2645_v47 = vpop.f32.mrf.mxu1  ;;  %4014 = vmatmul.mubr.bf16.gmra.mxu1 %v3596_v26  ;;  %v2902_v25 = vpop.f32.mrf.mxu0  ;;  %v9195_v14 = vld [vmem:[%s18297_s0 + $0xd0] sm:$0xff]  ;;  %v3604_v29 = vpack.c.bf16 %v9414_v8, %v9413_v63 }
 0x2df   :  { %v14060_v55 = vadd.f32 %v2645_v47, %v2037_v27  ;;  %v14063_v28 = vadd.f32 %v2902_v25, %v12919_v13  ;;  %4021 = vmatprep.mubr.bf16.mxu1 %v3600_v31  ;;  %v9305_v27 = vld [vmem:[%s18297_s0 + $0xe9] sm:$0xff]  ;;  %v9306_v13 = vld [vmem:[%s18297_s0 + $0xf1] sm:$0xff]  ;;  %v3599_v0 = vpack.c.bf16 %v9196_v20, %v9195_v14 }
 0x2e0   :  { %v2647_v41 = vpop.f32.mrf.mxu1  ;;  %v10110_v57 = vpop.f32.mrf.mxu0  ;;  %v3603_v37 = vpack.c.bf16 %v9306_v13, %v9305_v27  ;;  %v18739_v25 = vld [vmem:[#allocation48_spill] sm:$0xff]  ;;  %v9417_v14 = vld [vmem:[%s18297_s0 + $0x112] sm:$0xff] }
 0x2e1   :  { %v14080_v24 = vadd.f32 %v10110_v57, %v12985_v46  ;;  %v2045_v41 = vadd.f32 %v18739_v25, %v13075_v30  ;;  %v9415_v46 = vld [vmem:[%s18297_s0 + $0x102] sm:$0xff] }
 0x2e2   :  { %v2648_v7 = vpop.f32.mrf.mxu1  ;;  %v2905_v26 = vpop.f32.mrf.mxu0  ;;  %v9197_v57 = vld [vmem:[%s18297_s0 + $0xe8] sm:$0xff] }
 0x2e3   :  { %18738 = vst [vmem:[#allocation108_spill] sm:$0xff] %v14080_v24  ;;  %v14082_v31 = vadd.f32 %v2648_v7, %v2040_v32  ;;  %v14085_v51 = vadd.f32 %v2905_v26, %v12940_v4  ;;  %v9416_v4 = vld [vmem:[%s18297_s0 + $0x10a] sm:$0xff]  ;;  %v9307_v32 = vld [vmem:[%s18297_s0 + $0x101] sm:$0xff] }
 0x2e4   :  { %v2650_v42 = vpop.f32.mrf.mxu1  ;;  %v10113_v47 = vpop.f32.mrf.mxu0  ;;  %10224 = vmatmul.mubr.bf16.gmra.mxu0 %v3601_v62  ;;  %v9198_v62 = vld [vmem:[%s18297_s0 + $0xf0] sm:$0xff]  ;;  %v3607_v52 = vpack.c.bf16 %v9416_v4, %v9415_v46 }
 0x2e5   :  { %v14090_v40 = vadd.f32 %v10113_v47, %v13052_v38  ;;  %10227 = vmatprep.mubr.bf16.mxu0 %v3604_v29  ;;  %v9418_v38 = vld [vmem:[%s18297_s0 + $0x122] sm:$0xff]  ;;  %v18742_v29 = vld [vmem:[#allocation50_spill] sm:$0xff]  ;;  %v3602_v47 = vpack.c.bf16 %v9198_v62, %v9197_v57 }
 0x2e6   :  { %v2653_v63 = vpop.f32.mrf.mxu1  ;;  %4022 = vmatmul.mubr.bf16.gmra.mxu1 %v3599_v0  ;;  %v2918_v8 = vpop.f32.mrf.mxu0  ;;  %v2048_v7 = vadd.f32 %v18742_v29, %v13102_v12  ;;  %v3610_v0 = vpack.c.bf16 %v9418_v38, %v9417_v14  ;;  %v9421_v57 = vld [vmem:[%s18297_s0 + $0x142] sm:$0xff] }
 0x2e7   :  { %18740 = vst [vmem:[#allocation45_spill] sm:$0xff] %v14090_v40  ;;  %v14104_v30 = vadd.f32 %v2653_v63, %v2045_v41  ;;  %v14107_v20 = vadd.f32 %v2918_v8, %v13010_v15  ;;  %4029 = vmatprep.mubr.bf16.mxu1 %v3603_v37  ;;  %v9308_v15 = vld [vmem:[%s18297_s0 + $0x109] sm:$0xff]  ;;  %v18745_v8 = vld [vmem:[#allocation53_spill] sm:$0xff] }
 0x2e8   :  { %v2655_v27 = vpop.f32.mrf.mxu1  ;;  %v10114_v13 = vpop.f32.mrf.mxu0  ;;  %v3606_v46 = vpack.c.bf16 %v9308_v15, %v9307_v32 }
 0x2e9   :  { %18741 = vst [vmem:[#allocation114_spill] sm:$0xff] %v14107_v20  ;;  %v14124_v26 = vadd.f32 %v10114_v13, %v13073_v49  ;;  %v2053_v27 = vadd.f32 %v18745_v8, %v13120_v3  ;;  %v9419_v49 = vld [vmem:[%s18297_s0 + $0x12a] sm:$0xff]  ;;  %v9199_v13 = vld [vmem:[%s18297_s0 + $0x100] sm:$0xff] }
 0x2ea   :  { %v2656_v37 = vpop.f32.mrf.mxu1  ;;  %v2921_v42 = vpop.f32.mrf.mxu0  ;;  %v9422_v3 = vld [vmem:[%s18297_s0 + $0x14a] sm:$0xff] }
 0x2eb   :  { %18743 = vst [vmem:[#allocation111_spill] sm:$0xff] %v14124_v26  ;;  %v14126_v25 = vadd.f32 %v2656_v37, %v2048_v7  ;;  %v14129_v41 = vadd.f32 %v2921_v42, %v13031_v10  ;;  %v9420_v10 = vld [vmem:[%s18297_s0 + $0x132] sm:$0xff]  ;;  %v18749_v42 = vld [vmem:[#allocation7_spill] sm:$0xff] }
 0x2ec   :  { %v2658_v4 = vpop.f32.mrf.mxu1  ;;  %v10117_v63 = vpop.f32.mrf.mxu0  ;;  %10228 = vmatmul.mubr.bf16.gmra.mxu0 %v3607_v52  ;;  %v9200_v52 = vld [vmem:[%s18297_s0 + $0x108] sm:$0xff]  ;;  %v3613_v29 = vpack.c.bf16 %v9420_v10, %v9419_v49  ;;  %v9309_v7 = vld [vmem:[%s18297_s0 + $0x111] sm:$0xff]  ;;  %v18751_v49 = vld [vmem:[#allocation118_spill] sm:$0xff] }
 0x2ed   :  { %18744 = vst [vmem:[#allocation47_spill] sm:$0xff] %v14129_v41  ;;  %v14134_v12 = vadd.f32 %v10117_v63, %v13139_v16  ;;  %10231 = vmatprep.mubr.bf16.mxu0 %v3610_v0  ;;  %v18748_v0 = vld [vmem:[#allocation55_spill] sm:$0xff]  ;;  %v3605_v8 = vpack.c.bf16 %v9200_v52, %v9199_v13 }
 0x2ee   :  { %v2661_v14 = vpop.f32.mrf.mxu1  ;;  %4030 = vmatmul.mubr.bf16.gmra.mxu1 %v3602_v47  ;;  %v2934_v38 = vpop.f32.mrf.mxu0  ;;  %v2056_v37 = vadd.f32 %v18748_v0, %v13148_v48  ;;  %v18755_v48 = vld [vmem:[#allocation62_spill] sm:$0xff] }
 0x2ef   :  { %18746 = vst [vmem:[#allocation113_spill] sm:$0xff] %v14134_v12  ;;  %v14148_v16 = vadd.f32 %v2661_v14, %v2053_v27  ;;  %v14151_v62 = vadd.f32 %v2934_v38, %v13094_v43  ;;  %4037 = vmatprep.mubr.bf16.mxu1 %v3606_v46  ;;  %v9310_v43 = vld [vmem:[%s18297_s0 + $0x121] sm:$0xff]  ;;  %v3616_v46 = vpack.c.bf16 %v9422_v3, %v9421_v57  ;;  %v9423_v57 = vld [vmem:[%s18297_s0 + $0x152] sm:$0xff] }
 0x2f0   :  { %v2663_v32 = vpop.f32.mrf.mxu1  ;;  %v10118_v15 = vpop.f32.mrf.mxu0  ;;  %v3609_v14 = vpack.c.bf16 %v9310_v43, %v9309_v7  ;;  %v18753_v12 = vld [vmem:[#allocation119_spill] sm:$0xff]  ;;  %v9201_v43 = vld [vmem:[%s18297_s0 + $0x110] sm:$0xff] }
 0x2f1   :  { %18747 = vst [vmem:[#allocation44_spill] sm:$0xff] %v14151_v62  ;;  %v14168_v47 = vadd.f32 %v10118_v15, %v18749_v42  ;;  %v18754_v62 = vld [vmem:[#allocation52_spill] sm:$0xff]  ;;  %v9424_v3 = vld [vmem:[%s18297_s0 + $0x162] sm:$0xff] }
 0x2f2   :  { %v2664_v4 = vpop.f32.mrf.mxu1  ;;  %v2937_v63 = vpop.f32.mrf.mxu0  ;;  %v2061_v26 = vadd.f32 %v18754_v62, %v18753_v12  ;;  %v9425_v15 = vld [vmem:[%s18297_s0 + $0x16a] sm:$0xff]  ;;  %v9426_v12 = vld [vmem:[%s18297_s0 + $0x172] sm:$0xff] }
 0x2f3   :  { %18750 = vst [vmem:[#allocation117_spill] sm:$0xff] %v14168_v47  ;;  %v14170_v27 = vadd.f32 %v2664_v4, %v2056_v37  ;;  %v14173_v10 = vadd.f32 %v2937_v63, %v18751_v49  ;;  %v9202_v37 = vld [vmem:[%s18297_s0 + $0x120] sm:$0xff]  ;;  %v9311_v4 = vld [vmem:[%s18297_s0 + $0x129] sm:$0xff]  ;;  %v3619_v63 = vpack.c.bf16 %v9424_v3, %v9423_v57 }
 0x2f4   :  { %v2666_v38 = vpop.f32.mrf.mxu1  ;;  %v10121_v32 = vpop.f32.mrf.mxu0  ;;  %10232 = vmatmul.mubr.bf16.gmra.mxu0 %v3613_v29  ;;  %v18757_v29 = vld [vmem:[#allocation56_spill] sm:$0xff]  ;;  %v18760_v49 = vld [vmem:[#allocation54_spill] sm:$0xff]  ;;  %v18765_v57 = vld [vmem:[#allocation11_spill] sm:$0xff] }
 0x2f5   :  { %18752 = vst [vmem:[#allocation115_spill] sm:$0xff] %v14173_v10  ;;  %v14178_v0 = vadd.f32 %v10121_v32, %v18755_v48  ;;  %10235 = vmatprep.mubr.bf16.mxu0 %v3616_v46  ;;  %v18761_v38 = vld [vmem:[#allocation65_spill] sm:$0xff]  ;;  %v3622_v48 = vpack.c.bf16 %v9426_v12, %v9425_v15  ;;  %v18766_v3 = vld [vmem:[#allocation58_spill] sm:$0xff]  ;;  %v9427_v15 = vld [vmem:[%s18297_s0 + $0x182] sm:$0xff] }
 0x2f6   :  { %v2669_v13 = vpop.f32.mrf.mxu1  ;;  %4038 = vmatmul.mubr.bf16.gmra.mxu1 %v3605_v8  ;;  %v2950_v52 = vpop.f32.mrf.mxu0  ;;  %v18759_v8 = vld [vmem:[#allocation9_spill] sm:$0xff]  ;;  %v2069_v41 = vadd.f32 %v18766_v3, %v18765_v57 }
 0x2f7   :  { %18756 = vst [vmem:[#allocation46_spill] sm:$0xff] %v14178_v0  ;;  %v14192_v62 = vadd.f32 %v2669_v13, %v2061_v26  ;;  %v14195_v7 = vadd.f32 %v2950_v52, %v18757_v29  ;;  %4045 = vmatprep.mubr.bf16.mxu1 %v3609_v14  ;;  %v9312_v26 = vld [vmem:[%s18297_s0 + $0x131] sm:$0xff]  ;;  %v2064_v14 = vadd.f32 %v18760_v49, %v18759_v8  ;;  %v18763_v0 = vld [vmem:[#allocation59_spill] sm:$0xff]  ;;  %v18767_v8 = vld [vmem:[#allocation74_spill] sm:$0xff] }
 0x2f8   :  { %v2671_v42 = vpop.f32.mrf.mxu1  ;;  %v10122_v46 = vpop.f32.mrf.mxu0  ;;  %v3608_v29 = vpack.c.bf16 %v9202_v37, %v9201_v43  ;;  %v3612_v47 = vpack.c.bf16 %v9312_v26, %v9311_v4  ;;  %v9429_v43 = vld [vmem:[%s18297_s0 + $0x192] sm:$0xff]  ;;  %v9203_v26 = vld [vmem:[%s18297_s0 + $0x128] sm:$0xff] }
 0x2f9   :  { %18758 = vst [vmem:[#allocation116_spill] sm:$0xff] %v14195_v7  ;;  %v14212_v32 = vadd.f32 %v10122_v46, %v18761_v38  ;;  %v18769_v46 = vld [vmem:[#allocation68_spill] sm:$0xff]  ;;  %v18773_v57 = vld [vmem:[#allocation77_spill] sm:$0xff] }
 0x2fa   :  { %v2672_v13 = vpop.f32.mrf.mxu1  ;;  %v2953_v52 = vpop.f32.mrf.mxu0 }
 0x2fb   :  { %18762 = vst [vmem:[#allocation49_spill] sm:$0xff] %v14212_v32  ;;  %v14214_v42 = vadd.f32 %v2672_v13, %v2064_v14  ;;  %v14217_v7 = vadd.f32 %v2953_v52, %v18763_v0  ;;  %v9428_v0 = vld [vmem:[%s18297_s0 + $0x18a] sm:$0xff]  ;;  %v18772_v52 = vld [vmem:[#allocation61_spill] sm:$0xff] }
 0x2fc   :  { %v2674_v10 = vpop.f32.mrf.mxu1  ;;  %v10125_v40 = vpop.f32.mrf.mxu0  ;;  %10236 = vmatmul.mubr.bf16.gmra.mxu0 %v3619_v63  ;;  %v9204_v63 = vld [vmem:[%s18297_s0 + $0x130] sm:$0xff]  ;;  %v3625_v13 = vpack.c.bf16 %v9428_v0, %v9427_v15  ;;  %v18777_v15 = vld [vmem:[#allocation10_spill] sm:$0xff] }
 0x2fd   :  { %18764 = vst [vmem:[#allocation51_spill] sm:$0xff] %v14217_v7  ;;  %v14222_v49 = vadd.f32 %v10125_v40, %v18767_v8  ;;  %10239 = vmatprep.mubr.bf16.mxu0 %v3622_v48  ;;  %v9430_v40 = vld [vmem:[%s18297_s0 + $0x1a2] sm:$0xff]  ;;  %v18778_v0 = vld [vmem:[#allocation57_spill] sm:$0xff] }
 0x2fe   :  { %v2677_v12 = vpop.f32.mrf.mxu1  ;;  %4046 = vmatmul.mubr.bf16.gmra.mxu1 %v3608_v29  ;;  %v2966_v10 = vpop.f32.mrf.mxu0  ;;  %v9313_v48 = vld [vmem:[%s18297_s0 + $0x141] sm:$0xff]  ;;  %v3628_v8 = vpack.c.bf16 %v9430_v40, %v9429_v43  ;;  %v2077_v24 = vadd.f32 %v18778_v0, %v18777_v15  ;;  %v9431_v43 = vld [vmem:[%s18297_s0 + $0x1aa] sm:$0xff] }
 0x2ff   :  { %18768 = vst [vmem:[#allocation48_spill] sm:$0xff] %v14222_v49  ;;  %v14236_v37 = vadd.f32 %v2677_v12, %v2069_v41  ;;  %v14239_v4 = vadd.f32 %v2966_v10, %v18769_v46  ;;  %4053 = vmatprep.mubr.bf16.mxu1 %v3612_v47  ;;  %v9314_v41 = vld [vmem:[%s18297_s0 + $0x149] sm:$0xff]  ;;  %v3611_v46 = vpack.c.bf16 %v9204_v63, %v9203_v26 }
 0x300   :  { %v2679_v14 = vpop.f32.mrf.mxu1  ;;  %v10126_v38 = vpop.f32.mrf.mxu0  ;;  %v18771_v47 = vld [vmem:[#allocation8_spill] sm:$0xff]  ;;  %v18775_v49 = vld [vmem:[#allocation71_spill] sm:$0xff]  ;;  %v3615_v32 = vpack.c.bf16 %v9314_v41, %v9313_v48 }
 0x301   :  { %18770 = vst [vmem:[#allocation50_spill] sm:$0xff] %v14239_v4  ;;  %v2072_v29 = vadd.f32 %v18772_v52, %v18771_v47  ;;  %v14256_v3 = vadd.f32 %v10126_v38, %v18773_v57  ;;  %v9433_v26 = vld [vmem:[%s18297_s0 + $0x1c2] sm:$0xff]  ;;  %v18780_v63 = vld [vmem:[#allocation80_spill] sm:$0xff] }
 0x302   :  { %v2680_v12 = vpop.f32.mrf.mxu1  ;;  %v2969_v10 = vpop.f32.mrf.mxu0  ;;  %v9205_v48 = vld [vmem:[%s18297_s0 + $0x140] sm:$0xff]  ;;  %v9206_v41 = vld [vmem:[%s18297_s0 + $0x148] sm:$0xff] }
 0x303   :  { %18774 = vst [vmem:[#allocation53_spill] sm:$0xff] %v14256_v3  ;;  %v14258_v14 = vadd.f32 %v2680_v12, %v2072_v29  ;;  %v14261_v4 = vadd.f32 %v2969_v10, %v18775_v49  ;;  %v9432_v49 = vld [vmem:[%s18297_s0 + $0x1b2] sm:$0xff] }
 0x304   :  { %v2682_v7 = vpop.f32.mrf.mxu1  ;;  %v10129_v20 = vpop.f32.mrf.mxu0  ;;  %10240 = vmatmul.mubr.bf16.gmra.mxu0 %v3625_v13  ;;  %v9315_v29 = vld [vmem:[%s18297_s0 + $0x151] sm:$0xff]  ;;  %v3631_v57 = vpack.c.bf16 %v9432_v49, %v9431_v43  ;;  %v18787_v43 = vld [vmem:[#allocation15_spill] sm:$0xff] }
 0x305   :  { %18776 = vst [vmem:[#allocation55_spill] sm:$0xff] %v14261_v4  ;;  %v14266_v47 = vadd.f32 %v10129_v20, %v13392_v34  ;;  %10243 = vmatprep.mubr.bf16.mxu0 %v3628_v8  ;;  %v9434_v34 = vld [vmem:[%s18297_s0 + $0x1ca] sm:$0xff] }
 0x306   :  { %v2685_v40 = vpop.f32.mrf.mxu1  ;;  %4054 = vmatmul.mubr.bf16.gmra.mxu1 %v3611_v46  ;;  %v2982_v7 = vpop.f32.mrf.mxu0  ;;  %v18783_v8 = vld [vmem:[#allocation60_spill] sm:$0xff]  ;;  %v3634_v46 = vpack.c.bf16 %v9434_v34, %v9433_v26  ;;  %v9436_v26 = vld [vmem:[%s18297_s0 + $0x1e2] sm:$0xff] }
 0x307   :  { %18779 = vst [vmem:[#allocation7_spill] sm:$0xff] %v14266_v47  ;;  %v14280_v20 = vadd.f32 %v2685_v40, %v2077_v24  ;;  %v14283_v38 = vadd.f32 %v2982_v7, %v18780_v63  ;;  %4061 = vmatprep.mubr.bf16.mxu1 %v3615_v32  ;;  %v9316_v24 = vld [vmem:[%s18297_s0 + $0x161] sm:$0xff]  ;;  %v18782_v32 = vld [vmem:[#allocation13_spill] sm:$0xff]  ;;  %v3614_v40 = vpack.c.bf16 %v9206_v41, %v9205_v48  ;;  %v18788_v49 = vld [vmem:[#allocation64_spill] sm:$0xff] }
 0x308   :  { %v2687_v13 = vpop.f32.mrf.mxu1  ;;  %v10130_v52 = vpop.f32.mrf.mxu0  ;;  %v2080_v12 = vadd.f32 %v18783_v8, %v18782_v32  ;;  %v18785_v63 = vld [vmem:[#allocation83_spill] sm:$0xff]  ;;  %v3618_v47 = vpack.c.bf16 %v9316_v24, %v9315_v29  ;;  %v2085_v4 = vadd.f32 %v18788_v49, %v18787_v43  ;;  %v9437_v48 = vld [vmem:[%s18297_s0 + $0x1ea] sm:$0xff]  ;;  %v18790_v41 = vld [vmem:[#allocation89_spill] sm:$0xff] }
 0x309   :  { %18781 = vst [vmem:[#allocation118_spill] sm:$0xff] %v14283_v38  ;;  %v14300_v10 = vadd.f32 %v10130_v52, %v13413_v11  ;;  %v9435_v11 = vld [vmem:[%s18297_s0 + $0x1d2] sm:$0xff]  ;;  %v9208_v24 = vld [vmem:[%s18297_s0 + $0x160] sm:$0xff] }
 0x30a   :  { %v2688_v15 = vpop.f32.mrf.mxu1  ;;  %v2985_v0 = vpop.f32.mrf.mxu0  ;;  %v9207_v29 = vld [vmem:[%s18297_s0 + $0x150] sm:$0xff] }
 0x30b   :  { %18784 = vst [vmem:[#allocation119_spill] sm:$0xff] %v14300_v10  ;;  %v14302_v7 = vadd.f32 %v2688_v15, %v2080_v12  ;;  %v14305_v13 = vadd.f32 %v2985_v0, %v18785_v63  ;;  %v9317_v12 = vld [vmem:[%s18297_s0 + $0x169] sm:$0xff] }
 0x30c   :  { %v2690_v38 = vpop.f32.mrf.mxu1  ;;  %v10133_v3 = vpop.f32.mrf.mxu0  ;;  %10244 = vmatmul.mubr.bf16.gmra.mxu0 %v3631_v57  ;;  %v18793_v15 = vld [vmem:[#allocation67_spill] sm:$0xff] }
 0x30d   :  { %18786 = vst [vmem:[#allocation52_spill] sm:$0xff] %v14305_v13  ;;  %v14310_v32 = vadd.f32 %v10133_v3, %v13485_v53  ;;  %10247 = vmatprep.mubr.bf16.mxu0 %v3634_v46  ;;  %v9438_v53 = vld [vmem:[%s18297_s0 + $0x1f2] sm:$0xff]  ;;  %v3637_v46 = vpack.c.bf16 %v9436_v26, %v9435_v11  ;;  %v18795_v11 = vld [vmem:[#allocation14_spill] sm:$0xff]  ;;  %v18796_v26 = vld [vmem:[#allocation63_spill] sm:$0xff] }
 0x30e   :  { %v2693_v34 = vpop.f32.mrf.mxu1  ;;  %4062 = vmatmul.mubr.bf16.gmra.mxu1 %v3614_v40  ;;  %v2998_v38 = vpop.f32.mrf.mxu0  ;;  %v3640_v63 = vpack.c.bf16 %v9438_v53, %v9437_v48  ;;  %v2093_v13 = vadd.f32 %v18796_v26, %v18795_v11  ;;  %v9440_v48 = vld [vmem:[%s18297_s0 + $0x20a] sm:$0xff] }
 0x30f   :  { %18789 = vst [vmem:[#allocation62_spill] sm:$0xff] %v14310_v32  ;;  %v14324_v3 = vadd.f32 %v2693_v34, %v2085_v4  ;;  %v14327_v52 = vadd.f32 %v2998_v38, %v18790_v41  ;;  %4069 = vmatprep.mubr.bf16.mxu1 %v3618_v47  ;;  %v9318_v4 = vld [vmem:[%s18297_s0 + $0x171] sm:$0xff]  ;;  %v3617_v34 = vpack.c.bf16 %v9208_v24, %v9207_v29 }
 0x310   :  { %v2695_v57 = vpop.f32.mrf.mxu1  ;;  %v10134_v8 = vpop.f32.mrf.mxu0  ;;  %v18792_v47 = vld [vmem:[#allocation12_spill] sm:$0xff]  ;;  %v3621_v32 = vpack.c.bf16 %v9318_v4, %v9317_v12  ;;  %v9441_v29 = vld [vmem:[%s18297_s0 + $0x212] sm:$0xff] }
 0x311   :  { %18791 = vst [vmem:[#allocation56_spill] sm:$0xff] %v14327_v52  ;;  %v2088_v0 = vadd.f32 %v18793_v15, %v18792_v47  ;;  %v14344_v40 = vadd.f32 %v10134_v8, %v13509_v33  ;;  %v18794_v41 = vld [vmem:[#allocation92_spill] sm:$0xff]  ;;  %v9439_v33 = vld [vmem:[%s18297_s0 + $0x202] sm:$0xff] }
 0x312   :  { %v2696_v43 = vpop.f32.mrf.mxu1  ;;  %v3001_v49 = vpop.f32.mrf.mxu0  ;;  %v9209_v8 = vld [vmem:[%s18297_s0 + $0x168] sm:$0xff]  ;;  %v9210_v12 = vld [vmem:[%s18297_s0 + $0x170] sm:$0xff] }
 0x313   :  { %v14346_v38 = vadd.f32 %v2696_v43, %v2088_v0  ;;  %v14349_v57 = vadd.f32 %v3001_v49, %v18794_v41  ;;  %v9319_v15 = vld [vmem:[%s18297_s0 + $0x181] sm:$0xff]  ;;  %v3620_v11 = vpack.c.bf16 %v9210_v12, %v9209_v8 }
 0x314   :  { %v2698_v10 = vpop.f32.mrf.mxu1  ;;  %v10137_v52 = vpop.f32.mrf.mxu0  ;;  %10248 = vmatmul.mubr.bf16.gmra.mxu0 %v3637_v46  ;;  %v18800_v0 = vld [vmem:[#allocation66_spill] sm:$0xff]  ;;  %v9445_v8 = vld [vmem:[%s18297_s0 + $0x242] sm:$0xff] }
 0x315   :  { %v14354_v47 = vadd.f32 %v10137_v52, %v13581_v39  ;;  %10251 = vmatprep.mubr.bf16.mxu0 %v3640_v63  ;;  %v9442_v39 = vld [vmem:[%s18297_s0 + $0x222] sm:$0xff] }
 0x316   :  { %v2701_v53 = vpop.f32.mrf.mxu1  ;;  %4070 = vmatmul.mubr.bf16.gmra.mxu1 %v3617_v34  ;;  %v3014_v10 = vpop.f32.mrf.mxu0  ;;  %v3646_v49 = vpack.c.bf16 %v9442_v39, %v9441_v29 }
 0x317   :  { %18797 = vst [vmem:[#allocation9_spill] sm:$0xff] %v14354_v47  ;;  %v14368_v52 = vadd.f32 %v2701_v53, %v2093_v13  ;;  %v14371_v24 = vadd.f32 %v3014_v10, %v13533_v35  ;;  %4077 = vmatprep.mubr.bf16.mxu1 %v3621_v32  ;;  %v9320_v35 = vld [vmem:[%s18297_s0 + $0x189] sm:$0xff]  ;;  %v3643_v13 = vpack.c.bf16 %v9440_v48, %v9439_v33  ;;  %v18799_v32 = vld [vmem:[#allocation17_spill] sm:$0xff]  ;;  %v18804_v48 = vld [vmem:[#allocation70_spill] sm:$0xff] }
 0x318   :  { %v2703_v4 = vpop.f32.mrf.mxu1  ;;  %v10138_v46 = vpop.f32.mrf.mxu0  ;;  %v2096_v63 = vadd.f32 %v18800_v0, %v18799_v32  ;;  %v3624_v10 = vpack.c.bf16 %v9320_v35, %v9319_v15  ;;  %v18803_v33 = vld [vmem:[#allocation19_spill] sm:$0xff]  ;;  %v9321_v0 = vld [vmem:[%s18297_s0 + $0x191] sm:$0xff] }
 0x319   :  { %18798 = vst [vmem:[#allocation54_spill] sm:$0xff] %v14371_v24  ;;  %v14388_v43 = vadd.f32 %v10138_v46, %v13605_v9  ;;  %v2101_v24 = vadd.f32 %v18804_v48, %v18803_v33  ;;  %v9443_v9 = vld [vmem:[%s18297_s0 + $0x22a] sm:$0xff]  ;;  %v9211_v46 = vld [vmem:[%s18297_s0 + $0x180] sm:$0xff] }
 0x31a   :  { %v2704_v34 = vpop.f32.mrf.mxu1  ;;  %v3017_v41 = vpop.f32.mrf.mxu0  ;;  %v9212_v15 = vld [vmem:[%s18297_s0 + $0x188] sm:$0xff] }
 0x31b   :  { %18801 = vst [vmem:[#allocation65_spill] sm:$0xff] %v14388_v43  ;;  %v14390_v26 = vadd.f32 %v2704_v34, %v2096_v63  ;;  %v14393_v53 = vadd.f32 %v3017_v41, %v13557_v56  ;;  %v9444_v56 = vld [vmem:[%s18297_s0 + $0x232] sm:$0xff]  ;;  %v18807_v63 = vld [vmem:[#allocation86_spill] sm:$0xff]  ;;  %v3623_v33 = vpack.c.bf16 %v9212_v15, %v9211_v46  ;;  %v9449_v46 = vld [vmem:[%s18297_s0 + $0x26a] sm:$0xff] }
 0x31c   :  { %v2706_v4 = vpop.f32.mrf.mxu1  ;;  %v10141_v47 = vpop.f32.mrf.mxu0  ;;  %10252 = vmatmul.mubr.bf16.gmra.mxu0 %v3643_v13  ;;  %v18814_v15 = vld [vmem:[#allocation31_spill] sm:$0xff] }
 0x31d   :  { %18802 = vst [vmem:[#allocation59_spill] sm:$0xff] %v14393_v53  ;;  %v14398_v32 = vadd.f32 %v10141_v47, %v13677_v61  ;;  %10255 = vmatprep.mubr.bf16.mxu0 %v3646_v49  ;;  %v9446_v61 = vld [vmem:[%s18297_s0 + $0x24a] sm:$0xff]  ;;  %v18808_v49 = vld [vmem:[#allocation73_spill] sm:$0xff] }
 0x31e   :  { %v2709_v29 = vpop.f32.mrf.mxu1  ;;  %4078 = vmatmul.mubr.bf16.gmra.mxu1 %v3620_v11  ;;  %v3030_v39 = vpop.f32.mrf.mxu0  ;;  %v2104_v34 = vadd.f32 %v18808_v49, %v18807_v63  ;;  %v3652_v11 = vpack.c.bf16 %v9446_v61, %v9445_v8 }
 0x31f   :  { %18805 = vst [vmem:[#allocation11_spill] sm:$0xff] %v14398_v32  ;;  %v14412_v47 = vadd.f32 %v2709_v29, %v2101_v24  ;;  %v14415_v12 = vadd.f32 %v3030_v39, %v13629_v17  ;;  %4085 = vmatprep.mubr.bf16.mxu1 %v3624_v10  ;;  %v9322_v17 = vld [vmem:[%s18297_s0 + $0x1a1] sm:$0xff]  ;;  %v3649_v24 = vpack.c.bf16 %v9444_v56, %v9443_v9  ;;  %v18811_v9 = vld [vmem:[#allocation16_spill] sm:$0xff]  ;;  %v18812_v56 = vld [vmem:[#allocation69_spill] sm:$0xff] }
 0x320   :  { %v2711_v35 = vpop.f32.mrf.mxu1  ;;  %v10142_v13 = vpop.f32.mrf.mxu0  ;;  %v3627_v39 = vpack.c.bf16 %v9322_v17, %v9321_v0  ;;  %v2109_v53 = vadd.f32 %v18812_v56, %v18811_v9  ;;  %v9213_v0 = vld [vmem:[%s18297_s0 + $0x190] sm:$0xff]  ;;  %v9214_v17 = vld [vmem:[%s18297_s0 + $0x1a0] sm:$0xff] }
 0x321   :  { %18806 = vst [vmem:[#allocation58_spill] sm:$0xff] %v14415_v12  ;;  %v14432_v41 = vadd.f32 %v10142_v13, %v13701_v58  ;;  %v9447_v58 = vld [vmem:[%s18297_s0 + $0x252] sm:$0xff] }
 0x322   :  { %v2712_v10 = vpop.f32.mrf.mxu1  ;;  %v3033_v4 = vpop.f32.mrf.mxu0 }
 0x323   :  { %18809 = vst [vmem:[#allocation74_spill] sm:$0xff] %v14432_v41  ;;  %v14434_v48 = vadd.f32 %v2712_v10, %v2104_v34  ;;  %v14437_v29 = vadd.f32 %v3033_v4, %v13653_v60  ;;  %v9448_v60 = vld [vmem:[%s18297_s0 + $0x262] sm:$0xff]  ;;  %v18816_v10 = vld [vmem:[#allocation18_spill] sm:$0xff]  ;;  %v18817_v4 = vld [vmem:[#allocation72_spill] sm:$0xff] }
 0x324   :  { %v2714_v35 = vpop.f32.mrf.mxu1  ;;  %v10145_v32 = vpop.f32.mrf.mxu0  ;;  %10256 = vmatmul.mubr.bf16.gmra.mxu0 %v3649_v24  ;;  %v9323_v34 = vld [vmem:[%s18297_s0 + $0x1a9] sm:$0xff] }
 0x325   :  { %18810 = vst [vmem:[#allocation68_spill] sm:$0xff] %v14437_v29  ;;  %v14442_v63 = vadd.f32 %v10145_v32, %v13767_v59  ;;  %10259 = vmatprep.mubr.bf16.mxu0 %v3652_v11  ;;  %v9450_v59 = vld [vmem:[%s18297_s0 + $0x272] sm:$0xff]  ;;  %v3655_v11 = vpack.c.bf16 %v9448_v60, %v9447_v58  ;;  %v18823_v60 = vld [vmem:[#allocation76_spill] sm:$0xff] }
 0x326   :  { %v2717_v8 = vpop.f32.mrf.mxu1  ;;  %4086 = vmatmul.mubr.bf16.gmra.mxu1 %v3623_v33  ;;  %v3046_v61 = vpop.f32.mrf.mxu0  ;;  %v2112_v33 = vadd.f32 %v18817_v4, %v18816_v10  ;;  %v3658_v9 = vpack.c.bf16 %v9450_v59, %v9449_v46  ;;  %v18822_v58 = vld [vmem:[#allocation21_spill] sm:$0xff]  ;;  %v9451_v46 = vld [vmem:[%s18297_s0 + $0x2c2] sm:$0xff]  ;;  %v9452_v59 = vld [vmem:[%s18297_s0 + $0x2ca] sm:$0xff] }
 0x327   :  { %18813 = vst [vmem:[#allocation8_spill] sm:$0xff] %v14442_v63  ;;  %v14456_v32 = vadd.f32 %v2717_v8, %v2109_v53  ;;  %v14459_v13 = vadd.f32 %v3046_v61, %v18814_v15  ;;  %4093 = vmatprep.mubr.bf16.mxu1 %v3627_v39  ;;  %v9324_v53 = vld [vmem:[%s18297_s0 + $0x1b1] sm:$0xff]  ;;  %v3626_v61 = vpack.c.bf16 %v9214_v17, %v9213_v0 }
 0x328   :  { %v2719_v24 = vpop.f32.mrf.mxu1  ;;  %v10146_v49 = vpop.f32.mrf.mxu0  ;;  %v18818_v39 = vld [vmem:[#allocation32_spill] sm:$0xff]  ;;  %v2117_v12 = vadd.f32 %v18823_v60, %v18822_v58  ;;  %v18824_v10 = vld [vmem:[#allocation101_spill] sm:$0xff] }
 0x329   :  { %18815 = vst [vmem:[#allocation61_spill] sm:$0xff] %v14459_v13  ;;  %v14476_v35 = vadd.f32 %v10146_v49, %v18818_v39  ;;  %v18820_v24 = vld [vmem:[#allocation30_spill] sm:$0xff]  ;;  %v3630_v13 = vpack.c.bf16 %v9324_v53, %v9323_v34  ;;  %v9453_v17 = vld [vmem:[%s18297_s0 + $0x2d2] sm:$0xff] }
 0x32a   :  { %v2720_v56 = vpop.f32.mrf.mxu1  ;;  %v3049_v8 = vpop.f32.mrf.mxu0  ;;  %v18826_v34 = vld [vmem:[#allocation34_spill] sm:$0xff] }
 0x32b   :  { %18819 = vst [vmem:[#allocation77_spill] sm:$0xff] %v14476_v35  ;;  %v14478_v15 = vadd.f32 %v2720_v56, %v2112_v33  ;;  %v14481_v63 = vadd.f32 %v3049_v8, %v18820_v24  ;;  %v9216_v33 = vld [vmem:[%s18297_s0 + $0x1b0] sm:$0xff]  ;;  %v9325_v56 = vld [vmem:[%s18297_s0 + $0x1c1] sm:$0xff]  ;;  %v3661_v8 = vpack.c.bf16 %v9452_v59, %v9451_v46 }
 0x32c   :  { %v2722_v41 = vpop.f32.mrf.mxu1  ;;  %v10149_v29 = vpop.f32.mrf.mxu0  ;;  %10260 = vmatmul.mubr.bf16.gmra.mxu0 %v3655_v11  ;;  %v9215_v11 = vld [vmem:[%s18297_s0 + $0x1a8] sm:$0xff] }
 0x32d   :  { %18821 = vst [vmem:[#allocation71_spill] sm:$0xff] %v14481_v63  ;;  %v14486_v4 = vadd.f32 %v10149_v29, %v18824_v10  ;;  %10263 = vmatprep.mubr.bf16.mxu0 %v3658_v9  ;;  %v9454_v29 = vld [vmem:[%s18297_s0 + $0x2e2] sm:$0xff] }
 0x32e   :  { %v2725_v0 = vpop.f32.mrf.mxu1  ;;  %4094 = vmatmul.mubr.bf16.gmra.mxu1 %v3626_v61  ;;  %v3062_v41 = vpop.f32.mrf.mxu0  ;;  %v18829_v61 = vld [vmem:[#allocation79_spill] sm:$0xff]  ;;  %v3664_v60 = vpack.c.bf16 %v9454_v29, %v9453_v17  ;;  %v9456_v17 = vld [vmem:[%s18297_s0 + $0x2f2] sm:$0xff] }
 0x32f   :  { %18825 = vst [vmem:[#allocation10_spill] sm:$0xff] %v14486_v4  ;;  %v14500_v49 = vadd.f32 %v2725_v0, %v2117_v12  ;;  %v14503_v53 = vadd.f32 %v3062_v41, %v18826_v34  ;;  %4101 = vmatprep.mubr.bf16.mxu1 %v3630_v13  ;;  %v9326_v12 = vld [vmem:[%s18297_s0 + $0x1c9] sm:$0xff]  ;;  %v3629_v41 = vpack.c.bf16 %v9216_v33, %v9215_v11 }
 0x330   :  { %v2727_v39 = vpop.f32.mrf.mxu1  ;;  %v10150_v9 = vpop.f32.mrf.mxu0  ;;  %v18828_v13 = vld [vmem:[#allocation95_spill] sm:$0xff] }
 0x331   :  { %18827 = vst [vmem:[#allocation57_spill] sm:$0xff] %v14503_v53  ;;  %v2120_v24 = vadd.f32 %v18829_v61, %v18828_v13  ;;  %v14520_v58 = vadd.f32 %v10150_v9, %v13862_v22  ;;  %v18831_v39 = vld [vmem:[#allocation39_spill] sm:$0xff]  ;;  %v3633_v53 = vpack.c.bf16 %v9326_v12, %v9325_v56  ;;  %v9455_v22 = vld [vmem:[%s18297_s0 + $0x2ea] sm:$0xff] }
 0x332   :  { %v2728_v10 = vpop.f32.mrf.mxu1  ;;  %v3065_v0 = vpop.f32.mrf.mxu0  ;;  %v18833_v46 = vld [vmem:[#allocation23_spill] sm:$0xff]  ;;  %v9327_v61 = vld [vmem:[%s18297_s0 + $0x1d1] sm:$0xff] }
 0x333   :  { %18830 = vst [vmem:[#allocation80_spill] sm:$0xff] %v14520_v58  ;;  %v14522_v34 = vadd.f32 %v2728_v10, %v2120_v24  ;;  %v14525_v4 = vadd.f32 %v3065_v0, %v18831_v39  ;;  %v18834_v59 = vld [vmem:[#allocation75_spill] sm:$0xff]  ;;  %v18838_v24 = vld [vmem:[#allocation78_spill] sm:$0xff] }
 0x334   :  { %v2730_v35 = vpop.f32.mrf.mxu1  ;;  %v10153_v63 = vpop.f32.mrf.mxu0  ;;  %10264 = vmatmul.mubr.bf16.gmra.mxu0 %v3661_v8  ;;  %v2125_v43 = vadd.f32 %v18834_v59, %v18833_v46  ;;  %v9457_v11 = vld [vmem:[%s18297_s0 + $0x302] sm:$0xff] }
 0x335   :  { %18832 = vst [vmem:[#allocation13_spill] sm:$0xff] %v14525_v4  ;;  %v14530_v13 = vadd.f32 %v10153_v63, %v13928_v44  ;;  %10267 = vmatprep.mubr.bf16.mxu0 %v3664_v60  ;;  %v9458_v44 = vld [vmem:[%s18297_s0 + $0x30a] sm:$0xff]  ;;  %v9217_v9 = vld [vmem:[%s18297_s0 + $0x1c0] sm:$0xff] }
 0x336   :  { %v2733_v29 = vpop.f32.mrf.mxu1  ;;  %4102 = vmatmul.mubr.bf16.gmra.mxu1 %v3629_v41  ;;  %v3078_v35 = vpop.f32.mrf.mxu0  ;;  %v9218_v56 = vld [vmem:[%s18297_s0 + $0x1c8] sm:$0xff]  ;;  %v3670_v0 = vpack.c.bf16 %v9458_v44, %v9457_v11 }
 0x337   :  { %18835 = vst [vmem:[#allocation60_spill] sm:$0xff] %v14530_v13  ;;  %v14544_v63 = vadd.f32 %v2733_v29, %v2125_v43  ;;  %v14547_v33 = vadd.f32 %v3078_v35, %v13884_v5  ;;  %4109 = vmatprep.mubr.bf16.mxu1 %v3633_v53  ;;  %v9328_v5 = vld [vmem:[%s18297_s0 + $0x1e1] sm:$0xff]  ;;  %v3667_v43 = vpack.c.bf16 %v9456_v17, %v9455_v22  ;;  %v18841_v22 = vld [vmem:[#allocation20_spill] sm:$0xff] }
 0x338   :  { %v2735_v12 = vpop.f32.mrf.mxu1  ;;  %v10154_v8 = vpop.f32.mrf.mxu0  ;;  %v18837_v53 = vld [vmem:[#allocation98_spill] sm:$0xff]  ;;  %v3632_v46 = vpack.c.bf16 %v9218_v56, %v9217_v9  ;;  %v3636_v35 = vpack.c.bf16 %v9328_v5, %v9327_v61  ;;  %v9461_v9 = vld [vmem:[%s18297_s0 + $0x32a] sm:$0xff] }
 0x339   :  { %18836 = vst [vmem:[#allocation83_spill] sm:$0xff] %v14547_v33  ;;  %v2128_v60 = vadd.f32 %v18838_v24, %v18837_v53  ;;  %v14564_v10 = vadd.f32 %v10154_v8, %v13950_v50  ;;  %v18842_v17 = vld [vmem:[#allocation82_spill] sm:$0xff]  ;;  %v9459_v50 = vld [vmem:[%s18297_s0 + $0x312] sm:$0xff]  ;;  %v9329_v24 = vld [vmem:[%s18297_s0 + $0x1e9] sm:$0xff] }
 0x33a   :  { %v2736_v41 = vpop.f32.mrf.mxu1  ;;  %v3081_v39 = vpop.f32.mrf.mxu0  ;;  %v2133_v33 = vadd.f32 %v18842_v17, %v18841_v22  ;;  %v9219_v8 = vld [vmem:[%s18297_s0 + $0x1d0] sm:$0xff]  ;;  %v9220_v61 = vld [vmem:[%s18297_s0 + $0x1e0] sm:$0xff] }
 0x33b   :  { %18839 = vst [vmem:[#allocation15_spill] sm:$0xff] %v14564_v10  ;;  %v14566_v59 = vadd.f32 %v2736_v41, %v2128_v60  ;;  %v14569_v29 = vadd.f32 %v3081_v39, %v13906_v36  ;;  %v9460_v36 = vld [vmem:[%s18297_s0 + $0x322] sm:$0xff]  ;;  %v18845_v60 = vld [vmem:[#allocation22_spill] sm:$0xff]  ;;  %v3635_v22 = vpack.c.bf16 %v9220_v61, %v9219_v8  ;;  %v9465_v8 = vld [vmem:[%s18297_s0 + $0x352] sm:$0xff] }
 0x33c   :  { %v2738_v12 = vpop.f32.mrf.mxu1  ;;  %v10157_v13 = vpop.f32.mrf.mxu0  ;;  %10268 = vmatmul.mubr.bf16.gmra.mxu0 %v3667_v43 }
 0x33d   :  { %18840 = vst [vmem:[#allocation64_spill] sm:$0xff] %v14569_v29  ;;  %v14574_v53 = vadd.f32 %v10157_v13, %v14016_v18  ;;  %10271 = vmatprep.mubr.bf16.mxu0 %v3670_v0  ;;  %v9462_v18 = vld [vmem:[%s18297_s0 + $0x332] sm:$0xff] }
 0x33e   :  { %v2741_v11 = vpop.f32.mrf.mxu1  ;;  %4110 = vmatmul.mubr.bf16.gmra.mxu1 %v3632_v46  ;;  %v3094_v44 = vpop.f32.mrf.mxu0  ;;  %v18846_v0 = vld [vmem:[#allocation85_spill] sm:$0xff]  ;;  %v3676_v46 = vpack.c.bf16 %v9462_v18, %v9461_v9 }
 0x33f   :  { %18843 = vst [vmem:[#allocation89_spill] sm:$0xff] %v14574_v53  ;;  %v14588_v13 = vadd.f32 %v2741_v11, %v2133_v33  ;;  %v14591_v56 = vadd.f32 %v3094_v44, %v13972_v45  ;;  %4117 = vmatprep.mubr.bf16.mxu1 %v3636_v35  ;;  %v9330_v45 = vld [vmem:[%s18297_s0 + $0x1f1] sm:$0xff]  ;;  %v3673_v33 = vpack.c.bf16 %v9460_v36, %v9459_v50 }
 0x340   :  { %v2743_v5 = vpop.f32.mrf.mxu1  ;;  %v10158_v43 = vpop.f32.mrf.mxu0  ;;  %v2136_v41 = vadd.f32 %v18846_v0, %v18845_v60  ;;  %v3639_v44 = vpack.c.bf16 %v9330_v45, %v9329_v24  ;;  %v18849_v50 = vld [vmem:[#allocation25_spill] sm:$0xff]  ;;  %v9331_v0 = vld [vmem:[%s18297_s0 + $0x201] sm:$0xff] }
 0x341   :  { %18844 = vst [vmem:[#allocation12_spill] sm:$0xff] %v14591_v56  ;;  %v14608_v39 = vadd.f32 %v10158_v43, %v14038_v6  ;;  %v18850_v36 = vld [vmem:[#allocation81_spill] sm:$0xff]  ;;  %v9463_v6 = vld [vmem:[%s18297_s0 + $0x342] sm:$0xff] }
 0x342   :  { %v2744_v35 = vpop.f32.mrf.mxu1  ;;  %v3097_v12 = vpop.f32.mrf.mxu0  ;;  %v2141_v56 = vadd.f32 %v18850_v36, %v18849_v50  ;;  %v9221_v43 = vld [vmem:[%s18297_s0 + $0x1e8] sm:$0xff]  ;;  %v9222_v24 = vld [vmem:[%s18297_s0 + $0x1f0] sm:$0xff] }
 0x343   :  { %18847 = vst [vmem:[#allocation67_spill] sm:$0xff] %v14608_v39  ;;  %v14610_v17 = vadd.f32 %v2744_v35, %v2136_v41  ;;  %v14613_v11 = vadd.f32 %v3097_v12, %v13994_v19  ;;  %v9464_v19 = vld [vmem:[%s18297_s0 + $0x34a] sm:$0xff]  ;;  %v18853_v41 = vld [vmem:[#allocation27_spill] sm:$0xff]  ;;  %v3638_v50 = vpack.c.bf16 %v9222_v24, %v9221_v43 }
 0x344   :  { %v2746_v5 = vpop.f32.mrf.mxu1  ;;  %v10161_v53 = vpop.f32.mrf.mxu0  ;;  %10272 = vmatmul.mubr.bf16.gmra.mxu0 %v3673_v33  ;;  %v9469_v43 = vld [vmem:[%s18297_s0 + $0x382] sm:$0xff] }
 0x345   :  { %18848 = vst [vmem:[#allocation92_spill] sm:$0xff] %v14613_v11  ;;  %v14618_v60 = vadd.f32 %v10161_v53, %v14104_v30  ;;  %10275 = vmatprep.mubr.bf16.mxu0 %v3676_v46  ;;  %v9466_v30 = vld [vmem:[%s18297_s0 + $0x362] sm:$0xff]  ;;  %v18854_v46 = vld [vmem:[#allocation84_spill] sm:$0xff] }
 0x346   :  { %v2749_v9 = vpop.f32.mrf.mxu1  ;;  %4118 = vmatmul.mubr.bf16.gmra.mxu1 %v3635_v22  ;;  %v3110_v18 = vpop.f32.mrf.mxu0  ;;  %v2144_v35 = vadd.f32 %v18854_v46, %v18853_v41  ;;  %v3682_v22 = vpack.c.bf16 %v9466_v30, %v9465_v8  ;;  %v9333_v46 = vld [vmem:[%s18297_s0 + $0x211] sm:$0xff] }
 0x347   :  { %18851 = vst [vmem:[#allocation14_spill] sm:$0xff] %v14618_v60  ;;  %v14632_v53 = vadd.f32 %v2749_v9, %v2141_v56  ;;  %v14635_v61 = vadd.f32 %v3110_v18, %v14060_v55  ;;  %4125 = vmatprep.mubr.bf16.mxu1 %v3639_v44  ;;  %v9332_v55 = vld [vmem:[%s18297_s0 + $0x209] sm:$0xff]  ;;  %v3679_v56 = vpack.c.bf16 %v9464_v19, %v9463_v6 }
 0x348   :  { %v2751_v45 = vpop.f32.mrf.mxu1  ;;  %v10162_v33 = vpop.f32.mrf.mxu0  ;;  %v3642_v18 = vpack.c.bf16 %v9332_v55, %v9331_v0  ;;  %v18857_v6 = vld [vmem:[#allocation24_spill] sm:$0xff] }
 0x349   :  { %18852 = vst [vmem:[#allocation63_spill] sm:$0xff] %v14635_v61  ;;  %v14652_v12 = vadd.f32 %v10162_v33, %v14126_v25  ;;  %v18858_v19 = vld [vmem:[#allocation88_spill] sm:$0xff]  ;;  %v9223_v33 = vld [vmem:[%s18297_s0 + $0x200] sm:$0xff] }
 0x34a   :  { %v2752_v44 = vpop.f32.mrf.mxu1  ;;  %v3113_v5 = vpop.f32.mrf.mxu0  ;;  %v2149_v61 = vadd.f32 %v18858_v19, %v18857_v6  ;;  %v9467_v25 = vld [vmem:[%s18297_s0 + $0x36a] sm:$0xff] }
 0x34b   :  { %18855 = vst [vmem:[#allocation17_spill] sm:$0xff] %v14652_v12  ;;  %v14654_v36 = vadd.f32 %v2752_v44, %v2144_v35  ;;  %v14657_v9 = vadd.f32 %v3113_v5, %v14082_v31  ;;  %v9468_v31 = vld [vmem:[%s18297_s0 + $0x372] sm:$0xff]  ;;  %v9224_v0 = vld [vmem:[%s18297_s0 + $0x208] sm:$0xff]  ;;  %v18861_v35 = vld [vmem:[#allocation26_spill] sm:$0xff] }
 0x34c   :  { %v2754_v45 = vpop.f32.mrf.mxu1  ;;  %v10165_v60 = vpop.f32.mrf.mxu0  ;;  %10276 = vmatmul.mubr.bf16.gmra.mxu0 %v3679_v56  ;;  %v3641_v6 = vpack.c.bf16 %v9224_v0, %v9223_v33  ;;  %v9473_v33 = vld [vmem:[%s18297_s0 + $0x3aa] sm:$0xff] }
 0x34d   :  { %18856 = vst [vmem:[#allocation66_spill] sm:$0xff] %v14657_v9  ;;  %v14662_v41 = vadd.f32 %v10165_v60, %v14192_v62  ;;  %10279 = vmatprep.mubr.bf16.mxu0 %v3682_v22  ;;  %v9470_v62 = vld [vmem:[%s18297_s0 + $0x38a] sm:$0xff]  ;;  %v18862_v22 = vld [vmem:[#allocation91_spill] sm:$0xff] }
 0x34e   :  { %v2757_v8 = vpop.f32.mrf.mxu1  ;;  %4126 = vmatmul.mubr.bf16.gmra.mxu1 %v3638_v50  ;;  %v3126_v30 = vpop.f32.mrf.mxu0  ;;  %v2152_v44 = vadd.f32 %v18862_v22, %v18861_v35  ;;  %v3688_v50 = vpack.c.bf16 %v9470_v62, %v9469_v43  ;;  %v9335_v22 = vld [vmem:[%s18297_s0 + $0x229] sm:$0xff] }
 0x34f   :  { %18859 = vst [vmem:[#allocation19_spill] sm:$0xff] %v14662_v41  ;;  %v14676_v60 = vadd.f32 %v2757_v8, %v2149_v61  ;;  %v14679_v24 = vadd.f32 %v3126_v30, %v14148_v16  ;;  %4133 = vmatprep.mubr.bf16.mxu1 %v3642_v18  ;;  %v9334_v16 = vld [vmem:[%s18297_s0 + $0x221] sm:$0xff]  ;;  %v3685_v61 = vpack.c.bf16 %v9468_v31, %v9467_v25  ;;  %v18865_v25 = vld [vmem:[#allocation29_spill] sm:$0xff] }
 0x350   :  { %v2759_v55 = vpop.f32.mrf.mxu1  ;;  %v10166_v56 = vpop.f32.mrf.mxu0  ;;  %v3645_v30 = vpack.c.bf16 %v9334_v16, %v9333_v46  ;;  %v18866_v31 = vld [vmem:[#allocation87_spill] sm:$0xff] }
 0x351   :  { %18860 = vst [vmem:[#allocation70_spill] sm:$0xff] %v14679_v24  ;;  %v14696_v5 = vadd.f32 %v10166_v56, %v14214_v42  ;;  %v2157_v24 = vadd.f32 %v18866_v31, %v18865_v25  ;;  %v9471_v42 = vld [vmem:[%s18297_s0 + $0x392] sm:$0xff]  ;;  %v9226_v46 = vld [vmem:[%s18297_s0 + $0x220] sm:$0xff] }
 0x352   :  { %v2760_v18 = vpop.f32.mrf.mxu1  ;;  %v3129_v45 = vpop.f32.mrf.mxu0  ;;  %v9225_v56 = vld [vmem:[%s18297_s0 + $0x210] sm:$0xff] }
 0x353   :  { %18863 = vst [vmem:[#allocation86_spill] sm:$0xff] %v14696_v5  ;;  %v14698_v19 = vadd.f32 %v2760_v18, %v2152_v44  ;;  %v14701_v8 = vadd.f32 %v3129_v45, %v14170_v27  ;;  %v9472_v27 = vld [vmem:[%s18297_s0 + $0x3a2] sm:$0xff]  ;;  %v18869_v44 = vld [vmem:[#allocation28_spill] sm:$0xff]  ;;  %v3644_v25 = vpack.c.bf16 %v9226_v46, %v9225_v56  ;;  %v9477_v56 = vld [vmem:[%s18297_s0 + $0x3d2] sm:$0xff] }
 0x354   :  { %v2762_v55 = vpop.f32.mrf.mxu1  ;;  %v10169_v41 = vpop.f32.mrf.mxu0  ;;  %10280 = vmatmul.mubr.bf16.gmra.mxu0 %v3685_v61 }
 0x355   :  { %18864 = vst [vmem:[#allocation73_spill] sm:$0xff] %v14701_v8  ;;  %v14706_v35 = vadd.f32 %v10169_v41, %v14280_v20  ;;  %10283 = vmatprep.mubr.bf16.mxu0 %v3688_v50  ;;  %v9474_v20 = vld [vmem:[%s18297_s0 + $0x3b2] sm:$0xff]  ;;  %v18870_v50 = vld [vmem:[#allocation90_spill] sm:$0xff] }
 0x356   :  { %v2765_v43 = vpop.f32.mrf.mxu1  ;;  %4134 = vmatmul.mubr.bf16.gmra.mxu1 %v3641_v6  ;;  %v3142_v62 = vpop.f32.mrf.mxu0  ;;  %v2160_v18 = vadd.f32 %v18870_v50, %v18869_v44  ;;  %v3694_v6 = vpack.c.bf16 %v9474_v20, %v9473_v33  ;;  %v9337_v50 = vld [vmem:[%s18297_s0 + $0x241] sm:$0xff] }
 0x357   :  { %18867 = vst [vmem:[#allocation16_spill] sm:$0xff] %v14706_v35  ;;  %v14720_v41 = vadd.f32 %v2765_v43, %v2157_v24  ;;  %v14723_v0 = vadd.f32 %v3142_v62, %v14236_v37  ;;  %4141 = vmatprep.mubr.bf16.mxu1 %v3645_v30  ;;  %v9336_v37 = vld [vmem:[%s18297_s0 + $0x231] sm:$0xff]  ;;  %v3691_v24 = vpack.c.bf16 %v9472_v27, %v9471_v42  ;;  %v18874_v27 = vld [vmem:[#allocation94_spill] sm:$0xff] }
 0x358   :  { %v2767_v16 = vpop.f32.mrf.mxu1  ;;  %v10170_v61 = vpop.f32.mrf.mxu0  ;;  %v3648_v62 = vpack.c.bf16 %v9336_v37, %v9335_v22  ;;  %v18873_v42 = vld [vmem:[#allocation33_spill] sm:$0xff] }
 0x359   :  { %18868 = vst [vmem:[#allocation69_spill] sm:$0xff] %v14723_v0  ;;  %v14740_v45 = vadd.f32 %v10170_v61, %v14302_v7  ;;  %v2165_v5 = vadd.f32 %v18874_v27, %v18873_v42  ;;  %v9475_v7 = vld [vmem:[%s18297_s0 + $0x3c2] sm:$0xff]  ;;  %v9228_v22 = vld [vmem:[%s18297_s0 + $0x230] sm:$0xff] }
 0x35a   :  { %v2768_v30 = vpop.f32.mrf.mxu1  ;;  %v3145_v55 = vpop.f32.mrf.mxu0  ;;  %v9227_v61 = vld [vmem:[%s18297_s0 + $0x228] sm:$0xff] }
 0x35b   :  { %18871 = vst [vmem:[#allocation31_spill] sm:$0xff] %v14740_v45  ;;  %v14742_v31 = vadd.f32 %v2768_v30, %v2160_v18  ;;  %v14745_v43 = vadd.f32 %v3145_v55, %v14258_v14  ;;  %v9476_v14 = vld [vmem:[%s18297_s0 + $0x3ca] sm:$0xff]  ;;  %v18877_v18 = vld [vmem:[#allocation35_spill] sm:$0xff]  ;;  %v3647_v42 = vpack.c.bf16 %v9228_v22, %v9227_v61 }
 0x35c   :  { %v2770_v16 = vpop.f32.mrf.mxu1  ;;  %v10173_v35 = vpop.f32.mrf.mxu0  ;;  %10284 = vmatmul.mubr.bf16.gmra.mxu0 %v3691_v24  ;;  %v9481_v61 = vld [vmem:[%s18297_s0 + $0x402] sm:$0xff] }
 0x35d   :  { %18872 = vst [vmem:[#allocation18_spill] sm:$0xff] %v14745_v43  ;;  %v14750_v44 = vadd.f32 %v10173_v35, %v14368_v52  ;;  %10287 = vmatprep.mubr.bf16.mxu0 %v3694_v6  ;;  %v9478_v52 = vld [vmem:[%s18297_s0 + $0x3e2] sm:$0xff]  ;;  %v18878_v6 = vld [vmem:[#allocation97_spill] sm:$0xff] }
 0x35e   :  { %v2773_v33 = vpop.f32.mrf.mxu1  ;;  %4142 = vmatmul.mubr.bf16.gmra.mxu1 %v3644_v25  ;;  %v3158_v20 = vpop.f32.mrf.mxu0  ;;  %v2168_v30 = vadd.f32 %v18878_v6, %v18877_v18  ;;  %v3700_v25 = vpack.c.bf16 %v9478_v52, %v9477_v56  ;;  %v9339_v6 = vld [vmem:[%s18297_s0 + $0x251] sm:$0xff] }
 0x35f   :  { %18875 = vst [vmem:[#allocation72_spill] sm:$0xff] %v14750_v44  ;;  %v14764_v35 = vadd.f32 %v2773_v33, %v2165_v5  ;;  %v14767_v46 = vadd.f32 %v3158_v20, %v14324_v3  ;;  %4149 = vmatprep.mubr.bf16.mxu1 %v3648_v62  ;;  %v9338_v3 = vld [vmem:[%s18297_s0 + $0x249] sm:$0xff]  ;;  %v3697_v5 = vpack.c.bf16 %v9476_v14, %v9475_v7  ;;  %v18883_v14 = vld [vmem:[#allocation93_spill] sm:$0xff] }
 0x360   :  { %v2775_v37 = vpop.f32.mrf.mxu1  ;;  %v10174_v24 = vpop.f32.mrf.mxu0  ;;  %v3651_v20 = vpack.c.bf16 %v9338_v3, %v9337_v50  ;;  %v18882_v7 = vld [vmem:[#allocation112_spill] sm:$0xff] }
 0x361   :  { %18876 = vst [vmem:[#allocation32_spill] sm:$0xff] %v14767_v46  ;;  %v14784_v55 = vadd.f32 %v10174_v24, %v14390_v26  ;;  %v2173_v46 = vadd.f32 %v18883_v14, %v18882_v7  ;;  %v9479_v26 = vld [vmem:[%s18297_s0 + $0x3ea] sm:$0xff]  ;;  %v9229_v24 = vld [vmem:[%s18297_s0 + $0x240] sm:$0xff] }
 0x362   :  { %v2776_v62 = vpop.f32.mrf.mxu1  ;;  %v3161_v16 = vpop.f32.mrf.mxu0  ;;  %v9230_v50 = vld [vmem:[%s18297_s0 + $0x248] sm:$0xff] }
 0x363   :  { %18879 = vst [vmem:[#allocation30_spill] sm:$0xff] %v14784_v55  ;;  %v14786_v27 = vadd.f32 %v2776_v62, %v2168_v30  ;;  %v14789_v33 = vadd.f32 %v3161_v16, %v14346_v38  ;;  %v9480_v38 = vld [vmem:[%s18297_s0 + $0x3f2] sm:$0xff]  ;;  %v3650_v7 = vpack.c.bf16 %v9230_v50, %v9229_v24  ;;  %v9232_v50 = vld [vmem:[%s18297_s0 + $0x260] sm:$0xff] }
 0x364   :  { %v2778_v37 = vpop.f32.mrf.mxu1  ;;  %v10177_v44 = vpop.f32.mrf.mxu0  ;;  %10288 = vmatmul.mubr.bf16.gmra.mxu0 %v3697_v5  ;;  %v18886_v30 = vld [vmem:[#allocation37_spill] sm:$0xff] }
 0x365   :  { %18880 = vst [vmem:[#allocation21_spill] sm:$0xff] %v14786_v27  ;;  %18881 = vst [vmem:[#allocation76_spill] sm:$0xff] %v14789_v33  ;;  %v14794_v18 = vadd.f32 %v10177_v44, %v14456_v32  ;;  %10291 = vmatprep.mubr.bf16.mxu0 %v3700_v25  ;;  %v9482_v32 = vld [vmem:[%s18297_s0 + $0x40a] sm:$0xff] }
 0x366   :  { %v2781_v56 = vpop.f32.mrf.mxu1  ;;  %4150 = vmatmul.mubr.bf16.gmra.mxu1 %v3647_v42  ;;  %v3174_v52 = vpop.f32.mrf.mxu0  ;;  %v18887_v25 = vld [vmem:[#allocation96_spill] sm:$0xff]  ;;  %v3706_v42 = vpack.c.bf16 %v9482_v32, %v9481_v61 }
 0x367   :  { %18884 = vst [vmem:[#allocation101_spill] sm:$0xff] %v14794_v18  ;;  %v14808_v44 = vadd.f32 %v2781_v56, %v2173_v46  ;;  %v14811_v22 = vadd.f32 %v3174_v52, %v14412_v47  ;;  %4157 = vmatprep.mubr.bf16.mxu1 %v3651_v20  ;;  %v9340_v47 = vld [vmem:[%s18297_s0 + $0x261] sm:$0xff]  ;;  %v3703_v46 = vpack.c.bf16 %v9480_v38, %v9479_v26  ;;  %v9485_v32 = vld [vmem:[%s18297_s0 + $0x42a] sm:$0xff] }
 0x368   :  { %v2783_v3 = vpop.f32.mrf.mxu1  ;;  %v10178_v5 = vpop.f32.mrf.mxu0  ;;  %v2176_v62 = vadd.f32 %v18887_v25, %v18886_v30  ;;  %v3654_v52 = vpack.c.bf16 %v9340_v47, %v9339_v6  ;;  %v9484_v38 = vld [vmem:[%s18297_s0 + $0x422] sm:$0xff]  ;;  %v9231_v24 = vld [vmem:[%s18297_s0 + $0x250] sm:$0xff] }
 0x369   :  { %18885 = vst [vmem:[#allocation34_spill] sm:$0xff] %v14811_v22  ;;  %v14828_v16 = vadd.f32 %v10178_v5, %v14478_v15  ;;  %v9483_v15 = vld [vmem:[%s18297_s0 + $0x412] sm:$0xff]  ;;  %v9341_v47 = vld [vmem:[%s18297_s0 + $0x269] sm:$0xff] }
 0x36a   :  { %v2784_v20 = vpop.f32.mrf.mxu1  ;;  %v3177_v37 = vpop.f32.mrf.mxu0 }
 0x36b   :  { %18888 = vst [vmem:[#allocation95_spill] sm:$0xff] %v14828_v16  ;;  %v14830_v14 = vadd.f32 %v2784_v20, %v2176_v62  ;;  %v14833_v56 = vadd.f32 %v3177_v37, %v14434_v48  ;;  %v3653_v20 = vpack.c.bf16 %v9232_v50, %v9231_v24  ;;  %v9233_v24 = vld [vmem:[%s18297_s0 + $0x268] sm:$0xff]  ;;  %v9234_v50 = vld [vmem:[%s18297_s0 + $0x270] sm:$0xff] }
 0x36c   :  { %v2786_v3 = vpop.f32.mrf.mxu1  ;;  %v10181_v27 = vpop.f32.mrf.mxu0  ;;  %10292 = vmatmul.mubr.bf16.gmra.mxu0 %v3703_v46  ;;  %v3709_v46 = vpack.c.bf16 %v9484_v38, %v9483_v15  ;;  %v9488_v15 = vld [vmem:[%s18297_s0 + $0x44a] sm:$0xff] }
 0x36d   :  { %18889 = vst [vmem:[#allocation79_spill] sm:$0xff] %v14833_v56  ;;  %v14836_v26 = vadd.f32 %v10181_v27, %v14544_v63  ;;  %10295 = vmatprep.mubr.bf16.mxu0 %v3706_v42  ;;  %v9486_v63 = vld [vmem:[%s18297_s0 + $0x432] sm:$0xff] }
 0x36e   :  { %v14844_v61 = vpop.f32.mrf.mxu1  ;;  %4158 = vmatmul.mubr.bf16.gmra.mxu1 %v3650_v7  ;;  %v3190_v48 = vpop.f32.mrf.mxu0  ;;  %v3712_v25 = vpack.c.bf16 %v9486_v63, %v9485_v32  ;;  %v9489_v32 = vld [vmem:[%s18297_s0 + $0x452] sm:$0xff] }
 0x36f   :  { %18890 = vst [vmem:[#allocation39_spill] sm:$0xff] %v14836_v26  ;;  %v14853_v27 = vadd.f32 %v3190_v48, %v14500_v49  ;;  %4165 = vmatprep.mubr.bf16.mxu1 %v3654_v52  ;;  %v9342_v49 = vld [vmem:[%s18297_s0 + $0x271] sm:$0xff] }
 0x370   :  { %v3969_v5 = vpop.f32.mrf.mxu1  ;;  %v10182_v6 = vpop.f32.mrf.mxu0  ;;  %v3657_v7 = vpack.c.bf16 %v9342_v49, %v9341_v47  ;;  %v9343_v47 = vld [vmem:[%s18297_s0 + $0x2c1] sm:$0xff] }
 0x371   :  { %18891 = vst [vmem:[#allocation23_spill] sm:$0xff] %v14853_v27  ;;  %v14868_v30 = vadd.f32 %v10182_v6, %v14566_v59  ;;  %v9487_v59 = vld [vmem:[%s18297_s0 + $0x442] sm:$0xff] }
 0x372   :  { %v14870_v62 = vpop.f32.mrf.mxu1  ;;  %v3193_v42 = vpop.f32.mrf.mxu0  ;;  %v3715_v49 = vpack.c.bf16 %v9488_v15, %v9487_v59 }
 0x373   :  { %18892 = vst [vmem:[#allocation75_spill] sm:$0xff] %v14868_v30  ;;  %v14873_v37 = vadd.f32 %v3193_v42, %v14522_v34  ;;  %v10611_v30 = vld [vmem:[%s18301_s4 + $0xb8] sm:$0xff]  }
 0x374   :  { %v3972_v52 = vpop.f32.mrf.mxu1  ;;  %v10185_v3 = vpop.f32.mrf.mxu0  ;;  %10296 = vmatmul.mubr.bf16.gmra.mxu0 %v3709_v46 }
 0x375   :  { %18893 = vst [vmem:[#allocation98_spill] sm:$0xff] %v14873_v37  ;;  %v14876_v48 = vadd.f32 %v10185_v3, %v14632_v53  ;;  %10299 = vmatprep.mubr.bf16.mxu0 %v3712_v25  ;;  %v9490_v53 = vld [vmem:[%s18297_s0 + $0x462] sm:$0xff] }
 0x376   :  { %v14884_v38 = vpop.f32.mrf.mxu1  ;;  %4166 = vmatmul.mubr.bf16.gmra.mxu1 %v3653_v20  ;;  %v3206_v34 = vpop.f32.mrf.mxu0  ;;  %v3718_v25 = vpack.c.bf16 %v9490_v53, %v9489_v32  ;;  %v9493_v53 = vld [vmem:[%s18297_s0 + $0x482] sm:$0xff] }
 0x377   :  { %18894 = vst [vmem:[#allocation78_spill] sm:$0xff] %v14876_v48  ;;  %v14893_v63 = vadd.f32 %v3206_v34, %v14588_v13  ;;  %4173 = vmatprep.mubr.bf16.mxu1 %v3657_v7  ;;  %v9344_v13 = vld [vmem:[%s18297_s0 + $0x2c9] sm:$0xff]  ;;  %v3656_v7 = vpack.c.bf16 %v9234_v50, %v9233_v24  ;;  %v10602_v48 = vld [vmem:[%s18301_s4 + $0x98] sm:$0xff]   ;;  %v9235_v50 = vld [vmem:[%s18297_s0 + $0x2c0] sm:$0xff] }
 0x378   :  { %v3977_v5 = vpop.f32.mrf.mxu1  ;;  %v10186_v6 = vpop.f32.mrf.mxu0  ;;  %v3660_v3 = vpack.c.bf16 %v9344_v13, %v9343_v47  ;;  %7247 = vmatpush1.bf16.msra.mxu0 %v10602_v48  ;;  %v18900_v47 = vmov 0   ;;  %v9345_v48 = vld [vmem:[%s18297_s0 + $0x2d1] sm:$0xff]  ;;  %v18915_v37 = vld [vmem:[#allocation103_spill] sm:$0xff] }
 0x379   :  { %18895 = vst [vmem:[#allocation20_spill] sm:$0xff] %v14893_v63  ;;  %v14908_v46 = vadd.f32 %v10186_v6, %v14654_v36  ;;  %v9491_v36 = vld [vmem:[%s18297_s0 + $0x46a] sm:$0xff]  ;;  %7248 = vmatprep.subr.bf16.mxu0 %v18900_v47 }
 0x37a   :  { %v14910_v42 = vpop.f32.mrf.mxu1  ;;  %v3209_v20 = vpop.f32.mrf.mxu0  ;;  %v9236_v6 = vld [vmem:[%s18297_s0 + $0x2c8] sm:$0xff] }
 0x37b   :  { %18896 = vst [vmem:[#allocation82_spill] sm:$0xff] %v14908_v46  ;;  %v14913_v52 = vadd.f32 %v3209_v20, %v14610_v17  ;;  %v9492_v17 = vld [vmem:[%s18297_s0 + $0x472] sm:$0xff] }
 0x37c   :  { %v3980_v34 = vpop.f32.mrf.mxu1  ;;  %v10189_v5 = vpop.f32.mrf.mxu0  ;;  %10300 = vmatmul.mubr.bf16.gmra.mxu0 %v3715_v49  ;;  %v10603_v20 = vld [vmem:[%s18301_s4 + $0x90] sm:$0xff]  }
 0x37d   :  { %18897 = vst [vmem:[#allocation22_spill] sm:$0xff] %v14913_v52  ;;  %v14919_v59 = vadd.f32 %v10189_v5, %v14720_v41  ;;  %10303 = vmatprep.mubr.bf16.mxu0 %v3718_v25  ;;  %v9494_v41 = vld [vmem:[%s18297_s0 + $0x48a] sm:$0xff]  ;;  %v3721_v25 = vpack.c.bf16 %v9492_v17, %v9491_v36  ;;  %7249 = vmatpush1.bf16.msra.mxu0 %v10603_v20 }
 0x37e   :  { %v14927_v15 = vpop.f32.mrf.mxu1  ;;  %4174 = vmatmul.mubr.bf16.gmra.mxu1 %v3656_v7  ;;  %v3222_v32 = vpop.f32.mrf.mxu0  ;;  %7250 = vmatprep.subr.bf16.mxu0 %v18900_v47 }
 0x37f   :  { %18898 = vst [vmem:[#allocation85_spill] sm:$0xff] %v14919_v59  ;;  %v14936_v24 = vadd.f32 %v3222_v32, %v14676_v60  ;;  %4181 = vmatprep.mubr.bf16.mxu1 %v3660_v3  ;;  %v9346_v60 = vld [vmem:[%s18297_s0 + $0x2e1] sm:$0xff]  ;;  %v3724_v3 = vpack.c.bf16 %v9494_v41, %v9493_v53  ;;  %v3659_v32 = vpack.c.bf16 %v9236_v6, %v9235_v50  ;;  %v9497_v50 = vld [vmem:[%s18297_s0 + $0x4aa] sm:$0xff] }
 0x380   :  { %v3985_v13 = vpop.f32.mrf.mxu1  ;;  %v10190_v49 = vpop.f32.mrf.mxu0  ;;  %v3663_v59 = vpack.c.bf16 %v9346_v60, %v9345_v48  ;;  %v9496_v53 = vld [vmem:[%s18297_s0 + $0x4a2] sm:$0xff]  ;;  %v9237_v48 = vld [vmem:[%s18297_s0 + $0x2d0] sm:$0xff] }
 0x381   :  { %18899 = vst [vmem:[#allocation25_spill] sm:$0xff] %v14936_v24  ;;  %v14955_v7 = vadd.f32 %v10190_v49, %v14742_v31  ;;  %v9495_v31 = vld [vmem:[%s18297_s0 + $0x492] sm:$0xff]  ;;  %v10604_v6 = vld [vmem:[%s18301_s4 + $0x88] sm:$0xff]   ;;  %v9238_v60 = vld [vmem:[%s18297_s0 + $0x2e0] sm:$0xff] }
 0x382   :  { %v14957_v34 = vpop.f32.mrf.mxu1  ;;  %v3225_v5 = vpop.f32.mrf.mxu0  ;;  %7251 = vmatpush1.bf16.msra.mxu0 %v10604_v6 }
 0x383   :  { %18901 = vst [vmem:[#allocation81_spill] sm:$0xff] %v14955_v7  ;;  %v14960_v13 = vadd.f32 %v3225_v5, %v14698_v19  ;;  %v3727_v5 = vpack.c.bf16 %v9496_v53, %v9495_v31  ;;  %7252 = vmatprep.subr.bf16.mxu0 %v18900_v47  ;;  %v9500_v53 = vld [vmem:[%s18297_s0 + $0x4ca] sm:$0xff] }
 0x384   :  { %v3988_v36 = vpop.f32.mrf.mxu1  ;;  %v10193_v17 = vpop.f32.mrf.mxu0  ;;  %10304 = vmatmul.mubr.bf16.gmra.mxu0 %v3721_v25 }
 0x385   :  { %18902 = vst [vmem:[#allocation27_spill] sm:$0xff] %v14960_v13  ;;  %v14964_v24 = vadd.f32 %v10193_v17, %v14808_v44  ;;  %10307 = vmatprep.mubr.bf16.mxu0 %v3724_v3  ;;  %v9498_v44 = vld [vmem:[%s18297_s0 + $0x4b2] sm:$0xff]  ;;  %v9347_v3 = vld [vmem:[%s18297_s0 + $0x2e9] sm:$0xff]  ;;  %v10605_v36 = vld [vmem:[%s18301_s4 + $0x80] sm:$0xff]  }
 0x386   :  { %v14972_v19 = vpop.f32.mrf.mxu1  ;;  %4182 = vmatmul.mubr.bf16.gmra.mxu1 %v3659_v32  ;;  %v3238_v41 = vpop.f32.mrf.mxu0  ;;  %v3730_v32 = vpack.c.bf16 %v9498_v44, %v9497_v50  ;;  %7253 = vmatpush1.bf16.msra.mxu0 %v10605_v36  ;;  %v10606_v50 = vld [vmem:[%s18301_s4 + $0x78] sm:$0xff]   ;;  %v9350_v36 = vld [vmem:[%s18297_s0 + $0x309] sm:$0xff] }
 0x387   :  { %18903 = vst [vmem:[#allocation84_spill] sm:$0xff] %v14964_v24  ;;  %v14984_v49 = vadd.f32 %v3238_v41, %v14764_v35  ;;  %4189 = vmatprep.mubr.bf16.mxu1 %v3663_v59  ;;  %v9348_v35 = vld [vmem:[%s18297_s0 + $0x2f1] sm:$0xff]  ;;  %7254 = vmatprep.subr.bf16.mxu0 %v18900_v47 }
 0x388   :  { %v3993_v25 = vpop.f32.mrf.mxu1  ;;  %v10194_v20 = vpop.f32.mrf.mxu0  ;;  %v3666_v7 = vpack.c.bf16 %v9348_v35, %v9347_v3  ;;  %v9240_v3 = vld [vmem:[%s18297_s0 + $0x2f0] sm:$0xff] }
 0x389   :  { %18904 = vst [vmem:[#allocation24_spill] sm:$0xff] %v14984_v49  ;;  %v14999_v59 = vadd.f32 %v10194_v20, %v14830_v14  ;;  %v3662_v25 = vpack.c.bf16 %v9238_v60, %v9237_v48  ;;  %v9499_v14 = vld [vmem:[%s18297_s0 + $0x4c2] sm:$0xff] }
 0x38a   :  { %v15005_v17 = vpop.f32.mrf.mxu1  ;;  %v15007_v41 = vpop.f32.mrf.mxu0  ;;  %v9239_v20 = vld [vmem:[%s18297_s0 + $0x2e8] sm:$0xff]  ;;  %7255 = vmatpush1.bf16.msra.mxu0 %v10606_v50 }
 0x38b   :  { %18905 = vst [vmem:[#allocation88_spill] sm:$0xff] %v14999_v59  ;;  %18906 = vst [vmem:[#allocation26_spill] sm:$0xff] %v15007_v41  ;;  %v3665_v59 = vpack.c.bf16 %v9240_v3, %v9239_v20  ;;  %7256 = vmatprep.subr.bf16.mxu0 %v18900_v47  ;;  %v9504_v20 = vld [vmem:[%s18297_s0 + $0x4f2] sm:$0xff] }
 0x38c   :  { %v3996_v49 = vpop.f32.mrf.mxu1  ;;  %v10213_v24 = vpop.f32.mrf.mxu0  ;;  %10308 = vmatmul.mubr.bf16.gmra.mxu0 %v3727_v5 }
 0x38d   :  { %v4441_v31 = vadd.f32 %v10213_v24, %v14884_v38  ;;  %10311 = vmatprep.mubr.bf16.mxu0 %v3730_v32  ;;  %v9501_v38 = vld [vmem:[%s18297_s0 + $0x4d2] sm:$0xff]  ;;  %v9502_v24 = vld [vmem:[%s18297_s0 + $0x4e2] sm:$0xff]  ;;  %v18907_v49 = vld [vmem:[#allocation36_spill] sm:$0xff] }
 0x38e   :  { %v15019_v44 = vpop.f32.mrf.mxu1  ;;  %4190 = vmatmul.mubr.bf16.gmra.mxu1 %v3662_v25  ;;  %v4432_v6 = vpop.f32.mrf.mxu0  ;;  %v9349_v32 = vld [vmem:[%s18297_s0 + $0x301] sm:$0xff] }
 0x38f   :  { %v15029_v48 = vadd.f32 %v4441_v31, %v18907_v49  ;;  %v4433_v60 = vadd.f32 %v4432_v6, %v14844_v61  ;;  %4197 = vmatprep.mubr.bf16.mxu1 %v3666_v7  ;;  %v3733_v61 = vpack.c.bf16 %v9500_v53, %v9499_v14  ;;  %v18909_v7 = vld [vmem:[#allocation99_spill] sm:$0xff]  ;;  %v3736_v31 = vpack.c.bf16 %v9502_v24, %v9501_v38  ;;  %v18911_v38 = vld [vmem:[#allocation102_spill] sm:$0xff]  ;;  %v9503_v24 = vld [vmem:[%s18297_s0 + $0x4ea] sm:$0xff] }
 0x390   :  { %v4001_v35 = vpop.f32.mrf.mxu1  ;;  %v10214_v5 = vpop.f32.mrf.mxu0  ;;  %v3669_v46 = vpack.c.bf16 %v9350_v36, %v9349_v32  ;;  %v9241_v32 = vld [vmem:[%s18297_s0 + $0x300] sm:$0xff]  ;;  %v9242_v36 = vld [vmem:[%s18297_s0 + $0x308] sm:$0xff] }
 0x391   :  { %18908 = vst [vmem:[#allocation91_spill] sm:$0xff] %v15029_v48  ;;  %v15045_v25 = vadd.f32 %v4433_v60, %v18909_v7  ;;  %v10607_v35 = vld [vmem:[%s18301_s4 + $0x70] sm:$0xff]   ;;  %v4444_v14 = vadd.f32 %v10214_v5, %v14910_v42  ;;  %v15073_v5 = vpop.permute.xlu0 %5201 }
 0x392   :  { %v15047_v6 = vpop.f32.mrf.mxu1  ;;  %v4435_v49 = vpop.f32.mrf.mxu0  ;;  %7257 = vmatpush1.bf16.msra.mxu0 %v10607_v35  ;;  %v9351_v35 = vld [vmem:[%s18297_s0 + $0x311] sm:$0xff] }
 0x393   :  { %18910 = vst [vmem:[#allocation29_spill] sm:$0xff] %v15045_v25  ;;  %v4436_v13 = vadd.f32 %v4435_v49, %v14870_v62  ;;  %v10608_v62 = vld [vmem:[%s18301_s4 + $0x68] sm:$0xff]   ;;  %7258 = vmatprep.subr.bf16.mxu0 %v18900_v47 }
 0x394   :  { %v4004_v53 = vpop.f32.mrf.mxu1  ;;  %v10217_v60 = vpop.f32.mrf.mxu0  ;;  %10312 = vmatmul.mubr.bf16.gmra.mxu0 %v3733_v61  ;;  %v18913_v61 = vld [vmem:[#allocation38_spill] sm:$0xff] }
 0x395   :  { %v15056_v50 = vadd.f32 %v4436_v13, %v18911_v38  ;;  %10315 = vmatprep.mubr.bf16.mxu0 %v3736_v31  ;;  %v10610_v13 = vld [vmem:[%s18301_s4 + $0x38] sm:$0xff]   ;;  %v3739_v53 = vpack.c.bf16 %v9504_v20, %v9503_v24  ;;  %v5551_v38 = vpop.permute.xlu1 %5550 }
 0x396   :  { %v15067_v42 = vpop.f32.mrf.mxu1  ;;  %4198 = vmatmul.mubr.bf16.gmra.mxu1 %v3665_v59  ;;  %v4448_v3 = vpop.f32.mrf.mxu0  ;;  %v4866_v59 = vadd.f32 %v4444_v14, %v18913_v61  ;;  %7259 = vmatpush1.bf16.msra.mxu0 %v10608_v62  ;;  %v10609_v14 = vld [vmem:[%s18301_s4 + $0x60] sm:$0xff]   ;;  %v3668_v61 = vpack.c.bf16 %v9242_v36, %v9241_v32  ;;  %v18914_v24 = vld [vmem:[#allocation41_spill] sm:$0xff] }
 0x397   :  { %18912 = vst [vmem:[#allocation87_spill] sm:$0xff] %v15056_v50  ;;  %4205 = vmatprep.mubr.bf16.mxu1 %v3669_v46  ;;  %v4449_v7 = vadd.f32 %v4448_v3, %v14927_v15  ;;  %v9352_v46 = vld [vmem:[%s18297_s0 + $0x321] sm:$0xff]  ;;  %7614 = vmatpush1.bf16.msra.mxu1 %v10610_v13  ;;  %v5546_v32 = vpop.permute.xlu0 %5545 }
 0x398   :  { %v4009_v31 = vpop.f32.mrf.mxu1  ;;  %v10218_v49 = vpop.f32.mrf.mxu0  ;;  %7615 = vmatprep.subr.bf16.mxu1 %v18900_v47  ;;  %7260 = vmatprep.subr.bf16.mxu0 %v18900_v47  ;;  %v3672_v62 = vpack.c.bf16 %v9352_v46, %v9351_v35  ;;  %v18916_v46 = vld [vmem:[#allocation105_spill] sm:$0xff] }
 0x399   :  { %v15099_v31 = vld [vmem:[%s18299_s2] ss:$0 sm:$0xff]  ;;  %v4867_v20 = vadd.f32 %v4449_v7, %v18914_v24  ;;  %v4460_v41 = vadd.f32 %v10218_v49, %v15005_v17  ;;  %v9243_v49 = vld [vmem:[%s18297_s0 + $0x310] sm:$0xff] }
 0x39a   :  { %v15093_v15 = vpop.f32.mrf.mxu1  ;;  %v4451_v3 = vpop.f32.mrf.mxu0  ;;  %v4981_v13 = vadd.f32 %v15099_v31, %v4866_v59  ;;  %7261 = vmatpush1.bf16.msra.mxu0 %v10609_v14  ;;  %v9354_v24 = vld [vmem:[%s18297_s0 + $0x331] sm:$0xff] }
 0x39b   :  { %v4452_v52 = vadd.f32 %v4451_v3, %v14957_v34  ;;  %v4982_v36 = vadd.f32 %v15099_v31, %v4867_v20  ;;  %7270 = vmatprep.subr.bf16.mxu0 %v18900_v47  ;;  %v5556_v34 = vpop.permute.xlu1 %5555 }
 0x39c   :  { %v4012_v63 = vpop.f32.mrf.mxu1  ;;  %v10221_v26 = vpop.f32.mrf.mxu0  ;;  %10316 = vmatmul.mubr.bf16.gmra.mxu0 %v3739_v53  ;;  %v4870_v53 = vadd.f32 %v4460_v41, %v18916_v46  ;;  %vm5089_vm1 = vcmp.ge.f32.partialorder %v4981_v13, 0.0  ;;  %v10612_v41 = vld [vmem:[%s18301_s4 + $0xb0] sm:$0xff]  }
 0x39d   :  { %v4868_v7 = vadd.f32 %v4452_v52, %v18915_v37  ;;  %v4457_v63 = vadd.f32 %v10217_v60, %v14972_v19  ;;  %vm5090_vm0 = vcmp.ge.f32.partialorder %v4982_v36, 0.0  ;;  %v5208_v17 = vmul.f32 %v15073_v5, %v4982_v36  ;;  %v9244_v37 = vld [vmem:[%s18297_s0 + $0x320] sm:$0xff]  ;;  %v15139_v46 = vpop.permute.xlu0 %5560 }
 0x39e   :  { %v15110_v35 = vpop.f32.mrf.mxu1  ;;  %4206 = vmatmul.mubr.bf16.gmra.mxu1 %v3668_v61  ;;  %v4464_v59 = vpop.f32.mrf.mxu0  ;;  %v5207_v52 = vmul.f32 %v15073_v5, %v4981_v13  ;;  %v9353_v61 = vld [vmem:[%s18297_s0 + $0x329] sm:$0xff]  ;;  %7271 = vmatpush2.bf16.msra.mxu0 %v10611_v30  ;;  %v18918_v30 = vld [vmem:[#allocation106_spill] sm:$0xff]  ;;  %v4985_v56 = vadd.f32 %v15099_v31, %v4870_v53 }
 0x39f   :  { %4213 = vmatprep.mubr.bf16.mxu1 %v3672_v62  ;;  %v4983_v14 = vadd.f32 %v15099_v31, %v4868_v7  ;;  %v4465_v19 = vadd.f32 %v4464_v59, %v15019_v44  ;;  %v5316_v20 = vsel %vm5090_vm0, %v4982_v36, %v5208_v17  ;;  %v3671_v59 = vpack.c.bf16 %v9244_v37, %v9243_v49  ;;  %v15145_v45 = vpop.permute.xlu1 %5565 }
 0x3a0   :  { %v4017_v60 = vpop.f32.mrf.mxu1  ;;  %v10222_v3 = vpop.f32.mrf.mxu0  ;;  %7272 = vmatprep.subr.bf16.mxu0 %v18900_v47  ;;  %v3675_v18 = vpack.c.bf16 %v9354_v24, %v9353_v61  ;;  %v5315_v22 = vsel %vm5089_vm1, %v4981_v13, %v5207_v52  ;;  %v4473_v17 = vadd.f32 %v10221_v26, %v15067_v42  ;;  %v15147_v49 = vmul.f32 %v5551_v38, %v5316_v20  ;;  %v10613_v13 = vld [vmem:[%s18301_s4 + $0xa8] sm:$0xff]  }
 0x3a1   :  { %vm5091_vm2 = vcmp.ge.f32.partialorder %v4983_v14, 0.0  ;;  %v5209_v44 = vmul.f32 %v15073_v5, %v4983_v14  ;;  %v18917_v60 = vld [vmem:[#allocation100_spill] sm:$0xff]  ;;  %v4871_v27 = vadd.f32 %v4465_v19, %v18918_v30  ;;  %v4476_v52 = vadd.f32 %v10222_v3, %v15093_v15 }
 0x3a2   :  { %v15136_v62 = vpop.f32.mrf.mxu1  ;;  %v4467_v7 = vpop.f32.mrf.mxu0  ;;  %v4869_v16 = vadd.f32 %v4457_v63, %v18917_v60  ;;  %7273 = vmatpush2.bf16.msra.mxu0 %v10612_v41  ;;  %v15157_v42 = vmul.f32 %v5546_v32, %v5315_v22  ;;  %vm5093_vm3 = vcmp.ge.f32.partialorder %v4985_v56, 0.0  ;;  %v5211_v15 = vmul.f32 %v15073_v5, %v4985_v56  ;;  %v18920_v41 = vld [vmem:[#allocation104_spill] sm:$0xff] }
 0x3a3   :  { %v5317_v36 = vsel %vm5091_vm2, %v4983_v14, %v5209_v44  ;;  %v4986_v43 = vadd.f32 %v15099_v31, %v4871_v27  ;;  %v4468_v63 = vadd.f32 %v4467_v7, %v15047_v6  ;;  %v9245_v27 = vld [vmem:[%s18297_s0 + $0x328] sm:$0xff]  ;;  %v9246_v6 = vld [vmem:[%s18297_s0 + $0x330] sm:$0xff]  ;;  %7274 = vmatprep.subr.bf16.mxu0 %v18900_v47  ;;  %v5571_v14 = vpop.permute.xlu0 %5570  ;;  %v6440_v61 = vrot.slane %v15147_v49, 2  ;;  %v15185_v60 = vpop.permute.xlu1 %5575 }
 0x3a4   :  { %v4020_v55 = vpop.f32.mrf.mxu1  ;;  %v10225_v33 = vpop.f32.mrf.mxu0  ;;  %v15149_v37 = vmul.f32 %v5556_v34, %v5317_v36  ;;  %v4984_v38 = vadd.f32 %v15099_v31, %v4869_v16  ;;  %v18919_v34 = vld [vmem:[#allocation43_spill] sm:$0xff]  ;;  %v4874_v20 = vadd.f32 %v4476_v52, %v18920_v41 }
 0x3a5   :  { %v4873_v53 = vadd.f32 %v4473_v17, %v18919_v34  ;;  %v9356_v16 = vld [vmem:[%s18297_s0 + $0x349] sm:$0xff]  ;;  %v5212_v19 = vmul.f32 %v15073_v5, %v4986_v43  ;;  %v4872_v3 = vadd.f32 %v4468_v63, %v13953_v21  ;;  %vm5094_vm5 = vcmp.ge.f32.partialorder %v4986_v43, 0.0  ;;  %v10614_v36 = vld [vmem:[%s18301_s4 + $0xa0] sm:$0xff]  }
 0x3a6   :  { %v4023_v26 = vpop.f32.mrf.mxu1  ;;  %4214 = vmatmul.mubr.bf16.gmra.mxu1 %v3671_v59  ;;  %v4480_v55 = vpop.f32.mrf.mxu0  ;;  %v6442_v24 = vrot.slane %v15149_v37, 2  ;;  %7275 = vmatpush2.bf16.msra.mxu0 %v10613_v13  ;;  %v3674_v59 = vpack.c.bf16 %v9246_v6, %v9245_v27  ;;  %vm5092_vm7 = vcmp.ge.f32.partialorder %v4984_v38, 0.0  ;;  %v6439_v21 = vrot.slane %v15157_v42, 2  ;;  %v15200_v34 = vld [vmem:[%s18297_s0 + $0x340] sm:$0xff] }
 0x3a7   :  { %4221 = vmatprep.mubr.bf16.mxu1 %v3675_v18  ;;  %v9355_v18 = vld [vmem:[%s18297_s0 + $0x341] sm:$0xff]  ;;  %7276 = vmatprep.subr.bf16.mxu0 %v18900_v47  ;;  %v5210_v17 = vmul.f32 %v15073_v5, %v4984_v38  ;;  %v5319_v63 = vsel %vm5093_vm3, %v4985_v56, %v5211_v15  ;;  %v4988_v13 = vadd.f32 %v15099_v31, %v4873_v53  ;;  %v15215_v48 = vpop.permute.xlu0 %5580 }
 0x3a8   :  { %v4025_v22 = vpop.f32.mrf.mxu1  ;;  %v15169_v32 = vpop.f32.mrf.mxu0  ;;  %v3678_v30 = vpack.c.bf16 %v9356_v16, %v9355_v18  ;;  %v6443_v27 = vsel %vm6433_vm4, %v6440_v61, %v6442_v24  ;;  %v5320_v18 = vsel %vm5094_vm5, %v4986_v43, %v5212_v19  ;;  %v4987_v56 = vadd.f32 %v15099_v31, %v4872_v3 }
 0x3a9   :  { %v15205_v22 = vld [vmem:[%s18297_s0 + $0x348] sm:$0xff]  ;;  %v6441_v53 = vsel %vm6433_vm4, %v6439_v21, %v6440_v61  ;;  %v4989_v16 = vadd.f32 %v15099_v31, %v4874_v20  ;;  %v4489_v24 = vadd.f32 %v10225_v33, %v4023_v26  ;;  %v4481_v43 = vadd.f32 %v4480_v55, %v15110_v35  ;;  %v5586_v20 = vpop.permute.xlu1 %5585 }
 0x3aa   :  { %v15182_v44 = vpop.f32.mrf.mxu1  ;;  %v4483_v7 = vpop.f32.mrf.mxu0  ;;  %7277 = vmatpush2.bf16.msra.mxu0 %v10614_v36  ;;  %v15212_v41 = vpack.c.bf16 %v6443_v27, %v6441_v53  ;;  %v6278_v19 = vrot.slane %v15157_v42, 1  ;;  %v3677_v3 = vpack.c.bf16 %v15205_v22, %v15200_v34  ;;  %v5318_v33 = vsel %vm5092_vm7, %v4984_v38, %v5210_v17  ;;  %v9358_v38 = vld [vmem:[%s18297_s0 + $0x361] sm:$0xff]  ;;  %v18923_v34 = vld [vmem:[#allocation109_spill] sm:$0xff] }
 0x3ab   :  { %v4484_v15 = vadd.f32 %v4483_v7, %v15136_v62  ;;  %v6281_v62 = vrot.slane %v15149_v37, 1  ;;  %8055 = vmatprep.subr.bf16.mxu0 %v18900_v47  ;;  %v15225_v26 = vmul.f32 %v15145_v45, %v5319_v63  ;;  %vm5096_vm9 = vcmp.ge.f32.partialorder %v4988_v13, 0.0  ;;  %v9357_v37 = vld [vmem:[%s18297_s0 + $0x351] sm:$0xff] }
 0x3ac   :  { %v4028_v52 = vpop.f32.mrf.mxu1  ;;  %v15195_v6 = vpop.f32.mrf.mxu0  ;;  %18921 = vst [vmem:[#allocation28_spill] sm:$0xff] %v15212_v41  ;;  %v15227_v61 = vmul.f32 %v5571_v14, %v5320_v18  ;;  %9615 = vmatprep.mubr.msk.bf16.mxu0 %vm6850_vm8, %v15212_v41  ;;  %v5214_v45 = vmul.f32 %v15073_v5, %v4988_v13  ;;  %v5213_v14 = vmul.f32 %v15073_v5, %v4987_v56  ;;  %vm5095_vm10 = vcmp.ge.f32.partialorder %v4987_v56, 0.0 }
 0x3ad   :  { %v6279_v52 = vrot.slane %v15147_v49, 1  ;;  %v4876_v7 = vadd.f32 %v4484_v15, %v13997_v54  ;;  %v5215_v21 = vmul.f32 %v15073_v5, %v4989_v16  ;;  %vm5097_vm11 = vcmp.ge.f32.partialorder %v4989_v16, 0.0 }
 0x3ae   :  { %v4031_v50 = vpop.f32.mrf.mxu1  ;;  %4222 = vmatmul.mubr.bf16.gmra.mxu1 %v3674_v59  ;;  %v4496_v25 = vpop.f32.mrf.mxu0  ;;  %v4875_v22 = vadd.f32 %v4481_v43, %v18923_v34  ;;  %v3681_v53 = vpack.c.bf16 %v9358_v38, %v9357_v37  ;;  %v9359_v38 = vld [vmem:[%s18297_s0 + $0x369] sm:$0xff] }
 0x3af   :  { %4229 = vmatprep.mubr.bf16.mxu1 %v3678_v30  ;;  %v6282_v59 = vsel %vm6272_vm6, %v6279_v52, %v6281_v62  ;;  %v18922_v30 = vld [vmem:[#allocation40_spill] sm:$0xff]  ;;  %v6280_v17 = vsel %vm6272_vm6, %v6278_v19, %v6279_v52  ;;  %v6286_v62 = vrot.slane %v15227_v61, 1  ;;  %v15261_v52 = vld [vmem:[%s18297_s0 + $0x360] sm:$0xff]  ;;  %v15263_v43 = vpop.permute.xlu0 %5590  ;;  %v5321_v19 = vsel %vm5095_vm10, %v4987_v56, %v5213_v14 }
 0x3b0   :  { %v4033_v35 = vpop.f32.mrf.mxu1  ;;  %v15231_v55 = vpop.f32.mrf.mxu0  ;;  %v4877_v36 = vadd.f32 %v4489_v24, %v18922_v30  ;;  %v10350_v18 = vpack.i.bf16 %v6282_v59, %v6280_v17  ;;  %v15256_v24 = vld [vmem:[%s18297_s0 + $0x350] sm:$0xff]  ;;  %v4497_v37 = vadd.f32 %v4496_v25, %v4031_v50  ;;  %v5323_v30 = vsel %vm5097_vm11, %v4989_v16, %v5215_v21 }
 0x3b1   :  { %v15248_v35 = vmul.f32 %v15139_v46, %v5318_v33  ;;  %v5322_v46 = vsel %vm5096_vm9, %v4988_v13, %v5214_v45  ;;  %v4991_v33 = vadd.f32 %v15099_v31, %v4876_v7  ;;  %v9360_v59 = vld [vmem:[%s18297_s0 + $0x371] sm:$0xff]  ;;  %v4492_v56 = vadd.f32 %v15169_v32, %v15182_v44  ;;  %v5457_v45 = vld [vmem:[%s18303_s7 + $0x128] sm:$0xff]  ;;  %v5596_v7 = vpop.permute.xlu1 %5595 }
 0x3b2   :  { %v4034_v63 = vpop.f32.mrf.mxu1  ;;  %v4499_v27 = vpop.f32.mrf.mxu0  ;;  %10351 = vrot.lane.b32.xlu0 %v10350_v18, %s10674_s20  ;;  %v4992_v13 = vadd.f32 %v15099_v31, %v4877_v36  ;;  %v6284_v25 = vrot.slane %v15225_v26, 1  ;;  %v4990_v17 = vadd.f32 %v15099_v31, %v4875_v22  ;;  %v3680_v21 = vpack.c.bf16 %v15261_v52, %v15256_v24  ;;  %v18926_v18 = vld [vmem:[#allocation110_spill] sm:$0xff] }
 0x3b3   :  { %v4500_v54 = vadd.f32 %v4499_v27, %v4034_v63  ;;  %v15290_v32 = vmul.f32 %v15185_v60, %v5321_v19  ;;  %v6283_v44 = vrot.slane %v15248_v35, 1  ;;  %v15297_v34 = vmul.f32 %v15215_v48, %v5322_v46  ;;  %v15311_v48 = vld [vmem:[%s18297_s0 + $0x368] sm:$0xff]  ;;  %v5601_v46 = vpop.permute.xlu0 %5600 }
 0x3b4   :  { %v4036_v15 = vpop.f32.mrf.mxu1  ;;  %v15251_v41 = vpop.f32.mrf.mxu0  ;;  %v6287_v36 = vsel %vm6272_vm6, %v6284_v25, %v6286_v62  ;;  %v15299_v22 = vmul.f32 %v5586_v20, %v5323_v30  ;;  %v5218_v60 = vmul.f32 %v15073_v5, %v4992_v13  ;;  %vm5099_vm12 = vcmp.ge.f32.partialorder %v4991_v33, 0.0  ;;  %v15316_v20 = vld [vmem:[%s18297_s0 + $0x370] sm:$0xff] }
 0x3b5   :  { %v4880_v16 = vadd.f32 %v4500_v54, %v14041_v2  ;;  %18924 = vst [vmem:[#allocation90_spill] sm:$0xff] %v15290_v32  ;;  %18925 = vst [vmem:[#allocation33_spill] sm:$0xff] %v15297_v34  ;;  %v5217_v2 = vmul.f32 %v15073_v5, %v4991_v33  ;;  %v18927_v54 = vld [vmem:[#allocation107_spill] sm:$0xff]  ;;  %v6285_v62 = vsel %vm6272_vm6, %v6283_v44, %v6284_v25  ;;  %vm5100_vm13 = vcmp.ge.f32.partialorder %v4992_v13, 0.0 }
 0x3b6   :  { %v15283_v50 = vpop.f32.mrf.mxu1  ;;  %4230 = vmatmul.mubr.bf16.gmra.mxu1 %v3677_v3  ;;  %v4512_v14 = vpop.f32.mrf.mxu0  ;;  %v3684_v3 = vpack.c.bf16 %v9360_v59, %v9359_v38  ;;  %5715 = vperm.xlu0 %10348, %v5457_v45   ;;  %v4878_v15 = vadd.f32 %v4492_v56, %v18927_v54  ;;  %v5216_v19 = vmul.f32 %v15073_v5, %v4990_v17  ;;  %vm5098_vm14 = vcmp.ge.f32.partialorder %v4990_v17, 0.0 }
 0x3b7   :  { %4237 = vmatprep.mubr.bf16.mxu1 %v3681_v53  ;;  %v4879_v53 = vadd.f32 %v4497_v37, %v18926_v18  ;;  %v4995_v37 = vadd.f32 %v15099_v31, %v4880_v16  ;;  %v10355_v38 = vpack.i.bf16 %v6287_v36, %v6285_v62  ;;  %v6288_v30 = vrot.slane %v15290_v32, 1  ;;  %v15323_v45 = vpop.permute.xlu1 %5605  ;;  %v9361_v16 = vld [vmem:[%s18297_s0 + $0x381] sm:$0xff]  ;;  %v9362_v36 = vld [vmem:[%s18297_s0 + $0x389] sm:$0xff]  ;;  %v5611_v12 = vpop.permute.xlu0 %5610 }
 0x3b8   :  { %v4041_v63 = vpop.f32.mrf.mxu1  ;;  %v15294_v27 = vpop.f32.mrf.mxu0  ;;  %v5325_v25 = vsel %vm5099_vm12, %v4991_v33, %v5217_v2  ;;  %v5326_v18 = vsel %vm5100_vm13, %v4992_v13, %v5218_v60  ;;  %v4993_v54 = vadd.f32 %v15099_v31, %v4878_v15  ;;  %v5460_v33 = vld [vmem:[%s18303_s7 + $0x140] sm:$0xff]  ;;  %v6289_v2 = vrot.slane %v15297_v34, 1  ;;  %v10615_v15 = vld [vmem:[%s18301_s4 + $0x30] sm:$0xff]  }
 0x3b9   :  { %v4994_v44 = vadd.f32 %v15099_v31, %v4879_v53  ;;  %v3683_v63 = vpack.c.bf16 %v15316_v20, %v15311_v48  ;;  %v6291_v53 = vrot.slane %v15299_v22, 1  ;;  %v5324_v20 = vsel %vm5098_vm14, %v4990_v17, %v5216_v19  ;;  %7616 = vmatpush1.bf16.msra.mxu1 %v10615_v15 }
 0x3ba   :  { %v4042_v24 = vpop.f32.mrf.mxu1  ;;  %v15306_v52 = vpop.f32.mrf.mxu0  ;;  %10356 = vrot.lane.b32.xlu0 %v10355_v38, %s10674_s20  ;;  %v5221_v38 = vmul.f32 %v15073_v5, %v4995_v37  ;;  %vm5103_vm15 = vcmp.ge.f32.partialorder %v4995_v37, 0.0  ;;  %v6290_v0 = vsel %vm6272_vm6, %v6288_v30, %v6289_v2  ;;  %v3687_v8 = vpack.c.bf16 %v9362_v36, %v9361_v16  ;;  %7617 = vmatprep.subr.bf16.mxu1 %v18900_v47 }
 0x3bb   :  { %v4508_v13 = vadd.f32 %v15231_v55, %v4042_v24  ;;  %v5220_v17 = vmul.f32 %v15073_v5, %v4994_v44  ;;  %v4505_v19 = vadd.f32 %v15195_v6, %v15283_v50  ;;  %vm5102_vm0 = vcmp.ge.f32.partialorder %v4994_v44, 0.0 }
 0x3bc   :  { %v4044_v59 = vpop.f32.mrf.mxu1  ;;  %v15321_v56 = vpop.f32.mrf.mxu0  ;;  %v6292_v24 = vsel %vm6272_vm6, %v6289_v2, %v6291_v53  ;;  %v5219_v6 = vmul.f32 %v15073_v5, %v4993_v54  ;;  %v5329_v50 = vsel %vm5103_vm15, %v4995_v37, %v5221_v38  ;;  %vm5101_vm1 = vcmp.ge.f32.partialorder %v4993_v54, 0.0  ;;  %v9254_v38 = vld [vmem:[%s18297_s0 + $0x388] sm:$0xff] }
 0x3bd   :  { %v15350_v59 = vmul.f32 %v5596_v7, %v5325_v25  ;;  %v15362_v7 = vmul.f32 %v15263_v43, %v5324_v20  ;;  %v5616_v25 = vpop.permute.xlu1 %5615  ;;  %v10360_v16 = vpack.i.bf16 %v6292_v24, %v6290_v0  ;;  %v5328_v43 = vsel %vm5102_vm0, %v4994_v44, %v5220_v17  ;;  %v9253_v44 = vld [vmem:[%s18297_s0 + $0x380] sm:$0xff] }
 0x3be   :  { %v4047_v62 = vpop.f32.mrf.mxu1  ;;  %4238 = vmatmul.mubr.bf16.gmra.mxu1 %v3680_v21  ;;  %v15342_v48 = vpop.f32.mrf.mxu0  ;;  %5730 = vperm.xlu0 %10348, %v5460_v33   ;;  %v15402_v24 = vmul.f32 %v5611_v12, %v5328_v43 }
 0x3bf   :  { %v4513_v60 = vadd.f32 %v4512_v14, %v4047_v62  ;;  %4245 = vmatprep.mubr.bf16.mxu1 %v3684_v3  ;;  %v15359_v3 = vmul.f32 %v5601_v46, %v5326_v18  ;;  %v6294_v36 = vrot.slane %v15350_v59, 1  ;;  %v18928_v18 = vld [vmem:[#allocation42_spill] sm:$0xff]  ;;  %v15375_v62 = vmul.f32 %v5616_v25, %v5329_v50 }
 0x3c0   :  { %v4049_v21 = vpop.f32.mrf.mxu1  ;;  %v15357_v14 = vpop.f32.mrf.mxu0  ;;  %v4881_v33 = vadd.f32 %v4505_v19, %v18928_v18  ;;  %v6293_v0 = vrot.slane %v15362_v7, 1  ;;  %v9364_v19 = vld [vmem:[%s18297_s0 + $0x3a1] sm:$0xff]  ;;  %18929 = vst [vmem:[#allocation94_spill] sm:$0xff] %v15402_v24  ;;  %v3686_v50 = vpack.c.bf16 %v9254_v38, %v9253_v44  ;;  %v18931_v38 = vld [vmem:[#allocation108_spill] sm:$0xff] }
 0x3c1   :  { %v4883_v55 = vadd.f32 %v4513_v60, %v14063_v28  ;;  %v4882_v28 = vadd.f32 %v4508_v13, %v14036_v1  ;;  %v5463_v1 = vld [vmem:[%s18303_s7 + $0x158] sm:$0xff]  ;;  %v6296_v37 = vrot.slane %v15359_v3, 1  ;;  %v15388_v13 = vpop.permute.xlu0 %5620  ;;  %v5327_v60 = vsel %vm5101_vm1, %v4993_v54, %v5219_v6 }
 0x3c2   :  { %v4050_v30 = vpop.f32.mrf.mxu1  ;;  %10361 = vrot.lane.b32.xlu0 %v10360_v16, %s10674_s20  ;;  %v15373_v53 = vpop.f32.mrf.mxu0  ;;  %v6295_v54 = vsel %vm6272_vm6, %v6293_v0, %v6294_v36  ;;  %v6301_v16 = vrot.slane %v15375_v62, 1 }
 0x3c3   :  { %v4998_v2 = vadd.f32 %v15099_v31, %v4883_v55  ;;  %v4997_v15 = vadd.f32 %v15099_v31, %v4882_v28  ;;  %v4516_v21 = vadd.f32 %v15306_v52, %v4050_v30  ;;  %v6297_v25 = vsel %vm6272_vm6, %v6294_v36, %v6296_v37  ;;  %v5626_v30 = vpop.permute.xlu1 %5625 }
 0x3c4   :  { %v4052_v46 = vpop.f32.mrf.mxu1  ;;  %v15400_v55 = vpop.f32.mrf.mxu0  ;;  %v15410_v28 = vmul.f32 %v15323_v45, %v5327_v60  ;;  %v10365_v18 = vpack.i.bf16 %v6297_v25, %v6295_v54 }
 0x3c5   :  { %vm5106_vm2 = vcmp.ge.f32.partialorder %v4998_v2, 0.0  ;;  %v5223_v36 = vmul.f32 %v15073_v5, %v4997_v15  ;;  %v4884_v43 = vadd.f32 %v4516_v21, %v14085_v51  ;;  %vm5105_vm3 = vcmp.ge.f32.partialorder %v4997_v15, 0.0  ;;  %v5631_v45 = vpop.permute.xlu0 %5630  ;;  %v9255_v51 = vld [vmem:[%s18297_s0 + $0x390] sm:$0xff] }
 0x3c6   :  { %v4055_v20 = vpop.f32.mrf.mxu1  ;;  %4246 = vmatmul.mubr.bf16.gmra.mxu1 %v3683_v63  ;;  %v9363_v63 = vld [vmem:[%s18297_s0 + $0x391] sm:$0xff]  ;;  %5745 = vperm.xlu0 %10348, %v5463_v1   ;;  %18930 = vst [vmem:[#allocation35_spill] sm:$0xff] %v15410_v28  ;;  %v15416_v0 = vpop.f32.mrf.mxu0  ;;  %v6299_v1 = vrot.slane %v15402_v24, 1 }
 0x3c7   :  { %v4521_v17 = vadd.f32 %v15251_v41, %v4055_v20  ;;  %4253 = vmatprep.mubr.bf16.mxu1 %v3687_v8  ;;  %v4996_v8 = vadd.f32 %v15099_v31, %v4881_v33  ;;  %v5224_v41 = vmul.f32 %v15073_v5, %v4998_v2  ;;  %v3690_v46 = vpack.c.bf16 %v9364_v19, %v9363_v63  ;;  %v5466_v21 = vld [vmem:[%s18303_s7 + $0x170] sm:$0xff]  ;;  %v15434_v19 = vpop.permute.xlu1 %5635 }
 0x3c8   :  { %v4057_v52 = vpop.f32.mrf.mxu1  ;;  %v5331_v54 = vsel %vm5105_vm3, %v4997_v15, %v5223_v36  ;;  %v4999_v25 = vadd.f32 %v15099_v31, %v4884_v43 }
 0x3c9   :  { %v4885_v6 = vadd.f32 %v4521_v17, %v14046_v23  ;;  %v5222_v37 = vmul.f32 %v15073_v5, %v4996_v8  ;;  %v5332_v20 = vsel %vm5106_vm2, %v4998_v2, %v5224_v41  ;;  %vm5104_vm5 = vcmp.ge.f32.partialorder %v4996_v8, 0.0 }
 0x3ca   :  { %v4058_v12 = vpop.f32.mrf.mxu1  ;;  %10366 = vrot.lane.b32.xlu0 %v10365_v18, %s10674_s20  ;;  %v6298_v2 = vrot.slane %v15410_v28, 1  ;;  %v6302_v17 = vsel %vm6272_vm6, %v6299_v1, %v6301_v16  ;;  %v15448_v16 = vmul.f32 %v5631_v45, %v5332_v20  ;;  %v5641_v45 = vpop.permute.xlu0 %5640  ;;  %v5225_v20 = vmul.f32 %v15073_v5, %v4999_v25 }
 0x3cb   :  { %v4524_v33 = vadd.f32 %v15294_v27, %v4058_v12  ;;  %v5000_v44 = vadd.f32 %v15099_v31, %v4885_v6  ;;  %v9256_v27 = vld [vmem:[%s18297_s0 + $0x3a0] sm:$0xff]  ;;  %v9365_v6 = vld [vmem:[%s18297_s0 + $0x3a9] sm:$0xff]  ;;  %v9366_v12 = vld [vmem:[%s18297_s0 + $0x3b1] sm:$0xff]  ;;  %v5330_v18 = vsel %vm5104_vm5, %v4996_v8, %v5222_v37  ;;  %vm5107_vm10 = vcmp.ge.f32.partialorder %v4999_v25, 0.0 }
 0x3cc   :  { %v4060_v23 = vpop.f32.mrf.mxu1  ;;  %18932 = vst [vmem:[#allocation97_spill] sm:$0xff] %v15448_v16  ;;  %v6300_v15 = vsel %vm6272_vm6, %v6298_v2, %v6299_v1  ;;  %v3689_v43 = vpack.c.bf16 %v9256_v27, %v9255_v51  ;;  %v18934_v2 = vld [vmem:[#allocation114_spill] sm:$0xff]  ;;  %v15462_v27 = vmul.f32 %v15388_v13, %v5330_v18  ;;  %v9368_v18 = vld [vmem:[%s18297_s0 + $0x3c9] sm:$0xff] }
 0x3cd   :  { %v4886_v60 = vadd.f32 %v4524_v33, %v18931_v38  ;;  %v15454_v33 = vmul.f32 %v5626_v30, %v5331_v54  ;;  %vm5108_vm9 = vcmp.ge.f32.partialorder %v5000_v44, 0.0  ;;  %v10370_v23 = vpack.i.bf16 %v6302_v17, %v6300_v15  ;;  %v5646_v17 = vpop.permute.xlu1 %5645  ;;  %v5469_v54 = vld [vmem:[%s18303_s7 + $0x188] sm:$0xff] }
 0x3ce   :  { %v4063_v63 = vpop.f32.mrf.mxu1  ;;  %4254 = vmatmul.mubr.bf16.gmra.mxu1 %v3686_v50  ;;  %v15446_v50 = vpop.f32.mrf.mxu0  ;;  %5760 = vperm.xlu0 %10348, %v5466_v21   ;;  %18935 = vst [vmem:[#allocation93_spill] sm:$0xff] %v15462_v27  ;;  %v6306_v21 = vrot.slane %v15448_v16, 1  ;;  %v6457_v16 = vrot.slane %v15359_v3, 2 }
 0x3cf   :  { %v5001_v52 = vadd.f32 %v15099_v31, %v4886_v60  ;;  %v4529_v41 = vadd.f32 %v15342_v48, %v4063_v63  ;;  %4261 = vmatprep.mubr.bf16.mxu1 %v3690_v46  ;;  %v5226_v48 = vmul.f32 %v15073_v5, %v5000_v44  ;;  %18933 = vst [vmem:[#allocation112_spill] sm:$0xff] %v15454_v33 }
 0x3d0   :  { %v4065_v36 = vpop.f32.mrf.mxu1  ;;  %v3693_v60 = vpack.c.bf16 %v9366_v12, %v9365_v6  ;;  %v15459_v37 = vpop.f32.mrf.mxu0  ;;  %v6304_v12 = vrot.slane %v15454_v33, 1  ;;  %v15839_v33 = vld [vmem:[%s18297_s0 + $0x4a0] sm:$0xff] }
 0x3d1   :  { %vm5109_vm7 = vcmp.ge.f32.partialorder %v5001_v52, 0.0  ;;  %v5227_v46 = vmul.f32 %v15073_v5, %v5001_v52  ;;  %v4887_v51 = vadd.f32 %v4529_v41, %v18934_v2  ;;  %v5334_v63 = vsel %vm5108_vm9, %v5000_v44, %v5226_v48  ;;  %v9258_v44 = vld [vmem:[%s18297_s0 + $0x3b0] sm:$0xff]  ;;  %v9367_v36 = vld [vmem:[%s18297_s0 + $0x3c1] sm:$0xff] }
 0x3d2   :  { %v4066_v38 = vpop.f32.mrf.mxu1  ;;  %10371 = vrot.lane.b32.xlu0 %v10370_v23, %s10674_s20  ;;  %v15473_v13 = vpop.f32.mrf.mxu0  ;;  %v5333_v48 = vsel %vm5107_vm10, %v4999_v25, %v5225_v20  ;;  %v6307_v2 = vsel %vm6272_vm6, %v6304_v12, %v6306_v21 }
 0x3d3   :  { %v5335_v1 = vsel %vm5109_vm7, %v5001_v52, %v5227_v46  ;;  %v4532_v8 = vadd.f32 %v15373_v53, %v4066_v38  ;;  %v18936_v52 = vld [vmem:[#allocation47_spill] sm:$0xff]  ;;  %v5002_v46 = vadd.f32 %v15099_v31, %v4887_v51  ;;  %v15491_v38 = vmul.f32 %v5641_v45, %v5334_v63 }
 0x3d4   :  { %v4068_v30 = vpop.f32.mrf.mxu1  ;;  %v9257_v53 = vld [vmem:[%s18297_s0 + $0x3a8] sm:$0xff]  ;;  %v15475_v6 = vmul.f32 %v5646_v17, %v5335_v1  ;;  %v6303_v1 = vrot.slane %v15462_v27, 1  ;;  %v3696_v51 = vpack.c.bf16 %v9368_v18, %v9367_v36  ;;  %v15497_v9 = vpop.f32.mrf.mxu0  ;;  %v10618_v27 = vld [vmem:[%s18301_s4 + $0x18] sm:$0xff]  }
 0x3d5   :  { %v4888_v41 = vadd.f32 %v4532_v8, %v18936_v52  ;;  %18938 = vst [vmem:[#allocation96_spill] sm:$0xff] %v15491_v38  ;;  %v5651_v30 = vpop.permute.xlu0 %5650  ;;  %v18939_v52 = vld [vmem:[#allocation45_spill] sm:$0xff]  ;;  %v3692_v20 = vpack.c.bf16 %v9258_v44, %v9257_v53  ;;  %v5228_v63 = vmul.f32 %v15073_v5, %v5002_v46  ;;  %vm5110_vm12 = vcmp.ge.f32.partialorder %v5002_v46, 0.0 }
 0x3d6   :  { %18937 = vst [vmem:[#allocation37_spill] sm:$0xff] %v15475_v6  ;;  %v4071_v15 = vpop.f32.mrf.mxu1  ;;  %4262 = vmatmul.mubr.bf16.gmra.mxu1 %v3689_v43  ;;  %5775 = vperm.xlu0 %10348, %v5469_v54   ;;  %v6311_v21 = vrot.slane %v15475_v6, 1  ;;  %v6309_v44 = vrot.slane %v15491_v38, 1  ;;  %v15829_v6 = vld [vmem:[%s18297_s0 + $0x4a1] sm:$0xff]  ;;  %v15834_v38 = vld [vmem:[%s18297_s0 + $0x490] sm:$0xff] }
 0x3d7   :  { %v5003_v23 = vadd.f32 %v15099_v31, %v4888_v41  ;;  %v4537_v43 = vadd.f32 %v15321_v56, %v4071_v15  ;;  %4269 = vmatprep.mubr.bf16.mxu1 %v3693_v60  ;;  %v15500_v56 = vmul.f32 %v15434_v19, %v5333_v48  ;;  %v6305_v60 = vsel %vm6272_vm6, %v6303_v1, %v6304_v12  ;;  %v18941_v12 = vld [vmem:[#allocation111_spill] sm:$0xff]  ;;  %v15511_v48 = vpop.f32.mrf.mxu0 }
 0x3d8   :  { %v4073_v8 = vpop.f32.mrf.mxu1  ;;  %v10375_v54 = vpack.i.bf16 %v6307_v2, %v6305_v60  ;;  %v6312_v1 = vsel %vm6272_vm6, %v6309_v44, %v6311_v21  ;;  %v9260_v21 = vld [vmem:[%s18297_s0 + $0x3c8] sm:$0xff] }
 0x3d9   :  { %v5229_v17 = vmul.f32 %v15073_v5, %v5003_v23  ;;  %v4889_v25 = vadd.f32 %v4537_v43, %v18939_v52  ;;  %18940 = vst [vmem:[#allocation36_spill] sm:$0xff] %v15500_v56  ;;  %vm5111_vm11 = vcmp.ge.f32.partialorder %v5003_v23, 0.0  ;;  %v5478_v43 = vld [vmem:[%s18303_s7 + $0x1d0] sm:$0xff]  ;;  %v5661_v8 = vpop.permute.xlu0 %5660 }
 0x3da   :  { %v4074_v45 = vpop.f32.mrf.mxu1  ;;  %10376 = vrot.lane.b32.xlu0 %v10375_v54, %s10674_s20 }
 0x3db   :  { %v5004_v41 = vadd.f32 %v15099_v31, %v4889_v25  ;;  %v4540_v15 = vadd.f32 %v15357_v14, %v4074_v45  ;;  %v5337_v36 = vsel %vm5111_vm11, %v5003_v23, %v5229_v17  ;;  %v6308_v14 = vrot.slane %v15500_v56, 1  ;;  %v5656_v23 = vpop.permute.xlu1 %5655  ;;  %v9259_v45 = vld [vmem:[%s18297_s0 + $0x3c0] sm:$0xff]  ;;  %v15813_v56 = vld [vmem:[%s18297_s0 + $0x488] sm:$0xff] }
 0x3dc   :  { %v4076_v53 = vpop.f32.mrf.mxu1  ;;  %v5336_v17 = vsel %vm5110_vm12, %v5002_v46, %v5228_v63  ;;  %v15527_v54 = vmul.f32 %v5656_v23, %v5337_v36 }
 0x3dd   :  { %vm5112_vm13 = vcmp.ge.f32.partialorder %v5004_v41, 0.0  ;;  %v5230_v19 = vmul.f32 %v15073_v5, %v5004_v41  ;;  %v4890_v18 = vadd.f32 %v4540_v15, %v18941_v12  ;;  %v6310_v46 = vsel %vm6272_vm6, %v6308_v14, %v6309_v44  ;;  %v18944_v15 = vld [vmem:[#allocation44_spill] sm:$0xff] }
 0x3de   :  { %v4079_v2 = vpop.f32.mrf.mxu1  ;;  %4270 = vmatmul.mubr.bf16.gmra.mxu1 %v3692_v20  ;;  %18942 = vst [vmem:[#allocation99_spill] sm:$0xff] %v15527_v54  ;;  %5820 = vperm.xlu0 %10348, %v5478_v43   ;;  %v15541_v36 = vmul.f32 %v5651_v30, %v5336_v17  ;;  %v10616_v30 = vld [vmem:[%s18301_s4 + $0x28] sm:$0xff]  }
 0x3df   :  { %v5338_v52 = vsel %vm5112_vm13, %v5004_v41, %v5230_v19  ;;  %v5005_v25 = vadd.f32 %v15099_v31, %v4890_v18  ;;  %v4545_v60 = vadd.f32 %v15416_v0, %v4079_v2  ;;  %4277 = vmatprep.mubr.bf16.mxu1 %v3696_v51  ;;  %v9369_v0 = vld [vmem:[%s18297_s0 + $0x3d1] sm:$0xff]  ;;  %v9370_v51 = vld [vmem:[%s18297_s0 + $0x3e1] sm:$0xff]  ;;  %v10380_v41 = vpack.i.bf16 %v6312_v1, %v6310_v46  ;;  %v15539_v19 = vpop.f32.mrf.mxu0  ;;  %v5666_v17 = vpop.permute.xlu1 %5665 }
 0x3e0   :  { %v15529_v20 = vmul.f32 %v5661_v8, %v5338_v52  ;;  %v4081_v63 = vpop.f32.mrf.mxu1  ;;  %18945 = vst [vmem:[#allocation38_spill] sm:$0xff] %v15541_v36  ;;  %v3695_v18 = vpack.c.bf16 %v9260_v21, %v9259_v45  ;;  %v3699_v8 = vpack.c.bf16 %v9370_v51, %v9369_v0  ;;  %v6314_v52 = vrot.slane %v15527_v54, 1  ;;  %v18946_v45 = vld [vmem:[#allocation115_spill] sm:$0xff]  ;;  %7618 = vmatpush1.bf16.msra.mxu1 %v10616_v30  ;;  %v18948_v30 = vld [vmem:[#allocation113_spill] sm:$0xff] }
 0x3e1   :  { %v4891_v53 = vadd.f32 %v4545_v60, %v18944_v15  ;;  %v5231_v12 = vmul.f32 %v15073_v5, %v5005_v25  ;;  %vm5113_vm14 = vcmp.ge.f32.partialorder %v5005_v25, 0.0  ;;  %v15547_v43 = vpop.f32.mrf.mxu0  ;;  %v6313_v0 = vrot.slane %v15541_v36, 1  ;;  %v5671_v15 = vpop.permute.xlu0 %5670  ;;  %7619 = vmatprep.subr.bf16.mxu1 %v18900_v47  ;;  %v15808_v54 = vld [vmem:[%s18297_s0 + $0x480] sm:$0xff] }
 0x3e2   :  { %18943 = vst [vmem:[#allocation102_spill] sm:$0xff] %v15529_v20  ;;  %v4082_v44 = vpop.f32.mrf.mxu1  ;;  %v6316_v14 = vrot.slane %v15529_v20, 1  ;;  %10381 = vrot.lane.b32.xlu0 %v10380_v41, %s10674_s20 }
 0x3e3   :  { %v5006_v2 = vadd.f32 %v15099_v31, %v4891_v53  ;;  %v4548_v23 = vadd.f32 %v15459_v37, %v4082_v44  ;;  %v5339_v46 = vsel %vm5113_vm14, %v5005_v25, %v5231_v12  ;;  %v5481_v37 = vld [vmem:[%s18303_s7 + $0x1e8] sm:$0xff]  ;;  %v9261_v25 = vld [vmem:[%s18297_s0 + $0x3d0] sm:$0xff]  ;;  %v9262_v12 = vld [vmem:[%s18297_s0 + $0x3e0] sm:$0xff] }
 0x3e4   :  { %v4084_v1 = vpop.f32.mrf.mxu1  ;;  %v6317_v51 = vsel %vm6272_vm6, %v6314_v52, %v6316_v14  ;;  %v6315_v14 = vsel %vm6272_vm6, %v6313_v0, %v6314_v52  ;;  %v5676_v0 = vpop.permute.xlu1 %5675 }
 0x3e5   :  { %vm5114_vm15 = vcmp.ge.f32.partialorder %v5006_v2, 0.0  ;;  %v5232_v60 = vmul.f32 %v15073_v5, %v5006_v2  ;;  %v4892_v21 = vadd.f32 %v4548_v23, %v18946_v45  ;;  %v10385_v45 = vpack.i.bf16 %v6317_v51, %v6315_v14  ;;  %v5484_v51 = vld [vmem:[%s18303_s7 + $0x200] sm:$0xff]  ;;  %v5686_v58 = vpop.permute.xlu0 %5685 }
 0x3e6   :  { %v4087_v63 = vpop.f32.mrf.mxu1  ;;  %4278 = vmatmul.mubr.bf16.gmra.mxu1 %v3695_v18  ;;  %v15569_v18 = vpop.f32.mrf.mxu0  ;;  %5835 = vperm.xlu0 %10348, %v5481_v37  }
 0x3e7   :  { %v5340_v53 = vsel %vm5114_vm15, %v5006_v2, %v5232_v60  ;;  %v5007_v41 = vadd.f32 %v15099_v31, %v4892_v21  ;;  %v4553_v44 = vadd.f32 %v15400_v55, %v4087_v63  ;;  %4285 = vmatprep.mubr.bf16.mxu1 %v3699_v8  ;;  %v9371_v55 = vld [vmem:[%s18297_s0 + $0x3e9] sm:$0xff]  ;;  %v9372_v8 = vld [vmem:[%s18297_s0 + $0x3f1] sm:$0xff]  ;;  %v15583_v21 = vmul.f32 %v5666_v17, %v5339_v46 }
 0x3e8   :  { %v15571_v23 = vmul.f32 %v5671_v15, %v5340_v53  ;;  %v4089_v2 = vpop.f32.mrf.mxu1  ;;  %v3698_v63 = vpack.c.bf16 %v9262_v12, %v9261_v25  ;;  %v3702_v39 = vpack.c.bf16 %v9372_v8, %v9371_v55  ;;  %v15587_v11 = vpop.f32.mrf.mxu0  ;;  %v18951_v17 = vld [vmem:[#allocation117_spill] sm:$0xff]  ;;  %v9373_v8 = vld [vmem:[%s18297_s0 + $0x401] sm:$0xff] }
 0x3e9   :  { %vm5115_vm0 = vcmp.ge.f32.partialorder %v5007_v41, 0.0  ;;  %v5233_v1 = vmul.f32 %v15073_v5, %v5007_v41  ;;  %v4893_v60 = vadd.f32 %v4553_v44, %v18948_v30  ;;  %18949 = vst [vmem:[#allocation103_spill] sm:$0xff] %v15583_v21  ;;  %v9264_v55 = vld [vmem:[%s18297_s0 + $0x3f0] sm:$0xff] }
 0x3ea   :  { %18947 = vst [vmem:[#allocation41_spill] sm:$0xff] %v15571_v23  ;;  %v4090_v52 = vpop.f32.mrf.mxu1  ;;  %v6319_v29 = vrot.slane %v15571_v23, 1  ;;  %10386 = vrot.lane.b32.xlu0 %v10385_v45, %s10674_s20  ;;  %v15614_v30 = vpop.f32.mrf.mxu0 }
 0x3eb   :  { %v5341_v15 = vsel %vm5115_vm0, %v5007_v41, %v5233_v1  ;;  %v5008_v53 = vadd.f32 %v15099_v31, %v4893_v60  ;;  %v4556_v2 = vadd.f32 %v15446_v50, %v4090_v52  ;;  %v6318_v50 = vrot.slane %v15583_v21, 1  ;;  %v9374_v1 = vld [vmem:[%s18297_s0 + $0x409] sm:$0xff] }
 0x3ec   :  { %v15589_v37 = vmul.f32 %v5676_v0, %v5341_v15  ;;  %v4092_v10 = vpop.f32.mrf.mxu1 }
 0x3ed   :  { %v4894_v46 = vadd.f32 %v4556_v2, %v18951_v17  ;;  %v9263_v10 = vld [vmem:[%s18297_s0 + $0x3e8] sm:$0xff]  ;;  %v5234_v25 = vmul.f32 %v15073_v5, %v5008_v53  ;;  %vm5116_vm1 = vcmp.ge.f32.partialorder %v5008_v53, 0.0  ;;  %v6320_v45 = vsel %vm6272_vm6, %v6318_v50, %v6319_v29  ;;  %v15620_v2 = vpop.f32.mrf.mxu0 }
 0x3ee   :  { %18950 = vst [vmem:[#allocation105_spill] sm:$0xff] %v15589_v37  ;;  %v4095_v41 = vpop.f32.mrf.mxu1  ;;  %4286 = vmatmul.mubr.bf16.gmra.mxu1 %v3698_v63  ;;  %v6321_v44 = vrot.slane %v15589_v37, 1  ;;  %5850 = vperm.xlu0 %10348, %v5484_v51   ;;  %v18952_v63 = vld [vmem:[#allocation116_spill] sm:$0xff]  ;;  %v6447_v37 = vrot.slane %v15227_v61, 2  ;;  %v9385_v61 = vld [vmem:[%s18297_s0 + $0x481] sm:$0xff] }
 0x3ef   :  { %v5009_v12 = vadd.f32 %v15099_v31, %v4894_v46  ;;  %v4561_v14 = vadd.f32 %v15497_v9, %v4095_v41  ;;  %4293 = vmatprep.mubr.bf16.mxu1 %v3702_v39  ;;  %v5681_v9 = vpop.permute.xlu1 %5680  ;;  %v3701_v46 = vpack.c.bf16 %v9264_v55, %v9263_v10  ;;  %v3705_v41 = vpack.c.bf16 %v9374_v1, %v9373_v8  ;;  %v9266_v55 = vld [vmem:[%s18297_s0 + $0x408] sm:$0xff] }
 0x3f0   :  { %v4097_v60 = vpop.f32.mrf.mxu1  ;;  %v6322_v39 = vsel %vm6272_vm6, %v6319_v29, %v6321_v44  ;;  %v5342_v21 = vsel %vm5116_vm1, %v5008_v53, %v5234_v25 }
 0x3f1   :  { %vm5117_vm2 = vcmp.ge.f32.partialorder %v5009_v12, 0.0  ;;  %v5235_v52 = vmul.f32 %v15073_v5, %v5009_v12  ;;  %v4895_v0 = vadd.f32 %v4561_v14, %v18952_v63  ;;  %v10390_v15 = vpack.i.bf16 %v6322_v39, %v6320_v45  ;;  %v18954_v14 = vld [vmem:[#allocation51_spill] sm:$0xff]  ;;  %v15629_v39 = vpop.f32.mrf.mxu0  ;;  %v18957_v63 = vld [vmem:[#allocation46_spill] sm:$0xff] }
 0x3f2   :  { %v4098_v17 = vpop.f32.mrf.mxu1  ;;  %v15631_v10 = vmul.f32 %v5681_v9, %v5342_v21  ;;  %v9265_v21 = vld [vmem:[%s18297_s0 + $0x400] sm:$0xff] }
 0x3f3   :  { %v5343_v60 = vsel %vm5117_vm2, %v5009_v12, %v5235_v52  ;;  %v5010_v50 = vadd.f32 %v15099_v31, %v4895_v0  ;;  %v4564_v29 = vadd.f32 %v15539_v19, %v4098_v17  ;;  %10391 = vrot.lane.b32.xlu0 %v10390_v15, %s10674_s20  ;;  %v5487_v31 = vld [vmem:[%s18303_s7 + $0x218] sm:$0xff]  ;;  %v15659_v15 = vpop.f32.mrf.mxu0 }
 0x3f4   :  { %v15624_v44 = vmul.f32 %v5686_v58, %v5343_v60  ;;  %v4100_v4 = vpop.f32.mrf.mxu1  ;;  %18955 = vst [vmem:[#allocation106_spill] sm:$0xff] %v15631_v10  ;;  %v5691_v58 = vpop.permute.xlu1 %5690  ;;  %v9375_v52 = vld [vmem:[%s18297_s0 + $0x411] sm:$0xff] }
 0x3f5   :  { %vm5118_vm3 = vcmp.ge.f32.partialorder %v5010_v50, 0.0  ;;  %v5236_v51 = vmul.f32 %v15073_v5, %v5010_v50  ;;  %v4896_v45 = vadd.f32 %v4564_v29, %v18954_v14  ;;  %v15639_v4 = vld [vmem:[%s18299_s2] ss:$0 sm:$0xff] }
 0x3f6   :  { %18953 = vst [vmem:[#allocation100_spill] sm:$0xff] %v15624_v44  ;;  %v4103_v53 = vpop.f32.mrf.mxu1  ;;  %4294 = vmatmul.mubr.bf16.gmra.mxu1 %v3701_v46  ;;  %v6324_v9 = vrot.slane %v15624_v44, 1  ;;  %v3704_v46 = vpack.c.bf16 %v9266_v55, %v9265_v21 }
 0x3f7   :  { %v5344_v19 = vsel %vm5118_vm3, %v5010_v50, %v5236_v51  ;;  %v5011_v25 = vadd.f32 %v15639_v4, %v4896_v45  ;;  %v4569_v12 = vadd.f32 %v15473_v13, %v4103_v53  ;;  %4301 = vmatprep.mubr.bf16.mxu1 %v3705_v41  ;;  %v9376_v13 = vld [vmem:[%s18297_s0 + $0x421] sm:$0xff]  ;;  %5865 = vperm.xlu0 %10348, %v5487_v31   ;;  %v6323_v41 = vrot.slane %v15631_v10, 1 }
 0x3f8   :  { %v15649_v8 = vmul.f32 %v5691_v58, %v5344_v19  ;;  %v4105_v1 = vpop.f32.mrf.mxu1  ;;  %v3708_v14 = vpack.c.bf16 %v9376_v13, %v9375_v52  ;;  %v5696_v58 = vpop.permute.xlu1 %5695 }
 0x3f9   :  { %v4897_v0 = vadd.f32 %v4569_v12, %v18957_v63  ;;  %v5237_v50 = vmul.f32 %v15073_v5, %v5011_v25  ;;  %vm5119_vm5 = vcmp.ge.f32.partialorder %v5011_v25, 0.0  ;;  %v6325_v53 = vsel %vm6272_vm6, %v6323_v41, %v6324_v9  ;;  %v18958_v12 = vld [vmem:[#allocation49_spill] sm:$0xff]  ;;  %v15670_v1 = vpop.f32.mrf.mxu0 }
 0x3fa   :  { %18956 = vst [vmem:[#allocation43_spill] sm:$0xff] %v15649_v8  ;;  %v4106_v17 = vpop.f32.mrf.mxu1  ;;  %v6326_v60 = vrot.slane %v15649_v8, 1 }
 0x3fb   :  { %v5012_v29 = vadd.f32 %v15639_v4, %v4897_v0  ;;  %v4572_v51 = vadd.f32 %v15511_v48, %v4106_v17  ;;  %v5701_v48 = vpop.permute.xlu0 %5700  ;;  %v5345_v52 = vsel %vm5119_vm5, %v5011_v25, %v5237_v50  ;;  %v9268_v17 = vld [vmem:[%s18297_s0 + $0x420] sm:$0xff]  ;;  %v15682_v41 = vpop.f32.mrf.mxu0  ;;  %v5490_v25 = vld [vmem:[%s18303_s7 + $0x230] sm:$0xff] }
 0x3fc   :  { %v4108_v45 = vpop.f32.mrf.mxu1  ;;  %v6327_v31 = vsel %vm6272_vm6, %v6324_v9, %v6326_v60  ;;  %v9267_v9 = vld [vmem:[%s18297_s0 + $0x410] sm:$0xff] }
 0x3fd   :  { %vm5120_vm7 = vcmp.ge.f32.partialorder %v5012_v29, 0.0  ;;  %v5238_v19 = vmul.f32 %v15073_v5, %v5012_v29  ;;  %v4898_v21 = vadd.f32 %v4572_v51, %v18958_v12  ;;  %v10395_v55 = vpack.i.bf16 %v6327_v31, %v6325_v53  ;;  %v9377_v50 = vld [vmem:[%s18297_s0 + $0x429] sm:$0xff]  ;;  %v5706_v31 = vpop.permute.xlu1 %5705 }
 0x3fe   :  { %v15672_v63 = vpop.f32.mrf.mxu1  ;;  %4302 = vmatmul.mubr.bf16.gmra.mxu1 %v3704_v46  ;;  %v3707_v53 = vpack.c.bf16 %v9268_v17, %v9267_v9  ;;  %v9270_v17 = vld [vmem:[%s18297_s0 + $0x430] sm:$0xff] }
 0x3ff   :  { %v5346_v13 = vsel %vm5120_vm7, %v5012_v29, %v5238_v19  ;;  %v5013_v0 = vadd.f32 %v15639_v4, %v4898_v21  ;;  %10396 = vrot.lane.b32.xlu0 %v10395_v55, %s10674_s20  ;;  %4309 = vmatprep.mubr.bf16.mxu1 %v3708_v14  ;;  %v9378_v29 = vld [vmem:[%s18297_s0 + $0x431] sm:$0xff]  ;;  %v15696_v14 = vmul.f32 %v5696_v58, %v5345_v52  ;;  %v15700_v21 = vpop.f32.mrf.mxu0 }
 0x400   :  { %v15684_v60 = vmul.f32 %v5701_v48, %v5346_v13  ;;  %v4113_v46 = vpop.f32.mrf.mxu1  ;;  %v3711_v12 = vpack.c.bf16 %v9378_v29, %v9377_v50 }
 0x401   :  { %vm5121_vm9 = vcmp.ge.f32.partialorder %v5013_v0, 0.0  ;;  %v5239_v51 = vmul.f32 %v15073_v5, %v5013_v0  ;;  %18960 = vst [vmem:[#allocation40_spill] sm:$0xff] %v15696_v14  ;;  %v10617_v46 = vld [vmem:[%s18301_s4 + $0x20] sm:$0xff]   ;;  %v6328_v52 = vrot.slane %v15696_v14, 1  ;;  %v15775_v8 = vpop.permute.xlu1 %5710 }
 0x402   :  { %18959 = vst [vmem:[#allocation104_spill] sm:$0xff] %v15684_v60  ;;  %v15698_v45 = vpop.f32.mrf.mxu1  ;;  %v6329_v13 = vrot.slane %v15684_v60, 1  ;;  %7620 = vmatpush1.bf16.msra.mxu1 %v10617_v46 }
 0x403   :  { %v5347_v19 = vsel %vm5121_vm9, %v5013_v0, %v5239_v51  ;;  %5880 = vperm.xlu0 %10348, %v5490_v25   ;;  %v9269_v0 = vld [vmem:[%s18297_s0 + $0x428] sm:$0xff]  ;;  %v15716_v25 = vpop.f32.mrf.mxu0  ;;  %7621 = vmatprep.subr.bf16.mxu1 %v18900_v47 }
 0x404   :  { %v15702_v55 = vmul.f32 %v5706_v31, %v5347_v19  ;;  %v4116_v48 = vpop.f32.mrf.mxu1  ;;  %v6330_v29 = vsel %vm6272_vm6, %v6328_v52, %v6329_v13  ;;  %v9380_v31 = vld [vmem:[%s18297_s0 + $0x449] sm:$0xff] }
 0x405   :  { %v3710_v48 = vpack.c.bf16 %v9270_v17, %v9269_v0  ;;  %v15730_v52 = vpop.f32.mrf.mxu0  ;;  %v9271_v0 = vld [vmem:[%s18297_s0 + $0x440] sm:$0xff]  ;;  %v9272_v17 = vld [vmem:[%s18297_s0 + $0x448] sm:$0xff] }
 0x406   :  { %18961 = vst [vmem:[#allocation109_spill] sm:$0xff] %v15702_v55  ;;  %v4119_v58 = vpop.f32.mrf.mxu1  ;;  %4310 = vmatmul.mubr.bf16.gmra.mxu1 %v3707_v53  ;;  %v6331_v9 = vrot.slane %v15702_v55, 1  ;;  %v9379_v53 = vld [vmem:[%s18297_s0 + $0x441] sm:$0xff] }
 0x407   :  { %4317 = vmatprep.mubr.bf16.mxu1 %v3711_v12  ;;  %v3714_v46 = vpack.c.bf16 %v9380_v31, %v9379_v53  ;;  %v9382_v53 = vld [vmem:[%s18297_s0 + $0x461] sm:$0xff]  ;;  %v4585_v36 = vadd.f32 %v15547_v43, %v4119_v58  ;;  %v9386_v43 = vld [vmem:[%s18297_s0 + $0x489] sm:$0xff]  ;;  %7622 = vmatpush1.bf16.msra.mxu1 %v10618_v27 }
 0x408   :  { %v4121_v50 = vpop.f32.mrf.mxu1  ;;  %v6332_v51 = vsel %vm6272_vm6, %v6329_v13, %v6331_v9  ;;  %v5493_v9 = vld [vmem:[%s18303_s7 + $0x248] sm:$0xff]  ;;  %v9274_v55 = vld [vmem:[%s18297_s0 + $0x460] sm:$0xff]  ;;  %7623 = vmatprep.subr.bf16.mxu1 %v18900_v47 }
 0x409   :  { %v10400_v19 = vpack.i.bf16 %v6332_v51, %v6330_v29  ;;  %v15735_v50 = vpop.f32.mrf.mxu0  ;;  %v9381_v51 = vld [vmem:[%s18297_s0 + $0x451] sm:$0xff]  ;;  %v15893_v27 = vld [vmem:[%s18297_s0 + $0x4a8] sm:$0xff] }
 0x40a   :  { %v15727_v12 = vpop.f32.mrf.mxu1 }
 0x40b   :  { %10401 = vrot.lane.b32.xlu0 %v10400_v19, %s10674_s20  ;;  %v15751_v31 = vpop.f32.mrf.mxu0 }
 0x40c   :  { %v4124_v13 = vpop.f32.mrf.mxu1 }
 0x40e   :  { %v15737_v60 = vpop.f32.mrf.mxu1  ;;  %4318 = vmatmul.mubr.bf16.gmra.mxu1 %v3710_v48  ;;  %v3713_v48 = vpack.c.bf16 %v9272_v17, %v9271_v0  ;;  %v9383_v0 = vld [vmem:[%s18297_s0 + $0x469] sm:$0xff]  ;;  %v9384_v17 = vld [vmem:[%s18297_s0 + $0x471] sm:$0xff] }
 0x40f   :  { %5895 = vperm.xlu0 %10348, %v5493_v9   ;;  %4325 = vmatprep.mubr.bf16.mxu1 %v3714_v46  ;;  %v3717_v46 = vpack.c.bf16 %v9382_v53, %v9381_v51  ;;  %v15753_v9 = vpop.f32.mrf.mxu0 }
 0x410   :  { %v4129_v29 = vpop.f32.mrf.mxu1 }
 0x411   :  { %v9273_v29 = vld [vmem:[%s18297_s0 + $0x450] sm:$0xff]  ;;  %v15769_v51 = vpop.f32.mrf.mxu0 }
 0x412   :  { %v4130_v19 = vpop.f32.mrf.mxu1  ;;  %18962 = vst [vmem:[#allocation110_spill] sm:$0xff] %v15769_v51 }
 0x414   :  { %v4132_v13 = vpop.f32.mrf.mxu1 }
 0x415   :  { %v15773_v13 = vpop.f32.mrf.mxu0 }
 0x416   :  { %v15755_v14 = vpop.f32.mrf.mxu1  ;;  %4326 = vmatmul.mubr.bf16.gmra.mxu1 %v3713_v48  ;;  %v3716_v48 = vpack.c.bf16 %v9274_v55, %v9273_v29  ;;  %18963 = vst [vmem:[#allocation107_spill] sm:$0xff] %v15773_v13  ;;  %v9275_v55 = vld [vmem:[%s18297_s0 + $0x468] sm:$0xff] }
 0x417   :  { %4333 = vmatprep.mubr.bf16.mxu1 %v3717_v46  ;;  %v3720_v46 = vpack.c.bf16 %v9384_v17, %v9383_v0  ;;  %v15789_v29 = vpop.f32.mrf.mxu0  ;;  %v6444_v17 = vrot.slane %v15248_v35, 2 }
 0x418   :  { %v4137_v10 = vpop.f32.mrf.mxu1 }
 0x419   :  { %v4577_v10 = vadd.f32 %v15569_v18, %v15672_v63  ;;  %v6445_v18 = vrot.slane %v15225_v26, 2  ;;  %v18964_v63 = vld [vmem:[#allocation50_spill] sm:$0xff] }
 0x41a   :  { %v15771_v53 = vpop.f32.mrf.mxu1 }
 0x41b   :  { %v4899_v58 = vadd.f32 %v4577_v10, %v18964_v63  ;;  %v15818_v10 = vld [vmem:[%s18297_s0 + $0x491] sm:$0xff]  ;;  %v3723_v63 = vpack.c.bf16 %v9386_v43, %v9385_v61  ;;  %v6446_v43 = vsel %vm6433_vm4, %v6444_v17, %v6445_v18 }
 0x41c   :  { %v4140_v44 = vpop.f32.mrf.mxu1 }
 0x41d   :  { %v9276_v44 = vld [vmem:[%s18297_s0 + $0x470] sm:$0xff]  ;;  %v5014_v13 = vadd.f32 %v15639_v4, %v4899_v58 }
 0x41e   :  { %v15780_v23 = vpop.f32.mrf.mxu1  ;;  %4334 = vmatmul.mubr.bf16.gmra.mxu1 %v3716_v48  ;;  %v4580_v48 = vadd.f32 %v15614_v30, %v15698_v45  ;;  %v3719_v20 = vpack.c.bf16 %v9276_v44, %v9275_v55  ;;  %v6449_v30 = vrot.slane %v15290_v32, 2  ;;  %v15821_v45 = vpop.permute.xlu1 %5720  ;;  %v4588_v44 = vadd.f32 %v15587_v11, %v15727_v12  ;;  %v15867_v58 = vld [vmem:[%s18297_s0 + $0x4a9] sm:$0xff] }
 0x41f   :  { %4341 = vmatprep.mubr.bf16.mxu1 %v3720_v46  ;;  %v6452_v11 = vrot.slane %v15299_v22, 2  ;;  %v4596_v12 = vadd.f32 %v15670_v1, %v4130_v19  ;;  %v3722_v22 = vpack.c.bf16 %v15813_v56, %v15808_v54  ;;  %v15872_v56 = vld [vmem:[%s18297_s0 + $0x4b1] sm:$0xff]  ;;  %vm5122_vm10 = vcmp.ge.f32.partialorder %v5014_v13, 0.0 }
 0x420   :  { %v4145_v0 = vpop.f32.mrf.mxu1 }
 0x421   :  { %v6448_v0 = vsel %vm6433_vm4, %v6445_v18, %v6447_v37  ;;  %v18965_v37 = vld [vmem:[#allocation48_spill] sm:$0xff]  ;;  %v3726_v18 = vpack.c.bf16 %v15829_v6, %v15818_v10  ;;  %v6455_v10 = vrot.slane %v15350_v59, 2 }
 0x422   :  { %v15802_v46 = vpop.f32.mrf.mxu1  ;;  %v4901_v55 = vadd.f32 %v4585_v36, %v18965_v37  ;;  %v15841_v36 = vpop.f32.mrf.mxu0  ;;  %v6450_v37 = vrot.slane %v15297_v34, 2  ;;  %v15852_v51 = vpack.c.bf16 %v6448_v0, %v6446_v43  ;;  %v6454_v0 = vrot.slane %v15362_v7, 2 }
 0x423   :  { %18966 = vst [vmem:[#allocation42_spill] sm:$0xff] %v15841_v36  ;;  %v18968_v36 = vld [vmem:[#allocation55_spill] sm:$0xff] }
 0x424   :  { %v4148_v61 = vpop.f32.mrf.mxu1  ;;  %18967 = vst [vmem:[#allocation108_spill] sm:$0xff] %v15852_v51  ;;  %v4900_v1 = vadd.f32 %v4580_v48, %v18968_v36  ;;  %v6451_v3 = vsel %vm6433_vm4, %v6449_v30, %v6450_v37  ;;  %v5016_v54 = vadd.f32 %v15639_v4, %v4901_v55  ;;  %v10352_v6 = vpop.permute.xlu0 %10351  ;;  %v18970_v36 = vld [vmem:[#allocation52_spill] sm:$0xff]  ;;  %v6453_v34 = vsel %vm6433_vm4, %v6450_v37, %v6452_v11 }
 0x425   :  { %v15878_v30 = vpop.f32.mrf.mxu0  ;;  %v4904_v61 = vadd.f32 %v4596_v12, %v18970_v36  ;;  %v10354_v43 = vunpack.i.h.bf16 %v10352_v6  ;;  %v10353_v17 = vunpack.i.l.bf16 %v10352_v6  ;;  %v15883_v55 = vpop.permute.xlu1 %5725 }
 0x426   :  { %v15857_v19 = vpop.f32.mrf.mxu1  ;;  %4342 = vmatmul.mubr.bf16.gmra.mxu1 %v3719_v20  ;;  %v18969_v20 = vld [vmem:[#allocation53_spill] sm:$0xff]  ;;  %v5015_v12 = vadd.f32 %v15639_v4, %v4900_v1  ;;  %v5242_v36 = vmul.f32 %v15073_v5, %v5016_v54  ;;  %vm5124_vm11 = vcmp.ge.f32.partialorder %v5016_v54, 0.0  ;;  %v6456_v1 = vsel %vm6433_vm4, %v6454_v0, %v6455_v10  ;;  %v15943_v0 = vld [vmem:[%s18297_s0 + $0x4c9] sm:$0xff] }
 0x427   :  { %v4902_v48 = vadd.f32 %v4588_v44, %v18969_v20  ;;  %4349 = vmatprep.mubr.bf16.mxu1 %v3723_v63  ;;  %v5240_v44 = vmul.f32 %v15073_v5, %v5014_v13  ;;  %v15886_v63 = vpack.c.bf16 %v6453_v34, %v6451_v3  ;;  %v15900_v11 = vpop.f32.mrf.mxu0  ;;  %v4593_v34 = vadd.f32 %v15629_v39, %v15737_v60 }
 0x428   :  { %v4153_v32 = vpop.f32.mrf.mxu1  ;;  %18972 = vst [vmem:[#allocation47_spill] sm:$0xff] %v15900_v11  ;;  %v6854_v37 = vsel %vm6850_vm8, %v15147_v49, %v10354_v43  ;;  %v6853_v3 = vsel %vm6850_vm8, %v15157_v42, %v10353_v17  ;;  %v4601_v11 = vadd.f32 %v15620_v2, %v15755_v14  ;;  %v5019_v39 = vadd.f32 %v15639_v4, %v4904_v61  ;;  %v18975_v43 = vld [vmem:[#allocation118_spill] sm:$0xff]  ;;  %v18977_v42 = vld [vmem:[#allocation56_spill] sm:$0xff] }
 0x429   :  { %18971 = vst [vmem:[#allocation114_spill] sm:$0xff] %v15886_v63  ;;  %v15898_v32 = vld [vmem:[%s18297_s0 + $0x4b0] sm:$0xff]  ;;  %v5017_v20 = vadd.f32 %v15639_v4, %v4902_v48  ;;  %v15915_v47 = vpack.c.bf16 %v6854_v37, %v6853_v3  ;;  %v4609_v49 = vadd.f32 %v15700_v21, %v15780_v23  ;;  %v6458_v17 = vsel %vm6433_vm4, %v6455_v10, %v6457_v16  ;;  %v15927_v48 = vpop.f32.mrf.mxu0  ;;  %v15938_v16 = vld [vmem:[%s18297_s0 + $0x4c1] sm:$0xff]  ;;  %v5736_v10 = vpop.permute.xlu1 %5735 }
 0x42a   :  { %v15909_v6 = vpop.f32.mrf.mxu1  ;;  %v6459_v2 = vrot.slane %v15410_v28, 2  ;;  %v6460_v14 = vrot.slane %v15402_v24, 2  ;;  %18974 = vst [vmem:[#allocation111_spill] sm:$0xff] %v15927_v48  ;;  %v5348_v61 = vsel %vm5122_vm10, %v5014_v13, %v5240_v44  ;;  %v4903_v23 = vadd.f32 %v4593_v34, %v18975_v43  ;;  %v18976_v37 = vld [vmem:[#allocation7_spill] sm:$0xff] }
 0x42b   :  { %18973 = vst [vmem:[#allocation45_spill] sm:$0xff] %v15915_v47  ;;  %7279 = vmatmul.mubr.bf16.vlgmr.msra.gmra.mxu0 %v15915_v47  ;;  %vm5123_vm12 = vcmp.ge.f32.partialorder %v5015_v12, 0.0  ;;  %v6462_v13 = vrot.slane %v15375_v62, 2  ;;  %v5350_v44 = vsel %vm5124_vm11, %v5016_v54, %v5242_v36  ;;  %v5243_v34 = vmul.f32 %v15073_v5, %v5017_v20  ;;  %v15957_v62 = vld [vmem:[%s18297_s0 + $0x4c0] sm:$0xff]  ;;  %v15962_v54 = vld [vmem:[%s18297_s0 + $0x4c8] sm:$0xff] }
 0x42c   :  { %v4156_v60 = vpop.f32.mrf.mxu1  ;;  %9616 = vmatprep.mubr.msk.bf16.mxu0 %vm6850_vm8, %v15852_v51  ;;  %v4905_v3 = vadd.f32 %v4601_v11, %v18976_v37  ;;  %vm5125_vm13 = vcmp.ge.f32.partialorder %v5017_v20, 0.0  ;;  %v4604_v43 = vadd.f32 %v15659_v15, %v15771_v53  ;;  %v4907_v51 = vadd.f32 %v4609_v49, %v18977_v42 }
 0x42d   :  { %v5245_v60 = vmul.f32 %v15073_v5, %v5019_v39  ;;  %vm5127_vm14 = vcmp.ge.f32.partialorder %v5019_v39, 0.0  ;;  %v15967_v11 = vpack.c.bf16 %v6458_v17, %v6456_v1  ;;  %v15974_v53 = vmul.f32 %v15821_v45, %v5350_v44  ;;  %v15984_v1 = vld [vmem:[%s18297_s0 + $0x4d1] sm:$0xff]  ;;  %v15989_v17 = vld [vmem:[%s18297_s0 + $0x4e1] sm:$0xff]  ;;  %v5741_v24 = vpop.permute.xlu1 %5740 }
 0x42e   :  { %v15933_v21 = vpop.f32.mrf.mxu1  ;;  %4350 = vmatmul.mubr.bf16.gmra.mxu1 %v3722_v22  ;;  %v5241_v22 = vmul.f32 %v15073_v5, %v5015_v12  ;;  %v5018_v36 = vadd.f32 %v15639_v4, %v4903_v23  ;;  %v6461_v42 = vsel %vm6433_vm4, %v6459_v2, %v6460_v14  ;;  %v5351_v45 = vsel %vm5125_vm13, %v5017_v20, %v5243_v34 }
 0x42f   :  { %4357 = vmatprep.mubr.bf16.mxu1 %v3726_v18  ;;  %v15965_v18 = vmul.f32 %v15775_v8, %v5348_v61  ;;  %18978 = vst [vmem:[#allocation44_spill] sm:$0xff] %v15967_v11  ;;  %v6463_v8 = vsel %vm6433_vm4, %v6460_v14, %v6462_v13  ;;  %v5020_v61 = vadd.f32 %v15639_v4, %v4905_v3  ;;  %v18980_v13 = vld [vmem:[#allocation119_spill] sm:$0xff] }
 0x430   :  { %v4161_v47 = vpop.f32.mrf.mxu1  ;;  %v5349_v23 = vsel %vm5123_vm12, %v5015_v12, %v5241_v22  ;;  %v3731_v2 = vpack.c.bf16 %v15962_v54, %v15957_v62  ;;  %v5353_v14 = vsel %vm5127_vm14, %v5019_v39, %v5245_v60  ;;  %v4906_v44 = vadd.f32 %v4604_v43, %v18980_v13 }
 0x431   :  { %v15971_v47 = vpop.f32.mrf.mxu0  ;;  %v5022_v37 = vadd.f32 %v15639_v4, %v4907_v51  ;;  %v4612_v15 = vadd.f32 %v15730_v52, %v15802_v46  ;;  %v6333_v20 = vrot.slane %v15965_v18, 1  ;;  %v16003_v34 = vpack.c.bf16 %v6463_v8, %v6461_v42 }
 0x432   :  { %18979 = vst [vmem:[#allocation115_spill] sm:$0xff] %v15971_v47  ;;  %v15977_v49 = vpop.f32.mrf.mxu1  ;;  %v5716_v47 = vpop.permute.xlu0 %5715  ;;  %v3735_v12 = vpack.c.bf16 %v15989_v17, %v15984_v1  ;;  %v16010_v3 = vmul.f32 %v15883_v55, %v5351_v45  ;;  %v4620_v52 = vadd.f32 %v15716_v25, %v15909_v6  ;;  %vm5126_vm15 = vcmp.ge.f32.partialorder %v5018_v36, 0.0 }
 0x433   :  { %v16000_v48 = vmul.f32 %v5716_v47, %v5349_v23  ;;  %18981 = vst [vmem:[#allocation113_spill] sm:$0xff] %v16003_v34  ;;  %v16007_v39 = vpop.f32.mrf.mxu0  ;;  %v18982_v46 = vpack.c.bf16 %v15839_v33, %v15834_v38  ;;  %v16018_v22 = vmul.f32 %v5736_v10, %v5353_v14  ;;  %vm5128_vm0 = vcmp.ge.f32.partialorder %v5020_v61, 0.0 }
 0x434   :  { %v4164_v28 = vpop.f32.mrf.mxu1  ;;  %v5244_v43 = vmul.f32 %v15073_v5, %v5018_v36  ;;  %v18983_v55 = vpack.c.bf16 %v15872_v56, %v15867_v58  ;;  %v5246_v6 = vmul.f32 %v15073_v5, %v5020_v61  ;;  %v5021_v47 = vadd.f32 %v15639_v4, %v4906_v44 }
 0x435   :  { %v6336_v28 = vrot.slane %v15974_v53, 1  ;;  %v6334_v60 = vrot.slane %v16000_v48, 1  ;;  %v16025_v25 = vpop.f32.mrf.mxu0  ;;  %v5248_v33 = vmul.f32 %v15073_v5, %v5022_v37  ;;  %v4908_v38 = vadd.f32 %v4612_v15, %v14349_v57 }
 0x436   :  { %v4167_v51 = vpop.f32.mrf.mxu1  ;;  %4358 = vmatmul.mubr.bf16.gmra.mxu1 %v18982_v46  ;;  %v10357_v10 = vpop.permute.xlu0 %10356  ;;  %vm5130_vm1 = vcmp.ge.f32.partialorder %v5022_v37, 0.0  ;;  %v4617_v58 = vadd.f32 %v15682_v41, %v15857_v19  ;;  %v4910_v56 = vadd.f32 %v4620_v52, %v14344_v40  ;;  %vm5129_vm2 = vcmp.ge.f32.partialorder %v5021_v47, 0.0 }
 0x437   :  { %4365 = vmatprep.mubr.bf16.mxu1 %v18983_v55  ;;  %v10359_v8 = vunpack.i.h.bf16 %v10357_v10  ;;  %v10358_v45 = vunpack.i.l.bf16 %v10357_v10  ;;  %v6335_v23 = vsel %vm6272_vm6, %v6333_v20, %v6334_v60  ;;  %v6337_v14 = vsel %vm6272_vm6, %v6334_v60, %v6336_v28  ;;  %v5751_v46 = vpop.permute.xlu1 %5750  ;;  %v16042_v28 = vpop.f32.mrf.mxu0 }
 0x438   :  { %v4169_v42 = vpop.f32.mrf.mxu1  ;;  %v10405_v13 = vpack.i.bf16 %v6337_v14, %v6335_v23  ;;  %v5352_v55 = vsel %vm5126_vm15, %v5018_v36, %v5244_v43  ;;  %v5354_v60 = vsel %vm5128_vm0, %v5020_v61, %v5246_v6  ;;  %v16046_v41 = vadd.f32 %v15639_v4, %v4908_v38  ;;  %v18985_v61 = vld [vmem:[#allocation65_spill] sm:$0xff]  ;;  %v18987_v6 = vld [vmem:[#allocation62_spill] sm:$0xff] }
 0x439   :  { %v6856_v57 = vsel %vm6850_vm8, %v15225_v26, %v10359_v8  ;;  %v6855_v15 = vsel %vm6850_vm8, %v15248_v35, %v10358_v45  ;;  %v5247_v26 = vmul.f32 %v15073_v5, %v5021_v47  ;;  %v5356_v35 = vsel %vm5130_vm1, %v5022_v37, %v5248_v33 }
 0x43a   :  { %v4170_v44 = vpop.f32.mrf.mxu1  ;;  %10406 = vrot.lane.b32.xlu0 %v10405_v13, %s10674_s20  ;;  %v5731_v40 = vpop.permute.xlu0 %5730  ;;  %v16049_v19 = vpack.c.bf16 %v6856_v57, %v6855_v15  ;;  %v4909_v38 = vadd.f32 %v4617_v58, %v18987_v6  ;;  %v16063_v10 = vadd.f32 %v15639_v4, %v4910_v56  ;;  %v6338_v42 = vrot.slane %v16010_v3, 1  ;;  %v18990_v15 = vld [vmem:[#allocation58_spill] sm:$0xff] }
 0x43b   :  { %v4636_v20 = vadd.f32 %v15753_v9, %v4170_v44  ;;  %v16053_v36 = vmul.f32 %v5731_v40, %v5352_v55  ;;  %v5496_v9 = vld [vmem:[%s18303_s7 + $0x260] sm:$0xff]  ;;  %v6341_v37 = vrot.slane %v16018_v22, 1  ;;  %v18988_v8 = vpack.c.bf16 %v15898_v32, %v15893_v27  ;;  %v16082_v13 = vpop.f32.mrf.mxu0  ;;  %v5756_v44 = vpop.permute.xlu1 %5755  ;;  %v16112_v40 = vld [vmem:[%s18297_s0 + $0x4e9] sm:$0xff] }
 0x43c   :  { %18984 = vst [vmem:[#allocation117_spill] sm:$0xff] %v16049_v19  ;;  %v4172_v52 = vpop.f32.mrf.mxu1  ;;  %7287 = vmatmul.mubr.bf16.gmra.mxu0 %v16049_v19  ;;  %v16071_v45 = vmul.f32 %v5741_v24, %v5354_v60  ;;  %v4625_v23 = vadd.f32 %v15751_v31, %v15933_v21  ;;  %v18989_v56 = vpack.c.bf16 %v15943_v0, %v15938_v16  ;;  %vm5131_vm3 = vcmp.ge.f32.partialorder %v16046_v41, 0.0  ;;  %v16107_v60 = vld [vmem:[%s18297_s0 + $0x4e0] sm:$0xff] }
 0x43d   :  { %v16059_v43 = vadd.f32 %v4636_v20, %v18985_v61  ;;  %v6339_v14 = vrot.slane %v16053_v36, 1  ;;  %9617 = vmatprep.mubr.msk.bf16.mxu0 %vm6850_vm8, %v15886_v63  ;;  %v16084_v27 = vmul.f32 %v5751_v46, %v5356_v35  ;;  %v4633_v24 = vadd.f32 %v15735_v50, %v4167_v51  ;;  %v16095_v46 = vld [vmem:[%s18297_s0 + $0x4d0] sm:$0xff]  ;;  %v18992_v52 = vld [vmem:[#allocation54_spill] sm:$0xff] }
 0x43e   :  { %v4175_v33 = vpop.f32.mrf.mxu1  ;;  %4366 = vmatmul.mubr.bf16.gmra.mxu1 %v18988_v8  ;;  %5910 = vperm.xlu0 %10348, %v5496_v9   ;;  %v10362_v31 = vpop.permute.xlu0 %10361  ;;  %v5355_v32 = vsel %vm5129_vm2, %v5021_v47, %v5247_v26  ;;  %v5024_v50 = vadd.f32 %v15639_v4, %v4909_v38  ;;  %v5251_v51 = vmul.f32 %v15073_v5, %v16063_v10  ;;  %v16117_v26 = vld [vmem:[%s18297_s0 + $0x4f1] sm:$0xff]  ;;  %v18994_v6 = vld [vmem:[#allocation90_spill] sm:$0xff]  ;;  %vm5133_vm5 = vcmp.ge.f32.partialorder %v16063_v10, 0.0 }
 0x43f   :  { %18986 = vst [vmem:[#allocation116_spill] sm:$0xff] %v16059_v43  ;;  %v4641_v58 = vadd.f32 %v15789_v29, %v4175_v33  ;;  %4373 = vmatprep.mubr.bf16.mxu1 %v18989_v56  ;;  %v5249_v29 = vmul.f32 %v15073_v5, %v16046_v41  ;;  %v10364_v57 = vunpack.i.h.bf16 %v10362_v31  ;;  %v10363_v16 = vunpack.i.l.bf16 %v10362_v31  ;;  %v18993_v9 = vld [vmem:[#allocation33_spill] sm:$0xff]  ;;  %v18995_v33 = vld [vmem:[#allocation110_spill] sm:$0xff] }
 0x440   :  { %v4177_v21 = vpop.f32.mrf.mxu1  ;;  %v6340_v0 = vsel %vm6272_vm6, %v6338_v42, %v6339_v14  ;;  %v6342_v47 = vsel %vm6272_vm6, %v6339_v14, %v6341_v37  ;;  %v4911_v35 = vadd.f32 %v4625_v23, %v18992_v52  ;;  %v16124_v37 = vpop.f32.mrf.mxu0  ;;  %v4628_v8 = vadd.f32 %v18995_v33, %v15977_v49  ;;  %v18996_v14 = vld [vmem:[#allocation9_spill] sm:$0xff] }
 0x441   :  { %v16102_v55 = vadd.f32 %v4641_v58, %v18990_v15  ;;  %v6858_v61 = vsel %vm6850_vm8, %v18993_v9, %v10364_v57  ;;  %v6857_v38 = vsel %vm6850_vm8, %v18994_v6, %v10363_v16  ;;  %v10410_v42 = vpack.i.bf16 %v6342_v47, %v6340_v0 }
 0x442   :  { %v4178_v20 = vpop.f32.mrf.mxu1  ;;  %v4913_v58 = vadd.f32 %v4633_v24, %v18996_v14  ;;  %v5746_v56 = vpop.permute.xlu0 %5745  ;;  %v16129_v31 = vpack.c.bf16 %v6858_v61, %v6857_v38  ;;  %v3734_v16 = vpack.c.bf16 %v16107_v60, %v16095_v46  ;;  %v3738_v49 = vpack.c.bf16 %v16117_v26, %v16112_v40  ;;  %v18998_v24 = vld [vmem:[#allocation68_spill] sm:$0xff]  ;;  %v19000_v61 = vld [vmem:[#allocation107_spill] sm:$0xff] }
 0x443   :  { %18991 = vst [vmem:[#allocation51_spill] sm:$0xff] %v16102_v55  ;;  %v4644_v21 = vadd.f32 %v15878_v30, %v4178_v20  ;;  %10411 = vrot.lane.b32.xlu0 %v10410_v42, %s10674_s20  ;;  %v16134_v57 = vmul.f32 %v5746_v56, %v5355_v32  ;;  %v16140_v0 = vpop.f32.mrf.mxu0  ;;  %v5499_v30 = vld [vmem:[%s18303_s7 + $0x278] sm:$0xff]  ;;  %v6343_v32 = vrot.slane %v16071_v45, 1  ;;  %v6346_v15 = vrot.slane %v16084_v27, 1  ;;  %v5766_v60 = vpop.permute.xlu1 %5765 }
 0x444   :  { %18997 = vst [vmem:[#allocation46_spill] sm:$0xff] %v16129_v31  ;;  %v4180_v23 = vpop.f32.mrf.mxu1  ;;  %7295 = vmatmul.mubr.bf16.gmra.mxu0 %v16129_v31  ;;  %v5250_v46 = vmul.f32 %v15073_v5, %v5024_v50  ;;  %v5357_v52 = vsel %vm5131_vm3, %v16046_v41, %v5249_v29  ;;  %vm5132_vm7 = vcmp.ge.f32.partialorder %v5024_v50, 0.0  ;;  %v5359_v62 = vsel %vm5133_vm5, %v16063_v10, %v5251_v51 }
 0x445   :  { %v16147_v47 = vadd.f32 %v4644_v21, %v18998_v24  ;;  %v6344_v9 = vrot.slane %v16134_v57, 1  ;;  %9618 = vmatprep.mubr.msk.bf16.mxu0 %vm6850_vm8, %v15967_v11  ;;  %v5026_v54 = vadd.f32 %v15639_v4, %v4911_v35  ;;  %v5028_v29 = vadd.f32 %v15639_v4, %v4913_v58  ;;  %v16173_v17 = vpop.f32.mrf.mxu0  ;;  %v19002_v35 = vld [vmem:[#allocation11_spill] sm:$0xff]  ;;  %v19004_v24 = vld [vmem:[#allocation42_spill] sm:$0xff] }
 0x446   :  { %v4183_v20 = vpop.f32.mrf.mxu1  ;;  %4374 = vmatmul.mubr.bf16.gmra.mxu1 %v3731_v2  ;;  %v19001_v2 = vld [vmem:[#allocation59_spill] sm:$0xff]  ;;  %v10367_v38 = vpop.permute.xlu0 %10366  ;;  %v5358_v51 = vsel %vm5132_vm7, %v5024_v50, %v5250_v46  ;;  %v16181_v21 = vmul.f32 %v5766_v60, %v5359_v62 }
 0x447   :  { %18999 = vst [vmem:[#allocation49_spill] sm:$0xff] %v16147_v47  ;;  %v4649_v6 = vadd.f32 %v19000_v61, %v4183_v20  ;;  %4381 = vmatprep.mubr.bf16.mxu1 %v3735_v12  ;;  %v4912_v41 = vadd.f32 %v4628_v8, %v19001_v2  ;;  %5925 = vperm.xlu0 %10348, %v5499_v30   ;;  %v10369_v33 = vunpack.i.h.bf16 %v10367_v38  ;;  %v10368_v14 = vunpack.i.l.bf16 %v10367_v38  ;;  %v5771_v60 = vpop.permute.xlu1 %5770  ;;  %v16199_v61 = vpop.f32.mrf.mxu0  ;;  %v5421_v2 = vld [vmem:[%s18303_s7 + $0x8] sm:$0xff]  ;;  %v19009_v38 = vld [vmem:[#allocation93_spill] sm:$0xff] }
 0x448   :  { %v4185_v42 = vpop.f32.mrf.mxu1  ;;  %v6345_v56 = vsel %vm6272_vm6, %v6343_v32, %v6344_v9  ;;  %v6347_v1 = vsel %vm6272_vm6, %v6344_v9, %v6346_v15  ;;  %v16175_v12 = vmul.f32 %v5756_v44, %v5357_v52  ;;  %v5252_v44 = vmul.f32 %v15073_v5, %v5026_v54 }
 0x449   :  { %v10415_v10 = vpack.i.bf16 %v6347_v1, %v6345_v56  ;;  %v16179_v8 = vadd.f32 %v4649_v6, %v19002_v35  ;;  %v6860_v23 = vsel %vm6850_vm8, %v15350_v59, %v10369_v33  ;;  %v6859_v30 = vsel %vm6850_vm8, %v15362_v7, %v10368_v14  ;;  %v19006_v7 = vld [vmem:[#allocation74_spill] sm:$0xff]  ;;  %v19008_v6 = vld [vmem:[#allocation97_spill] sm:$0xff]  ;;  %v19010_v33 = vld [vmem:[#allocation112_spill] sm:$0xff] }
 0x44a   :  { %v4186_v58 = vpop.f32.mrf.mxu1  ;;  %v5027_v15 = vadd.f32 %v15639_v4, %v4912_v41  ;;  %v5254_v50 = vmul.f32 %v15073_v5, %v5028_v29  ;;  %v5761_v46 = vpop.permute.xlu0 %5760  ;;  %v16191_v20 = vpack.c.bf16 %v6860_v23, %v6859_v30  ;;  %vm5134_vm9 = vcmp.ge.f32.partialorder %v5026_v54, 0.0  ;;  %v10619_v23 = vld [vmem:[%s18301_s4 + $0x10] sm:$0xff]  }
 0x44b   :  { %19003 = vst [vmem:[#allocation50_spill] sm:$0xff] %v16179_v8  ;;  %v4652_v32 = vadd.f32 %v19004_v24, %v4186_v58  ;;  %vm5136_vm10 = vcmp.ge.f32.partialorder %v5028_v29, 0.0  ;;  %10416 = vrot.lane.b32.xlu0 %v10415_v10, %s10674_s20  ;;  %v16194_v59 = vmul.f32 %v5761_v46, %v5358_v51  ;;  %v6467_v62 = vrot.slane %v19008_v6, 2  ;;  %v19011_v51 = vld [vmem:[#allocation111_spill] sm:$0xff]  ;;  %v9288_v58 = vld [vmem:[%s18297_s0 + $0x4f0] sm:$0xff]  ;;  %v16231_v6 = vpop.f32.mrf.mxu0  ;;  %7624 = vmatpush1.bf16.msra.mxu1 %v10619_v23 }
 0x44c   :  { %19005 = vst [vmem:[#allocation48_spill] sm:$0xff] %v16191_v20  ;;  %v4188_v52 = vpop.f32.mrf.mxu1  ;;  %7303 = vmatmul.mubr.bf16.gmra.mxu0 %v16191_v20  ;;  %v6464_v42 = vrot.slane %v19009_v38, 2  ;;  %v6465_v14 = vrot.slane %v19010_v33, 2  ;;  %v6348_v1 = vrot.slane %v16175_v12, 1  ;;  %v6351_v10 = vrot.slane %v16181_v21, 1 }
 0x44d   :  { %v16197_v9 = vadd.f32 %v4652_v32, %v19006_v7  ;;  %v6349_v56 = vrot.slane %v16194_v59, 1  ;;  %9619 = vmatprep.mubr.msk.bf16.mxu0 %vm6850_vm8, %v16003_v34  ;;  %v5360_v30 = vsel %vm5134_vm9, %v5026_v54, %v5252_v44  ;;  %v5362_v24 = vsel %vm5136_vm10, %v5028_v29, %v5254_v50 }
 0x44e   :  { %v4191_v41 = vpop.f32.mrf.mxu1  ;;  %4382 = vmatmul.mubr.bf16.gmra.mxu1 %v3734_v16  ;;  %v9287_v16 = vld [vmem:[%s18297_s0 + $0x4e8] sm:$0xff]  ;;  %v10372_v32 = vpop.permute.xlu0 %10371  ;;  %vm5135_vm11 = vcmp.ge.f32.partialorder %v5027_v15, 0.0  ;;  %v5253_v40 = vmul.f32 %v15073_v5, %v5027_v15  ;;  %v6468_v29 = vsel %vm6433_vm4, %v6465_v14, %v6467_v62  ;;  %v19014_v47 = vmov 0  }
 0x44f   :  { %19007 = vst [vmem:[#allocation55_spill] sm:$0xff] %v16197_v9  ;;  %v4657_v35 = vadd.f32 %v19011_v51, %v4191_v41  ;;  %4389 = vmatprep.mubr.bf16.mxu1 %v3738_v49  ;;  %5535 = vperm.xlu0 %10348, %v5421_v2   ;;  %v10374_v49 = vunpack.i.h.bf16 %v10372_v32  ;;  %v10373_v46 = vunpack.i.l.bf16 %v10372_v32  ;;  %v6350_v52 = vsel %vm6272_vm6, %v6348_v1, %v6349_v56  ;;  %v19012_v51 = vld [vmem:[#allocation61_spill] sm:$0xff]  ;;  %v5781_v2 = vpop.permute.xlu1 %5780  ;;  %v19016_v1 = vld [vmem:[#allocation35_spill] sm:$0xff] }
 0x450   :  { %v4193_v26 = vpop.f32.mrf.mxu1  ;;  %v6352_v7 = vsel %vm6272_vm6, %v6349_v56, %v6351_v10  ;;  %v3737_v50 = vpack.c.bf16 %v9288_v58, %v9287_v16  ;;  %7625 = vmatprep.subr.bf16.mxu1 %v19014_v47  ;;  %v6466_v10 = vsel %vm6433_vm4, %v6464_v42, %v6465_v14  ;;  %v16248_v62 = vmul.f32 %v5781_v2, %v5362_v24  ;;  %v19019_v42 = vld [vmem:[#allocation71_spill] sm:$0xff]  ;;  %v19020_v14 = vld [vmem:[#allocation96_spill] sm:$0xff] }
 0x451   :  { %v10420_v41 = vpack.i.bf16 %v6352_v7, %v6350_v52  ;;  %v16234_v54 = vadd.f32 %v4657_v35, %v19012_v51  ;;  %v19015_v26 = vld [vmem:[#allocation94_spill] sm:$0xff]  ;;  %v6861_v56 = vsel %vm6850_vm8, %v19016_v1, %v10373_v46  ;;  %v16244_v52 = vpop.f32.mrf.mxu0  ;;  %v16246_v35 = vmul.f32 %v5771_v60, %v5360_v30  ;;  %v19021_v60 = vld [vmem:[#allocation37_spill] sm:$0xff]  ;;  %v19023_v2 = vld [vmem:[#allocation36_spill] sm:$0xff] }
 0x452   :  { %v4194_v44 = vpop.f32.mrf.mxu1  ;;  %v6862_v32 = vsel %vm6850_vm8, %v19015_v26, %v10374_v49  ;;  %v5361_v58 = vsel %vm5135_vm11, %v5027_v15, %v5253_v40  ;;  %v5776_v7 = vpop.permute.xlu0 %5775  ;;  %v16256_v46 = vpack.c.bf16 %v6468_v29, %v6466_v10  ;;  %v6472_v30 = vrot.slane %v19021_v60, 2  ;;  %v5501_v15 = vld [vmem:[%s18303_s7 + $0x288] sm:$0xff] }
 0x453   :  { %19013 = vst [vmem:[#allocation53_spill] sm:$0xff] %v16234_v54  ;;  %v4660_v23 = vadd.f32 %v16007_v39, %v4194_v44  ;;  %v16250_v16 = vpack.c.bf16 %v6862_v32, %v6861_v56  ;;  %10421 = vrot.lane.b32.xlu0 %v10420_v41, %s10674_s20  ;;  %v16254_v49 = vmul.f32 %v5776_v7, %v5361_v58  ;;  %v6470_v44 = vrot.slane %v19020_v14, 2  ;;  %v19022_v41 = vld [vmem:[#allocation47_spill] sm:$0xff]  ;;  %v16270_v32 = vpop.f32.mrf.mxu0 }
 0x454   :  { %v4196_v51 = vpop.f32.mrf.mxu1  ;;  %19018 = vst [vmem:[#allocation118_spill] sm:$0xff] %v16256_v46  ;;  %v6469_v26 = vrot.slane %v19023_v2, 2  ;;  %v7009_v56 = vrot.slane %v16246_v35, 1  ;;  %v7012_v10 = vrot.slane %v16248_v62, 1 }
 0x455   :  { %19017 = vst [vmem:[#allocation52_spill] sm:$0xff] %v16250_v16  ;;  %v4920_v39 = vadd.f32 %v4660_v23, %v19019_v42  ;;  %7311 = vmatmul.mubr.bf16.gmra.mxu0 %v16250_v16  ;;  %v7010_v40 = vrot.slane %v16254_v49, 1  ;;  %v6473_v55 = vsel %vm6433_vm4, %v6470_v44, %v6472_v30  ;;  %v16285_v54 = vpop.f32.mrf.mxu0  ;;  %v19032_v16 = vld [vmem:[#allocation57_spill] sm:$0xff] }
 0x456   :  { %v4199_v24 = vpop.f32.mrf.mxu1  ;;  %4390 = vmatmul.mubr.bf16.gmra.mxu1 %v3737_v50  ;;  %9620 = vmatprep.mubr.msk.bf16.mxu0 %vm6850_vm8, %v16256_v46  ;;  %v10377_v1 = vpop.permute.xlu0 %10376  ;;  %v6471_v51 = vsel %vm6433_vm4, %v6469_v26, %v6470_v44  ;;  %v19026_v26 = vld [vmem:[#allocation102_spill] sm:$0xff]  ;;  %v19028_v44 = vld [vmem:[#allocation115_spill] sm:$0xff] }
 0x457   :  { %v4665_v29 = vadd.f32 %v19022_v41, %v4199_v24  ;;  %5935 = vperm.xlu0 %10348, %v5501_v15   ;;  %v10379_v58 = vunpack.i.h.bf16 %v10377_v1  ;;  %v10378_v50 = vunpack.i.l.bf16 %v10377_v1  ;;  %v5035_v7 = vadd.f32 %v15639_v4, %v4920_v39  ;;  %v19024_v24 = vld [vmem:[#allocation8_spill] sm:$0xff] }
 0x458   :  { %v4201_v23 = vpop.f32.mrf.mxu1  ;;  %v7011_v42 = vsel %vm6272_vm6, %v7009_v56, %v7010_v40  ;;  %v7013_v60 = vsel %vm6272_vm6, %v7010_v40, %v7012_v10  ;;  %v6477_v56 = vrot.slane %v19026_v26, 2 }
 0x459   :  { %v4921_v41 = vadd.f32 %v4665_v29, %v19024_v24  ;;  %v6864_v9 = vsel %vm6850_vm8, %v19010_v33, %v10379_v58  ;;  %v6863_v15 = vsel %vm6850_vm8, %v19009_v38, %v10378_v50  ;;  %v10425_v1 = vpack.i.bf16 %v7013_v60, %v7011_v42  ;;  %v19025_v23 = vld [vmem:[#allocation99_spill] sm:$0xff]  ;;  %v5816_v24 = vpop.permute.xlu1 %5815  ;;  %v19030_v58 = vld [vmem:[#allocation38_spill] sm:$0xff]  ;;  %v19031_v42 = vld [vmem:[#allocation77_spill] sm:$0xff] }
 0x45a   :  { %v4202_v43 = vpop.f32.mrf.mxu1  ;;  %v6475_v39 = vrot.slane %v19025_v23, 2  ;;  %v16288_v8 = vpack.c.bf16 %v6864_v9, %v6863_v15  ;;  %v5821_v40 = vpop.permute.xlu0 %5820  ;;  %v5261_v33 = vmul.f32 %v15073_v5, %v5035_v7  ;;  %v16294_v38 = vpack.c.bf16 %v6473_v55, %v6471_v51 }
 0x45b   :  { %v5036_v29 = vadd.f32 %v15639_v4, %v4921_v41  ;;  %v4668_v30 = vadd.f32 %v19028_v44, %v4202_v43  ;;  %10426 = vrot.lane.b32.xlu0 %v10425_v1, %s10674_s20  ;;  %v6474_v50 = vrot.slane %v19030_v58, 2  ;;  %vm5143_vm12 = vcmp.ge.f32.partialorder %v5035_v7, 0.0  ;;  %v5503_v43 = vld [vmem:[%s18303_s7 + $0x298] sm:$0xff]  ;;  %v16306_v51 = vpop.f32.mrf.mxu0 }
 0x45c   :  { %19027 = vst [vmem:[#allocation7_spill] sm:$0xff] %v16288_v8  ;;  %v4204_v10 = vpop.f32.mrf.mxu1  ;;  %19029 = vst [vmem:[#allocation56_spill] sm:$0xff] %v16294_v38  ;;  %v5369_v46 = vsel %vm5143_vm12, %v5035_v7, %v5261_v33 }
 0x45d   :  { %7319 = vmatmul.mubr.bf16.gmra.mxu0 %v16288_v8  ;;  %vm5144_vm13 = vcmp.ge.f32.partialorder %v5036_v29, 0.0  ;;  %v5262_v9 = vmul.f32 %v15073_v5, %v5036_v29  ;;  %v4922_v60 = vadd.f32 %v4668_v30, %v19031_v42  ;;  %v6476_v44 = vsel %vm6433_vm4, %v6474_v50, %v6475_v39  ;;  %v16313_v34 = vpop.f32.mrf.mxu0  ;;  %v5826_v7 = vpop.permute.xlu1 %5825  ;;  %v19034_v50 = vld [vmem:[#allocation105_spill] sm:$0xff] }
 0x45e   :  { %v4207_v41 = vpop.f32.mrf.mxu1  ;;  %9621 = vmatprep.mubr.msk.bf16.mxu0 %vm6850_vm8, %v16294_v38  ;;  %v10382_v1 = vpop.permute.xlu0 %10381  ;;  %v6478_v10 = vsel %vm6433_vm4, %v6475_v39, %v6477_v56 }
 0x45f   :  { %v4673_v55 = vadd.f32 %v16042_v28, %v4207_v41  ;;  %v5370_v15 = vsel %vm5144_vm13, %v5036_v29, %v5262_v9  ;;  %v5037_v26 = vadd.f32 %v15639_v4, %v4922_v60  ;;  %5945 = vperm.xlu0 %10348, %v5503_v43   ;;  %v10384_v30 = vunpack.i.h.bf16 %v10382_v1  ;;  %v5504_v4 = vld [vmem:[%s18303_s7 + $0x2a0] sm:$0xff] }
 0x460   :  { %v4209_v8 = vpop.f32.mrf.mxu1  ;;  %v10383_v42 = vunpack.i.l.bf16 %v10382_v1  ;;  %v16315_v28 = vmul.f32 %v5821_v40, %v5370_v15  ;;  %v6482_v9 = vrot.slane %v19034_v50, 2  ;;  %v16328_v43 = vmul.f32 %v5816_v24, %v5369_v46  ;;  %v16335_v15 = vld [vmem:[%s18299_s2] ss:$0 sm:$0xff]  ;;  %v19039_v24 = vld [vmem:[#allocation103_spill] sm:$0xff] }
 0x461   :  { %v4923_v38 = vadd.f32 %v4673_v55, %v19032_v16  ;;  %vm5145_vm14 = vcmp.ge.f32.partialorder %v5037_v26, 0.0  ;;  %v5263_v29 = vmul.f32 %v15073_v5, %v5037_v26  ;;  %v19033_v8 = vld [vmem:[#allocation41_spill] sm:$0xff]  ;;  %v6866_v33 = vsel %vm6850_vm8, %v19020_v14, %v10384_v30 }
 0x462   :  { %v4210_v39 = vpop.f32.mrf.mxu1  ;;  %v6480_v56 = vrot.slane %v19033_v8, 2  ;;  %v6865_v16 = vsel %vm6850_vm8, %v19023_v2, %v10383_v42  ;;  %19035 = vst [vmem:[#allocation119_spill] sm:$0xff] %v16328_v43  ;;  %v5836_v55 = vpop.permute.xlu0 %5835  ;;  %v19038_v2 = vld [vmem:[#allocation13_spill] sm:$0xff]  ;;  %v6479_v42 = vrot.slane %v19039_v24, 2  ;;  %v6358_v50 = vrot.slane %v16328_v43, 1 }
 0x463   :  { %v4676_v40 = vadd.f32 %v16124_v37, %v4210_v39  ;;  %v16330_v60 = vpack.c.bf16 %v6866_v33, %v6865_v16  ;;  %v5371_v41 = vsel %vm5145_vm14, %v5037_v26, %v5263_v29  ;;  %v5038_v14 = vadd.f32 %v16335_v15, %v4923_v38  ;;  %5950 = vperm.xlu0 %10348, %v5504_v4   ;;  %v16344_v39 = vpop.f32.mrf.mxu0  ;;  %v5506_v26 = vld [vmem:[%s18303_s7 + $0x2b0] sm:$0xff] }
 0x464   :  { %v4212_v1 = vpop.f32.mrf.mxu1  ;;  %v16338_v30 = vmul.f32 %v5826_v7, %v5371_v41  ;;  %v16340_v37 = vpack.c.bf16 %v6478_v10, %v6476_v44  ;;  %v6359_v38 = vrot.slane %v16315_v28, 1  ;;  %v6481_v4 = vsel %vm6433_vm4, %v6479_v42, %v6480_v56  ;;  %v19040_v42 = vld [vmem:[#allocation43_spill] sm:$0xff] }
 0x465   :  { %19036 = vst [vmem:[#allocation65_spill] sm:$0xff] %v16330_v60  ;;  %v4924_v46 = vadd.f32 %v4676_v40, %v19038_v2  ;;  %7327 = vmatmul.mubr.bf16.gmra.mxu0 %v16330_v60  ;;  %v6483_v7 = vsel %vm6433_vm4, %v6480_v56, %v6482_v9  ;;  %vm5146_vm15 = vcmp.ge.f32.partialorder %v5038_v14, 0.0  ;;  %v5264_v33 = vmul.f32 %v15073_v5, %v5038_v14  ;;  %v5831_v1 = vpop.permute.xlu1 %5830  ;;  %v5507_v9 = vld [vmem:[%s18303_s7 + $0x2b8] sm:$0xff] }
 0x466   :  { %19037 = vst [vmem:[#allocation62_spill] sm:$0xff] %v16340_v37  ;;  %v4215_v29 = vpop.f32.mrf.mxu1  ;;  %9622 = vmatprep.mubr.msk.bf16.mxu0 %vm6850_vm8, %v16340_v37  ;;  %v10387_v16 = vpop.permute.xlu0 %10386  ;;  %v6361_v41 = vrot.slane %v16338_v30, 1  ;;  %v6487_v56 = vrot.slane %v19040_v42, 2  ;;  %v6360_v20 = vsel %vm6272_vm6, %v6358_v50, %v6359_v38 }
 0x467   :  { %v5039_v44 = vadd.f32 %v16335_v15, %v4924_v46  ;;  %v4681_v10 = vadd.f32 %v16025_v25, %v4215_v29  ;;  %5960 = vperm.xlu0 %10348, %v5506_v26   ;;  %v10389_v2 = vunpack.i.h.bf16 %v10387_v16  ;;  %v10388_v37 = vunpack.i.l.bf16 %v10387_v16  ;;  %v16361_v46 = vpop.f32.mrf.mxu0  ;;  %v19041_v29 = vld [vmem:[#allocation10_spill] sm:$0xff] }
 0x468   :  { %v4217_v40 = vpop.f32.mrf.mxu1  ;;  %v6362_v26 = vsel %vm6272_vm6, %v6359_v38, %v6361_v41  ;;  %v5372_v63 = vsel %vm5146_vm15, %v5038_v14, %v5264_v33  ;;  %v19044_v41 = vld [vmem:[#allocation80_spill] sm:$0xff] }
 0x469   :  { %vm5147_vm0 = vcmp.ge.f32.partialorder %v5039_v44, 0.0  ;;  %v5265_v25 = vmul.f32 %v15073_v5, %v5039_v44  ;;  %v4925_v40 = vadd.f32 %v4681_v10, %v19041_v29  ;;  %v6868_v16 = vsel %vm6850_vm8, %v19025_v23, %v10389_v2  ;;  %v5505_v33 = vld [vmem:[%s18303_s7 + $0x2a8] sm:$0xff] }
 0x46a   :  { %v4218_v60 = vpop.f32.mrf.mxu1  ;;  %v6867_v11 = vsel %vm6850_vm8, %v19030_v58, %v10388_v37  ;;  %v16379_v29 = vpop.permute.xlu0 %5850  ;;  %v10430_v50 = vpack.i.bf16 %v6362_v26, %v6360_v20  ;;  %v16383_v23 = vpack.c.bf16 %v6483_v7, %v6481_v4  ;;  %v19045_v37 = vld [vmem:[#allocation100_spill] sm:$0xff]  ;;  %v16396_v14 = vmul.f32 %v5831_v1, %v5372_v63 }
 0x46b   :  { %v5373_v31 = vsel %vm5147_vm0, %v5039_v44, %v5265_v25  ;;  %v4684_v42 = vadd.f32 %v16082_v13, %v4218_v60  ;;  %v16376_v19 = vpack.c.bf16 %v6868_v16, %v6867_v11  ;;  %v5040_v10 = vadd.f32 %v16335_v15, %v4925_v40  ;;  %5965 = vperm.xlu0 %10348, %v5507_v9   ;;  %v16387_v13 = vpop.f32.mrf.mxu0  ;;  %v5509_v20 = vld [vmem:[%s18303_s7 + $0x2c8] sm:$0xff] }
 0x46c   :  { %v4220_v43 = vpop.f32.mrf.mxu1  ;;  %v16381_v38 = vmul.f32 %v5836_v55, %v5373_v31  ;;  %19043 = vst [vmem:[#allocation54_spill] sm:$0xff] %v16383_v23  ;;  %v6485_v44 = vrot.slane %v19045_v37, 2  ;;  %10431 = vrot.lane.b32.xlu1 %v10430_v50, %s10674_s20  ;;  %v5841_v55 = vpop.permute.xlu1 %5840  ;;  %19047 = vst [vmem:[#allocation33_spill] sm:$0xff] %v16396_v14  ;;  %v5510_v50 = vld [vmem:[%s18303_s7 + $0x2d0] sm:$0xff] }
 0x46d   :  { %19042 = vst [vmem:[#allocation58_spill] sm:$0xff] %v16376_v19  ;;  %v4926_v58 = vadd.f32 %v4684_v42, %v19044_v41  ;;  %7335 = vmatmul.mubr.bf16.gmra.mxu0 %v16376_v19  ;;  %vm5148_vm1 = vcmp.ge.f32.partialorder %v5040_v10, 0.0  ;;  %v5266_v11 = vmul.f32 %v15073_v5, %v5040_v10  ;;  %v19046_v43 = vld [vmem:[#allocation106_spill] sm:$0xff]  ;;  %v16406_v25 = vpop.f32.mrf.mxu0  ;;  %v19048_v41 = vld [vmem:[#allocation83_spill] sm:$0xff] }
 0x46e   :  { %v4223_v31 = vpop.f32.mrf.mxu1  ;;  %v6484_v60 = vrot.slane %v19046_v43, 2  ;;  %9623 = vmatprep.mubr.msk.bf16.mxu0 %vm6850_vm8, %v16383_v23  ;;  %v6488_v2 = vsel %vm6433_vm4, %v6485_v44, %v6487_v56  ;;  %v10392_v40 = vpop.permute.xlu0 %10391  ;;  %v6364_v42 = vrot.slane %v16381_v38, 1 }
 0x46f   :  { %v5041_v4 = vadd.f32 %v16335_v15, %v4926_v58  ;;  %v4689_v7 = vadd.f32 %v16173_v17, %v4223_v31  ;;  %v5374_v9 = vsel %vm5148_vm1, %v5040_v10, %v5266_v11  ;;  %5975 = vperm.xlu0 %10348, %v5509_v20   ;;  %v10394_v1 = vunpack.i.h.bf16 %v10392_v40 }
 0x470   :  { %v4225_v26 = vpop.f32.mrf.mxu1  ;;  %v16408_v63 = vmul.f32 %v5841_v55, %v5374_v9  ;;  %v6486_v16 = vsel %vm6433_vm4, %v6484_v60, %v6485_v44  ;;  %v10393_v17 = vunpack.i.l.bf16 %v10392_v40  ;;  %5955 = vperm.xlu1 %10349, %v5505_v33   ;;  %v6363_v31 = vrot.slane %v16396_v14, 1  ;;  %v16423_v60 = vpop.f32.mrf.mxu0  ;;  %v10620_v55 = vld [vmem:[%s18301_s4 + $0x8] sm:$0xff]  }
 0x471   :  { %v4927_v56 = vadd.f32 %v4689_v7, %v19048_v41  ;;  %v16416_v58 = vpack.c.bf16 %v6488_v2, %v6486_v16  ;;  %v5267_v20 = vmul.f32 %v15073_v5, %v5041_v4  ;;  %v6870_v44 = vsel %vm6850_vm8, %v19033_v8, %v10394_v1  ;;  %v5846_v8 = vpop.permute.xlu1 %5845  ;;  %v19050_v26 = vld [vmem:[#allocation109_spill] sm:$0xff]  ;;  %7626 = vmatpush1.bf16.msra.mxu1 %v10620_v55 }
 0x472   :  { %v4226_v10 = vpop.f32.mrf.mxu1  ;;  %v6366_v11 = vrot.slane %v16408_v63, 1  ;;  %vm5149_vm2 = vcmp.ge.f32.partialorder %v5041_v4, 0.0  ;;  %v6869_v7 = vsel %vm6850_vm8, %v19039_v24, %v10393_v17  ;;  %v16432_v9 = vpop.permute.xlu0 %5865  ;;  %v6492_v1 = vrot.slane %v19050_v26, 2  ;;  %v19052_v17 = vld [vmem:[#allocation64_spill] sm:$0xff]  ;;  %7627 = vmatprep.subr.bf16.mxu1 %v19014_v47 }
 0x473   :  { %19049 = vst [vmem:[#allocation90_spill] sm:$0xff] %v16416_v58  ;;  %v5042_v33 = vadd.f32 %v16335_v15, %v4927_v56  ;;  %v4692_v2 = vadd.f32 %v16231_v6, %v4226_v10  ;;  %v16435_v16 = vpack.c.bf16 %v6870_v44, %v6869_v7  ;;  %5980 = vperm.xlu0 %10348, %v5510_v50   ;;  %v5512_v6 = vld [vmem:[%s18303_s7 + $0x2e0] sm:$0xff]  ;;  %v19053_v7 = vld [vmem:[#allocation40_spill] sm:$0xff] }
 0x474   :  { %v4228_v40 = vpop.f32.mrf.mxu1  ;;  %v6365_v41 = vsel %vm6272_vm6, %v6363_v31, %v6364_v42  ;;  %v6367_v23 = vsel %vm6272_vm6, %v6364_v42, %v6366_v11  ;;  %v5375_v50 = vsel %vm5149_vm2, %v5041_v4, %v5267_v20  ;;  %v16448_v11 = vpop.f32.mrf.mxu0  ;;  %v19054_v26 = vld [vmem:[#allocation104_spill] sm:$0xff] }
 0x475   :  { %19051 = vst [vmem:[#allocation110_spill] sm:$0xff] %v16435_v16  ;;  %vm5150_vm3 = vcmp.ge.f32.partialorder %v5042_v33, 0.0  ;;  %v5268_v24 = vmul.f32 %v15073_v5, %v5042_v33  ;;  %v4928_v56 = vadd.f32 %v4692_v2, %v19052_v17  ;;  %v10435_v40 = vpack.i.bf16 %v6367_v23, %v6365_v41  ;;  %7343 = vmatmul.mubr.bf16.gmra.mxu0 %v16435_v16  ;;  %v5508_v17 = vld [vmem:[%s18303_s7 + $0x2c0] sm:$0xff] }
 0x476   :  { %v4231_v10 = vpop.f32.mrf.mxu1  ;;  %9624 = vmatprep.mubr.msk.bf16.mxu0 %vm6850_vm8, %v16416_v58  ;;  %v10397_v55 = vpop.permute.xlu0 %10396  ;;  %v6489_v2 = vrot.slane %v19053_v7, 2  ;;  %v6490_v4 = vrot.slane %v19054_v26, 2 }
 0x477   :  { %v4697_v42 = vadd.f32 %v16140_v0, %v4231_v10  ;;  %v5376_v44 = vsel %vm5150_vm3, %v5042_v33, %v5268_v24  ;;  %v5043_v31 = vadd.f32 %v16335_v15, %v4928_v56  ;;  %10436 = vrot.lane.b32.xlu1 %v10435_v40, %s10674_s20  ;;  %5990 = vperm.xlu0 %10348, %v5512_v6   ;;  %v19055_v0 = vld [vmem:[#allocation60_spill] sm:$0xff]  ;;  %v10399_v33 = vunpack.i.h.bf16 %v10397_v55 }
 0x478   :  { %v4233_v23 = vpop.f32.mrf.mxu1  ;;  %v16457_v20 = vmul.f32 %v16379_v29, %v5376_v44  ;;  %v10398_v24 = vunpack.i.l.bf16 %v10397_v55  ;;  %v16463_v56 = vmul.f32 %v5846_v8, %v5375_v50  ;;  %v5513_v40 = vld [vmem:[%s18303_s7 + $0x2e8] sm:$0xff]  ;;  %v6493_v6 = vsel %vm6433_vm4, %v6490_v4, %v6492_v1  ;;  %v5856_v44 = vpop.permute.xlu1 %5855 }
 0x479   :  { %v4929_v41 = vadd.f32 %v4697_v42, %v19055_v0  ;;  %vm5151_vm5 = vcmp.ge.f32.partialorder %v5043_v31, 0.0  ;;  %v5269_v10 = vmul.f32 %v15073_v5, %v5043_v31  ;;  %v6872_v55 = vsel %vm6850_vm8, %v19045_v37, %v10399_v33  ;;  %v16476_v23 = vpop.f32.mrf.mxu0 }
 0x47a   :  { %v4234_v29 = vpop.f32.mrf.mxu1  ;;  %v6871_v8 = vsel %vm6850_vm8, %v19046_v43, %v10398_v24  ;;  %v6369_v1 = vrot.slane %v16457_v20, 1  ;;  %v6491_v37 = vsel %vm6433_vm4, %v6489_v2, %v6490_v4  ;;  %v5515_v43 = vld [vmem:[%s18303_s7 + $0x2f8] sm:$0xff] }
 0x47b   :  { %v5044_v42 = vadd.f32 %v16335_v15, %v4929_v41  ;;  %v4700_v50 = vadd.f32 %v16199_v61, %v4234_v29  ;;  %v5377_v0 = vsel %vm5151_vm5, %v5043_v31, %v5269_v10  ;;  %v16478_v58 = vpack.c.bf16 %v6872_v55, %v6871_v8  ;;  %5970 = vperm.xlu1 %10349, %v5508_v17   ;;  %v19057_v41 = vld [vmem:[#allocation15_spill] sm:$0xff]  ;;  %v16485_v33 = vpop.f32.mrf.mxu0 }
 0x47c   :  { %v4236_v16 = vpop.f32.mrf.mxu1  ;;  %v16481_v19 = vmul.f32 %v5856_v44, %v5377_v0  ;;  %5995 = vperm.xlu0 %10348, %v5513_v40   ;;  %v16491_v31 = vpack.c.bf16 %v6493_v6, %v6491_v37  ;;  %v6368_v17 = vrot.slane %v16463_v56, 1  ;;  %v6495_v40 = vrot.slane %v16000_v48, 2  ;;  %v5861_v44 = vpop.permute.xlu1 %5860  ;;  %v5516_v37 = vld [vmem:[%s18303_s7 + $0x300] sm:$0xff] }
 0x47d   :  { %19056 = vst [vmem:[#allocation9_spill] sm:$0xff] %v16478_v58  ;;  %v4930_v14 = vadd.f32 %v4700_v50, %v19057_v41  ;;  %v5270_v61 = vmul.f32 %v15073_v5, %v5044_v42  ;;  %vm5152_vm7 = vcmp.ge.f32.partialorder %v5044_v42, 0.0  ;;  %7351 = vmatmul.mubr.bf16.gmra.mxu0 %v16478_v58  ;;  %v6497_v0 = vrot.slane %v15974_v53, 2 }
 0x47e   :  { %19058 = vst [vmem:[#allocation68_spill] sm:$0xff] %v16491_v31  ;;  %v4239_v16 = vpop.f32.mrf.mxu1  ;;  %v16493_v24 = vpop.permute.xlu0 %5880  ;;  %v6371_v4 = vrot.slane %v16481_v19, 1  ;;  %9625 = vmatprep.mubr.msk.bf16.mxu0 %vm6850_vm8, %v16491_v31  ;;  %v6370_v6 = vsel %vm6272_vm6, %v6368_v17, %v6369_v1 }
 0x47f   :  { %v5045_v10 = vadd.f32 %v16335_v15, %v4930_v14  ;;  %v4705_v2 = vadd.f32 %v16270_v32, %v4239_v16  ;;  %v19059_v14 = vld [vmem:[#allocation12_spill] sm:$0xff]  ;;  %v16507_v32 = vpop.f32.mrf.mxu0  ;;  %v5378_v41 = vsel %vm5152_vm7, %v5044_v42, %v5270_v61  ;;  %v6498_v58 = vsel %vm6433_vm4, %v6495_v40, %v6497_v0 }
 0x480   :  { %v4241_v29 = vpop.f32.mrf.mxu1  ;;  %6005 = vperm.xlu0 %10348, %v5515_v43   ;;  %v6372_v50 = vsel %vm6272_vm6, %v6369_v1, %v6371_v4 }
 0x481   :  { %vm5153_vm9 = vcmp.ge.f32.partialorder %v5045_v10, 0.0  ;;  %v5271_v55 = vmul.f32 %v15073_v5, %v5045_v10  ;;  %v4931_v8 = vadd.f32 %v4705_v2, %v19059_v14  ;;  %v10440_v43 = vpack.i.bf16 %v6372_v50, %v6370_v6  ;;  %v19061_v6 = vld [vmem:[#allocation92_spill] sm:$0xff] }
 0x482   :  { %v4242_v16 = vpop.f32.mrf.mxu1  ;;  %v10402_v17 = vpop.permute.xlu0 %10401  ;;  %v6494_v29 = vrot.slane %v15965_v18, 2 }
 0x483   :  { %v5379_v31 = vsel %vm5153_vm9, %v5045_v10, %v5271_v55  ;;  %v5046_v2 = vadd.f32 %v16335_v15, %v4931_v8  ;;  %v4708_v1 = vadd.f32 %v16306_v51, %v4242_v16  ;;  %v10404_v4 = vunpack.i.h.bf16 %v10402_v17  ;;  %10441 = vrot.lane.b32.xlu1 %v10440_v43, %s10674_s20 }
 0x484   :  { %v16518_v14 = vmul.f32 %v16432_v9, %v5379_v31  ;;  %v10403_v53 = vunpack.i.l.bf16 %v10402_v17  ;;  %v4244_v42 = vpop.f32.mrf.mxu1  ;;  %v6496_v61 = vsel %vm6433_vm4, %v6494_v29, %v6495_v40  ;;  %6010 = vperm.xlu0 %10348, %v5516_v37   ;;  %v5511_v9 = vld [vmem:[%s18303_s7 + $0x2d8] sm:$0xff]  ;;  %v16530_v31 = vpop.f32.mrf.mxu0  ;;  %v16532_v8 = vmul.f32 %v5861_v44, %v5378_v41  ;;  %v5518_v40 = vld [vmem:[%s18303_s7 + $0x310] sm:$0xff] }
 0x485   :  { %vm5154_vm10 = vcmp.ge.f32.partialorder %v5046_v2, 0.0  ;;  %v5272_v10 = vmul.f32 %v15073_v5, %v5046_v2  ;;  %v4932_v55 = vadd.f32 %v4708_v1, %v19061_v6  ;;  %v6874_v51 = vsel %vm6850_vm8, %v19054_v26, %v10404_v4  ;;  %v5871_v37 = vpop.permute.xlu1 %5870  ;;  %v19066_v4 = vld [vmem:[#allocation89_spill] sm:$0xff] }
 0x486   :  { %19060 = vst [vmem:[#allocation107_spill] sm:$0xff] %v16518_v14  ;;  %19062 = vst [vmem:[#allocation59_spill] sm:$0xff] %v16532_v8  ;;  %v6873_v50 = vsel %vm6850_vm8, %v19053_v7, %v10403_v53  ;;  %v4247_v0 = vpop.f32.mrf.mxu1  ;;  %v16545_v41 = vpack.c.bf16 %v6498_v58, %v6496_v61  ;;  %v6374_v1 = vrot.slane %v16518_v14, 1  ;;  %v6373_v42 = vrot.slane %v16532_v8, 1 }
 0x487   :  { %v5380_v16 = vsel %vm5154_vm10, %v5046_v2, %v5272_v10  ;;  %v5047_v26 = vadd.f32 %v16335_v15, %v4932_v55  ;;  %v16540_v17 = vpack.c.bf16 %v6874_v51, %v6873_v50  ;;  %v4713_v43 = vadd.f32 %v16244_v52, %v4247_v0  ;;  %5985 = vperm.xlu1 %10349, %v5511_v9   ;;  %v16550_v2 = vpop.f32.mrf.mxu0  ;;  %v5519_v52 = vld [vmem:[%s18303_s7 + $0x318] sm:$0xff] }
 0x488   :  { %v16543_v29 = vmul.f32 %v5871_v37, %v5380_v16  ;;  %v4249_v44 = vpop.f32.mrf.mxu1  ;;  %19065 = vst [vmem:[#allocation74_spill] sm:$0xff] %v16545_v41  ;;  %6020 = vperm.xlu0 %10348, %v5518_v40   ;;  %v10621_v55 = vld [vmem:[%s18301_s4 + $0xf8] sm:$0xff]   ;;  %v6375_v9 = vsel %vm6272_vm6, %v6373_v42, %v6374_v1  ;;  %v19067_v37 = vld [vmem:[#allocation67_spill] sm:$0xff] }
 0x489   :  { %19063 = vst [vmem:[#allocation11_spill] sm:$0xff] %v16540_v17  ;;  %v4933_v7 = vadd.f32 %v4713_v43, %v19066_v4  ;;  %7359 = vmatmul.mubr.bf16.gmra.mxu0 %v16540_v17  ;;  %v5273_v61 = vmul.f32 %v15073_v5, %v5047_v26  ;;  %vm5155_vm11 = vcmp.ge.f32.partialorder %v5047_v26, 0.0  ;;  %v5876_v50 = vpop.permute.xlu1 %5875  ;;  %v16569_v44 = vpop.f32.mrf.mxu0 }
 0x48a   :  { %19064 = vst [vmem:[#allocation42_spill] sm:$0xff] %v16543_v29  ;;  %v6376_v53 = vrot.slane %v16543_v29, 1  ;;  %9626 = vmatprep.mubr.msk.bf16.mxu0 %vm6850_vm8, %v16545_v41  ;;  %v4250_v58 = vpop.f32.mrf.mxu1  ;;  %8056 = vmatpush1.bf16.msra.mxu0 %v10621_v55 }
 0x48b   :  { %v5048_v10 = vadd.f32 %v16335_v15, %v4933_v7  ;;  %v4716_v6 = vadd.f32 %v16285_v54, %v4250_v58  ;;  %v5521_v54 = vld [vmem:[%s18303_s7 + $0x328] sm:$0xff]  ;;  %8057 = vmatprep.subr.bf16.mxu0 %v19014_v47  ;;  %v5381_v7 = vsel %vm5155_vm11, %v5047_v26, %v5273_v61 }
 0x48c   :  { %v4252_v51 = vpop.f32.mrf.mxu1  ;;  %v6377_v40 = vsel %vm6272_vm6, %v6374_v1, %v6376_v53  ;;  %6025 = vperm.xlu0 %10348, %v5519_v52   ;;  %v19069_v26 = vld [vmem:[#allocation63_spill] sm:$0xff] }
 0x48d   :  { %vm5156_vm12 = vcmp.ge.f32.partialorder %v5048_v10, 0.0  ;;  %v5274_v0 = vmul.f32 %v15073_v5, %v5048_v10  ;;  %v4934_v16 = vadd.f32 %v4716_v6, %v19067_v37  ;;  %v10445_v43 = vpack.i.bf16 %v6377_v40, %v6375_v9  ;;  %v5514_v6 = vld [vmem:[%s18303_s7 + $0x2f0] sm:$0xff]  ;;  %v5886_v9 = vpop.permute.xlu1 %5885 }
 0x48e   :  { %v4255_v4 = vpop.f32.mrf.mxu1  ;;  %v16588_v51 = vmul.f32 %v5876_v50, %v5381_v7  ;;  %v19072_v50 = vld [vmem:[#allocation66_spill] sm:$0xff] }
 0x48f   :  { %v5382_v1 = vsel %vm5156_vm12, %v5048_v10, %v5274_v0  ;;  %v5049_v53 = vadd.f32 %v16335_v15, %v4934_v16  ;;  %v4721_v52 = vadd.f32 %v16344_v39, %v4255_v4  ;;  %10446 = vrot.lane.b32.xlu1 %v10445_v43, %s10674_s20  ;;  %v16586_v10 = vpop.f32.mrf.mxu0  ;;  %v5522_v39 = vld [vmem:[%s18303_s7 + $0x330] sm:$0xff] }
 0x490   :  { %v16579_v58 = vmul.f32 %v16493_v24, %v5382_v1  ;;  %v4257_v42 = vpop.f32.mrf.mxu1  ;;  %6035 = vperm.xlu0 %10348, %v5521_v54   ;;  %19070 = vst [vmem:[#allocation93_spill] sm:$0xff] %v16588_v51 }
 0x491   :  { %vm5157_vm13 = vcmp.ge.f32.partialorder %v5049_v53, 0.0  ;;  %v5275_v55 = vmul.f32 %v15073_v5, %v5049_v53  ;;  %v4935_v61 = vadd.f32 %v4721_v52, %v19069_v26  ;;  %v16599_v7 = vpop.f32.mrf.mxu0  ;;  %v10622_v42 = vld [vmem:[%s18301_s4] sm:$0xff]  }
 0x492   :  { %19068 = vst [vmem:[#allocation97_spill] sm:$0xff] %v16579_v58  ;;  %v4258_v24 = vpop.f32.mrf.mxu1  ;;  %v6379_v54 = vrot.slane %v16579_v58, 1  ;;  %7628 = vmatpush1.bf16.msra.mxu1 %v10622_v42 }
 0x493   :  { %v5383_v40 = vsel %vm5157_vm13, %v5049_v53, %v5275_v55  ;;  %v5050_v0 = vadd.f32 %v16335_v15, %v4935_v61  ;;  %v4724_v37 = vadd.f32 %v16387_v13, %v4258_v24  ;;  %6000 = vperm.xlu1 %10349, %v5514_v6   ;;  %v5524_v53 = vld [vmem:[%s18303_s7 + $0x340] sm:$0xff]  ;;  %v6378_v13 = vrot.slane %v16588_v51, 1  ;;  %v16616_v41 = vpop.f32.mrf.mxu0  ;;  %7637 = vmatprep.subr.bf16.mxu1 %v19014_v47 }
 0x494   :  { %v16595_v16 = vmul.f32 %v5886_v9, %v5383_v40  ;;  %v4260_v43 = vpop.f32.mrf.mxu1  ;;  %6040 = vperm.xlu0 %10348, %v5522_v39   ;;  %v5891_v9 = vpop.permute.xlu1 %5890 }
 0x495   :  { %v4936_v4 = vadd.f32 %v4724_v37, %v19072_v50  ;;  %v5276_v6 = vmul.f32 %v15073_v5, %v5050_v0  ;;  %vm5158_vm14 = vcmp.ge.f32.partialorder %v5050_v0, 0.0  ;;  %v6380_v39 = vsel %vm6272_vm6, %v6378_v13, %v6379_v54  ;;  %v19073_v37 = vld [vmem:[#allocation14_spill] sm:$0xff] }
 0x496   :  { %19071 = vst [vmem:[#allocation112_spill] sm:$0xff] %v16595_v16  ;;  %v6381_v1 = vrot.slane %v16595_v16, 1  ;;  %v4263_v52 = vpop.f32.mrf.mxu1 }
 0x497   :  { %v5051_v55 = vadd.f32 %v16335_v15, %v4936_v4  ;;  %v4729_v26 = vadd.f32 %v16313_v34, %v4263_v52  ;;  %v5896_v4 = vpop.permute.xlu0 %5895  ;;  %v5384_v52 = vsel %vm5158_vm14, %v5050_v0, %v5276_v6 }
 0x498   :  { %v4265_v61 = vpop.f32.mrf.mxu1  ;;  %v6382_v24 = vsel %vm6272_vm6, %v6379_v54, %v6381_v1  ;;  %6050 = vperm.xlu0 %10348, %v5524_v53   ;;  %v5517_v53 = vld [vmem:[%s18303_s7 + $0x308] sm:$0xff]  ;;  %v5901_v6 = vpop.permute.xlu1 %5900 }
 0x499   :  { %vm5159_vm15 = vcmp.ge.f32.partialorder %v5051_v55, 0.0  ;;  %v5277_v40 = vmul.f32 %v15073_v5, %v5051_v55  ;;  %v4937_v43 = vadd.f32 %v4729_v26, %v19073_v37  ;;  %v10450_v50 = vpack.i.bf16 %v6382_v24, %v6380_v39  ;;  %v16627_v26 = vpop.f32.mrf.mxu0 }
 0x49a   :  { %v4266_v34 = vpop.f32.mrf.mxu1  ;;  %v16629_v39 = vmul.f32 %v5891_v9, %v5384_v52 }
 0x49b   :  { %v5385_v61 = vsel %vm5159_vm15, %v5051_v55, %v5277_v40  ;;  %v5052_v13 = vadd.f32 %v16335_v15, %v4937_v43  ;;  %10451 = vrot.lane.b32.xlu1 %v10450_v50, %s10674_s20  ;;  %v10623_v43 = vld [vmem:[%s18301_s4 + $0xf0] sm:$0xff]   ;;  %v16637_v50 = vpop.f32.mrf.mxu0 }
 0x49c   :  { %v16621_v54 = vmul.f32 %v5896_v4, %v5385_v61  ;;  %v4268_v1 = vpop.f32.mrf.mxu1  ;;  %19075 = vst [vmem:[#allocation61_spill] sm:$0xff] %v16629_v39  ;;  %v6383_v9 = vrot.slane %v16629_v39, 1  ;;  %8058 = vmatpush1.bf16.msra.mxu0 %v10623_v43  ;;  %v5520_v43 = vld [vmem:[%s18303_s7 + $0x320] sm:$0xff] }
 0x49d   :  { %vm5160_vm0 = vcmp.ge.f32.partialorder %v5052_v13, 0.0  ;;  %v5278_v42 = vmul.f32 %v15073_v5, %v5052_v13  ;;  %8059 = vmatprep.subr.bf16.mxu0 %v19014_v47 }
 0x49e   :  { %19074 = vst [vmem:[#allocation111_spill] sm:$0xff] %v16621_v54  ;;  %v4271_v0 = vpop.f32.mrf.mxu1  ;;  %v6384_v37 = vrot.slane %v16621_v54, 1 }
 0x49f   :  { %v5386_v55 = vsel %vm5160_vm0, %v5052_v13, %v5278_v42  ;;  %6015 = vperm.xlu1 %10349, %v5517_v53   ;;  %v16644_v42 = vpop.f32.mrf.mxu0 }
 0x4a0   :  { %v16631_v24 = vmul.f32 %v5901_v6, %v5386_v55  ;;  %v4273_v40 = vpop.f32.mrf.mxu1  ;;  %v6385_v13 = vsel %vm6272_vm6, %v6383_v9, %v6384_v37  ;;  %19077 = vst [vmem:[#allocation35_spill] sm:$0xff] %v16644_v42  ;;  %v4732_v6 = vadd.f32 %v16361_v46, %v4266_v34  ;;  %v4737_v46 = vadd.f32 %v16423_v60, %v4271_v0  ;;  %v19079_v34 = vld [vmem:[#allocation73_spill] sm:$0xff]  ;;  %v19081_v60 = vld [vmem:[#allocation70_spill] sm:$0xff] }
 0x4a1   :  { %v16652_v39 = vpop.f32.mrf.mxu0 }
 0x4a2   :  { %19076 = vst [vmem:[#allocation94_spill] sm:$0xff] %v16631_v24  ;;  %v6386_v4 = vrot.slane %v16631_v24, 1  ;;  %v4274_v61 = vpop.f32.mrf.mxu1  ;;  %v4939_v0 = vadd.f32 %v4737_v46, %v19081_v60 }
 0x4a3   :  { %v4740_v40 = vadd.f32 %v16476_v23, %v4274_v61  ;;  %v6499_v23 = vrot.slane %v16010_v3, 2  ;;  %v16660_v61 = vpop.f32.mrf.mxu0 }
 0x4a4   :  { %v4276_v52 = vpop.f32.mrf.mxu1  ;;  %v6387_v1 = vsel %vm6272_vm6, %v6384_v37, %v6386_v4  ;;  %v6500_v37 = vrot.slane %v16053_v36, 2  ;;  %v19078_v4 = vld [vmem:[#allocation17_spill] sm:$0xff]  ;;  %19080 = vst [vmem:[#allocation71_spill] sm:$0xff] %v16660_v61 }
 0x4a5   :  { %v10455_v53 = vpack.i.bf16 %v6387_v1, %v6385_v13  ;;  %v5906_v52 = vpop.permute.xlu1 %5905  ;;  %v4938_v9 = vadd.f32 %v4732_v6, %v19078_v4  ;;  %v4940_v1 = vadd.f32 %v4740_v40, %v19079_v34 }
 0x4a6   :  { %v4279_v55 = vpop.f32.mrf.mxu1  ;;  %v6501_v58 = vsel %vm6433_vm4, %v6499_v23, %v6500_v37 }
 0x4a7   :  { %10456 = vrot.lane.b32.xlu1 %v10455_v53, %s10674_s20  ;;  %v5053_v24 = vadd.f32 %v16335_v15, %v4938_v9  ;;  %v4745_v34 = vadd.f32 %v16406_v25, %v4279_v55  ;;  %v5054_v55 = vadd.f32 %v16335_v15, %v4939_v0 }
 0x4a8   :  { %v4281_v17 = vpop.f32.mrf.mxu1 }
 0x4a9   :  { %v6502_v17 = vrot.slane %v16018_v22, 2  ;;  %v5916_v51 = vpop.permute.xlu1 %5915  ;;  %v5279_v25 = vmul.f32 %v15073_v5, %v5053_v24  ;;  %vm5161_vm1 = vcmp.ge.f32.partialorder %v5053_v24, 0.0  ;;  %vm5162_vm3 = vcmp.ge.f32.partialorder %v5054_v55, 0.0 }
 0x4aa   :  { %v4282_v13 = vpop.f32.mrf.mxu1 }
 0x4ab   :  { %6030 = vperm.xlu1 %10349, %v5520_v43   ;;  %v6503_v6 = vsel %vm6433_vm4, %v6500_v37, %v6502_v17  ;;  %v16673_v37 = vpop.f32.mrf.mxu0 }
 0x4ac   :  { %v4284_v53 = vpop.f32.mrf.mxu1  ;;  %v10407_v54 = vpop.permute.xlu0 %10406  ;;  %19082 = vst [vmem:[#allocation96_spill] sm:$0xff] %v16673_v37  ;;  %v16677_v46 = vpack.c.bf16 %v6503_v6, %v6501_v58 }
 0x4ad   :  { %v10409_v43 = vunpack.i.h.bf16 %v10407_v54  ;;  %v10408_v40 = vunpack.i.l.bf16 %v10407_v54  ;;  %v5055_v53 = vadd.f32 %v16335_v15, %v4940_v1  ;;  %v4748_v1 = vadd.f32 %v16448_v11, %v4282_v13  ;;  %v16688_v58 = vpop.permute.xlu1 %5920  ;;  %v16692_v6 = vpop.f32.mrf.mxu0  ;;  %v19088_v13 = vld [vmem:[#allocation86_spill] sm:$0xff] }
 0x4ae   :  { %v4287_v4 = vpop.f32.mrf.mxu1  ;;  %19084 = vst [vmem:[#allocation47_spill] sm:$0xff] %v16677_v46  ;;  %19087 = vst [vmem:[#allocation36_spill] sm:$0xff] %v16692_v6 }
 0x4af   :  { %v4753_v22 = vadd.f32 %v16507_v32, %v4287_v4  ;;  %v6876_v9 = vsel %vm6850_vm8, %v16000_v48, %v10409_v43  ;;  %v6875_v23 = vsel %vm6850_vm8, %v15965_v18, %v10408_v40  ;;  %v19085_v32 = vld [vmem:[#allocation19_spill] sm:$0xff]  ;;  %v5281_v48 = vmul.f32 %v15073_v5, %v5055_v53  ;;  %v19086_v18 = vld [vmem:[#allocation69_spill] sm:$0xff] }
 0x4b0   :  { %v4289_v16 = vpop.f32.mrf.mxu1  ;;  %v16675_v17 = vpack.c.bf16 %v6876_v9, %v6875_v23  ;;  %vm5163_vm2 = vcmp.ge.f32.partialorder %v5055_v53, 0.0  ;;  %v5387_v43 = vsel %vm5161_vm1, %v5053_v24, %v5279_v25  ;;  %v4942_v40 = vadd.f32 %v4748_v1, %v19088_v13  ;;  %v19089_v9 = vld [vmem:[#allocation91_spill] sm:$0xff] }
 0x4b1   :  { %v4941_v16 = vadd.f32 %v4745_v34, %v19085_v32  ;;  %v4943_v4 = vadd.f32 %v4753_v22, %v19086_v18  ;;  %v5280_v34 = vmul.f32 %v15073_v5, %v5054_v55  ;;  %v16701_v22 = vadd.f32 %v16335_v15, %v19089_v9  ;;  %v5931_v1 = vpop.permute.xlu1 %5930 }
 0x4b2   :  { %19083 = vst [vmem:[#allocation37_spill] sm:$0xff] %v16675_v17  ;;  %v16679_v54 = vpop.f32.mrf.mxu1  ;;  %7367 = vmatmul.mubr.bf16.gmra.mxu0 %v16675_v17  ;;  %v5389_v23 = vsel %vm5163_vm2, %v5055_v53, %v5281_v48  ;;  %v16706_v17 = vpop.f32.mrf.mxu0  ;;  %v16708_v24 = vmul.f32 %v5906_v52, %v5387_v43  ;;  %v10625_v53 = vld [vmem:[%s18301_s4 + $0x58] sm:$0xff]   ;;  %v5057_v13 = vadd.f32 %v16335_v15, %v4942_v40 }
 0x4b3   :  { %9627 = vmatprep.mubr.msk.bf16.mxu0 %vm6850_vm8, %v16677_v46  ;;  %v5056_v11 = vadd.f32 %v16335_v15, %v4941_v16  ;;  %v5058_v32 = vadd.f32 %v16335_v15, %v4943_v4  ;;  %19091 = vst [vmem:[#allocation8_spill] sm:$0xff] %v16706_v17  ;;  %v10624_v16 = vld [vmem:[%s18301_s4 + $0xe8] sm:$0xff]   ;;  %v16718_v48 = vmul.f32 %v5916_v51, %v5389_v23  ;;  %vm5088_vm5 = vcmp.ge.f32.partialorder %v16701_v22, 0.0 }
 0x4b4   :  { %v4292_v60 = vpop.f32.mrf.mxu1  ;;  %19092 = vst [vmem:[#allocation99_spill] sm:$0xff] %v16708_v24  ;;  %v5388_v9 = vsel %vm5162_vm3, %v5054_v55, %v5280_v34  ;;  %8060 = vmatpush1.bf16.msra.mxu0 %v10624_v16  ;;  %7638 = vmatpush2.bf16.msra.mxu1 %v10625_v53  ;;  %v5206_v51 = vmul.f32 %v15073_v5, %v16701_v22  ;;  %v6505_v23 = vrot.slane %v16134_v57, 2  ;;  %v16729_v40 = vpop.f32.mrf.mxu0  ;;  %v10626_v55 = vld [vmem:[%s18301_s4 + $0x50] sm:$0xff]   ;;  %v6388_v53 = vrot.slane %v16708_v24, 1 }
 0x4b5   :  { %v19090_v60 = vld [vmem:[#allocation29_spill] sm:$0xff]  ;;  %19093 = vst [vmem:[#allocation102_spill] sm:$0xff] %v16718_v48  ;;  %v5282_v4 = vmul.f32 %v15073_v5, %v5056_v11  ;;  %vm5164_vm7 = vcmp.ge.f32.partialorder %v5056_v11, 0.0  ;;  %v5284_v43 = vmul.f32 %v15073_v5, %v5058_v32  ;;  %vm5166_vm10 = vcmp.ge.f32.partialorder %v5058_v32, 0.0  ;;  %19095 = vst [vmem:[#allocation38_spill] sm:$0xff] %v16729_v40  ;;  %7639 = vmatprep.subr.bf16.mxu1 %v19014_v47  ;;  %v5531_v24 = vpop.permute.xlu1 %5530 }
 0x4b6   :  { %v16694_v0 = vpop.f32.mrf.mxu1  ;;  %v4978_v46 = vadd.f32 %v16335_v15, %v19090_v60  ;;  %8061 = vmatprep.subr.bf16.mxu0 %v19014_v47  ;;  %v6391_v6 = vrot.slane %v16718_v48, 1  ;;  %v5283_v8 = vmul.f32 %v15073_v5, %v5057_v13  ;;  %vm5165_vm11 = vcmp.ge.f32.partialorder %v5057_v13, 0.0  ;;  %v19096_v48 = vld [vmem:[#allocation87_spill] sm:$0xff] }
 0x4b7   :  { %v5390_v40 = vsel %vm5164_vm7, %v5056_v11, %v5282_v4  ;;  %v5392_v17 = vsel %vm5166_vm10, %v5058_v32, %v5284_v43  ;;  %v16750_v4 = vpop.f32.mrf.mxu0  ;;  %v4979_v32 = vadd.f32 %v16335_v15, %v19096_v48 }
 0x4b8   :  { %v4297_v18 = vpop.f32.mrf.mxu1  ;;  %vm5086_vm9 = vcmp.ge.f32.partialorder %v4978_v46, 0.0  ;;  %v5204_v34 = vmul.f32 %v15073_v5, %v4978_v46  ;;  %7640 = vmatpush2.bf16.msra.mxu1 %v10626_v55  ;;  %v5391_v48 = vsel %vm5165_vm11, %v5057_v13, %v5283_v8  ;;  %v5314_v8 = vsel %vm5088_vm5, %v16701_v22, %v5206_v51 }
 0x4b9   :  { %v5911_v52 = vpop.permute.xlu0 %5910  ;;  %7641 = vmatprep.subr.bf16.mxu1 %v19014_v47  ;;  %vm5087_vm12 = vcmp.ge.f32.partialorder %v4979_v32, 0.0  ;;  %v5541_v13 = vpop.permute.xlu1 %5540  ;;  %v5205_v22 = vmul.f32 %v15073_v5, %v4979_v32  ;;  %v6512_v51 = vrot.slane %v16181_v21, 2 }
 0x4ba   :  { %v16710_v25 = vpop.f32.mrf.mxu1  ;;  %v16724_v18 = vmul.f32 %v5911_v52, %v5388_v9  ;;  %v6504_v9 = vrot.slane %v16071_v45, 2  ;;  %v5312_v55 = vsel %vm5086_vm9, %v4978_v46, %v5204_v34  ;;  %v6510_v46 = vrot.slane %v16194_v59, 2 }
 0x4bb   :  { %v4756_v34 = vadd.f32 %v16550_v2, %v16679_v54  ;;  %v6070_v21 = vmul.f32 %v5541_v13, %v5314_v8  ;;  %v10628_v8 = vld [vmem:[%s18301_s4 + $0x40] sm:$0xff]  }
 0x4bc   :  { %19094 = vst [vmem:[#allocation115_spill] sm:$0xff] %v16724_v18  ;;  %v4300_v60 = vpop.f32.mrf.mxu1  ;;  %v6389_v16 = vrot.slane %v16724_v18, 1  ;;  %v6513_v54 = vsel %vm6433_vm4, %v6510_v46, %v6512_v51  ;;  %v19099_v13 = vld [vmem:[#allocation18_spill] sm:$0xff] }
 0x4bd   :  { %v6507_v60 = vrot.slane %v16084_v27, 2  ;;  %v10412_v61 = vpop.permute.xlu0 %10411  ;;  %v6506_v27 = vsel %vm6433_vm4, %v6504_v9, %v6505_v23 }
 0x4be   :  { %v16740_v52 = vpop.f32.mrf.mxu1  ;;  %v10414_v14 = vunpack.i.h.bf16 %v10412_v61  ;;  %v10413_v29 = vunpack.i.l.bf16 %v10412_v61  ;;  %v6390_v18 = vsel %vm6272_vm6, %v6388_v53, %v6389_v16  ;;  %v6392_v37 = vsel %vm6272_vm6, %v6389_v16, %v6391_v6 }
 0x4bf   :  { %v6508_v11 = vsel %vm6433_vm4, %v6505_v23, %v6507_v60  ;;  %v10460_v43 = vpack.i.bf16 %v6392_v37, %v6390_v18  ;;  %v16763_v23 = vmul.f32 %v16688_v58, %v5390_v40  ;;  %v16765_v16 = vmul.f32 %v5931_v1, %v5392_v17  ;;  %v16778_v37 = vpop.f32.mrf.mxu0  ;;  %v10627_v1 = vld [vmem:[%s18301_s4 + $0x48] sm:$0xff]  }
 0x4c0   :  { %v4305_v42 = vpop.f32.mrf.mxu1  ;;  %v6878_v61 = vsel %vm6850_vm8, %v16053_v36, %v10414_v14  ;;  %v16770_v36 = vpack.c.bf16 %v6508_v11, %v6506_v27  ;;  %v16780_v17 = vmul.f32 %v5531_v24, %v5312_v55  ;;  %v4761_v60 = vadd.f32 %v16485_v33, %v16694_v0  ;;  %7642 = vmatpush2.bf16.msra.mxu1 %v10627_v1 }
 0x4c1   :  { %v6877_v42 = vsel %vm6850_vm8, %v16010_v3, %v10413_v29  ;;  %10461 = vrot.lane.b32.xlu1 %v10460_v43, %s10674_s20  ;;  %v5523_v29 = vld [vmem:[%s18303_s7 + $0x338] sm:$0xff]  ;;  %v6396_v24 = vrot.slane %v16765_v16, 1  ;;  %v6393_v40 = vrot.slane %v16763_v23, 1  ;;  %v6509_v11 = vrot.slane %v16175_v12, 2  ;;  %7643 = vmatprep.subr.bf16.mxu1 %v19014_v47 }
 0x4c2   :  { %v16759_v6 = vpop.f32.mrf.mxu1  ;;  %v16767_v53 = vpack.c.bf16 %v6878_v61, %v6877_v42  ;;  %v5926_v9 = vpop.permute.xlu0 %5925  ;;  %19098 = vst [vmem:[#allocation57_spill] sm:$0xff] %v16770_v36 }
 0x4c3   :  { %v16772_v3 = vmul.f32 %v5926_v9, %v5391_v48  ;;  %v16805_v9 = vpop.f32.mrf.mxu0  ;;  %v6511_v33 = vsel %vm6433_vm4, %v6509_v11, %v6510_v46  ;;  %v10629_v46 = vld [vmem:[%s18301_s4 + $0xe0] sm:$0xff]  }
 0x4c4   :  { %19097 = vst [vmem:[#allocation77_spill] sm:$0xff] %v16767_v53  ;;  %v4308_v14 = vpop.f32.mrf.mxu1  ;;  %7375 = vmatmul.mubr.bf16.gmra.mxu0 %v16767_v53  ;;  %v16833_v11 = vpack.c.bf16 %v6513_v54, %v6511_v33  ;;  %7644 = vmatpush2.bf16.msra.mxu1 %v10628_v8 }
 0x4c5   :  { %9628 = vmatprep.mubr.msk.bf16.mxu0 %vm6850_vm8, %v16770_v36  ;;  %v6394_v18 = vrot.slane %v16772_v3, 1  ;;  %6045 = vperm.xlu1 %10349, %v5523_v29   ;;  %v7020_v14 = vrot.slane %v16254_v49, 2 }
 0x4c6   :  { %v16788_v58 = vpop.f32.mrf.mxu1  ;;  %v10417_v27 = vpop.permute.xlu0 %10416  ;;  %19102 = vst [vmem:[#allocation105_spill] sm:$0xff] %v16833_v11  ;;  %8062 = vmatpush1.bf16.msra.mxu0 %v10629_v46  ;;  %10319 = vmatprep.subr.bf16.mxu1 %v19014_v47 }
 0x4c7   :  { %v10419_v42 = vunpack.i.h.bf16 %v10417_v27  ;;  %v10418_v43 = vunpack.i.l.bf16 %v10417_v27  ;;  %v6395_v55 = vsel %vm6272_vm6, %v6393_v40, %v6394_v18  ;;  %v6397_v48 = vsel %vm6272_vm6, %v6394_v18, %v6396_v24  ;;  %v19100_v40 = vld [vmem:[#allocation16_spill] sm:$0xff]  ;;  %8063 = vmatprep.subr.bf16.mxu0 %v19014_v47 }
 0x4c8   :  { %v4313_v61 = vpop.f32.mrf.mxu1  ;;  %v10465_v2 = vpack.i.bf16 %v6397_v48, %v6395_v55  ;;  %v5313_v24 = vsel %vm5087_vm12, %v4979_v32, %v5205_v22  ;;  %v4944_v18 = vadd.f32 %v4756_v34, %v19099_v13  ;;  %v4945_v51 = vadd.f32 %v4761_v60, %v19100_v40 }
 0x4c9   :  { %v6880_v29 = vsel %vm6850_vm8, %v16134_v57, %v10419_v42  ;;  %v6879_v1 = vsel %vm6850_vm8, %v16071_v45, %v10418_v43  ;;  %v4764_v57 = vadd.f32 %v16530_v31, %v16710_v25  ;;  %v16835_v61 = vpop.f32.mrf.mxu0  ;;  %v6273_v34 = vrot.slane %v16780_v17, 1 }
 0x4ca   :  { %v16810_v0 = vpop.f32.mrf.mxu1  ;;  %v16828_v27 = vpack.c.bf16 %v6880_v29, %v6879_v1  ;;  %10466 = vrot.lane.b32.xlu1 %v10465_v2, %s10674_s20  ;;  %v5536_v45 = vpop.permute.xlu0 %5535  ;;  %v6434_v60 = vrot.slane %v16780_v17, 2  ;;  %v6276_v42 = vrot.slane %v6070_v21, 1  ;;  %v7019_v31 = vrot.slane %v16246_v35, 2  ;;  %v19103_v29 = vld [vmem:[#allocation31_spill] sm:$0xff] }
 0x4cb   :  { %v16831_v22 = vmul.f32 %v5536_v45, %v5313_v24  ;;  %v6437_v43 = vrot.slane %v6070_v21, 2  ;;  %v7022_v55 = vrot.slane %v16248_v62, 2  ;;  %v5059_v33 = vadd.f32 %v16335_v15, %v4944_v18  ;;  %v16856_v45 = vpop.f32.mrf.mxu0 }
 0x4cc   :  { %19101 = vst [vmem:[#allocation41_spill] sm:$0xff] %v16828_v27  ;;  %v4316_v32 = vpop.f32.mrf.mxu1  ;;  %7383 = vmatmul.mubr.bf16.gmra.mxu0 %v16828_v27  ;;  %v5060_v54 = vadd.f32 %v16335_v15, %v4945_v51  ;;  %v4946_v1 = vadd.f32 %v4764_v57, %v19103_v29  ;;  %v7021_v21 = vsel %vm6433_vm4, %v7019_v31, %v7020_v14 }
 0x4cd   :  { %v6274_v48 = vrot.slane %v16831_v22, 1  ;;  %v6435_v2 = vrot.slane %v16831_v22, 2  ;;  %9629 = vmatprep.mubr.msk.bf16.mxu0 %vm6850_vm8, %v16833_v11  ;;  %v7023_v15 = vsel %vm6433_vm4, %v7020_v14, %v7022_v55  ;;  %v5285_v14 = vmul.f32 %v15073_v5, %v5059_v33 }
 0x4ce   :  { %v16841_v25 = vpop.f32.mrf.mxu1  ;;  %v10422_v24 = vpop.permute.xlu0 %10421  ;;  %vm5168_vm13 = vcmp.ge.f32.partialorder %v5060_v54, 0.0  ;;  %vm5167_vm14 = vcmp.ge.f32.partialorder %v5059_v33, 0.0 }
 0x4cf   :  { %v10424_v62 = vunpack.i.h.bf16 %v10422_v24  ;;  %v10423_v46 = vunpack.i.l.bf16 %v10422_v24  ;;  %v6436_v13 = vsel %vm6433_vm4, %v6434_v60, %v6435_v2  ;;  %v6438_v40 = vsel %vm6433_vm4, %v6435_v2, %v6437_v43  ;;  %v16871_v2 = vld [vmem:[%s18299_s2] ss:$0 sm:$0xff] }
 0x4d0   :  { %v4321_v8 = vpop.f32.mrf.mxu1  ;;  %v6916_v32 = vpack.c.bf16 %v6438_v40, %v6436_v13  ;;  %v6275_v11 = vsel %vm6272_vm6, %v6273_v34, %v6274_v48  ;;  %v6277_v18 = vsel %vm6272_vm6, %v6274_v48, %v6276_v42  ;;  %v5286_v43 = vmul.f32 %v15073_v5, %v5060_v54 }
 0x4d1   :  { %v6882_v57 = vsel %vm6850_vm8, %v16194_v59, %v10424_v62  ;;  %v6881_v31 = vsel %vm6850_vm8, %v16175_v12, %v10423_v46  ;;  %v10470_v60 = vpack.i.bf16 %v6277_v18, %v6275_v11  ;;  %v5061_v34 = vadd.f32 %v16871_v2, %v4946_v1  ;;  %v16881_v11 = vpop.f32.mrf.mxu0 }
 0x4d2   :  { %v16861_v51 = vpop.f32.mrf.mxu1  ;;  %v16874_v42 = vpack.c.bf16 %v6882_v57, %v6881_v31  ;;  %v5936_v55 = vpop.permute.xlu0 %5935  ;;  %9659 = vmatprep.mubr.msk.bf16.mxu1 %vm6850_vm8, %v6916_v32  ;;  %v16879_v12 = vpack.c.bf16 %v7023_v15, %v7021_v21  ;;  %v6522_v48 = vrot.slane %v16338_v30, 2  ;;  %v6520_v1 = vrot.slane %v16315_v28, 2  ;;  %v19106_v21 = vld [vmem:[#allocation119_spill] sm:$0xff] }
 0x4d3   :  { %10471 = vrot.lane.b32.xlu0 %v10470_v60, %s10674_s20  ;;  %v5394_v24 = vsel %vm5168_vm13, %v5060_v54, %v5286_v43  ;;  %v5393_v8 = vsel %vm5167_vm14, %v5059_v33, %v5285_v14  ;;  %v5287_v46 = vmul.f32 %v15073_v5, %v5061_v34  ;;  %v6519_v13 = vrot.slane %v19106_v21, 2  ;;  %v16894_v15 = vpop.f32.mrf.mxu0  ;;  %v5941_v57 = vpop.permute.xlu1 %5940 }
 0x4d4   :  { %19104 = vst [vmem:[#allocation13_spill] sm:$0xff] %v16874_v42  ;;  %v4324_v59 = vpop.f32.mrf.mxu1  ;;  %19105 = vst [vmem:[#allocation103_spill] sm:$0xff] %v16879_v12  ;;  %7391 = vmatmul.mubr.bf16.gmra.mxu0 %v16874_v42  ;;  %v16892_v32 = vmul.f32 %v5936_v55, %v5393_v8  ;;  %vm5169_vm15 = vcmp.ge.f32.partialorder %v5061_v34, 0.0  ;;  %v6523_v31 = vsel %vm6433_vm4, %v6520_v1, %v6522_v48 }
 0x4d5   :  { %9630 = vmatprep.mubr.msk.bf16.mxu0 %vm6850_vm8, %v16879_v12  ;;  %v16899_v54 = vmul.f32 %v5941_v57, %v5394_v24  ;;  %v6521_v14 = vsel %vm6433_vm4, %v6519_v13, %v6520_v1  ;;  %v4769_v55 = vadd.f32 %v16586_v10, %v16740_v52  ;;  %v4772_v59 = vadd.f32 %v16616_v41, %v16759_v6  ;;  %v16919_v1 = vpop.f32.mrf.mxu0  ;;  %v16927_v41 = vld [vmem:[%s18301_s4 + $0xd8] sm:$0xff]  }
 0x4d6   :  { %v16885_v29 = vpop.f32.mrf.mxu1  ;;  %v10427_v62 = vpop.permute.xlu0 %10426  ;;  %v5395_v48 = vsel %vm5169_vm15, %v5061_v34, %v5287_v46  ;;  %v6527_v52 = vrot.slane %v16408_v63, 2  ;;  %v19110_v46 = vld [vmem:[#allocation76_spill] sm:$0xff]  ;;  %8064 = vmatpush1.bf16.msra.mxu0 %v16927_v41 }
 0x4d7   :  { %v10429_v30 = vunpack.i.h.bf16 %v10427_v62  ;;  %v10428_v18 = vunpack.i.l.bf16 %v10427_v62  ;;  %v4948_v13 = vadd.f32 %v4772_v59, %v19110_v46  ;;  %8065 = vmatprep.subr.bf16.mxu0 %v19014_v47 }
 0x4d8   :  { %v4329_v40 = vpop.f32.mrf.mxu1 }
 0x4d9   :  { %v7046_v33 = vsel %vm6850_vm8, %v16254_v49, %v10429_v30  ;;  %v7045_v43 = vsel %vm6850_vm8, %v16246_v35, %v10428_v18  ;;  %v4777_v40 = vadd.f32 %v16569_v44, %v16788_v58  ;;  %v6398_v49 = vrot.slane %v16892_v32, 1  ;;  %v19109_v58 = vld [vmem:[#allocation32_spill] sm:$0xff] }
 0x4da   :  { %v16897_v60 = vpop.f32.mrf.mxu1  ;;  %v16910_v8 = vpack.c.bf16 %v7046_v33, %v7045_v43  ;;  %v5946_v62 = vpop.permute.xlu0 %5945  ;;  %v16917_v35 = vpack.c.bf16 %v6523_v31, %v6521_v14  ;;  %v6399_v44 = vrot.slane %v16899_v54, 1  ;;  %v4947_v34 = vadd.f32 %v4769_v55, %v19109_v58  ;;  %v19111_v33 = vld [vmem:[#allocation72_spill] sm:$0xff]  ;;  %v19112_v58 = vld [vmem:[#allocation33_spill] sm:$0xff] }
 0x4db   :  { %v16915_v30 = vmul.f32 %v5946_v62, %v5395_v48  ;;  %v6525_v31 = vrot.slane %v16381_v38, 2  ;;  %v4949_v43 = vadd.f32 %v4777_v40, %v19111_v33  ;;  %v16941_v62 = vpop.f32.mrf.mxu0  ;;  %v6524_v46 = vrot.slane %v19112_v58, 2 }
 0x4dc   :  { %19107 = vst [vmem:[#allocation43_spill] sm:$0xff] %v16910_v8  ;;  %v4332_v24 = vpop.f32.mrf.mxu1  ;;  %19108 = vst [vmem:[#allocation10_spill] sm:$0xff] %v16917_v35  ;;  %7399 = vmatmul.mubr.bf16.gmra.mxu0 %v16910_v8  ;;  %v6400_v14 = vsel %vm6272_vm6, %v6398_v49, %v6399_v44  ;;  %v4780_v49 = vadd.f32 %v16599_v7, %v16810_v0  ;;  %v5063_v33 = vadd.f32 %v16871_v2, %v4948_v13  ;;  %v19115_v13 = vld [vmem:[#allocation30_spill] sm:$0xff] }
 0x4dd   :  { %v6401_v6 = vrot.slane %v16915_v30, 1  ;;  %9631 = vmatprep.mubr.msk.bf16.mxu0 %vm6850_vm8, %v16917_v35  ;;  %v6528_v40 = vsel %vm6433_vm4, %v6525_v31, %v6527_v52 }
 0x4de   :  { %v16922_v10 = vpop.f32.mrf.mxu1  ;;  %v5951_v18 = vpop.permute.xlu0 %5950  ;;  %vm5171_vm2 = vcmp.ge.f32.partialorder %v5063_v33, 0.0 }
 0x4df   :  { %v10432_v57 = vpop.permute.xlu1 %10431  ;;  %v6402_v63 = vsel %vm6272_vm6, %v6399_v44, %v6401_v6  ;;  %v5062_v6 = vadd.f32 %v16871_v2, %v4947_v34  ;;  %v16963_v34 = vpop.f32.mrf.mxu0 }
 0x4e0   :  { %v10434_v48 = vunpack.i.h.bf16 %v10432_v57  ;;  %v4337_v24 = vpop.f32.mrf.mxu1  ;;  %v10475_v55 = vpack.i.bf16 %v6402_v63, %v6400_v14  ;;  %v10433_v59 = vunpack.i.l.bf16 %v10432_v57  ;;  %v6526_v57 = vsel %vm6433_vm4, %v6524_v46, %v6525_v31 }
 0x4e1   :  { %v4788_v63 = vadd.f32 %v16652_v39, %v16861_v51  ;;  %v16965_v0 = vpack.c.bf16 %v6528_v40, %v6526_v57  ;;  %v19116_v39 = vld [vmem:[#allocation79_spill] sm:$0xff]  ;;  %vm5170_vm0 = vcmp.ge.f32.partialorder %v5062_v6, 0.0  ;;  %v16978_v24 = vpop.f32.mrf.mxu0  ;;  %v6530_v40 = vrot.slane %v16457_v20, 2 }
 0x4e2   :  { %v6886_v35 = vsel %vm6850_vm8, %v16315_v28, %v10434_v48  ;;  %v16947_v8 = vpop.f32.mrf.mxu1  ;;  %10476 = vrot.lane.b32.xlu1 %v10475_v55, %s10674_s20  ;;  %v6885_v44 = vsel %vm6850_vm8, %v19106_v21, %v10433_v59  ;;  %v5064_v28 = vadd.f32 %v16871_v2, %v4949_v43  ;;  %v5961_v7 = vpop.permute.xlu0 %5960  ;;  %v4785_v21 = vadd.f32 %v16637_v50, %v16841_v25  ;;  %v19117_v25 = vld [vmem:[#allocation34_spill] sm:$0xff] }
 0x4e3   :  { %v16961_v52 = vpack.c.bf16 %v6886_v35, %v6885_v44  ;;  %19114 = vst [vmem:[#allocation100_spill] sm:$0xff] %v16965_v0  ;;  %v4950_v43 = vadd.f32 %v4780_v49, %v19115_v13  ;;  %v5288_v48 = vmul.f32 %v15073_v5, %v5062_v6  ;;  %v4952_v51 = vadd.f32 %v4788_v63, %v19116_v39 }
 0x4e4   :  { %v4340_v14 = vpop.f32.mrf.mxu1  ;;  %v5290_v35 = vmul.f32 %v15073_v5, %v5064_v28  ;;  %v5289_v50 = vmul.f32 %v15073_v5, %v5063_v33  ;;  %vm5172_vm1 = vcmp.ge.f32.partialorder %v5064_v28, 0.0  ;;  %v4951_v59 = vadd.f32 %v4785_v21, %v19117_v25 }
 0x4e5   :  { %19113 = vst [vmem:[#allocation80_spill] sm:$0xff] %v16961_v52  ;;  %7407 = vmatmul.mubr.bf16.gmra.mxu0 %v16961_v52  ;;  %v5065_v49 = vadd.f32 %v16871_v2, %v4950_v43  ;;  %v5396_v44 = vsel %vm5170_vm0, %v5062_v6, %v5288_v48  ;;  %v6529_v63 = vrot.slane %v16463_v56, 2  ;;  %v6532_v14 = vrot.slane %v16481_v19, 2 }
 0x4e6   :  { %v16970_v31 = vpop.f32.mrf.mxu1  ;;  %9632 = vmatprep.mubr.msk.bf16.mxu0 %vm6850_vm8, %v16965_v0  ;;  %v5966_v57 = vpop.permute.xlu0 %5965  ;;  %v5067_v13 = vadd.f32 %v16871_v2, %v4952_v51  ;;  %v16989_v39 = vmul.f32 %v5951_v18, %v5396_v44  ;;  %v5397_v21 = vsel %vm5171_vm2, %v5063_v33, %v5289_v50  ;;  %v5066_v6 = vadd.f32 %v16871_v2, %v4951_v59 }
 0x4e7   :  { %v6531_v42 = vsel %vm6433_vm4, %v6529_v63, %v6530_v40  ;;  %vm5173_vm3 = vcmp.ge.f32.partialorder %v5065_v49, 0.0  ;;  %v5291_v19 = vmul.f32 %v15073_v5, %v5065_v49  ;;  %v6533_v33 = vsel %vm6433_vm4, %v6530_v40, %v6532_v14  ;;  %v19120_v63 = vld [vmem:[#allocation96_spill] sm:$0xff]  ;;  %v19121_v40 = vld [vmem:[#allocation35_spill] sm:$0xff] }
 0x4e8   :  { %v4345_v55 = vpop.f32.mrf.mxu1  ;;  %v6403_v51 = vrot.slane %v16989_v39, 1  ;;  %vm5175_vm5 = vcmp.ge.f32.partialorder %v5067_v13, 0.0  ;;  %v4796_v14 = vadd.f32 %v19121_v40, %v16897_v60  ;;  %vm5174_vm7 = vcmp.ge.f32.partialorder %v5066_v6, 0.0  ;;  %v19123_v60 = vld [vmem:[#allocation101_spill] sm:$0xff] }
 0x4e9   :  { %v5398_v55 = vsel %vm5172_vm1, %v5064_v28, %v5290_v35  ;;  %v5293_v35 = vmul.f32 %v15073_v5, %v5067_v13  ;;  %v5399_v40 = vsel %vm5173_vm3, %v5065_v49, %v5291_v19  ;;  %v19128_v49 = vld [vmem:[#allocation95_spill] sm:$0xff] }
 0x4ea   :  { %v16982_v46 = vpop.f32.mrf.mxu1  ;;  %v16993_v52 = vmul.f32 %v5961_v7, %v5398_v55  ;;  %v4793_v7 = vadd.f32 %v16627_v26, %v16885_v29  ;;  %v4801_v55 = vadd.f32 %v19120_v63, %v16922_v10  ;;  %v5976_v26 = vpop.permute.xlu0 %5975  ;;  %v17032_v36 = vmul.f32 %v5966_v57, %v5399_v40 }
 0x4eb   :  { %v16991_v0 = vpop.f32.mrf.mxu0  ;;  %v5956_v25 = vpop.permute.xlu1 %5955  ;;  %v4954_v19 = vadd.f32 %v4796_v14, %v19128_v49 }
 0x4ec   :  { %19118 = vst [vmem:[#allocation106_spill] sm:$0xff] %v16991_v0  ;;  %v16995_v12 = vmul.f32 %v5956_v25, %v5397_v21  ;;  %v4348_v43 = vpop.f32.mrf.mxu1  ;;  %v6406_v44 = vrot.slane %v16993_v52, 1  ;;  %v17016_v0 = vpack.c.bf16 %v6533_v33, %v6531_v42  ;;  %v5401_v42 = vsel %vm5175_vm5, %v5067_v13, %v5293_v35  ;;  %v19129_v35 = vld [vmem:[#allocation107_spill] sm:$0xff] }
 0x4ed   :  { %v7282_v48 = vpop.f32.mrf.mxu0  ;;  %v6535_v57 = vrot.slane %v19129_v35, 2 }
 0x4ee   :  { %v6404_v18 = vrot.slane %v16995_v12, 1  ;;  %v17001_v28 = vpop.f32.mrf.mxu1  ;;  %19122 = vst [vmem:[#allocation109_spill] sm:$0xff] %v17016_v0  ;;  %v5981_v14 = vpop.permute.xlu0 %5980 }
 0x4ef   :  { %v17008_v50 = vpop.f32.mrf.mxu0  ;;  %v10437_v59 = vpop.permute.xlu1 %10436 }
 0x4f0   :  { %19119 = vst [vmem:[#allocation83_spill] sm:$0xff] %v17008_v50  ;;  %v10439_v21 = vunpack.i.h.bf16 %v10437_v59  ;;  %v10438_v25 = vunpack.i.l.bf16 %v10437_v59  ;;  %v4353_v43 = vpop.f32.mrf.mxu1  ;;  %v6405_v48 = vsel %vm6272_vm6, %v6403_v51, %v6404_v18  ;;  %v5292_v50 = vmul.f32 %v15073_v5, %v5066_v6  ;;  %v19125_v51 = vld [vmem:[#allocation23_spill] sm:$0xff] }
 0x4f1   :  { %v7285_v29 = vpop.f32.mrf.mxu0  ;;  %v6407_v59 = vsel %vm6272_vm6, %v6404_v18, %v6406_v44  ;;  %v4953_v43 = vadd.f32 %v4793_v7, %v19123_v60  ;;  %v17039_v18 = vld [vmem:[%s18301_s4 + $0xd0] sm:$0xff]   ;;  %v19127_v7 = vld [vmem:[#allocation42_spill] sm:$0xff] }
 0x4f2   :  { %v6888_v27 = vsel %vm6850_vm8, %v16381_v38, %v10439_v21  ;;  %v6887_v10 = vsel %vm6850_vm8, %v19112_v58, %v10438_v25  ;;  %v17023_v63 = vpop.f32.mrf.mxu1  ;;  %v4955_v29 = vadd.f32 %v4801_v55, %v19125_v51  ;;  %v17034_v38 = vmul.f32 %v5976_v26, %v5401_v42  ;;  %8066 = vmatpush1.bf16.msra.mxu0 %v17039_v18 }
 0x4f3   :  { %v17029_v33 = vpack.c.bf16 %v6888_v27, %v6887_v10  ;;  %v10480_v58 = vpack.i.bf16 %v6407_v59, %v6405_v48  ;;  %v6537_v44 = vrot.slane %v19127_v7, 2  ;;  %v5400_v27 = vsel %vm5174_vm7, %v5066_v6, %v5292_v50  ;;  %v19130_v48 = vld [vmem:[#allocation8_spill] sm:$0xff]  ;;  %v19131_v59 = vld [vmem:[#allocation59_spill] sm:$0xff]  ;;  %8067 = vmatprep.subr.bf16.mxu0 %v19014_v47 }
 0x4f4   :  { %19126 = vst [vmem:[#allocation40_spill] sm:$0xff] %v17034_v38  ;;  %v4356_v21 = vpop.f32.mrf.mxu1  ;;  %v5068_v26 = vadd.f32 %v16871_v2, %v4953_v43  ;;  %v4804_v10 = vadd.f32 %v19130_v48, %v16947_v8  ;;  %v6534_v60 = vrot.slane %v19131_v59, 2  ;;  %v5070_v6 = vadd.f32 %v16871_v2, %v4955_v29  ;;  %v19132_v8 = vld [vmem:[#allocation36_spill] sm:$0xff] }
 0x4f5   :  { %19124 = vst [vmem:[#allocation64_spill] sm:$0xff] %v17029_v33  ;;  %7415 = vmatmul.mubr.bf16.gmra.mxu0 %v17029_v33  ;;  %10481 = vrot.lane.b32.xlu0 %v10480_v58, %s10674_s20  ;;  %v6408_v50 = vrot.slane %v17032_v36, 1  ;;  %v6411_v40 = vrot.slane %v17034_v38, 1  ;;  %v5069_v43 = vadd.f32 %v16871_v2, %v4954_v19  ;;  %v4812_v58 = vadd.f32 %v19132_v8, %v16982_v46  ;;  %v19134_v46 = vld [vmem:[#allocation71_spill] sm:$0xff] }
 0x4f6   :  { %v5971_v13 = vpop.permute.xlu1 %5970  ;;  %9633 = vmatprep.mubr.msk.bf16.mxu0 %vm6850_vm8, %v17016_v0  ;;  %v4359_v55 = vpop.f32.mrf.mxu1  ;;  %v6536_v7 = vsel %vm6433_vm4, %v6534_v60, %v6535_v57  ;;  %v6538_v49 = vsel %vm6433_vm4, %v6535_v57, %v6537_v44  ;;  %v19133_v0 = vld [vmem:[#allocation98_spill] sm:$0xff]  ;;  %vm5176_vm9 = vcmp.ge.f32.partialorder %v5068_v26, 0.0  ;;  %v5294_v19 = vmul.f32 %v15073_v5, %v5068_v26 }
 0x4f7   :  { %v17048_v25 = vmul.f32 %v5971_v13, %v5400_v27  ;;  %v4956_v33 = vadd.f32 %v4804_v10, %v19133_v0  ;;  %v4809_v8 = vadd.f32 %v19134_v46, %v16970_v31  ;;  %v5296_v60 = vmul.f32 %v15073_v5, %v5070_v6  ;;  %v5991_v10 = vpop.permute.xlu0 %5990 }
 0x4f8   :  { %v4361_v51 = vpop.f32.mrf.mxu1  ;;  %vm5178_vm10 = vcmp.ge.f32.partialorder %v5070_v6, 0.0  ;;  %v5295_v31 = vmul.f32 %v15073_v5, %v5069_v43  ;;  %vm5177_vm11 = vcmp.ge.f32.partialorder %v5069_v43, 0.0 }
 0x4f9   :  { %v6409_v42 = vrot.slane %v17048_v25, 1 }
 0x4fa   :  { %v10442_v21 = vpop.permute.xlu1 %10441  ;;  %v17065_v29 = vpop.f32.mrf.mxu1 }
 0x4fb   :  { %v10444_v27 = vunpack.i.h.bf16 %v10442_v21  ;;  %v10443_v13 = vunpack.i.l.bf16 %v10442_v21  ;;  %v6410_v48 = vsel %vm6272_vm6, %v6408_v50, %v6409_v42  ;;  %v6412_v51 = vsel %vm6272_vm6, %v6409_v42, %v6411_v40  ;;  %v19136_v42 = vld [vmem:[#allocation75_spill] sm:$0xff] }
 0x4fc   :  { %v10485_v53 = vpack.i.bf16 %v6412_v51, %v6410_v48  ;;  %v17074_v44 = vpop.f32.mrf.mxu0  ;;  %v4364_v40 = vpop.f32.mrf.mxu1  ;;  %v4958_v0 = vadd.f32 %v4812_v58, %v19136_v42  ;;  %v17085_v51 = vpack.c.bf16 %v6538_v49, %v6536_v7  ;;  %v19139_v58 = vld [vmem:[#allocation39_spill] sm:$0xff]  ;;  %v19145_v42 = vld [vmem:[#allocation38_spill] sm:$0xff] }
 0x4fd   :  { %19135 = vst [vmem:[#allocation104_spill] sm:$0xff] %v17074_v44  ;;  %v6890_v57 = vsel %vm6850_vm8, %v16457_v20, %v10444_v27  ;;  %v6889_v50 = vsel %vm6850_vm8, %v16463_v56, %v10443_v13  ;;  %v5402_v20 = vsel %vm5176_vm9, %v5068_v26, %v5294_v19  ;;  %v5071_v56 = vadd.f32 %v16871_v2, %v4956_v33 }
 0x4fe   :  { %v17081_v21 = vpack.c.bf16 %v6890_v57, %v6889_v50  ;;  %10486 = vrot.lane.b32.xlu1 %v10485_v53, %s10674_s20  ;;  %v7290_v48 = vpop.f32.mrf.mxu0  ;;  %19138 = vst [vmem:[#allocation15_spill] sm:$0xff] %v17085_v51  ;;  %v17088_v27 = vpop.f32.mrf.mxu1  ;;  %v4957_v13 = vadd.f32 %v4809_v8, %v19139_v58  ;;  %v17093_v46 = vmul.f32 %v5981_v14, %v5402_v20  ;;  %v19144_v14 = vld [vmem:[#allocation112_spill] sm:$0xff]  ;;  %v19146_v58 = vld [vmem:[#allocation93_spill] sm:$0xff] }
 0x4ff   :  { %v5404_v57 = vsel %vm5178_vm10, %v5070_v6, %v5296_v60  ;;  %v5073_v7 = vadd.f32 %v16871_v2, %v4958_v0  ;;  %v4817_v26 = vadd.f32 %v16750_v4, %v17001_v28  ;;  %v5403_v50 = vsel %vm5177_vm11, %v5069_v43, %v5295_v31  ;;  %v5996_v60 = vpop.permute.xlu0 %5995 }
 0x500   :  { %19137 = vst [vmem:[#allocation60_spill] sm:$0xff] %v17081_v21  ;;  %7423 = vmatmul.mubr.bf16.gmra.mxu0 %v17081_v21  ;;  %19140 = vst [vmem:[#allocation12_spill] sm:$0xff] %v17093_v46  ;;  %v17095_v53 = vpop.f32.mrf.mxu0  ;;  %v17100_v49 = vmul.f32 %v5991_v10, %v5404_v57  ;;  %v4369_v19 = vpop.f32.mrf.mxu1  ;;  %v6542_v6 = vrot.slane %v19144_v14, 2  ;;  %v4825_v48 = vadd.f32 %v19145_v42, %v4359_v55  ;;  %v6539_v0 = vrot.slane %v19146_v58, 2  ;;  %v19147_v10 = vld [vmem:[#allocation97_spill] sm:$0xff] }
 0x501   :  { %19141 = vst [vmem:[#allocation92_spill] sm:$0xff] %v17095_v53  ;;  %9634 = vmatprep.mubr.msk.bf16.mxu0 %vm6850_vm8, %v17085_v51  ;;  %v6540_v57 = vrot.slane %v19147_v10, 2  ;;  %v5072_v53 = vadd.f32 %v16871_v2, %v4957_v13  ;;  %v6413_v4 = vrot.slane %v17093_v46, 1  ;;  %v5297_v28 = vmul.f32 %v15073_v5, %v5071_v56 }
 0x502   :  { %19142 = vst [vmem:[#allocation89_spill] sm:$0xff] %v17100_v49  ;;  %v5986_v33 = vpop.permute.xlu1 %5985  ;;  %v7293_v40 = vpop.f32.mrf.mxu0  ;;  %v6416_v19 = vrot.slane %v17100_v49, 1  ;;  %vm5181_vm12 = vcmp.ge.f32.partialorder %v5073_v7, 0.0  ;;  %v4820_v13 = vadd.f32 %v16805_v9, %v17023_v63  ;;  %vm5179_vm13 = vcmp.ge.f32.partialorder %v5071_v56, 0.0 }
 0x503   :  { %v17104_v8 = vmul.f32 %v5986_v33, %v5403_v50  ;;  %v17108_v20 = vpop.f32.mrf.mxu1  ;;  %v19149_v50 = vld [vmem:[#allocation20_spill] sm:$0xff]  ;;  %v5299_v33 = vmul.f32 %v15073_v5, %v5073_v7  ;;  %vm5180_vm14 = vcmp.ge.f32.partialorder %v5072_v53, 0.0 }
 0x504   :  { %v17115_v43 = vpop.f32.mrf.mxu0  ;;  %v4959_v55 = vadd.f32 %v4817_v26, %v19149_v50  ;;  %v6543_v50 = vsel %vm6433_vm4, %v6540_v57, %v6542_v6  ;;  %v6006_v6 = vpop.permute.xlu0 %6005 }
 0x505   :  { %19143 = vst [vmem:[#allocation67_spill] sm:$0xff] %v17104_v8  ;;  %19148 = vst [vmem:[#allocation63_spill] sm:$0xff] %v17115_v43  ;;  %v6414_v31 = vrot.slane %v17104_v8, 1  ;;  %v4372_v40 = vpop.f32.mrf.mxu1  ;;  %v19150_v43 = vld [vmem:[#allocation78_spill] sm:$0xff] }
 0x506   :  { %v10447_v14 = vpop.permute.xlu1 %10446  ;;  %v7298_v42 = vpop.f32.mrf.mxu0  ;;  %v4961_v46 = vadd.f32 %v4825_v48, %v19150_v43  ;;  %v17132_v40 = vld [vmem:[%s18301_s4 + $0xc8] sm:$0xff]   ;;  %v6541_v48 = vsel %vm6433_vm4, %v6539_v0, %v6540_v57  ;;  %v5298_v43 = vmul.f32 %v15073_v5, %v5072_v53 }
 0x507   :  { %v10449_v44 = vunpack.i.h.bf16 %v10447_v14  ;;  %v10448_v51 = vunpack.i.l.bf16 %v10447_v14  ;;  %v6415_v21 = vsel %vm6272_vm6, %v6413_v4, %v6414_v31  ;;  %v17125_v8 = vpop.f32.mrf.mxu1  ;;  %v6417_v26 = vsel %vm6272_vm6, %v6414_v31, %v6416_v19  ;;  %8068 = vmatpush1.bf16.msra.mxu0 %v17132_v40 }
 0x508   :  { %v17134_v9 = vpop.f32.mrf.mxu0  ;;  %v5407_v31 = vsel %vm5181_vm12, %v5073_v7, %v5299_v33  ;;  %v10490_v42 = vpack.i.bf16 %v6417_v26, %v6415_v21  ;;  %v17149_v0 = vpack.c.bf16 %v6543_v50, %v6541_v48  ;;  %8069 = vmatprep.subr.bf16.mxu0 %v19014_v47  ;;  %v5076_v57 = vadd.f32 %v16871_v2, %v4961_v46  ;;  %v19159_v26 = vld [vmem:[#allocation21_spill] sm:$0xff]  ;;  %v19160_v46 = vld [vmem:[#allocation26_spill] sm:$0xff] }
 0x509   :  { %19151 = vst [vmem:[#allocation66_spill] sm:$0xff] %v17134_v9  ;;  %v6892_v63 = vsel %vm6850_vm8, %v19129_v35, %v10449_v44  ;;  %v6891_v4 = vsel %vm6850_vm8, %v19131_v59, %v10448_v51  ;;  %v4377_v14 = vpop.f32.mrf.mxu1  ;;  %v5074_v9 = vadd.f32 %v16871_v2, %v4959_v55  ;;  %v5405_v35 = vsel %vm5179_vm13, %v5071_v56, %v5297_v28  ;;  %v19153_v44 = vld [vmem:[#allocation22_spill] sm:$0xff] }
 0x50a   :  { %v17143_v19 = vpack.c.bf16 %v6892_v63, %v6891_v4  ;;  %v4960_v59 = vadd.f32 %v4820_v13, %v19153_v44  ;;  %v7301_v51 = vpop.f32.mrf.mxu0  ;;  %19154 = vst [vmem:[#allocation17_spill] sm:$0xff] %v17149_v0  ;;  %v17152_v7 = vmul.f32 %v5996_v60, %v5405_v35  ;;  %10491 = vrot.lane.b32.xlu0 %v10490_v42, %s10674_s20  ;;  %v19158_v60 = vld [vmem:[#allocation111_spill] sm:$0xff]  ;;  %v19161_v63 = vld [vmem:[#allocation94_spill] sm:$0xff]  ;;  %vm5184_vm0 = vcmp.ge.f32.partialorder %v5076_v57, 0.0 }
 0x50b   :  { %v17155_v33 = vpop.f32.mrf.mxu1  ;;  %v17159_v21 = vmul.f32 %v6006_v6, %v5407_v31  ;;  %v5406_v28 = vsel %vm5180_vm14, %v5072_v53, %v5298_v43  ;;  %v6545_v13 = vrot.slane %v19158_v60, 2  ;;  %v3242_v50 = vadd.f32 %v19160_v46, %v19159_v26  ;;  %v19163_v53 = vld [vmem:[#allocation61_spill] sm:$0xff]  ;;  %v6011_v51 = vpop.permute.xlu0 %6010 }
 0x50c   :  { %19152 = vst [vmem:[#allocation14_spill] sm:$0xff] %v17143_v19  ;;  %19155 = vst [vmem:[#allocation73_spill] sm:$0xff] %v17152_v7  ;;  %7431 = vmatmul.mubr.bf16.gmra.mxu0 %v17143_v19  ;;  %v17161_v56 = vpop.f32.mrf.mxu0  ;;  %v6547_v4 = vrot.slane %v19161_v63, 2  ;;  %v5075_v31 = vadd.f32 %v16871_v2, %v4960_v59  ;;  %v5300_v6 = vmul.f32 %v15073_v5, %v5074_v9  ;;  %v6544_v43 = vrot.slane %v19163_v53, 2 }
 0x50d   :  { %19156 = vst [vmem:[#allocation70_spill] sm:$0xff] %v17159_v21  ;;  %19157 = vst [vmem:[#allocation19_spill] sm:$0xff] %v17161_v56  ;;  %9635 = vmatprep.mubr.msk.bf16.mxu0 %vm6850_vm8, %v17149_v0  ;;  %v4380_v48 = vpop.f32.mrf.mxu1  ;;  %v4828_v42 = vadd.f32 %v16778_v37, %v17065_v29  ;;  %v6418_v44 = vrot.slane %v17152_v7, 1  ;;  %vm5182_vm15 = vcmp.ge.f32.partialorder %v5074_v9, 0.0  ;;  %v5302_v26 = vmul.f32 %v15073_v5, %v5076_v57 }
 0x50e   :  { %v6001_v55 = vpop.permute.xlu1 %6000  ;;  %v7306_v35 = vpop.f32.mrf.mxu0  ;;  %v6421_v59 = vrot.slane %v17159_v21, 1  ;;  %v6546_v63 = vsel %vm6433_vm4, %v6544_v43, %v6545_v13  ;;  %v6548_v19 = vsel %vm6433_vm4, %v6545_v13, %v6547_v4  ;;  %v5408_v7 = vsel %vm5182_vm15, %v5074_v9, %v5300_v6  ;;  %v19166_v4 = vld [vmem:[#allocation27_spill] sm:$0xff] }
 0x50f   :  { %v17170_v14 = vmul.f32 %v6001_v55, %v5406_v28  ;;  %v17179_v46 = vpop.f32.mrf.mxu1  ;;  %v4836_v55 = vadd.f32 %v16894_v15, %v17108_v20  ;;  %v5301_v15 = vmul.f32 %v15073_v5, %v5075_v31  ;;  %v5410_v20 = vsel %vm5184_vm0, %v5076_v57, %v5302_v26  ;;  %v6021_v57 = vpop.permute.xlu0 %6020 }
 0x510   :  { %v17185_v37 = vpop.f32.mrf.mxu0  ;;  %v4833_v43 = vadd.f32 %v16856_v45, %v17088_v27  ;;  %v17206_v26 = vpack.c.bf16 %v6548_v19, %v6546_v63  ;;  %vm5183_vm1 = vcmp.ge.f32.partialorder %v5075_v31, 0.0  ;;  %v17208_v45 = vmul.f32 %v6011_v51, %v5408_v7 }
 0x511   :  { %19162 = vst [vmem:[#allocation69_spill] sm:$0xff] %v17170_v14  ;;  %v6419_v28 = vrot.slane %v17170_v14, 1  ;;  %19164 = vst [vmem:[#allocation86_spill] sm:$0xff] %v17185_v37  ;;  %v4385_v48 = vpop.f32.mrf.mxu1  ;;  %v19165_v14 = vld [vmem:[#allocation82_spill] sm:$0xff]  ;;  %v4964_v9 = vadd.f32 %v4836_v55, %v19166_v4  ;;  %v5409_v51 = vsel %vm5183_vm1, %v5075_v31, %v5301_v15 }
 0x512   :  { %v10452_v29 = vpop.permute.xlu1 %10451  ;;  %v4962_v21 = vadd.f32 %v4828_v42, %v19165_v14  ;;  %v7309_v49 = vpop.f32.mrf.mxu0  ;;  %v19173_v4 = vld [vmem:[#allocation102_spill] sm:$0xff] }
 0x513   :  { %v10454_v35 = vunpack.i.h.bf16 %v10452_v29  ;;  %v10453_v56 = vunpack.i.l.bf16 %v10452_v29  ;;  %v6420_v0 = vsel %vm6272_vm6, %v6418_v44, %v6419_v28  ;;  %v6422_v38 = vsel %vm6272_vm6, %v6419_v28, %v6421_v59  ;;  %v4386_v48 = vpop.f32.mrf.mxu1  ;;  %v6026_v31 = vpop.permute.xlu0 %6025 }
 0x514   :  { %v4852_v49 = vadd.f32 %v16978_v24, %v4386_v48  ;;  %v10495_v42 = vpack.i.bf16 %v6422_v38, %v6420_v0  ;;  %v17215_v24 = vmul.f32 %v6021_v57, %v5410_v20  ;;  %v19168_v38 = vld [vmem:[#allocation25_spill] sm:$0xff]  ;;  %v5079_v0 = vadd.f32 %v16871_v2, %v4964_v9 }
 0x515   :  { %v6894_v29 = vsel %vm6850_vm8, %v19147_v10, %v10454_v35  ;;  %v6893_v13 = vsel %vm6850_vm8, %v19146_v58, %v10453_v56  ;;  %v17201_v6 = vpop.f32.mrf.mxu0  ;;  %v4388_v44 = vpop.f32.mrf.mxu1  ;;  %v5077_v58 = vadd.f32 %v16871_v2, %v4962_v21  ;;  %v4963_v19 = vadd.f32 %v4833_v43, %v19168_v38  ;;  %v19170_v21 = vld [vmem:[#allocation99_spill] sm:$0xff] }
 0x516   :  { %19167 = vst [vmem:[#allocation91_spill] sm:$0xff] %v17201_v6  ;;  %v17204_v14 = vpack.c.bf16 %v6894_v29, %v6893_v13  ;;  %v17210_v10 = vadd.f32 %v4852_v49, %v3242_v50  ;;  %10496 = vrot.lane.b32.xlu1 %v10495_v42, %s10674_s20  ;;  %v6549_v63 = vrot.slane %v19170_v21, 2  ;;  %v19171_v35 = vld [vmem:[#allocation115_spill] sm:$0xff]  ;;  %v6423_v48 = vrot.slane %v17208_v45, 1  ;;  %v19172_v13 = vld [vmem:[#allocation84_spill] sm:$0xff] }
 0x517   :  { %v7314_v27 = vpop.f32.mrf.mxu0  ;;  %v4391_v56 = vpop.f32.mrf.mxu1  ;;  %v6550_v20 = vrot.slane %v19171_v35, 2  ;;  %v6552_v9 = vrot.slane %v19173_v4, 2  ;;  %v6426_v49 = vrot.slane %v17215_v24, 1  ;;  %vm5185_vm2 = vcmp.ge.f32.partialorder %v5077_v58, 0.0  ;;  %v19175_v4 = vld [vmem:[#allocation88_spill] sm:$0xff] }
 0x518   :  { %7439 = vmatmul.mubr.bf16.gmra.mxu0 %v17204_v14  ;;  %v4857_v50 = vadd.f32 %v16919_v1, %v4391_v56  ;;  %v5303_v1 = vmul.f32 %v15073_v5, %v5077_v58  ;;  %v5078_v57 = vadd.f32 %v16871_v2, %v4963_v19  ;;  %vm5187_vm3 = vcmp.ge.f32.partialorder %v5079_v0, 0.0 }
 0x519   :  { %9636 = vmatprep.mubr.msk.bf16.mxu0 %vm6850_vm8, %v17206_v26  ;;  %v17221_v7 = vpop.f32.mrf.mxu0  ;;  %v4393_v59 = vpop.f32.mrf.mxu1  ;;  %v5305_v44 = vmul.f32 %v15073_v5, %v5079_v0  ;;  %v6551_v6 = vsel %vm6433_vm4, %v6549_v63, %v6550_v20  ;;  %v6553_v37 = vsel %vm6433_vm4, %v6550_v20, %v6552_v9 }
 0x51a   :  { %19169 = vst [vmem:[#allocation29_spill] sm:$0xff] %v17221_v7  ;;  %v6016_v28 = vpop.permute.xlu1 %6015  ;;  %v17230_v43 = vadd.f32 %v4857_v50, %v19172_v13  ;;  %v5304_v20 = vmul.f32 %v15073_v5, %v5078_v57  ;;  %v17266_v9 = vpack.c.bf16 %v6553_v37, %v6551_v6  ;;  %vm5186_vm5 = vcmp.ge.f32.partialorder %v5078_v57, 0.0 }
 0x51b   :  { %v17224_v55 = vmul.f32 %v6016_v28, %v5409_v51  ;;  %v7317_v29 = vpop.f32.mrf.mxu0  ;;  %v4394_v15 = vpop.f32.mrf.mxu1 }
 0x51c   :  { %v4860_v56 = vadd.f32 %v16963_v34, %v4394_v15  ;;  %v17251_v34 = vld [vmem:[%s18301_s4 + $0xc0] sm:$0xff]   ;;  %v5411_v15 = vsel %vm5185_vm2, %v5077_v58, %v5303_v1 }
 0x51d   :  { %v6424_v42 = vrot.slane %v17224_v55, 1  ;;  %v17238_v27 = vpop.f32.mrf.mxu0  ;;  %v4396_v29 = vpop.f32.mrf.mxu1  ;;  %8070 = vmatpush1.bf16.msra.mxu0 %v17251_v34 }
 0x51e   :  { %19174 = vst [vmem:[#allocation87_spill] sm:$0xff] %v17238_v27  ;;  %v10457_v38 = vpop.permute.xlu1 %10456  ;;  %v17244_v7 = vadd.f32 %v4860_v56, %v19175_v4  ;;  %8079 = vmatprep.subr.bf16.mxu0 %v19014_v47 }
 0x51f   :  { %v10459_v50 = vunpack.i.h.bf16 %v10457_v38  ;;  %v10458_v51 = vunpack.i.l.bf16 %v10457_v38  ;;  %v6425_v28 = vsel %vm6272_vm6, %v6423_v48, %v6424_v42  ;;  %v6427_v59 = vsel %vm6272_vm6, %v6424_v42, %v6426_v49  ;;  %v7322_v13 = vpop.f32.mrf.mxu0 }
 0x520   :  { %v10500_v19 = vpack.i.bf16 %v6427_v59, %v6425_v28  ;;  %v5413_v42 = vsel %vm5187_vm3, %v5079_v0, %v5305_v44  ;;  %v5412_v44 = vsel %vm5186_vm5, %v5078_v57, %v5304_v20  ;;  %v5474_v57 = vld [vmem:[%s18303_s7 + $0x1b0] sm:$0xff]  ;;  %v4844_v20 = vadd.f32 %v16881_v11, %v17155_v33  ;;  %v17312_v11 = vld [vmem:[%s18301_s4 + $0x118] sm:$0xff]  }
 0x521   :  { %v6896_v48 = vsel %vm6850_vm8, %v19158_v60, %v10459_v50  ;;  %v6895_v49 = vsel %vm6850_vm8, %v19163_v53, %v10458_v51  ;;  %v17259_v56 = vpop.f32.mrf.mxu0  ;;  %v6036_v60 = vpop.permute.xlu0 %6035  ;;  %v17270_v53 = vmul.f32 %v6026_v31, %v5411_v15  ;;  %v4841_v15 = vadd.f32 %v16835_v61, %v17125_v8  ;;  %v19183_v33 = vld [vmem:[#allocation81_spill] sm:$0xff]  ;;  %8080 = vmatpush2.bf16.msra.mxu0 %v17312_v11 }
 0x522   :  { %19176 = vst [vmem:[#allocation18_spill] sm:$0xff] %v17259_v56  ;;  %v17261_v63 = vpack.c.bf16 %v6896_v48, %v6895_v49  ;;  %10501 = vrot.lane.b32.xlu0 %v10500_v19, %s10674_s20  ;;  %v17272_v0 = vmul.f32 %v6036_v60, %v5413_v42  ;;  %v4849_v48 = vadd.f32 %v16941_v62, %v17179_v46  ;;  %v5476_v60 = vld [vmem:[%s18303_s7 + $0x1c0] sm:$0xff]  ;;  %v6557_v62 = vrot.slane %v16765_v16, 2 }
 0x523   :  { %v7325_v58 = vpop.f32.mrf.mxu0  ;;  %v6428_v50 = vrot.slane %v17270_v53, 1  ;;  %8081 = vmatprep.subr.bf16.mxu0 %v19014_v47 }
 0x524   :  { %7447 = vmatmul.mubr.bf16.gmra.mxu0 %v17261_v63  ;;  %v6431_v51 = vrot.slane %v17272_v0, 1  ;;  %v6555_v58 = vrot.slane %v16772_v3, 2 }
 0x525   :  { %9637 = vmatprep.mubr.msk.bf16.mxu0 %vm6850_vm8, %v17266_v9  ;;  %v17276_v1 = vpop.f32.mrf.mxu0 }
 0x526   :  { %19177 = vst [vmem:[#allocation16_spill] sm:$0xff] %v17276_v1  ;;  %v6031_v38 = vpop.permute.xlu1 %6030 }
 0x527   :  { %v17278_v37 = vmul.f32 %v6031_v38, %v5412_v44  ;;  %v7330_v6 = vpop.f32.mrf.mxu0  ;;  %v19181_v44 = vld [vmem:[#allocation85_spill] sm:$0xff] }
 0x528   :  { %v4965_v38 = vadd.f32 %v4841_v15, %v19181_v44  ;;  %v19182_v6 = vld [vmem:[#allocation24_spill] sm:$0xff]  ;;  %v6558_v15 = vsel %vm6433_vm4, %v6555_v58, %v6557_v62 }
 0x529   :  { %v6429_v28 = vrot.slane %v17278_v37, 1  ;;  %v17283_v31 = vpop.f32.mrf.mxu0  ;;  %v4967_v61 = vadd.f32 %v4849_v48, %v19182_v6 }
 0x52a   :  { %19178 = vst [vmem:[#allocation31_spill] sm:$0xff] %v17283_v31  ;;  %v5080_v16 = vadd.f32 %v16871_v2, %v4965_v38 }
 0x52b   :  { %v6430_v59 = vsel %vm6272_vm6, %v6428_v50, %v6429_v28  ;;  %v6432_v29 = vsel %vm6272_vm6, %v6429_v28, %v6431_v51  ;;  %v7333_v13 = vpop.f32.mrf.mxu0  ;;  %v6554_v50 = vrot.slane %v16763_v23, 2  ;;  %v4966_v51 = vadd.f32 %v4844_v20, %v19183_v33 }
 0x52c   :  { %v10505_v4 = vpack.i.bf16 %v6432_v29, %v6430_v59  ;;  %v5472_v13 = vld [vmem:[%s18303_s7 + $0x1a0] sm:$0xff]  ;;  %vm5188_vm7 = vcmp.ge.f32.partialorder %v5080_v16, 0.0 }
 0x52d   :  { %v17287_v19 = vpop.f32.mrf.mxu0  ;;  %v5081_v44 = vadd.f32 %v16871_v2, %v4966_v51 }
 0x52e   :  { %19179 = vst [vmem:[#allocation119_spill] sm:$0xff] %v17287_v19  ;;  %10506 = vrot.lane.b32.xlu1 %v10505_v4, %s10674_s20  ;;  %v5082_v4 = vadd.f32 %v16871_v2, %v4967_v61  ;;  %v6041_v61 = vpop.permute.xlu0 %6040 }
 0x52f   :  { %v7338_v49 = vpop.f32.mrf.mxu0  ;;  %vm5189_vm10 = vcmp.ge.f32.partialorder %v5081_v44, 0.0 }
 0x530   :  { %vm5190_vm9 = vcmp.ge.f32.partialorder %v5082_v4, 0.0 }
 0x531   :  { %v17297_v42 = vpop.f32.mrf.mxu0 }
 0x532   :  { %19180 = vst [vmem:[#allocation32_spill] sm:$0xff] %v17297_v42  ;;  %5800 = vperm.xlu1 %10349, %v5474_v57   ;;  %v6556_v57 = vsel %vm6433_vm4, %v6554_v50, %v6555_v58  ;;  %v5306_v58 = vmul.f32 %v15073_v5, %v5080_v16  ;;  %v6051_v33 = vpop.permute.xlu0 %6050 }
 0x533   :  { %v7341_v8 = vpop.f32.mrf.mxu0  ;;  %v10462_v46 = vpop.permute.xlu1 %10461  ;;  %v17333_v38 = vpack.c.bf16 %v6558_v15, %v6556_v57  ;;  %v17354_v15 = vld [vmem:[%s18301_s4 + $0x110] sm:$0xff]  }
 0x534   :  { %v10464_v28 = vunpack.i.h.bf16 %v10462_v46  ;;  %v10463_v59 = vunpack.i.l.bf16 %v10462_v46  ;;  %v5307_v8 = vmul.f32 %v15073_v5, %v5081_v44  ;;  %v5414_v62 = vsel %vm5188_vm7, %v5080_v16, %v5306_v58  ;;  %8082 = vmatpush2.bf16.msra.mxu0 %v17354_v15 }
 0x535   :  { %v17315_v29 = vpop.f32.mrf.mxu0  ;;  %v17345_v51 = vmul.f32 %v6041_v61, %v5414_v62  ;;  %v6562_v16 = vrot.slane %v16915_v30, 2  ;;  %8083 = vmatprep.subr.bf16.mxu0 %v19014_v47  ;;  %v6560_v58 = vrot.slane %v16899_v54, 2 }
 0x536   :  { %5810 = vperm.xlu1 %10349, %v5476_v60   ;;  %19184 = vst [vmem:[#allocation76_spill] sm:$0xff] %v17315_v29  ;;  %v6898_v48 = vsel %vm6850_vm8, %v19171_v35, %v10464_v28  ;;  %v6897_v49 = vsel %vm6850_vm8, %v19170_v21, %v10463_v59  ;;  %v5308_v35 = vmul.f32 %v15073_v5, %v5082_v4 }
 0x537   :  { %v7346_v20 = vpop.f32.mrf.mxu0  ;;  %v17330_v60 = vpack.c.bf16 %v6898_v48, %v6897_v49  ;;  %v5415_v59 = vsel %vm5189_vm10, %v5081_v44, %v5307_v8  ;;  %v17363_v49 = vld [vmem:[%s18301_s4 + $0x108] sm:$0xff]   ;;  %v6559_v44 = vrot.slane %v16892_v32, 2  ;;  %v7014_v61 = vrot.slane %v17345_v51, 1 }
 0x538   :  { %v5416_v46 = vsel %vm5190_vm9, %v5082_v4, %v5308_v35  ;;  %8084 = vmatpush2.bf16.msra.mxu0 %v17363_v49 }
 0x539   :  { %v17335_v6 = vpop.f32.mrf.mxu0  ;;  %7455 = vmatmul.mubr.bf16.gmra.mxu0 %v17330_v60  ;;  %v17347_v28 = vmul.f32 %v6051_v33, %v5416_v46  ;;  %v6563_v33 = vsel %vm6433_vm4, %v6560_v58, %v6562_v16  ;;  %8085 = vmatprep.subr.bf16.mxu0 %v19014_v47 }
 0x53a   :  { %5790 = vperm.xlu1 %10349, %v5472_v13   ;;  %19185 = vst [vmem:[#allocation72_spill] sm:$0xff] %v17335_v6  ;;  %9638 = vmatprep.mubr.msk.bf16.mxu0 %vm6850_vm8, %v17333_v38  ;;  %v19225_v6 = vld [vmem:[#allocation54_spill] sm:$0xff] }
 0x53b   :  { %v7349_v21 = vpop.f32.mrf.mxu0  ;;  %v7017_v30 = vrot.slane %v17347_v28, 1 }
 0x53d   :  { %v17343_v2 = vpop.f32.mrf.mxu0 }
 0x53e   :  { %19186 = vst [vmem:[#allocation33_spill] sm:$0xff] %v17343_v2 }
 0x53f   :  { %v7354_v50 = vpop.f32.mrf.mxu0 }
 0x540   :  { %v6046_v13 = vpop.permute.xlu1 %6045 }
 0x541   :  { %v17349_v57 = vpop.f32.mrf.mxu0  ;;  %v17356_v48 = vmul.f32 %v6046_v13, %v5415_v59 }
 0x542   :  { %19187 = vst [vmem:[#allocation30_spill] sm:$0xff] %v17349_v57 }
 0x543   :  { %v7357_v4 = vpop.f32.mrf.mxu0  ;;  %v7015_v20 = vrot.slane %v17356_v48, 1 }
 0x544   :  { %v10467_v21 = vpop.permute.xlu1 %10466 }
 0x545   :  { %v10472_v35 = vpop.permute.xlu0 %10471  ;;  %v10469_v46 = vunpack.i.h.bf16 %v10467_v21  ;;  %v10468_v50 = vunpack.i.l.bf16 %v10467_v21  ;;  %v7016_v59 = vsel %vm6272_vm6, %v7014_v61, %v7015_v20  ;;  %v7018_v13 = vsel %vm6272_vm6, %v7015_v20, %v7017_v30 }
 0x546   :  { %v10474_v8 = vunpack.i.h.bf16 %v10472_v35  ;;  %v10473_v62 = vunpack.i.l.bf16 %v10472_v35  ;;  %v10510_v30 = vpack.i.bf16 %v7018_v13, %v7016_v59  ;;  %v6567_v59 = vrot.slane %v16993_v52, 2  ;;  %v19192_v13 = vld [vmem:[#allocation108_spill] sm:$0xff] }
 0x547   :  { %v6900_v35 = vsel %vm6850_vm8, %v16772_v3, %v10469_v46  ;;  %v6899_v16 = vsel %vm6850_vm8, %v16763_v23, %v10468_v50  ;;  %v10646_v46 = vld [vmem:[%s18301_s4 + $0xf0] sm:$0xff]   ;;  %v10647_v52 = vld [vmem:[%s18301_s4 + $0xe8] sm:$0xff]  }
 0x548   :  { %v6852_v57 = vsel %vm6850_vm8, %v16831_v22, %v10474_v8  ;;  %v6851_v2 = vsel %vm6850_vm8, %v16780_v17, %v10473_v62  ;;  %v17386_v20 = vpack.c.bf16 %v6900_v35, %v6899_v16  ;;  %v17391_v22 = vld [vmem:[%s18301_s4 + $0x100] sm:$0xff]   ;;  %v6561_v17 = vsel %vm6433_vm4, %v6559_v44, %v6560_v58  ;;  %10511 = vrot.lane.b32.xlu0 %v10510_v30, %s10674_s20  ;;  %v10645_v58 = vld [vmem:[%s18301_s4 + $0xf8] sm:$0xff]   ;;  %v5473_v16 = vld [vmem:[%s18303_s7 + $0x1a8] sm:$0xff] }
 0x549   :  { %v17374_v4 = vpop.f32.mrf.mxu0  ;;  %v6915_v61 = vpack.c.bf16 %v6852_v57, %v6851_v2  ;;  %v17395_v3 = vpack.c.bf16 %v6563_v33, %v6561_v17  ;;  %v19190_v2 = vld [vmem:[#allocation28_spill] sm:$0xff]  ;;  %v5475_v57 = vld [vmem:[%s18303_s7 + $0x1b8] sm:$0xff]  ;;  %8086 = vmatpush2.bf16.msra.mxu0 %v17391_v22  ;;  %v6565_v62 = vrot.slane %v16995_v12, 2  ;;  %v6564_v33 = vrot.slane %v16989_v39, 2 }
 0x54a   :  { %19188 = vst [vmem:[#allocation79_spill] sm:$0xff] %v17374_v4  ;;  %7463 = vmatmul.mubr.bf16.gmra.mxu0 %v17386_v20  ;;  %v5471_v8 = vld [vmem:[%s18303_s7 + $0x198] sm:$0xff] }
 0x54b   :  { %v7362_v21 = vpop.f32.mrf.mxu0  ;;  %7646 = vmatmul.mubr.bf16.vlgmr.msra.gmra.mxu1 %v6915_v61  ;;  %9639 = vmatprep.mubr.msk.bf16.mxu0 %vm6850_vm8, %v17395_v3  ;;  %v19191_v50 = vld [vmem:[#allocation45_spill] sm:$0xff]  ;;  %v6568_v17 = vsel %vm6433_vm4, %v6565_v62, %v6567_v59 }
 0x54c   :  { %9660 = vmatprep.mubr.msk.bf16.mxu1 %vm6850_vm8, %v19190_v2  ;;  %10331 = vmatpush1.bf16.msra.mxu1 %v10645_v58  ;;  %v6566_v21 = vsel %vm6433_vm4, %v6564_v33, %v6565_v62  ;;  %v19195_v62 = vld [vmem:[#allocation117_spill] sm:$0xff]  ;;  %v6569_v33 = vrot.slane %v17032_v36, 2 }
 0x54d   :  { %v17397_v23 = vpop.f32.mrf.mxu0  ;;  %5805 = vperm.xlu0 %10348, %v5475_v57   ;;  %10320 = vmatprep.subr.bf16.mxu1 %v19014_v47  ;;  %v17440_v58 = vpack.c.bf16 %v6568_v17, %v6566_v21  ;;  %v19200_v21 = vld [vmem:[#allocation48_spill] sm:$0xff]  ;;  %v19220_v4 = vld [vmem:[#allocation65_spill] sm:$0xff] }
 0x54e   :  { %19189 = vst [vmem:[#allocation34_spill] sm:$0xff] %v17397_v23 }
 0x54f   :  { %v7365_v44 = vpop.f32.mrf.mxu0  ;;  %19194 = vst [vmem:[#allocation35_spill] sm:$0xff] %v17440_v58 }
 0x550   :  { %10332 = vmatpush1.bf16.msra.mxu1 %v10646_v46  ;;  %v19198_v46 = vld [vmem:[#allocation44_spill] sm:$0xff] }
 0x551   :  { %5785 = vperm.xlu0 %10348, %v5471_v8   ;;  %10321 = vmatprep.subr.bf16.mxu1 %v19014_v47  ;;  %v10648_v8 = vld [vmem:[%s18301_s4 + $0xe0] sm:$0xff]  }
 0x553   :  { %7654 = vmatmul.mubr.bf16.gmra.mxu1 %v19191_v50  ;;  %v6570_v50 = vrot.slane %v17048_v25, 2 }
 0x554   :  { %9661 = vmatprep.mubr.msk.bf16.mxu1 %vm6850_vm8, %v19192_v13  ;;  %v10477_v35 = vpop.permute.xlu1 %10476  ;;  %10333 = vmatpush1.bf16.msra.mxu1 %v10647_v52  ;;  %v19201_v52 = vld [vmem:[#allocation113_spill] sm:$0xff] }
 0x555   :  { %v10479_v61 = vunpack.i.h.bf16 %v10477_v35  ;;  %v10478_v30 = vunpack.i.l.bf16 %v10477_v35  ;;  %5795 = vperm.xlu0 %10348, %v5473_v16   ;;  %10322 = vmatprep.subr.bf16.mxu1 %v19014_v47 }
 0x557   :  { %v6902_v2 = vsel %vm6850_vm8, %v16899_v54, %v10479_v61  ;;  %v6901_v57 = vsel %vm6850_vm8, %v16892_v32, %v10478_v30  ;;  %v19196_v32 = vld [vmem:[#allocation114_spill] sm:$0xff]  ;;  %v6571_v61 = vsel %vm6433_vm4, %v6569_v33, %v6570_v50  ;;  %v19206_v33 = vld [vmem:[#allocation89_spill] sm:$0xff] }
 0x558   :  { %v17438_v44 = vpack.c.bf16 %v6902_v2, %v6901_v57  ;;  %10334 = vmatpush1.bf16.msra.mxu1 %v10648_v8  ;;  %v19197_v54 = vld [vmem:[#allocation46_spill] sm:$0xff]  ;;  %v19204_v8 = vld [vmem:[#allocation67_spill] sm:$0xff] }
 0x559   :  { %10323 = vmatprep.subr.bf16.mxu1 %v19014_v47 }
 0x55a   :  { %19193 = vst [vmem:[#allocation96_spill] sm:$0xff] %v17438_v44  ;;  %7471 = vmatmul.mubr.bf16.gmra.mxu0 %v17438_v44 }
 0x55b   :  { %7662 = vmatmul.mubr.bf16.gmra.mxu1 %v19195_v62  ;;  %9640 = vmatprep.mubr.msk.bf16.mxu0 %vm6850_vm8, %v17440_v58 }
 0x55c   :  { %9662 = vmatprep.mubr.msk.bf16.mxu1 %vm6850_vm8, %v19196_v32  ;;  %10335 = vmatpush1.bf16.msra.mxu1 %v16927_v41  ;;  %v19199_v41 = vld [vmem:[#allocation40_spill] sm:$0xff] }
 0x55d   :  { %10324 = vmatprep.subr.bf16.mxu1 %v19014_v47  ;;  %v6572_v59 = vrot.slane %v19199_v41, 2  ;;  %v6577_v41 = vrot.slane %v19206_v33, 2 }
 0x55f   :  { %v6573_v30 = vsel %vm6433_vm4, %v6570_v50, %v6572_v59  ;;  %v6575_v50 = vrot.slane %v19204_v8, 2 }
 0x560   :  { %10336 = vmatpush1.bf16.msra.mxu1 %v17039_v18  ;;  %v17477_v57 = vpack.c.bf16 %v6573_v30, %v6571_v61 }
 0x561   :  { %10325 = vmatprep.subr.bf16.mxu1 %v19014_v47  ;;  %v6578_v30 = vsel %vm6433_vm4, %v6575_v50, %v6577_v41  ;;  %v19215_v41 = vld [vmem:[#allocation56_spill] sm:$0xff] }
 0x562   :  { %19203 = vst [vmem:[#allocation23_spill] sm:$0xff] %v17477_v57 }
 0x563   :  { %7670 = vmatmul.mubr.bf16.gmra.mxu1 %v19197_v54 }
 0x564   :  { %9663 = vmatprep.mubr.msk.bf16.mxu1 %vm6850_vm8, %v19198_v46  ;;  %10337 = vmatpush1.bf16.msra.mxu1 %v17132_v40 }
 0x565   :  { %10326 = vmatprep.subr.bf16.mxu1 %v19014_v47 }
 0x567   :  { %v10482_v35 = vpop.permute.xlu0 %10481 }
 0x568   :  { %v10484_v16 = vunpack.i.h.bf16 %v10482_v35  ;;  %v10483_v18 = vunpack.i.l.bf16 %v10482_v35  ;;  %10338 = vmatpush1.bf16.msra.mxu1 %v17251_v34 }
 0x569   :  { %10327 = vmatprep.subr.bf16.mxu1 %v19014_v47 }
 0x56a   :  { %v6904_v40 = vsel %vm6850_vm8, %v16995_v12, %v10484_v16  ;;  %v6903_v17 = vsel %vm6850_vm8, %v16989_v39, %v10483_v18  ;;  %v19205_v39 = vld [vmem:[#allocation12_spill] sm:$0xff] }
 0x56b   :  { %7678 = vmatmul.mubr.bf16.gmra.mxu1 %v19200_v21  ;;  %v17475_v2 = vpack.c.bf16 %v6904_v40, %v6903_v17  ;;  %v6574_v34 = vrot.slane %v19205_v39, 2  ;;  %v19208_v40 = vld [vmem:[#allocation52_spill] sm:$0xff] }
 0x56c   :  { %9664 = vmatprep.mubr.msk.bf16.mxu1 %vm6850_vm8, %v19201_v52  ;;  %10339 = vmatpush2.bf16.msra.mxu1 %v17312_v11 }
 0x56d   :  { %19202 = vst [vmem:[#allocation101_spill] sm:$0xff] %v17475_v2  ;;  %7479 = vmatmul.mubr.bf16.gmra.mxu0 %v17475_v2  ;;  %10328 = vmatprep.subr.bf16.mxu1 %v19014_v47  ;;  %v6576_v61 = vsel %vm6433_vm4, %v6574_v34, %v6575_v50  ;;  %v19214_v34 = vld [vmem:[#allocation7_spill] sm:$0xff] }
 0x56e   :  { %9641 = vmatprep.mubr.msk.bf16.mxu0 %vm6850_vm8, %v17477_v57 }
 0x570   :  { %v10487_v12 = vpop.permute.xlu1 %10486  ;;  %10340 = vmatpush2.bf16.msra.mxu1 %v17354_v15  ;;  %v19213_v15 = vld [vmem:[#allocation69_spill] sm:$0xff] }
 0x571   :  { %v10489_v59 = vunpack.i.h.bf16 %v10487_v12  ;;  %v10488_v35 = vunpack.i.l.bf16 %v10487_v12  ;;  %10329 = vmatprep.subr.bf16.mxu1 %v19014_v47  ;;  %v19210_v12 = vld [vmem:[#allocation118_spill] sm:$0xff]  ;;  %v6580_v50 = vrot.slane %v19213_v15, 2 }
 0x572   :  { %v17487_v16 = vpop.f32.mrf.mxu0 }
 0x573   :  { %19207 = vst [vmem:[#allocation42_spill] sm:$0xff] %v17487_v16  ;;  %v6906_v18 = vsel %vm6850_vm8, %v17048_v25, %v10489_v59  ;;  %v6905_v11 = vsel %vm6850_vm8, %v17032_v36, %v10488_v35  ;;  %7686 = vmatmul.mubr.bf16.gmra.mxu1 %v19208_v40  ;;  %v17502_v25 = vpack.c.bf16 %v6578_v30, %v6576_v61  ;;  %v19216_v35 = vld [vmem:[#allocation73_spill] sm:$0xff] }
 0x574   :  { %v17497_v17 = vpack.c.bf16 %v6906_v18, %v6905_v11  ;;  %9665 = vmatprep.mubr.msk.bf16.mxu1 %vm6850_vm8, %v19210_v12  ;;  %v7370_v33 = vpop.f32.mrf.mxu0  ;;  %10341 = vmatpush2.bf16.msra.mxu1 %v17363_v49  ;;  %v6579_v18 = vrot.slane %v19216_v35, 2  ;;  %v19217_v11 = vld [vmem:[#allocation70_spill] sm:$0xff] }
 0x575   :  { %19211 = vst [vmem:[#allocation107_spill] sm:$0xff] %v17502_v25  ;;  %10330 = vmatprep.subr.bf16.mxu1 %v19014_v47  ;;  %v6582_v61 = vrot.slane %v19217_v11, 2 }
 0x576   :  { %19209 = vst [vmem:[#allocation95_spill] sm:$0xff] %v17497_v17  ;;  %v17504_v59 = vpop.f32.mrf.mxu0  ;;  %7487 = vmatmul.mubr.bf16.gmra.mxu0 %v17497_v17 }
 0x577   :  { %19212 = vst [vmem:[#allocation8_spill] sm:$0xff] %v17504_v59  ;;  %9642 = vmatprep.mubr.msk.bf16.mxu0 %vm6850_vm8, %v17502_v25  ;;  %v6581_v59 = vsel %vm6433_vm4, %v6579_v18, %v6580_v50  ;;  %v6583_v47 = vsel %vm6433_vm4, %v6580_v50, %v6582_v61  ;;  %v6585_v50 = vrot.slane %v17224_v55, 2  ;;  %v6587_v18 = vrot.slane %v17215_v24, 2  ;;  %v19263_v25 = vld [vmem:[#allocation49_spill] sm:$0xff] }
 0x578   :  { %v7373_v36 = vpop.f32.mrf.mxu0  ;;  %10342 = vmatpush2.bf16.msra.mxu1 %v17391_v22  ;;  %v17526_v23 = vpack.c.bf16 %v6583_v47, %v6581_v59  ;;  %v6584_v59 = vrot.slane %v17208_v45, 2 }
 0x57a   :  { %19219 = vst [vmem:[#allocation36_spill] sm:$0xff] %v17526_v23 }
 0x57b   :  { %7694 = vmatmul.mubr.bf16.gmra.mxu1 %v19214_v34 }
 0x57c   :  { %9666 = vmatprep.mubr.msk.bf16.mxu1 %vm6850_vm8, %v19215_v41  ;;  %v10492_v49 = vpop.permute.xlu0 %10491 }
 0x57d   :  { %v10494_v30 = vunpack.i.h.bf16 %v10492_v49  ;;  %v10493_v33 = vunpack.i.l.bf16 %v10492_v49  ;;  %v19222_v49 = vld [vmem:[#allocation62_spill] sm:$0xff] }
 0x57f   :  { %v6908_v22 = vsel %vm6850_vm8, %v19204_v8, %v10494_v30  ;;  %v6907_v36 = vsel %vm6850_vm8, %v19205_v39, %v10493_v33 }
 0x580   :  { %v17524_v16 = vpack.c.bf16 %v6908_v22, %v6907_v36  ;;  %v6586_v22 = vsel %vm6433_vm4, %v6584_v59, %v6585_v50  ;;  %v6588_v36 = vsel %vm6433_vm4, %v6585_v50, %v6587_v18  ;;  %v6592_v18 = vrot.slane %v17272_v0, 2 }
 0x582   :  { %19218 = vst [vmem:[#allocation59_spill] sm:$0xff] %v17524_v16  ;;  %7495 = vmatmul.mubr.bf16.gmra.mxu0 %v17524_v16 }
 0x583   :  { %7702 = vmatmul.mubr.bf16.gmra.mxu1 %v19220_v4  ;;  %9643 = vmatprep.mubr.msk.bf16.mxu0 %vm6850_vm8, %v17526_v23 }
 0x584   :  { %v17529_v11 = vpop.f32.mrf.mxu0  ;;  %9667 = vmatprep.mubr.msk.bf16.mxu1 %vm6850_vm8, %v19222_v49 }
 0x585   :  { %19221 = vst [vmem:[#allocation98_spill] sm:$0xff] %v17529_v11  ;;  %v19224_v11 = vld [vmem:[#allocation58_spill] sm:$0xff] }
 0x586   :  { %v7378_v8 = vpop.f32.mrf.mxu0 }
 0x588   :  { %v17537_v39 = vpop.f32.mrf.mxu0  ;;  %v10497_v61 = vpop.permute.xlu1 %10496 }
 0x589   :  { %19223 = vst [vmem:[#allocation71_spill] sm:$0xff] %v17537_v39  ;;  %v10499_v33 = vunpack.i.h.bf16 %v10497_v61  ;;  %v10498_v47 = vunpack.i.l.bf16 %v10497_v61  ;;  %v17554_v61 = vpack.c.bf16 %v6588_v36, %v6586_v22 }
 0x58a   :  { %v7381_v30 = vpop.f32.mrf.mxu0 }
 0x58b   :  { %7710 = vmatmul.mubr.bf16.gmra.mxu1 %v19224_v11  ;;  %v6910_v8 = vsel %vm6850_vm8, %v19213_v15, %v10499_v33  ;;  %v6909_v39 = vsel %vm6850_vm8, %v19216_v35, %v10498_v47  ;;  %19228 = vst [vmem:[#allocation112_spill] sm:$0xff] %v17554_v61  ;;  %v6590_v15 = vrot.slane %v17278_v37, 2  ;;  %v6589_v35 = vrot.slane %v17270_v53, 2 }
 0x58c   :  { %9668 = vmatprep.mubr.msk.bf16.mxu1 %vm6850_vm8, %v19225_v6  ;;  %v17550_v24 = vpop.f32.mrf.mxu0  ;;  %v17552_v30 = vpack.c.bf16 %v6910_v8, %v6909_v39  ;;  %v19230_v39 = vld [vmem:[#allocation110_spill] sm:$0xff] }
 0x58d   :  { %19226 = vst [vmem:[#allocation75_spill] sm:$0xff] %v17550_v24  ;;  %v19231_v8 = vld [vmem:[#allocation90_spill] sm:$0xff]  ;;  %v6591_v24 = vsel %vm6433_vm4, %v6589_v35, %v6590_v15  ;;  %v6593_v29 = vsel %vm6433_vm4, %v6590_v15, %v6592_v18  ;;  %v19236_v15 = vld [vmem:[#allocation9_spill] sm:$0xff]  ;;  %v19237_v18 = vld [vmem:[#allocation68_spill] sm:$0xff] }
 0x58e   :  { %19227 = vst [vmem:[#allocation39_spill] sm:$0xff] %v17552_v30  ;;  %v7386_v59 = vpop.f32.mrf.mxu0  ;;  %7503 = vmatmul.mubr.bf16.gmra.mxu0 %v17552_v30  ;;  %v17577_v19 = vpack.c.bf16 %v6593_v29, %v6591_v24  ;;  %v7024_v29 = vrot.slane %v17345_v51, 2  ;;  %v7027_v24 = vrot.slane %v17347_v28, 2  ;;  %v19241_v28 = vld [vmem:[#allocation11_spill] sm:$0xff] }
 0x58f   :  { %9644 = vmatprep.mubr.msk.bf16.mxu0 %vm6850_vm8, %v17554_v61  ;;  %v19258_v30 = vld [vmem:[#allocation55_spill] sm:$0xff] }
 0x590   :  { %v17560_v50 = vpop.f32.mrf.mxu0  ;;  %19234 = vst [vmem:[#allocation20_spill] sm:$0xff] %v17577_v19 }
 0x591   :  { %19229 = vst [vmem:[#allocation38_spill] sm:$0xff] %v17560_v50 }
 0x592   :  { %v7389_v33 = vpop.f32.mrf.mxu0 }
 0x593   :  { %7718 = vmatmul.mubr.bf16.gmra.mxu1 %v19230_v39 }
 0x594   :  { %v10502_v47 = vpop.permute.xlu0 %10501  ;;  %9669 = vmatprep.mubr.msk.bf16.mxu1 %vm6850_vm8, %v19231_v8  ;;  %v17567_v59 = vpop.f32.mrf.mxu0 }
 0x595   :  { %v10504_v22 = vunpack.i.h.bf16 %v10502_v47  ;;  %v10503_v36 = vunpack.i.l.bf16 %v10502_v47  ;;  %19232 = vst [vmem:[#allocation93_spill] sm:$0xff] %v17567_v59 }
 0x596   :  { %v7394_v33 = vpop.f32.mrf.mxu0 }
 0x597   :  { %v6912_v50 = vsel %vm6850_vm8, %v17224_v55, %v10504_v22  ;;  %v6911_v0 = vsel %vm6850_vm8, %v17208_v45, %v10503_v36  ;;  %v7025_v55 = vrot.slane %v17356_v48, 2 }
 0x598   :  { %v17575_v42 = vpack.c.bf16 %v6912_v50, %v6911_v0  ;;  %v17579_v47 = vpop.f32.mrf.mxu0 }
 0x599   :  { %19235 = vst [vmem:[#allocation78_spill] sm:$0xff] %v17579_v47  ;;  %v7028_v47 = vsel %vm6433_vm4, %v7025_v55, %v7027_v24 }
 0x59a   :  { %19233 = vst [vmem:[#allocation97_spill] sm:$0xff] %v17575_v42  ;;  %7511 = vmatmul.mubr.bf16.gmra.mxu0 %v17575_v42  ;;  %v7397_v35 = vpop.f32.mrf.mxu0 }
 0x59b   :  { %9645 = vmatprep.mubr.msk.bf16.mxu0 %vm6850_vm8, %v17577_v19  ;;  %7726 = vmatmul.mubr.bf16.gmra.mxu1 %v19236_v15  ;;  %v7026_v35 = vsel %vm6433_vm4, %v7024_v29, %v7025_v55 }
 0x59c   :  { %9670 = vmatprep.mubr.msk.bf16.mxu1 %vm6850_vm8, %v19237_v18  ;;  %v17588_v45 = vpop.f32.mrf.mxu0 }
 0x59d   :  { %19238 = vst [vmem:[#allocation22_spill] sm:$0xff] %v17588_v45 }
 0x59e   :  { %v7402_v50 = vpop.f32.mrf.mxu0 }
 0x59f   :  { %v17603_v50 = vpack.c.bf16 %v7028_v47, %v7026_v35  ;;  %v19248_v47 = vld [vmem:[#allocation77_spill] sm:$0xff] }
 0x5a0   :  { %v10507_v22 = vpop.permute.xlu1 %10506  ;;  %v17592_v33 = vpop.f32.mrf.mxu0  ;;  %v19252_v35 = vld [vmem:[#allocation41_spill] sm:$0xff] }
 0x5a1   :  { %v10509_v36 = vunpack.i.h.bf16 %v10507_v22  ;;  %v10508_v0 = vunpack.i.l.bf16 %v10507_v22  ;;  %19239 = vst [vmem:[#allocation111_spill] sm:$0xff] %v17592_v33  ;;  %19242 = vst [vmem:[#allocation26_spill] sm:$0xff] %v17603_v50  ;;  %v19243_v22 = vld [vmem:[#allocation74_spill] sm:$0xff] }
 0x5a2   :  { %v7405_v31 = vpop.f32.mrf.mxu0 }
 0x5a3   :  { %v6914_v59 = vsel %vm6850_vm8, %v17278_v37, %v10509_v36  ;;  %v6913_v45 = vsel %vm6850_vm8, %v17270_v53, %v10508_v0  ;;  %7734 = vmatmul.mubr.bf16.gmra.mxu1 %v19241_v28  ;;  %v19246_v53 = vld [vmem:[#allocation37_spill] sm:$0xff] }
 0x5a4   :  { %v17600_v19 = vpack.c.bf16 %v6914_v59, %v6913_v45  ;;  %9671 = vmatprep.mubr.msk.bf16.mxu1 %vm6850_vm8, %v19243_v22  ;;  %v19247_v59 = vld [vmem:[#allocation47_spill] sm:$0xff]  ;;  %v19249_v45 = vld [vmem:[#allocation57_spill] sm:$0xff] }
 0x5a5   :  { %v17608_v29 = vpop.f32.mrf.mxu0 }
 0x5a6   :  { %19240 = vst [vmem:[#allocation21_spill] sm:$0xff] %v17600_v19  ;;  %7519 = vmatmul.mubr.bf16.gmra.mxu0 %v17600_v19  ;;  %19244 = vst [vmem:[#allocation94_spill] sm:$0xff] %v17608_v29  ;;  %v19254_v19 = vld [vmem:[#allocation50_spill] sm:$0xff] }
 0x5a7   :  { %9646 = vmatprep.mubr.msk.bf16.mxu0 %vm6850_vm8, %v17603_v50  ;;  %v7410_v37 = vpop.f32.mrf.mxu0  ;;  %v17630_v50 = vld [vmem:[%s18299_s2] ss:$0 sm:$0xff] }
 0x5a8   :  { %v5033_v27 = vadd.f32 %v17630_v50, %v19258_v30 }
 0x5a9   :  { %v17612_v55 = vpop.f32.mrf.mxu0 }
 0x5aa   :  { %19245 = vst [vmem:[#allocation61_spill] sm:$0xff] %v17612_v55  ;;  %v19253_v55 = vld [vmem:[#allocation105_spill] sm:$0xff]  ;;  %vm5141_vm13 = vcmp.ge.f32.partialorder %v5033_v27, 0.0 }
 0x5ab   :  { %7742 = vmatmul.mubr.bf16.gmra.mxu1 %v19246_v53  ;;  %v7413_v31 = vpop.f32.mrf.mxu0 }
 0x5ac   :  { %9672 = vmatprep.mubr.msk.bf16.mxu1 %vm6850_vm8, %v19247_v59 }
 0x5b3   :  { %7750 = vmatmul.mubr.bf16.gmra.mxu1 %v19248_v47 }
 0x5b4   :  { %9673 = vmatprep.mubr.msk.bf16.mxu1 %vm6850_vm8, %v19249_v45 }
 0x5b5   :  { %v17620_v24 = vpop.f32.mrf.mxu0 }
 0x5b6   :  { %19250 = vst [vmem:[#allocation82_spill] sm:$0xff] %v17620_v24  ;;  %v5032_v24 = vadd.f32 %v17630_v50, %v19254_v19 }
 0x5b7   :  { %v7418_v36 = vpop.f32.mrf.mxu0 }
 0x5b8   :  { %v5258_v19 = vmul.f32 %v15073_v5, %v5032_v24  ;;  %vm5140_vm11 = vcmp.ge.f32.partialorder %v5032_v24, 0.0 }
 0x5b9   :  { %v17622_v0 = vpop.f32.mrf.mxu0 }
 0x5ba   :  { %19251 = vst [vmem:[#allocation27_spill] sm:$0xff] %v17622_v0  ;;  %v10512_v31 = vpop.permute.xlu0 %10511  ;;  %v19256_v0 = vld [vmem:[#allocation53_spill] sm:$0xff] }
 0x5bb   :  { %7758 = vmatmul.mubr.bf16.gmra.mxu1 %v19252_v35  ;;  %v7421_v37 = vpop.f32.mrf.mxu0  ;;  %v10514_v29 = vunpack.i.h.bf16 %v10512_v31  ;;  %v10513_v33 = vunpack.i.l.bf16 %v10512_v31  ;;  %v5034_v42 = vadd.f32 %v17630_v50, %v19256_v0 }
 0x5bc   :  { %9674 = vmatprep.mubr.msk.bf16.mxu1 %vm6850_vm8, %v19253_v55  ;;  %v5801_v37 = vpop.permute.xlu1 %5800 }
 0x5bd   :  { %v7048_v1 = vsel %vm6850_vm8, %v17356_v48, %v10514_v29  ;;  %v7047_v31 = vsel %vm6850_vm8, %v17345_v51, %v10513_v33  ;;  %v5260_v48 = vmul.f32 %v15073_v5, %v5034_v42  ;;  %vm5142_vm12 = vcmp.ge.f32.partialorder %v5034_v42, 0.0  ;;  %v19261_v51 = vld [vmem:[#allocation116_spill] sm:$0xff] }
 0x5be   :  { %v17642_v56 = vpack.c.bf16 %v7048_v1, %v7047_v31  ;;  %v5259_v33 = vmul.f32 %v15073_v5, %v5033_v27  ;;  %v5366_v29 = vsel %vm5140_vm11, %v5032_v24, %v5258_v19  ;;  %v19262_v31 = vld [vmem:[#allocation51_spill] sm:$0xff] }
 0x5bf   :  { %v5368_v23 = vsel %vm5142_vm12, %v5034_v42, %v5260_v48 }
 0x5c0   :  { %v17634_v36 = vpop.f32.mrf.mxu0  ;;  %19257 = vst [vmem:[#allocation99_spill] sm:$0xff] %v17642_v56  ;;  %7527 = vmatmul.mubr.bf16.gmra.mxu0 %v17642_v56  ;;  %v5811_v30 = vpop.permute.xlu1 %5810  ;;  %v5030_v56 = vadd.f32 %v17630_v50, %v19262_v31  ;;  %v5367_v17 = vsel %vm5141_vm13, %v5033_v27, %v5259_v33 }
 0x5c1   :  { %19255 = vst [vmem:[#allocation25_spill] sm:$0xff] %v17634_v36  ;;  %v19259_v36 = vld [vmem:[#allocation13_spill] sm:$0xff]  ;;  %9727 = vmatprep.mubr.msk.bf16.mxu0 %vm6850_vm8, %v19192_v13  ;;  %v6124_v16 = vmul.f32 %v5811_v30, %v5368_v23  ;;  %v5031_v13 = vadd.f32 %v17630_v50, %v19263_v25 }
 0x5c2   :  { %v7426_v61 = vpop.f32.mrf.mxu0  ;;  %vm5138_vm15 = vcmp.ge.f32.partialorder %v5030_v56, 0.0  ;;  %v5256_v42 = vmul.f32 %v15073_v5, %v5030_v56 }
 0x5c3   :  { %7766 = vmatmul.mubr.bf16.gmra.mxu1 %v19259_v36  ;;  %v5029_v61 = vadd.f32 %v17630_v50, %v19261_v51  ;;  %v6356_v23 = vrot.slane %v6124_v16, 1  ;;  %vm5139_vm0 = vcmp.ge.f32.partialorder %v5031_v13, 0.0 }
 0x5c4   :  { %v17649_v0 = vpop.f32.mrf.mxu0  ;;  %v5791_v48 = vpop.permute.xlu1 %5790  ;;  %v5364_v58 = vsel %vm5138_vm15, %v5030_v56, %v5256_v42  ;;  %v5525_v56 = vld [vmem:[%s18303_s7 + $0x348] sm:$0xff] }
 0x5c5   :  { %19260 = vst [vmem:[#allocation115_spill] sm:$0xff] %v17649_v0  ;;  %v17659_v0 = vmul.f32 %v5801_v37, %v5366_v29  ;;  %v5255_v57 = vmul.f32 %v15073_v5, %v5029_v61  ;;  %vm5137_vm14 = vcmp.ge.f32.partialorder %v5029_v61, 0.0  ;;  %v5257_v29 = vmul.f32 %v15073_v5, %v5031_v13 }
 0x5c6   :  { %v7429_v1 = vpop.f32.mrf.mxu0 }
 0x5c7   :  { %v6353_v19 = vrot.slane %v17659_v0, 1  ;;  %v6514_v27 = vrot.slane %v17659_v0, 2  ;;  %v5363_v30 = vsel %vm5137_vm14, %v5029_v61, %v5255_v57  ;;  %v17686_v57 = vmul.f32 %v5791_v48, %v5364_v58 }
 0x5c8   :  { %v5806_v1 = vpop.permute.xlu0 %5805  ;;  %8088 = vmatmul.mubr.bf16.vlgmr.msra.gmra.mxu0 %v19195_v62  ;;  %v6517_v62 = vrot.slane %v6124_v16, 2 }
 0x5c9   :  { %v17664_v51 = vmul.f32 %v5806_v1, %v5367_v17  ;;  %9728 = vmatprep.mubr.msk.bf16.mxu0 %vm6850_vm8, %v19196_v32 }
 0x5cb   :  { %v6354_v25 = vrot.slane %v17664_v51, 1  ;;  %v6515_v17 = vrot.slane %v17664_v51, 2 }
 0x5cc   :  { %v17667_v24 = vpop.f32.mrf.mxu0  ;;  %v5786_v33 = vpop.permute.xlu0 %5785 }
 0x5cd   :  { %19264 = vst [vmem:[#allocation84_spill] sm:$0xff] %v17667_v24  ;;  %v17677_v31 = vmul.f32 %v5786_v33, %v5363_v30  ;;  %v6355_v1 = vsel %vm6272_vm6, %v6353_v19, %v6354_v25  ;;  %v6357_v32 = vsel %vm6272_vm6, %v6354_v25, %v6356_v23  ;;  %v6516_v24 = vsel %vm6433_vm4, %v6514_v27, %v6515_v17 }
 0x5ce   :  { %v7434_v37 = vpop.f32.mrf.mxu0  ;;  %v6518_v16 = vsel %vm6433_vm4, %v6515_v17, %v6517_v62  ;;  %v5365_v30 = vsel %vm5139_vm0, %v5031_v13, %v5257_v29  ;;  %v9760_v17 = vld [vmem:[#allocation3] ss:$0 sm:$0xff]  ;;  %v5526_v62 = vld [vmem:[%s18303_s7 + $0x350] sm:$0xff] }
 0x5cf   :  { %v10515_v37 = vpack.i.bf16 %v6357_v32, %v6355_v1  ;;  %v6948_v61 = vpack.c.bf16 %v6518_v16, %v6516_v24  ;;  %v7908_v19 = vrot.slane %v17677_v31, 1 }
 0x5d0   :  { %v17682_v2 = vpop.f32.mrf.mxu0  ;;  %v5796_v33 = vpop.permute.xlu0 %5795  ;;  %8096 = vmatmul.mubr.bf16.gmra.mxu0 %v19197_v54  ;;  %v5527_v54 = vld [vmem:[%s18303_s7 + $0x358] sm:$0xff] }
 0x5d1   :  { %10516 = vrot.lane.b32.xlu1 %v10515_v37, %s10674_s20  ;;  %v17690_v23 = vmul.f32 %v5796_v33, %v5365_v30  ;;  %9675 = vmatprep.mubr.msk.bf16.mxu1 %vm6850_vm8, %v6948_v61 }
 0x5d2   :  { %v7437_v44 = vpop.f32.mrf.mxu0  ;;  %9729 = vmatprep.mubr.msk.bf16.mxu0 %vm6850_vm8, %v19198_v46 }
 0x5d3   :  { %v7909_v44 = vrot.slane %v17686_v57, 1  ;;  %v7911_v58 = vrot.slane %v17690_v23, 1 }
 0x5d5   :  { %6055 = vperm.xlu1 %10349, %v5525_v56   ;;  %v7912_v24 = vsel %vm6272_vm6, %v7909_v44, %v7911_v58  ;;  %v7910_v42 = vsel %vm6272_vm6, %v7908_v19, %v7909_v44 }
 0x5d6   :  { %v10520_v27 = vpack.i.bf16 %v7912_v24, %v7910_v42 }
 0x5d8   :  { %v17701_v13 = vpop.f32.mrf.mxu0  ;;  %10521 = vrot.lane.b32.xlu0 %v10520_v27, %s10674_s20  ;;  %8104 = vmatmul.mubr.bf16.gmra.mxu0 %v19200_v21 }
 0x5d9   :  { %6065 = vperm.xlu1 %10349, %v5527_v54   ;;  %9730 = vmatprep.mubr.msk.bf16.mxu0 %vm6850_vm8, %v19201_v52 }
 0x5da   :  { %v7442_v25 = vpop.f32.mrf.mxu0 }
 0x5dc   :  { %v17709_v46 = vpop.f32.mrf.mxu0  ;;  %6060 = vperm.xlu0 %10348, %v5526_v62  }
 0x5dd   :  { %8550 = vperm.xlu1 %10349, %v9760_v17  }
 0x5de   :  { %v7445_v48 = vpop.f32.mrf.mxu0 }
 0x5e0   :  { %8112 = vmatmul.mubr.bf16.gmra.mxu0 %v19208_v40 }
 0x5e1   :  { %9731 = vmatprep.mubr.msk.bf16.mxu0 %vm6850_vm8, %v19210_v12 }
 0x5e4   :  { %v17717_v29 = vpop.f32.mrf.mxu0 }
 0x5e6   :  { %v7450_v1 = vpop.f32.mrf.mxu0 }
 0x5e8   :  { %v17722_v21 = vpop.f32.mrf.mxu0  ;;  %8120 = vmatmul.mubr.bf16.gmra.mxu0 %v19214_v34 }
 0x5e9   :  { %9732 = vmatprep.mubr.msk.bf16.mxu0 %vm6850_vm8, %v19215_v41 }
 0x5ea   :  { %v7453_v32 = vpop.f32.mrf.mxu0 }
 0x5f0   :  { %8128 = vmatmul.mubr.bf16.gmra.mxu0 %v19220_v4 }
 0x5f1   :  { %9733 = vmatprep.mubr.msk.bf16.mxu0 %vm6850_vm8, %v19222_v49 }
 0x5f8   :  { %8136 = vmatmul.mubr.bf16.gmra.mxu0 %v19224_v11 }
 0x5f9   :  { %v17730_v52 = vpop.f32.mrf.mxu0  ;;  %9734 = vmatprep.mubr.msk.bf16.mxu0 %vm6850_vm8, %v19225_v6 }
 0x5fb   :  { %v7458_v40 = vpop.f32.mrf.mxu0 }
 0x5fc   :  { %v7918_v40 = vrot.slane %v17677_v31, 2 }
 0x5fd   :  { %v17735_v12 = vpop.f32.mrf.mxu0 }
 0x5ff   :  { %v7461_v37 = vpop.f32.mrf.mxu0 }
 0x600   :  { %8144 = vmatmul.mubr.bf16.gmra.mxu0 %v19230_v39 }
 0x601   :  { %9735 = vmatprep.mubr.msk.bf16.mxu0 %vm6850_vm8, %v19231_v8 }
 0x608   :  { %8152 = vmatmul.mubr.bf16.gmra.mxu0 %v19236_v15 }
 0x609   :  { %9736 = vmatprep.mubr.msk.bf16.mxu0 %vm6850_vm8, %v19237_v18 }
 0x60a   :  { %v17745_v34 = vpop.f32.mrf.mxu0 }
 0x60b   :  { %v17741_v4 = vpop.f32.mrf.mxu1 }
 0x60c   :  { %v7466_v6 = vpop.f32.mrf.mxu0 }
 0x60d   :  { %v7649_v41 = vpop.f32.mrf.mxu1 }
 0x60e   :  { %v17749_v49 = vpop.f32.mrf.mxu0 }
 0x60f   :  { %v17747_v11 = vpop.f32.mrf.mxu1 }
 0x610   :  { %v7469_v39 = vpop.f32.mrf.mxu0  ;;  %8160 = vmatmul.mubr.bf16.gmra.mxu0 %v19241_v28 }
 0x611   :  { %v7652_v16 = vpop.f32.mrf.mxu1  ;;  %9737 = vmatprep.mubr.msk.bf16.mxu0 %vm6850_vm8, %v19243_v22 }
 0x613   :  { %v17752_v8 = vpop.f32.mrf.mxu1 }
 0x615   :  { %v7657_v15 = vpop.f32.mrf.mxu1 }
 0x617   :  { %v17756_v61 = vpop.f32.mrf.mxu1 }
 0x618   :  { %8168 = vmatmul.mubr.bf16.gmra.mxu0 %v19246_v53 }
 0x619   :  { %v7660_v18 = vpop.f32.mrf.mxu1  ;;  %9738 = vmatprep.mubr.msk.bf16.mxu0 %vm6850_vm8, %v19247_v59 }
 0x61a   :  { %v17758_v30 = vpop.f32.mrf.mxu0 }
 0x61b   :  { %v17761_v33 = vpop.f32.mrf.mxu1 }
 0x61c   :  { %v7474_v19 = vpop.f32.mrf.mxu0 }
 0x61d   :  { %v7665_v28 = vpop.f32.mrf.mxu1  ;;  %v19268_v19 = vld [vmem:[#allocation43_spill] sm:$0xff] }
 0x61e   :  { %v17765_v56 = vpop.f32.mrf.mxu0 }
 0x61f   :  { %v17767_v44 = vpop.f32.mrf.mxu1 }
 0x620   :  { %v7477_v22 = vpop.f32.mrf.mxu0  ;;  %8176 = vmatmul.mubr.bf16.gmra.mxu0 %v19248_v47 }
 0x621   :  { %v7668_v58 = vpop.f32.mrf.mxu1  ;;  %9739 = vmatprep.mubr.msk.bf16.mxu0 %vm6850_vm8, %v19249_v45  ;;  %v7921_v45 = vrot.slane %v17690_v23, 2 }
 0x623   :  { %v17770_v24 = vpop.f32.mrf.mxu1 }
 0x625   :  { %v7673_v53 = vpop.f32.mrf.mxu1 }
 0x627   :  { %v17774_v54 = vpop.f32.mrf.mxu1 }
 0x628   :  { %8184 = vmatmul.mubr.bf16.gmra.mxu0 %v19252_v35  ;;  %v19265_v35 = vld [vmem:[#allocation103_spill] sm:$0xff] }
 0x629   :  { %v7676_v42 = vpop.f32.mrf.mxu1  ;;  %9740 = vmatprep.mubr.msk.bf16.mxu0 %vm6850_vm8, %v19253_v55  ;;  %v7919_v55 = vrot.slane %v17686_v57, 2 }
 0x62b   :  { %v17777_v59 = vpop.f32.mrf.mxu1  ;;  %v7922_v6 = vsel %vm6433_vm4, %v7919_v55, %v7921_v45 }
 0x62d   :  { %v7681_v27 = vpop.f32.mrf.mxu1  ;;  %v17781_v25 = vpop.f32.mrf.mxu0 }
 0x62f   :  { %v17783_v47 = vpop.f32.mrf.mxu1  ;;  %v7482_v17 = vpop.f32.mrf.mxu0 }
 0x630   :  { %8192 = vmatmul.mubr.bf16.gmra.mxu0 %v19259_v36  ;;  %v7920_v36 = vsel %vm6433_vm4, %v7918_v40, %v7919_v55 }
 0x631   :  { %v7684_v62 = vpop.f32.mrf.mxu1  ;;  %v17785_v48 = vpop.f32.mrf.mxu0  ;;  %9741 = vmatprep.mubr.msk.bf16.mxu0 %vm6850_vm8, %v19265_v35  ;;  %v7949_v15 = vpack.c.bf16 %v7922_v6, %v7920_v36 }
 0x633   :  { %v17789_v1 = vpop.f32.mrf.mxu1  ;;  %v7485_v32 = vpop.f32.mrf.mxu0 }
 0x635   :  { %v7689_v37 = vpop.f32.mrf.mxu1 }
 0x636   :  { %v17795_v41 = vpop.f32.mrf.mxu0 }
 0x637   :  { %19266 = vst [vmem:[#allocation102_spill] sm:$0xff] %v17795_v41  ;;  %v17798_v16 = vpop.f32.mrf.mxu1 }
 0x638   :  { %v7490_v23 = vpop.f32.mrf.mxu0  ;;  %8200 = vmatmul.mubr.bf16.gmra.mxu0 %v19268_v19  ;;  %v19271_v19 = vld [vmem:[#allocation10_spill] sm:$0xff] }
 0x639   :  { %v7692_v39 = vpop.f32.mrf.mxu1  ;;  %9742 = vmatprep.mubr.msk.bf16.mxu0 %vm6850_vm8, %v7949_v15 }
 0x63a   :  { %v17801_v18 = vpop.f32.mrf.mxu0 }
 0x63b   :  { %19267 = vst [vmem:[#allocation88_spill] sm:$0xff] %v17801_v18  ;;  %v17804_v28 = vpop.f32.mrf.mxu1 }
 0x63c   :  { %v7493_v22 = vpop.f32.mrf.mxu0 }
 0x63d   :  { %v7697_v58 = vpop.f32.mrf.mxu1 }
 0x63f   :  { %v17807_v53 = vpop.f32.mrf.mxu1 }
 0x641   :  { %v7700_v42 = vpop.f32.mrf.mxu1 }
 0x642   :  { %v17811_v17 = vpop.f32.mrf.mxu0 }
 0x643   :  { %v17809_v27 = vpop.f32.mrf.mxu1  ;;  %19269 = vst [vmem:[#allocation85_spill] sm:$0xff] %v17811_v17  ;;  %v10517_v62 = vpop.permute.xlu1 %10516  ;;  %v19290_v17 = vld [vmem:[#allocation104_spill] sm:$0xff] }
 0x644   :  { %v10519_v45 = vunpack.i.h.bf16 %v10517_v62  ;;  %v10518_v35 = vunpack.i.l.bf16 %v10517_v62  ;;  %v7498_v55 = vpop.f32.mrf.mxu0  ;;  %v7656_v18 = vadd.f32 %v17752_v8, %v19290_v17 }
 0x645   :  { %v7705_v32 = vpop.f32.mrf.mxu1 }
 0x646   :  { %v6884_v40 = vsel %vm6850_vm8, %v17664_v51, %v10519_v45  ;;  %v6883_v37 = vsel %vm6850_vm8, %v17659_v0, %v10518_v35  ;;  %v17819_v23 = vpop.f32.mrf.mxu0  ;;  %v5083_v0 = vadd.f32 %v17630_v50, %v17210_v10  ;;  %v5085_v35 = vadd.f32 %v17630_v50, %v17244_v7 }
 0x647   :  { %v17817_v6 = vpop.f32.mrf.mxu1  ;;  %19270 = vst [vmem:[#allocation24_spill] sm:$0xff] %v17819_v23  ;;  %v6947_v39 = vpack.c.bf16 %v6884_v40, %v6883_v37  ;;  %v19277_v23 = vld [vmem:[#allocation64_spill] sm:$0xff] }
 0x648   :  { %v7501_v15 = vpop.f32.mrf.mxu0  ;;  %v5309_v7 = vmul.f32 %v15073_v5, %v5083_v0  ;;  %vm5191_vm1 = vcmp.ge.f32.partialorder %v5083_v0, 0.0  ;;  %vm5193_vm2 = vcmp.ge.f32.partialorder %v5085_v35, 0.0 }
 0x649   :  { %v7708_v36 = vpop.f32.mrf.mxu1  ;;  %7774 = vmatmul.mubr.bf16.gmra.mxu1 %v6947_v39 }
 0x64a   :  { %9676 = vmatprep.mubr.msk.bf16.mxu1 %vm6850_vm8, %v19271_v19  ;;  %v10522_v58 = vpop.permute.xlu0 %10521  ;;  %v5084_v36 = vadd.f32 %v17630_v50, %v17230_v43 }
 0x64b   :  { %v17823_v22 = vpop.f32.mrf.mxu1  ;;  %v10524_v42 = vunpack.i.h.bf16 %v10522_v58  ;;  %v10523_v62 = vunpack.i.l.bf16 %v10522_v58  ;;  %v19273_v58 = vld [vmem:[#allocation80_spill] sm:$0xff] }
 0x64c   :  { %vm5192_vm3 = vcmp.ge.f32.partialorder %v5084_v36, 0.0 }
 0x64d   :  { %v7713_v51 = vpop.f32.mrf.mxu1  ;;  %v7945_v32 = vsel %vm6850_vm8, %v17686_v57, %v10524_v42  ;;  %v7944_v55 = vsel %vm6850_vm8, %v17677_v31, %v10523_v62  ;;  %v19275_v57 = vld [vmem:[#allocation100_spill] sm:$0xff]  ;;  %v5311_v42 = vmul.f32 %v15073_v5, %v5085_v35 }
 0x64e   :  { %v17825_v45 = vpop.f32.mrf.mxu0  ;;  %v7948_v37 = vpack.c.bf16 %v7945_v32, %v7944_v55  ;;  %v5310_v51 = vmul.f32 %v15073_v5, %v5084_v36  ;;  %v5417_v32 = vsel %vm5191_vm1, %v5083_v0, %v5309_v7  ;;  %v19278_v0 = vld [vmem:[#allocation109_spill] sm:$0xff] }
 0x64f   :  { %19272 = vst [vmem:[#allocation81_spill] sm:$0xff] %v17825_v45  ;;  %v17835_v40 = vpop.f32.mrf.mxu1  ;;  %v5419_v55 = vsel %vm5193_vm2, %v5085_v35, %v5311_v42 }
 0x650   :  { %v7506_v39 = vpop.f32.mrf.mxu0  ;;  %v6056_v15 = vpop.permute.xlu1 %6055  ;;  %8208 = vmatmul.mubr.bf16.gmra.mxu0 %v7948_v37 }
 0x651   :  { %v7716_v19 = vpop.f32.mrf.mxu1  ;;  %7782 = vmatmul.mubr.bf16.gmra.mxu1 %v19273_v58  ;;  %9743 = vmatprep.mubr.msk.bf16.mxu0 %vm6850_vm8, %v19275_v57  ;;  %v17853_v39 = vmul.f32 %v6056_v15, %v5417_v32 }
 0x652   :  { %v17840_v10 = vpop.f32.mrf.mxu0  ;;  %9677 = vmatprep.mubr.msk.bf16.mxu1 %vm6850_vm8, %v19275_v57  ;;  %v5418_v57 = vsel %vm5192_vm3, %v5084_v36, %v5310_v51 }
 0x653   :  { %19274 = vst [vmem:[#allocation28_spill] sm:$0xff] %v17840_v10  ;;  %v17847_v31 = vpop.f32.mrf.mxu1  ;;  %v7913_v35 = vrot.slane %v17853_v39, 1 }
 0x654   :  { %v7509_v43 = vpop.f32.mrf.mxu0  ;;  %v6066_v50 = vpop.permute.xlu1 %6065 }
 0x655   :  { %v7721_v62 = vpop.f32.mrf.mxu1  ;;  %v17855_v19 = vmul.f32 %v6066_v50, %v5419_v55 }
 0x657   :  { %v17851_v37 = vpop.f32.mrf.mxu1  ;;  %v6061_v10 = vpop.permute.xlu0 %6060  ;;  %v7916_v15 = vrot.slane %v17855_v19, 1 }
 0x658   :  { %v17859_v45 = vmul.f32 %v6061_v10, %v5418_v57  ;;  %8216 = vmatmul.mubr.bf16.gmra.mxu0 %v19277_v23  ;;  %v19280_v57 = vld [vmem:[#allocation60_spill] sm:$0xff] }
 0x659   :  { %v7724_v43 = vpop.f32.mrf.mxu1  ;;  %7790 = vmatmul.mubr.bf16.gmra.mxu1 %v19277_v23  ;;  %9744 = vmatprep.mubr.msk.bf16.mxu0 %vm6850_vm8, %v19278_v0 }
 0x65a   :  { %v17857_v58 = vpop.f32.mrf.mxu0  ;;  %9678 = vmatprep.mubr.msk.bf16.mxu1 %vm6850_vm8, %v19278_v0  ;;  %v7914_v36 = vrot.slane %v17859_v45, 1  ;;  %v19281_v43 = vld [vmem:[#allocation15_spill] sm:$0xff] }
 0x65b   :  { %19276 = vst [vmem:[#allocation45_spill] sm:$0xff] %v17857_v58  ;;  %v17870_v10 = vpop.f32.mrf.mxu1 }
 0x65c   :  { %v7514_v5 = vpop.f32.mrf.mxu0  ;;  %v7915_v23 = vsel %vm6272_vm6, %v7913_v35, %v7914_v36  ;;  %v7917_v50 = vsel %vm6272_vm6, %v7914_v36, %v7916_v15 }
 0x65d   :  { %v7729_v42 = vpop.f32.mrf.mxu1  ;;  %v10525_v51 = vpack.i.bf16 %v7917_v50, %v7915_v23  ;;  %v19284_v50 = vld [vmem:[#allocation14_spill] sm:$0xff] }
 0x65e   :  { %v17872_v7 = vpop.f32.mrf.mxu0 }
 0x65f   :  { %19279 = vst [vmem:[#allocation108_spill] sm:$0xff] %v17872_v7  ;;  %v17876_v32 = vpop.f32.mrf.mxu1  ;;  %10526 = vrot.lane.b32.xlu0 %v10525_v51, %s10674_s20  ;;  %v19285_v51 = vld [vmem:[#allocation17_spill] sm:$0xff] }
 0x660   :  { %v7517_v62 = vpop.f32.mrf.mxu0  ;;  %8224 = vmatmul.mubr.bf16.gmra.mxu0 %v19280_v57 }
 0x661   :  { %v7732_v55 = vpop.f32.mrf.mxu1  ;;  %7798 = vmatmul.mubr.bf16.gmra.mxu1 %v19280_v57  ;;  %9745 = vmatprep.mubr.msk.bf16.mxu0 %vm6850_vm8, %v19281_v43 }
 0x662   :  { %9679 = vmatprep.mubr.msk.bf16.mxu1 %vm6850_vm8, %v19281_v43 }
 0x663   :  { %v17885_v5 = vpop.f32.mrf.mxu1 }
 0x665   :  { %v7737_v35 = vpop.f32.mrf.mxu1 }
 0x666   :  { %v17887_v0 = vpop.f32.mrf.mxu0 }
 0x667   :  { %19282 = vst [vmem:[#allocation117_spill] sm:$0xff] %v17887_v0  ;;  %v17889_v36 = vpop.f32.mrf.mxu1 }
 0x668   :  { %v7522_v15 = vpop.f32.mrf.mxu0  ;;  %8232 = vmatmul.mubr.bf16.gmra.mxu0 %v19284_v50 }
 0x669   :  { %v7740_v23 = vpop.f32.mrf.mxu1  ;;  %7806 = vmatmul.mubr.bf16.gmra.mxu1 %v19284_v50  ;;  %9746 = vmatprep.mubr.msk.bf16.mxu0 %vm6850_vm8, %v19285_v51 }
 0x66a   :  { %v17891_v42 = vpop.f32.mrf.mxu0  ;;  %9680 = vmatprep.mubr.msk.bf16.mxu1 %vm6850_vm8, %v19285_v51 }
 0x66b   :  { %19283 = vst [vmem:[#allocation114_spill] sm:$0xff] %v17891_v42  ;;  %v17899_v55 = vpop.f32.mrf.mxu1  ;;  %v19288_v42 = vld [vmem:[#allocation106_spill] sm:$0xff] }
 0x66c   :  { %v7525_v62 = vpop.f32.mrf.mxu0 }
 0x66d   :  { %v7745_v57 = vpop.f32.mrf.mxu1 }
 0x66f   :  { %v17901_v43 = vpop.f32.mrf.mxu1 }
 0x670   :  { %8240 = vmatmul.mubr.bf16.gmra.mxu0 %v17204_v14 }
 0x671   :  { %v7748_v35 = vpop.f32.mrf.mxu1  ;;  %7814 = vmatmul.mubr.bf16.gmra.mxu1 %v17204_v14  ;;  %9747 = vmatprep.mubr.msk.bf16.mxu0 %vm6850_vm8, %v17206_v26 }
 0x672   :  { %9681 = vmatprep.mubr.msk.bf16.mxu1 %vm6850_vm8, %v17206_v26 }
 0x673   :  { %v17909_v15 = vpop.f32.mrf.mxu1 }
 0x675   :  { %v7753_v23 = vpop.f32.mrf.mxu1 }
 0x677   :  { %v17911_v50 = vpop.f32.mrf.mxu1 }
 0x678   :  { %8248 = vmatmul.mubr.bf16.gmra.mxu0 %v17261_v63 }
 0x679   :  { %v7756_v62 = vpop.f32.mrf.mxu1  ;;  %7822 = vmatmul.mubr.bf16.gmra.mxu1 %v17261_v63  ;;  %9748 = vmatprep.mubr.msk.bf16.mxu0 %vm6850_vm8, %v17266_v9 }
 0x67a   :  { %9682 = vmatprep.mubr.msk.bf16.mxu1 %vm6850_vm8, %v17266_v9 }
 0x67b   :  { %v17919_v14 = vpop.f32.mrf.mxu1 }
 0x67d   :  { %v7761_v51 = vpop.f32.mrf.mxu1 }
 0x67f   :  { %v17921_v26 = vpop.f32.mrf.mxu1 }
 0x680   :  { %8256 = vmatmul.mubr.bf16.gmra.mxu0 %v17330_v60  ;;  %v17925_v35 = vpop.f32.mrf.mxu0 }
 0x681   :  { %v7764_v57 = vpop.f32.mrf.mxu1  ;;  %7830 = vmatmul.mubr.bf16.gmra.mxu1 %v17330_v60  ;;  %19286 = vst [vmem:[#allocation46_spill] sm:$0xff] %v17925_v35  ;;  %9749 = vmatprep.mubr.msk.bf16.mxu0 %vm6850_vm8, %v17333_v38  ;;  %v7648_v60 = vadd.f32 %v17741_v4, %v19288_v42  ;;  %v19289_v4 = vld [vmem:[#allocation83_spill] sm:$0xff] }
 0x682   :  { %9683 = vmatprep.mubr.msk.bf16.mxu1 %vm6850_vm8, %v17333_v38  ;;  %v7530_v9 = vpop.f32.mrf.mxu0 }
 0x683   :  { %v17931_v63 = vpop.f32.mrf.mxu1  ;;  %v17946_v9 = vld [vmem:[%s18302_s5] ss:$0 sm:$0xff] }
 0x684   :  { %v17933_v62 = vpop.f32.mrf.mxu0 }
 0x685   :  { %v7769_v23 = vpop.f32.mrf.mxu1  ;;  %19287 = vst [vmem:[#allocation44_spill] sm:$0xff] %v17933_v62 }
 0x686   :  { %v7533_v57 = vpop.f32.mrf.mxu0 }
 0x687   :  { %v17935_v51 = vpop.f32.mrf.mxu1 }
 0x688   :  { %8264 = vmatmul.mubr.bf16.gmra.mxu0 %v17386_v20  ;;  %v8089_v38 = vpop.f32.mrf.mxu0 }
 0x689   :  { %v7772_v0 = vpop.f32.mrf.mxu1  ;;  %7838 = vmatmul.mubr.bf16.gmra.mxu1 %v17386_v20  ;;  %9750 = vmatprep.mubr.msk.bf16.mxu0 %vm6850_vm8, %v17395_v3  ;;  %v8344_v23 = vadd.f32 %v8089_v38, %v7648_v60  ;;  %v17953_v20 = vpop.permute.xlu1 %8550  ;;  %v19291_v60 = vld [vmem:[#allocation96_spill] sm:$0xff] }
 0x68a   :  { %9684 = vmatprep.mubr.msk.bf16.mxu1 %vm6850_vm8, %v17395_v3  ;;  %v8091_v57 = vpop.f32.mrf.mxu0  ;;  %v7651_v0 = vadd.f32 %v17747_v11, %v19289_v4  ;;  %v19292_v11 = vld [vmem:[#allocation35_spill] sm:$0xff] }
 0x68b   :  { %v8415_v42 = vadd.f32 %v17946_v9, %v8344_v23 }
 0x68c   :  { %v8092_v62 = vpop.f32.mrf.mxu0 }
 0x68d   :  { %vm8479_vm6 = vcmp.ge.f32.partialorder %v8415_v42, 0.0  ;;  %v8553_v35 = vmul.f32 %v17953_v20, %v8415_v42  ;;  %v8345_v7 = vadd.f32 %v8092_v62, %v7651_v0 }
 0x68e   :  { %v8094_v58 = vpop.f32.mrf.mxu0 }
 0x68f   :  { %v8617_v41 = vsel %vm8479_vm6, %v8415_v42, %v8553_v35  ;;  %v8416_v3 = vadd.f32 %v17946_v9, %v8345_v7  ;;  %v19293_v35 = vld [vmem:[#allocation92_spill] sm:$0xff]  ;;  %v19294_v42 = vld [vmem:[#allocation63_spill] sm:$0xff] }
 0x690   :  { %8272 = vmatmul.mubr.bf16.gmra.mxu0 %v19291_v60  ;;  %8681 = vst.msk [vmem:[#allocation4] sm:$0xff] %vm6850_vm8, %v8617_v41  ;;  %v8097_v38 = vpop.f32.mrf.mxu0  ;;  %v7659_v7 = vadd.f32 %v17756_v61, %v19293_v35  ;;  %v19296_v61 = vld [vmem:[#allocation23_spill] sm:$0xff] }
 0x691   :  { %7846 = vmatmul.mubr.bf16.gmra.mxu1 %v19291_v60  ;;  %9751 = vmatprep.mubr.msk.bf16.mxu0 %vm6850_vm8, %v19292_v11  ;;  %vm8480_vm5 = vcmp.ge.f32.partialorder %v8416_v3, 0.0  ;;  %v8554_v58 = vmul.f32 %v17953_v20, %v8416_v3  ;;  %v8346_v8 = vadd.f32 %v8097_v38, %v7656_v18  ;;  %v7664_v60 = vadd.f32 %v17761_v33, %v19294_v42  ;;  %v19295_v38 = vld [vmem:[#allocation101_spill] sm:$0xff] }
 0x692   :  { %9685 = vmatprep.mubr.msk.bf16.mxu1 %vm6850_vm8, %v19292_v11  ;;  %v8099_v17 = vpop.f32.mrf.mxu0 }
 0x693   :  { %v8618_v62 = vsel %vm8480_vm5, %v8416_v3, %v8554_v58  ;;  %v8417_v23 = vadd.f32 %v17946_v9, %v8346_v8  ;;  %v19297_v17 = vld [vmem:[#allocation66_spill] sm:$0xff] }
 0x694   :  { %8682 = vst.msk [vmem:[#allocation4 + $0x8] sm:$0xff] %vm6850_vm8, %v8618_v62  ;;  %v8100_v41 = vpop.f32.mrf.mxu0  ;;  %v7667_v35 = vadd.f32 %v17767_v44, %v19297_v17  ;;  %v19300_v44 = vld [vmem:[#allocation107_spill] sm:$0xff] }
 0x695   :  { %vm8481_vm7 = vcmp.ge.f32.partialorder %v8417_v23, 0.0  ;;  %v8555_v57 = vmul.f32 %v17953_v20, %v8417_v23  ;;  %v8347_v4 = vadd.f32 %v8100_v41, %v7659_v7 }
 0x696   :  { %v8102_v0 = vpop.f32.mrf.mxu0 }
 0x697   :  { %v8619_v11 = vsel %vm8481_vm7, %v8417_v23, %v8555_v57  ;;  %v8418_v18 = vadd.f32 %v17946_v9, %v8347_v4  ;;  %v19298_v0 = vld [vmem:[#allocation19_spill] sm:$0xff] }
 0x698   :  { %8280 = vmatmul.mubr.bf16.gmra.mxu0 %v19295_v38  ;;  %8683 = vst.msk [vmem:[#allocation4 + $0x10] sm:$0xff] %vm6850_vm8, %v8619_v11  ;;  %v8105_v3 = vpop.f32.mrf.mxu0  ;;  %v7672_v42 = vadd.f32 %v17770_v24, %v19298_v0 }
 0x699   :  { %7854 = vmatmul.mubr.bf16.gmra.mxu1 %v19295_v38  ;;  %9752 = vmatprep.mubr.msk.bf16.mxu0 %vm6850_vm8, %v19296_v61  ;;  %vm8482_vm9 = vcmp.ge.f32.partialorder %v8418_v18, 0.0  ;;  %v8556_v58 = vmul.f32 %v17953_v20, %v8418_v18  ;;  %v8348_v33 = vadd.f32 %v8105_v3, %v7664_v60  ;;  %v19299_v38 = vld [vmem:[#allocation95_spill] sm:$0xff] }
 0x69a   :  { %9686 = vmatprep.mubr.msk.bf16.mxu1 %vm6850_vm8, %v19296_v61  ;;  %v8107_v8 = vpop.f32.mrf.mxu0 }
 0x69b   :  { %v8620_v7 = vsel %vm8482_vm9, %v8418_v18, %v8556_v58  ;;  %v8419_v62 = vadd.f32 %v17946_v9, %v8348_v33  ;;  %v19301_v58 = vld [vmem:[#allocation86_spill] sm:$0xff] }
 0x69c   :  { %8684 = vst.msk [vmem:[#allocation4 + $0x18] sm:$0xff] %vm6850_vm8, %v8620_v7  ;;  %v8108_v23 = vpop.f32.mrf.mxu0  ;;  %v7675_v33 = vadd.f32 %v17774_v54, %v19301_v58  ;;  %v19304_v54 = vld [vmem:[#allocation36_spill] sm:$0xff] }
 0x69d   :  { %vm8483_vm10 = vcmp.ge.f32.partialorder %v8419_v62, 0.0  ;;  %v8557_v41 = vmul.f32 %v17953_v20, %v8419_v62  ;;  %v8349_v57 = vadd.f32 %v8108_v23, %v7667_v35 }
 0x69e   :  { %v8110_v4 = vpop.f32.mrf.mxu0 }
 0x69f   :  { %v8621_v11 = vsel %vm8483_vm10, %v8419_v62, %v8557_v41  ;;  %v8420_v60 = vadd.f32 %v17946_v9, %v8349_v57  ;;  %v19302_v41 = vld [vmem:[#allocation91_spill] sm:$0xff] }
 0x6a0   :  { %8288 = vmatmul.mubr.bf16.gmra.mxu0 %v19299_v38  ;;  %8685 = vst.msk [vmem:[#allocation4 + $0x20] sm:$0xff] %vm6850_vm8, %v8621_v11  ;;  %v8113_v18 = vpop.f32.mrf.mxu0  ;;  %v7680_v57 = vadd.f32 %v17777_v59, %v19302_v41 }
 0x6a1   :  { %7862 = vmatmul.mubr.bf16.gmra.mxu1 %v19299_v38  ;;  %9753 = vmatprep.mubr.msk.bf16.mxu0 %vm6850_vm8, %v19300_v44  ;;  %vm8484_vm11 = vcmp.ge.f32.partialorder %v8420_v60, 0.0  ;;  %v8558_v61 = vmul.f32 %v17953_v20, %v8420_v60  ;;  %v8350_v24 = vadd.f32 %v8113_v18, %v7672_v42  ;;  %v19303_v42 = vld [vmem:[#allocation59_spill] sm:$0xff] }
 0x6a2   :  { %9687 = vmatprep.mubr.msk.bf16.mxu1 %vm6850_vm8, %v19300_v44  ;;  %v8115_v3 = vpop.f32.mrf.mxu0  ;;  %v19305_v44 = vld [vmem:[#allocation29_spill] sm:$0xff] }
 0x6a3   :  { %v8622_v8 = vsel %vm8484_vm11, %v8420_v60, %v8558_v61  ;;  %v8421_v17 = vadd.f32 %v17946_v9, %v8350_v24  ;;  %v7683_v18 = vadd.f32 %v17783_v47, %v19305_v44  ;;  %v19308_v47 = vld [vmem:[#allocation112_spill] sm:$0xff] }
 0x6a4   :  { %8686 = vst.msk [vmem:[#allocation4 + $0x28] sm:$0xff] %vm6850_vm8, %v8622_v8  ;;  %v8116_v35 = vpop.f32.mrf.mxu0 }
 0x6a5   :  { %vm8485_vm12 = vcmp.ge.f32.partialorder %v8421_v17, 0.0  ;;  %v8559_v7 = vmul.f32 %v17953_v20, %v8421_v17  ;;  %v8351_v62 = vadd.f32 %v8116_v35, %v7675_v33 }
 0x6a6   :  { %v8118_v23 = vpop.f32.mrf.mxu0 }
 0x6a7   :  { %v8623_v4 = vsel %vm8485_vm12, %v8421_v17, %v8559_v7  ;;  %v8422_v0 = vadd.f32 %v17946_v9, %v8351_v62  ;;  %v19306_v17 = vld [vmem:[#allocation87_spill] sm:$0xff] }
 0x6a8   :  { %8296 = vmatmul.mubr.bf16.gmra.mxu0 %v19303_v42  ;;  %8687 = vst.msk [vmem:[#allocation4 + $0x30] sm:$0xff] %vm6850_vm8, %v8623_v4  ;;  %v8121_v11 = vpop.f32.mrf.mxu0  ;;  %v7688_v35 = vadd.f32 %v17789_v1, %v19306_v17  ;;  %v19307_v23 = vld [vmem:[#allocation39_spill] sm:$0xff] }
 0x6a9   :  { %7870 = vmatmul.mubr.bf16.gmra.mxu1 %v19303_v42  ;;  %9754 = vmatprep.mubr.msk.bf16.mxu0 %vm6850_vm8, %v19304_v54  ;;  %vm8486_vm13 = vcmp.ge.f32.partialorder %v8422_v0, 0.0  ;;  %v8560_v60 = vmul.f32 %v17953_v20, %v8422_v0  ;;  %v8352_v59 = vadd.f32 %v8121_v11, %v7680_v57  ;;  %v19309_v42 = vld [vmem:[#allocation18_spill] sm:$0xff] }
 0x6aa   :  { %9688 = vmatprep.mubr.msk.bf16.mxu1 %vm6850_vm8, %v19304_v54  ;;  %v8123_v38 = vpop.f32.mrf.mxu0  ;;  %v7691_v1 = vadd.f32 %v17798_v16, %v19309_v42  ;;  %v19312_v16 = vld [vmem:[#allocation20_spill] sm:$0xff]  ;;  %v19314_v42 = vld [vmem:[#allocation119_spill] sm:$0xff] }
 0x6ab   :  { %v8624_v61 = vsel %vm8486_vm13, %v8422_v0, %v8560_v60  ;;  %v8423_v24 = vadd.f32 %v17946_v9, %v8352_v59 }
 0x6ac   :  { %8688 = vst.msk [vmem:[#allocation4 + $0x38] sm:$0xff] %vm6850_vm8, %v8624_v61  ;;  %v8124_v3 = vpop.f32.mrf.mxu0 }
 0x6ad   :  { %vm8487_vm14 = vcmp.ge.f32.partialorder %v8423_v24, 0.0  ;;  %v8561_v58 = vmul.f32 %v17953_v20, %v8423_v24  ;;  %v8353_v33 = vadd.f32 %v8124_v3, %v7683_v18  ;;  %v19310_v18 = vld [vmem:[#allocation16_spill] sm:$0xff] }
 0x6ae   :  { %v8126_v8 = vpop.f32.mrf.mxu0  ;;  %v7696_v61 = vadd.f32 %v17804_v28, %v19310_v18  ;;  %v19316_v18 = vld [vmem:[#allocation32_spill] sm:$0xff] }
 0x6af   :  { %v8625_v7 = vsel %vm8487_vm14, %v8423_v24, %v8561_v58  ;;  %v8424_v62 = vadd.f32 %v17946_v9, %v8353_v33  ;;  %v19311_v58 = vld [vmem:[#allocation97_spill] sm:$0xff] }
 0x6b0   :  { %8304 = vmatmul.mubr.bf16.gmra.mxu0 %v19307_v23  ;;  %8689 = vst.msk [vmem:[#allocation4 + $0x40] sm:$0xff] %vm6850_vm8, %v8625_v7  ;;  %v8129_v41 = vpop.f32.mrf.mxu0  ;;  %v19313_v7 = vld [vmem:[#allocation31_spill] sm:$0xff] }
 0x6b1   :  { %7878 = vmatmul.mubr.bf16.gmra.mxu1 %v19307_v23  ;;  %vm8488_vm15 = vcmp.ge.f32.partialorder %v8424_v62, 0.0  ;;  %v8562_v57 = vmul.f32 %v17953_v20, %v8424_v62  ;;  %v8354_v4 = vadd.f32 %v8129_v41, %v7688_v35 }
 0x6b2   :  { %9689 = vmatprep.mubr.msk.bf16.mxu1 %vm6850_vm8, %v19308_v47  ;;  %v8131_v0 = vpop.f32.mrf.mxu0 }
 0x6b3   :  { %v8626_v54 = vsel %vm8488_vm15, %v8424_v62, %v8562_v57  ;;  %v8425_v11 = vadd.f32 %v17946_v9, %v8354_v4  ;;  %v7699_v62 = vadd.f32 %v17807_v53, %v19313_v7 }
 0x6b4   :  { %8690 = vst.msk [vmem:[#allocation4 + $0x48] sm:$0xff] %vm6850_vm8, %v8626_v54  ;;  %v8132_v60 = vpop.f32.mrf.mxu0 }
 0x6b5   :  { %vm8489_vm0 = vcmp.ge.f32.partialorder %v8425_v11, 0.0  ;;  %v8563_v59 = vmul.f32 %v17953_v20, %v8425_v11  ;;  %v8355_v38 = vadd.f32 %v8132_v60, %v7691_v1  ;;  %v7704_v1 = vadd.f32 %v17809_v27, %v19314_v42  ;;  %v19315_v60 = vld [vmem:[#allocation21_spill] sm:$0xff] }
 0x6b6   :  { %v8134_v44 = vpop.f32.mrf.mxu0 }
 0x6b7   :  { %v8627_v24 = vsel %vm8489_vm0, %v8425_v11, %v8563_v59  ;;  %v8426_v3 = vadd.f32 %v17946_v9, %v8355_v38 }
 0x6b8   :  { %8691 = vst.msk [vmem:[#allocation4 + $0x50] sm:$0xff] %vm6850_vm8, %v8627_v24  ;;  %v8137_v33 = vpop.f32.mrf.mxu0 }
 0x6b9   :  { %7886 = vmatmul.mubr.bf16.gmra.mxu1 %v19311_v58  ;;  %vm8490_vm1 = vcmp.ge.f32.partialorder %v8426_v3, 0.0  ;;  %v8564_v8 = vmul.f32 %v17953_v20, %v8426_v3  ;;  %v8356_v17 = vadd.f32 %v8137_v33, %v7696_v61  ;;  %v7707_v61 = vadd.f32 %v17817_v6, %v19316_v18 }
 0x6ba   :  { %9690 = vmatprep.mubr.msk.bf16.mxu1 %vm6850_vm8, %v19312_v16  ;;  %v8139_v35 = vpop.f32.mrf.mxu0 }
 0x6bb   :  { %v8628_v28 = vsel %vm8490_vm1, %v8426_v3, %v8564_v8  ;;  %v8427_v23 = vadd.f32 %v17946_v9, %v8356_v17 }
 0x6bc   :  { %8692 = vst.msk [vmem:[#allocation4 + $0x58] sm:$0xff] %vm6850_vm8, %v8628_v28  ;;  %v8140_v41 = vpop.f32.mrf.mxu0 }
 0x6bd   :  { %vm8491_vm2 = vcmp.ge.f32.partialorder %v8427_v23, 0.0  ;;  %v8565_v57 = vmul.f32 %v17953_v20, %v8427_v23  ;;  %v8357_v4 = vadd.f32 %v8140_v41, %v7699_v62 }
 0x6be   :  { %v8142_v0 = vpop.f32.mrf.mxu0 }
 0x6bf   :  { %v8629_v54 = vsel %vm8491_vm2, %v8427_v23, %v8565_v57  ;;  %v8428_v11 = vadd.f32 %v17946_v9, %v8357_v4  ;;  %v19318_v57 = vld [vmem:[#allocation72_spill] sm:$0xff] }
 0x6c0   :  { %8693 = vst.msk [vmem:[#allocation4 + $0x60] sm:$0xff] %vm6850_vm8, %v8629_v54  ;;  %v8145_v53 = vpop.f32.mrf.mxu0  ;;  %v7715_v4 = vadd.f32 %v17835_v40, %v19318_v57  ;;  %v7923_v40 = vrot.slane %v17853_v39, 2  ;;  %v19322_v57 = vld [vmem:[#allocation79_spill] sm:$0xff] }
 0x6c1   :  { %7894 = vmatmul.mubr.bf16.gmra.mxu1 %v19315_v60  ;;  %vm8492_vm3 = vcmp.ge.f32.partialorder %v8428_v11, 0.0  ;;  %v8566_v59 = vmul.f32 %v17953_v20, %v8428_v11  ;;  %v8358_v38 = vadd.f32 %v8145_v53, %v7704_v1 }
 0x6c2   :  { %9755 = vmatprep.mubr.msk.bf16.mxu1 %vm6850_vm8, %v19308_v47  ;;  %v8147_v44 = vpop.f32.mrf.mxu0  ;;  %v19317_v47 = vld [vmem:[#allocation76_spill] sm:$0xff] }
 0x6c3   :  { %v8630_v27 = vsel %vm8492_vm3, %v8428_v11, %v8566_v59  ;;  %v8429_v24 = vadd.f32 %v17946_v9, %v8358_v38  ;;  %v7712_v35 = vadd.f32 %v17823_v22, %v19317_v47  ;;  %v19319_v59 = vld [vmem:[#allocation33_spill] sm:$0xff]  ;;  %v7926_v44 = vrot.slane %v17855_v19, 2 }
 0x6c4   :  { %8694 = vst.msk [vmem:[#allocation4 + $0x68] sm:$0xff] %vm6850_vm8, %v8630_v27  ;;  %v8148_v3 = vpop.f32.mrf.mxu0  ;;  %v7720_v38 = vadd.f32 %v17847_v31, %v19319_v59 }
 0x6c5   :  { %vm8493_vm6 = vcmp.ge.f32.partialorder %v8429_v24, 0.0  ;;  %v8567_v33 = vmul.f32 %v17953_v20, %v8429_v24  ;;  %v8359_v8 = vadd.f32 %v8148_v3, %v7707_v61  ;;  %v19320_v61 = vld [vmem:[#allocation26_spill] sm:$0xff] }
 0x6c6   :  { %v8150_v17 = vpop.f32.mrf.mxu0 }
 0x6c7   :  { %v8631_v7 = vsel %vm8493_vm6, %v8429_v24, %v8567_v33  ;;  %v8430_v62 = vadd.f32 %v17946_v9, %v8359_v8  ;;  %v19321_v8 = vld [vmem:[#allocation30_spill] sm:$0xff] }
 0x6c8   :  { %8695 = vst.msk [vmem:[#allocation4 + $0x70] sm:$0xff] %vm6850_vm8, %v8631_v7  ;;  %v8153_v6 = vpop.f32.mrf.mxu0  ;;  %v7723_v31 = vadd.f32 %v17851_v37, %v19321_v8 }
 0x6c9   :  { %8312 = vmatmul.mubr.bf16.vlgmr.msra.gmra.mxu1 %v19311_v58  ;;  %vm8494_vm5 = vcmp.ge.f32.partialorder %v8430_v62, 0.0  ;;  %v8568_v28 = vmul.f32 %v17953_v20, %v8430_v62  ;;  %v8360_v23 = vadd.f32 %v8153_v6, %v7712_v35 }
 0x6ca   :  { %9756 = vmatprep.mubr.msk.bf16.mxu1 %vm6850_vm8, %v19312_v16  ;;  %v8155_v41 = vpop.f32.mrf.mxu0  ;;  %v7924_v16 = vrot.slane %v17859_v45, 2 }
 0x6cb   :  { %v8632_v22 = vsel %vm8494_vm5, %v8430_v62, %v8568_v28  ;;  %v8431_v0 = vadd.f32 %v17946_v9, %v8360_v23 }
 0x6cc   :  { %8696 = vst.msk [vmem:[#allocation4 + $0x78] sm:$0xff] %vm6850_vm8, %v8632_v22  ;;  %v8156_v58 = vpop.f32.mrf.mxu0  ;;  %v7927_v33 = vsel %vm6433_vm4, %v7924_v16, %v7926_v44  ;;  %v19323_v22 = vld [vmem:[#allocation99_spill] sm:$0xff] }
 0x6cd   :  { %vm8495_vm7 = vcmp.ge.f32.partialorder %v8431_v0, 0.0  ;;  %v8569_v42 = vmul.f32 %v17953_v20, %v8431_v0  ;;  %v8361_v1 = vadd.f32 %v8156_v58, %v7715_v4  ;;  %v7728_v4 = vadd.f32 %v17870_v10, %v19322_v57 }
 0x6ce   :  { %v8158_v54 = vpop.f32.mrf.mxu0 }
 0x6cf   :  { %v8633_v11 = vsel %vm8495_vm7, %v8431_v0, %v8569_v42  ;;  %v8432_v53 = vadd.f32 %v17946_v9, %v8361_v1 }
 0x6d0   :  { %8697 = vst.msk [vmem:[#allocation4 + $0x80] sm:$0xff] %vm6850_vm8, %v8633_v11  ;;  %v8161_v18 = vpop.f32.mrf.mxu0  ;;  %v19324_v11 = vld [vmem:[#allocation34_spill] sm:$0xff] }
 0x6d1   :  { %8320 = vmatmul.mubr.bf16.gmra.mxu1 %v19315_v60  ;;  %vm8496_vm9 = vcmp.ge.f32.partialorder %v8432_v53, 0.0  ;;  %v8570_v27 = vmul.f32 %v17953_v20, %v8432_v53  ;;  %v8362_v24 = vadd.f32 %v8161_v18, %v7720_v38  ;;  %v7925_v60 = vsel %vm6433_vm4, %v7923_v40, %v7924_v16  ;;  %v10527_v19 = vpop.permute.xlu0 %10526 }
 0x6d2   :  { %9757 = vmatprep.mubr.msk.bf16.mxu1 %vm6850_vm8, %v19320_v61  ;;  %v8163_v3 = vpop.f32.mrf.mxu0  ;;  %v7951_v62 = vpack.c.bf16 %v7927_v33, %v7925_v60  ;;  %v10529_v6 = vunpack.i.h.bf16 %v10527_v19  ;;  %v10528_v28 = vunpack.i.l.bf16 %v10527_v19 }
 0x6d3   :  { %v8634_v17 = vsel %vm8496_vm9, %v8432_v53, %v8570_v27  ;;  %v8433_v47 = vadd.f32 %v17946_v9, %v8362_v24  ;;  %v7731_v53 = vadd.f32 %v17876_v32, %v19324_v11 }
 0x6d4   :  { %8698 = vst.msk [vmem:[#allocation4 + $0x88] sm:$0xff] %vm6850_vm8, %v8634_v17  ;;  %v8164_v35 = vpop.f32.mrf.mxu0  ;;  %v7947_v16 = vsel %vm6850_vm8, %v17859_v45, %v10529_v6  ;;  %v7946_v10 = vsel %vm6850_vm8, %v17853_v39, %v10528_v28  ;;  %v19325_v45 = vld [vmem:[#allocation42_spill] sm:$0xff] }
 0x6d5   :  { %v8363_v7 = vadd.f32 %v8164_v35, %v7723_v31  ;;  %vm8497_vm10 = vcmp.ge.f32.partialorder %v8433_v47, 0.0  ;;  %v8571_v23 = vmul.f32 %v17953_v20, %v8433_v47  ;;  %v7950_v44 = vpack.c.bf16 %v7947_v16, %v7946_v10  ;;  %v19326_v31 = vld [vmem:[#allocation8_spill] sm:$0xff]  ;;  %v19327_v6 = vld [vmem:[#allocation98_spill] sm:$0xff] }
 0x6d6   :  { %v8166_v41 = vpop.f32.mrf.mxu0  ;;  %v7736_v24 = vadd.f32 %v17885_v5, %v19325_v45  ;;  %v7739_v17 = vadd.f32 %v17889_v36, %v19326_v31  ;;  %v7744_v28 = vadd.f32 %v17899_v55, %v19327_v6 }
 0x6d7   :  { %v8434_v37 = vadd.f32 %v17946_v9, %v8363_v7  ;;  %v8635_v0 = vsel %vm8497_vm10, %v8433_v47, %v8571_v23 }
 0x6d8   :  { %v8169_v58 = vpop.f32.mrf.mxu0  ;;  %8699 = vst.msk [vmem:[#allocation4 + $0x90] sm:$0xff] %vm6850_vm8, %v8635_v0 }
 0x6d9   :  { %8328 = vmatmul.mubr.bf16.gmra.mxu1 %v19323_v22  ;;  %vm8498_vm4 = vcmp.ge.f32.partialorder %v8434_v37, 0.0  ;;  %v8572_v42 = vmul.f32 %v17953_v20, %v8434_v37  ;;  %v8364_v1 = vadd.f32 %v8169_v58, %v7728_v4  ;;  %v19328_v22 = vld [vmem:[#allocation71_spill] sm:$0xff] }
 0x6da   :  { %9758 = vmatprep.mubr.msk.bf16.mxu1 %vm6850_vm8, %v7951_v62  ;;  %v8171_v54 = vpop.f32.mrf.mxu0  ;;  %v7747_v0 = vadd.f32 %v17901_v43, %v19328_v22 }
 0x6db   :  { %v8636_v40 = vsel %vm8498_vm4, %v8434_v37, %v8572_v42  ;;  %v8435_v59 = vadd.f32 %v17946_v9, %v8364_v1  ;;  %v19329_v54 = vld [vmem:[#allocation75_spill] sm:$0xff] }
 0x6dc   :  { %8700 = vst.msk [vmem:[#allocation4 + $0x98] sm:$0xff] %vm6850_vm8, %v8636_v40  ;;  %v8172_v38 = vpop.f32.mrf.mxu0  ;;  %v7752_v11 = vadd.f32 %v17909_v15, %v19329_v54  ;;  %v19334_v54 = vld [vmem:[#allocation111_spill] sm:$0xff] }
 0x6dd   :  { %vm8499_vm11 = vcmp.ge.f32.partialorder %v8435_v59, 0.0  ;;  %v8573_v18 = vmul.f32 %v17953_v20, %v8435_v59  ;;  %v8365_v61 = vadd.f32 %v8172_v38, %v7731_v53 }
 0x6de   :  { %v8174_v27 = vpop.f32.mrf.mxu0 }
 0x6df   :  { %v8637_v39 = vsel %vm8499_vm11, %v8435_v59, %v8573_v18  ;;  %v8436_v3 = vadd.f32 %v17946_v9, %v8365_v61  ;;  %v19330_v18 = vld [vmem:[#allocation38_spill] sm:$0xff] }
 0x6e0   :  { %8701 = vst.msk [vmem:[#allocation4 + $0xa0] sm:$0xff] %vm6850_vm8, %v8637_v39  ;;  %v8177_v32 = vpop.f32.mrf.mxu0  ;;  %v7755_v61 = vadd.f32 %v17911_v50, %v19330_v18 }
 0x6e1   :  { %8336 = vmatmul.mubr.bf16.gmra.mxu1 %v7950_v44  ;;  %vm8500_vm12 = vcmp.ge.f32.partialorder %v8436_v3, 0.0  ;;  %v8574_v60 = vmul.f32 %v17953_v20, %v8436_v3  ;;  %v8366_v33 = vadd.f32 %v8177_v32, %v7736_v24  ;;  %v19331_v32 = vld [vmem:[#allocation93_spill] sm:$0xff] }
 0x6e2   :  { %v8179_v8 = vpop.f32.mrf.mxu0 }
 0x6e3   :  { %v8638_v19 = vsel %vm8500_vm12, %v8436_v3, %v8574_v60  ;;  %v8437_v47 = vadd.f32 %v17946_v9, %v8366_v33  ;;  %v7760_v60 = vadd.f32 %v17919_v14, %v19331_v32 }
 0x6e4   :  { %8702 = vst.msk [vmem:[#allocation4 + $0xa8] sm:$0xff] %vm6850_vm8, %v8638_v19  ;;  %v8180_v5 = vpop.f32.mrf.mxu0 }
 0x6e5   :  { %vm8501_vm13 = vcmp.ge.f32.partialorder %v8437_v47, 0.0  ;;  %v8575_v35 = vmul.f32 %v17953_v20, %v8437_v47  ;;  %v8367_v7 = vadd.f32 %v8180_v5, %v7739_v17 }
 0x6e6   :  { %v8182_v62 = vpop.f32.mrf.mxu0 }
 0x6e7   :  { %v8639_v23 = vsel %vm8501_vm13, %v8437_v47, %v8575_v35  ;;  %v8438_v41 = vadd.f32 %v17946_v9, %v8367_v7  ;;  %v19332_v47 = vld [vmem:[#allocation78_spill] sm:$0xff] }
 0x6e8   :  { %8703 = vst.msk [vmem:[#allocation4 + $0xb0] sm:$0xff] %vm6850_vm8, %v8639_v23  ;;  %v8185_v36 = vpop.f32.mrf.mxu0  ;;  %v7763_v5 = vadd.f32 %v17921_v26, %v19332_v47 }
 0x6e9   :  { %vm8502_vm14 = vcmp.ge.f32.partialorder %v8438_v41, 0.0  ;;  %v8576_v57 = vmul.f32 %v17953_v20, %v8438_v41  ;;  %v8368_v4 = vadd.f32 %v8185_v36, %v7744_v28 }
 0x6ea   :  { %v8187_v37 = vpop.f32.mrf.mxu0 }
 0x6eb   :  { %v8640_v58 = vsel %vm8502_vm14, %v8438_v41, %v8576_v57  ;;  %v8439_v42 = vadd.f32 %v17946_v9, %v8368_v4 }
 0x6ec   :  { %8704 = vst.msk [vmem:[#allocation4 + $0xb8] sm:$0xff] %vm6850_vm8, %v8640_v58  ;;  %v8188_v55 = vpop.f32.mrf.mxu0 }
 0x6ed   :  { %vm8503_vm15 = vcmp.ge.f32.partialorder %v8439_v42, 0.0  ;;  %v8577_v1 = vmul.f32 %v17953_v20, %v8439_v42  ;;  %v8369_v16 = vadd.f32 %v8188_v55, %v7747_v0  ;;  %v19333_v0 = vld [vmem:[#allocation22_spill] sm:$0xff] }
 0x6ee   :  { %v8190_v10 = vpop.f32.mrf.mxu0  ;;  %v7768_v58 = vadd.f32 %v17931_v63, %v19333_v0 }
 0x6ef   :  { %v8641_v53 = vsel %vm8503_vm15, %v8439_v42, %v8577_v1  ;;  %v8440_v40 = vadd.f32 %v17946_v9, %v8369_v16 }
 0x6f0   :  { %8705 = vst.msk [vmem:[#allocation4 + $0xc0] sm:$0xff] %vm6850_vm8, %v8641_v53  ;;  %v8193_v43 = vpop.f32.mrf.mxu0 }
 0x6f1   :  { %vm8504_vm0 = vcmp.ge.f32.partialorder %v8440_v40, 0.0  ;;  %v8578_v59 = vmul.f32 %v17953_v20, %v8440_v40  ;;  %v8370_v38 = vadd.f32 %v8193_v43, %v7752_v11  ;;  %v7771_v11 = vadd.f32 %v17935_v51, %v19334_v54  ;;  %v19339_v54 = vld [vmem:[#allocation25_spill] sm:$0xff] }
 0x6f2   :  { %v8195_v44 = vpop.f32.mrf.mxu0 }
 0x6f3   :  { %v8642_v27 = vsel %vm8504_vm0, %v8440_v40, %v8578_v59  ;;  %v8441_v45 = vadd.f32 %v17946_v9, %v8370_v38 }
 0x6f4   :  { %8706 = vst.msk [vmem:[#allocation4 + $0xc8] sm:$0xff] %vm6850_vm8, %v8642_v27  ;;  %v8196_v15 = vpop.f32.mrf.mxu0 }
 0x6f5   :  { %vm8505_vm1 = vcmp.ge.f32.partialorder %v8441_v45, 0.0  ;;  %v8579_v24 = vmul.f32 %v17953_v20, %v8441_v45  ;;  %v8371_v39 = vadd.f32 %v8196_v15, %v7755_v61  ;;  %v19335_v61 = vld [vmem:[#allocation94_spill] sm:$0xff] }
 0x6f6   :  { %v8198_v3 = vpop.f32.mrf.mxu0 }
 0x6f7   :  { %v8643_v33 = vsel %vm8505_vm1, %v8441_v45, %v8579_v24  ;;  %v8442_v8 = vadd.f32 %v17946_v9, %v8371_v39 }
 0x6f8   :  { %8707 = vst.msk [vmem:[#allocation4 + $0xd0] sm:$0xff] %vm6850_vm8, %v8643_v33  ;;  %v8201_v50 = vpop.f32.mrf.mxu0 }
 0x6f9   :  { %vm8506_vm2 = vcmp.ge.f32.partialorder %v8442_v8, 0.0  ;;  %v8580_v31 = vmul.f32 %v17953_v20, %v8442_v8  ;;  %v8372_v17 = vadd.f32 %v8201_v50, %v7760_v60  ;;  %v19336_v60 = vld [vmem:[#allocation61_spill] sm:$0xff] }
 0x6fa   :  { %v8203_v19 = vpop.f32.mrf.mxu0 }
 0x6fb   :  { %v8644_v35 = vsel %vm8506_vm2, %v8442_v8, %v8580_v31  ;;  %v8443_v7 = vadd.f32 %v17946_v9, %v8372_v17 }
 0x6fc   :  { %8708 = vst.msk [vmem:[#allocation4 + $0xd8] sm:$0xff] %vm6850_vm8, %v8644_v35  ;;  %v8204_v14 = vpop.f32.mrf.mxu0 }
 0x6fd   :  { %vm8507_vm3 = vcmp.ge.f32.partialorder %v8443_v7, 0.0  ;;  %v8581_v62 = vmul.f32 %v17953_v20, %v8443_v7  ;;  %v8373_v6 = vadd.f32 %v8204_v14, %v7763_v5 }
 0x6fe   :  { %v8206_v28 = vpop.f32.mrf.mxu0 }
 0x6ff   :  { %v8645_v23 = vsel %vm8507_vm3, %v8443_v7, %v8581_v62  ;;  %v8444_v41 = vadd.f32 %v17946_v9, %v8373_v6  ;;  %v19337_v7 = vld [vmem:[#allocation82_spill] sm:$0xff] }
 0x700   :  { %8709 = vst.msk [vmem:[#allocation4 + $0xe0] sm:$0xff] %vm6850_vm8, %v8645_v23 }
 0x701   :  { %vm8508_vm6 = vcmp.ge.f32.partialorder %v8444_v41, 0.0  ;;  %v8582_v36 = vmul.f32 %v17953_v20, %v8444_v41 }
 0x703   :  { %v8646_v26 = vsel %vm8508_vm6, %v8444_v41, %v8582_v36 }
 0x704   :  { %8710 = vst.msk [vmem:[#allocation4 + $0xe8] sm:$0xff] %vm6850_vm8, %v8646_v26 }
 0x709   :  { %v7775_v57 = vpop.f32.mrf.mxu1 }
 0x70a   :  { %v7776_v63 = vadd.f32 %v7775_v57, %v19335_v61 }
 0x70b   :  { %v7777_v4 = vpop.f32.mrf.mxu1 }
 0x70c   :  { %v19338_v4 = vld [vmem:[#allocation27_spill] sm:$0xff] }
 0x70d   :  { %v7778_v37 = vpop.f32.mrf.mxu1 }
 0x70e   :  { %v7779_v33 = vadd.f32 %v7778_v37, %v19336_v60 }
 0x70f   :  { %v7780_v22 = vpop.f32.mrf.mxu1 }
 0x710   :  { %v8209_v55 = vpop.f32.mrf.mxu0 }
 0x711   :  { %v7783_v42 = vpop.f32.mrf.mxu1  ;;  %v8374_v1 = vadd.f32 %v8209_v55, %v7768_v58 }
 0x712   :  { %v8211_v10 = vpop.f32.mrf.mxu0  ;;  %v7784_v14 = vadd.f32 %v7783_v42, %v19337_v7 }
 0x713   :  { %v7785_v16 = vpop.f32.mrf.mxu1  ;;  %v8445_v53 = vadd.f32 %v17946_v9, %v8374_v1 }
 0x714   :  { %v8212_v43 = vpop.f32.mrf.mxu0 }
 0x715   :  { %v7786_v40 = vpop.f32.mrf.mxu1  ;;  %vm8509_vm5 = vcmp.ge.f32.partialorder %v8445_v53, 0.0  ;;  %v8583_v59 = vmul.f32 %v17953_v20, %v8445_v53  ;;  %v8375_v38 = vadd.f32 %v8212_v43, %v7771_v11 }
 0x716   :  { %v8214_v18 = vpop.f32.mrf.mxu0  ;;  %v7787_v37 = vadd.f32 %v7786_v40, %v19338_v4 }
 0x717   :  { %v7788_v44 = vpop.f32.mrf.mxu1  ;;  %v8647_v27 = vsel %vm8509_vm5, %v8445_v53, %v8583_v59  ;;  %v8446_v45 = vadd.f32 %v17946_v9, %v8375_v38 }
 0x718   :  { %8711 = vst.msk [vmem:[#allocation4 + $0xf0] sm:$0xff] %vm6850_vm8, %v8647_v27  ;;  %v8217_v24 = vpop.f32.mrf.mxu0 }
 0x719   :  { %v7791_v15 = vpop.f32.mrf.mxu1  ;;  %vm8510_vm7 = vcmp.ge.f32.partialorder %v8446_v45, 0.0  ;;  %v8584_v51 = vmul.f32 %v17953_v20, %v8446_v45  ;;  %v8376_v39 = vadd.f32 %v8217_v24, %v7776_v63  ;;  %v19340_v63 = vld [vmem:[#allocation115_spill] sm:$0xff] }
 0x71a   :  { %v8219_v32 = vpop.f32.mrf.mxu0  ;;  %v7792_v11 = vadd.f32 %v7791_v15, %v19339_v54 }
 0x71b   :  { %v7793_v3 = vpop.f32.mrf.mxu1  ;;  %v8648_v8 = vsel %vm8510_vm7, %v8446_v45, %v8584_v51  ;;  %v8447_v50 = vadd.f32 %v17946_v9, %v8376_v39 }
 0x71c   :  { %8712 = vst.msk [vmem:[#allocation4 + $0xf8] sm:$0xff] %vm6850_vm8, %v8648_v8  ;;  %v8220_v17 = vpop.f32.mrf.mxu0 }
 0x71d   :  { %v7794_v31 = vpop.f32.mrf.mxu1  ;;  %vm8511_vm9 = vcmp.ge.f32.partialorder %v8447_v50, 0.0  ;;  %v8585_v19 = vmul.f32 %v17953_v20, %v8447_v50  ;;  %v8377_v47 = vadd.f32 %v8220_v17, %v7779_v33  ;;  %v19341_v33 = vld [vmem:[#allocation84_spill] sm:$0xff] }
 0x71e   :  { %v8222_v35 = vpop.f32.mrf.mxu0  ;;  %v7795_v27 = vadd.f32 %v7794_v31, %v19340_v63 }
 0x71f   :  { %v7796_v5 = vpop.f32.mrf.mxu1  ;;  %v8649_v62 = vsel %vm8511_vm9, %v8447_v50, %v8585_v19  ;;  %v8448_v6 = vadd.f32 %v17946_v9, %v8377_v47 }
 0x720   :  { %8713 = vst.msk [vmem:[#allocation4 + $0x100] sm:$0xff] %vm6850_vm8, %v8649_v62  ;;  %v8225_v23 = vpop.f32.mrf.mxu0 }
 0x721   :  { %v7799_v28 = vpop.f32.mrf.mxu1  ;;  %vm8512_vm10 = vcmp.ge.f32.partialorder %v8448_v6, 0.0  ;;  %v8586_v41 = vmul.f32 %v17953_v20, %v8448_v6  ;;  %v8378_v36 = vadd.f32 %v8225_v23, %v7784_v14 }
 0x722   :  { %v8227_v57 = vpop.f32.mrf.mxu0  ;;  %v7800_v8 = vadd.f32 %v7799_v28, %v19341_v33 }
 0x723   :  { %v7801_v26 = vpop.f32.mrf.mxu1  ;;  %v8650_v22 = vsel %vm8512_vm10, %v8448_v6, %v8586_v41  ;;  %v8449_v0 = vadd.f32 %v17946_v9, %v8378_v36 }
 0x724   :  { %8714 = vst.msk [vmem:[#allocation4 + $0x108] sm:$0xff] %vm6850_vm8, %v8650_v22  ;;  %v8228_v42 = vpop.f32.mrf.mxu0 }
 0x725   :  { %v7802_v58 = vpop.f32.mrf.mxu1  ;;  %vm8513_vm4 = vcmp.ge.f32.partialorder %v8449_v0, 0.0  ;;  %v8587_v55 = vmul.f32 %v17953_v20, %v8449_v0  ;;  %v8379_v1 = vadd.f32 %v8228_v42, %v7787_v37 }
 0x726   :  { %v8230_v10 = vpop.f32.mrf.mxu0  ;;  %v7803_v14 = vadd.f32 %v7802_v58, %v17682_v2 }
 0x727   :  { %v7804_v16 = vpop.f32.mrf.mxu1  ;;  %v8651_v53 = vsel %vm8513_vm4, %v8449_v0, %v8587_v55  ;;  %v8450_v43 = vadd.f32 %v17946_v9, %v8379_v1 }
 0x728   :  { %8715 = vst.msk [vmem:[#allocation4 + $0x110] sm:$0xff] %vm6850_vm8, %v8651_v53  ;;  %v8233_v59 = vpop.f32.mrf.mxu0 }
 0x729   :  { %v7807_v40 = vpop.f32.mrf.mxu1  ;;  %vm8514_vm11 = vcmp.ge.f32.partialorder %v8450_v43, 0.0  ;;  %v8588_v38 = vmul.f32 %v17953_v20, %v8450_v43  ;;  %v8380_v44 = vadd.f32 %v8233_v59, %v7792_v11 }
 0x72a   :  { %v8235_v61 = vpop.f32.mrf.mxu0  ;;  %v7808_v4 = vadd.f32 %v7807_v40, %v17701_v13 }
 0x72b   :  { %v7809_v18 = vpop.f32.mrf.mxu1  ;;  %v8652_v45 = vsel %vm8514_vm11, %v8450_v43, %v8588_v38  ;;  %v8451_v24 = vadd.f32 %v17946_v9, %v8380_v44 }
 0x72c   :  { %8716 = vst.msk [vmem:[#allocation4 + $0x118] sm:$0xff] %vm6850_vm8, %v8652_v45  ;;  %v8236_v51 = vpop.f32.mrf.mxu0 }
 0x72d   :  { %v7810_v15 = vpop.f32.mrf.mxu1  ;;  %vm8515_vm12 = vcmp.ge.f32.partialorder %v8451_v24, 0.0  ;;  %v8589_v39 = vmul.f32 %v17953_v20, %v8451_v24  ;;  %v8381_v3 = vadd.f32 %v8236_v51, %v7795_v27 }
 0x72e   :  { %v8238_v60 = vpop.f32.mrf.mxu0  ;;  %v7811_v16 = vadd.f32 %v7810_v15, %v17709_v46 }
 0x72f   :  { %v7812_v32 = vpop.f32.mrf.mxu1  ;;  %v8653_v50 = vsel %vm8515_vm12, %v8451_v24, %v8589_v39  ;;  %v8452_v17 = vadd.f32 %v17946_v9, %v8381_v3 }
 0x730   :  { %8717 = vst.msk [vmem:[#allocation4 + $0x120] sm:$0xff] %vm6850_vm8, %v8653_v50  ;;  %v8241_v19 = vpop.f32.mrf.mxu0 }
 0x731   :  { %v7815_v31 = vpop.f32.mrf.mxu1  ;;  %vm8516_vm13 = vcmp.ge.f32.partialorder %v8452_v17, 0.0  ;;  %v8590_v47 = vmul.f32 %v17953_v20, %v8452_v17  ;;  %v8382_v5 = vadd.f32 %v8241_v19, %v7800_v8 }
 0x732   :  { %v8243_v7 = vpop.f32.mrf.mxu0  ;;  %v7816_v38 = vadd.f32 %v7815_v31, %v17717_v29 }
 0x733   :  { %v7817_v35 = vpop.f32.mrf.mxu1  ;;  %v8654_v62 = vsel %vm8516_vm13, %v8452_v17, %v8590_v47  ;;  %v8453_v6 = vadd.f32 %v17946_v9, %v8382_v5 }
 0x734   :  { %8718 = vst.msk [vmem:[#allocation4 + $0x128] sm:$0xff] %vm6850_vm8, %v8654_v62  ;;  %v8244_v23 = vpop.f32.mrf.mxu0 }
 0x735   :  { %v7818_v28 = vpop.f32.mrf.mxu1  ;;  %vm8517_vm14 = vcmp.ge.f32.partialorder %v8453_v6, 0.0  ;;  %v8591_v41 = vmul.f32 %v17953_v20, %v8453_v6  ;;  %v8383_v36 = vadd.f32 %v8244_v23, %v7803_v14 }
 0x736   :  { %v8246_v57 = vpop.f32.mrf.mxu0  ;;  %v7819_v15 = vadd.f32 %v7818_v28, %v17722_v21 }
 0x737   :  { %v7820_v26 = vpop.f32.mrf.mxu1  ;;  %v8655_v37 = vsel %vm8517_vm14, %v8453_v6, %v8591_v41  ;;  %v8454_v22 = vadd.f32 %v17946_v9, %v8383_v36 }
 0x738   :  { %8719 = vst.msk [vmem:[#allocation4 + $0x130] sm:$0xff] %vm6850_vm8, %v8655_v37  ;;  %v8249_v0 = vpop.f32.mrf.mxu0 }
 0x739   :  { %v7823_v2 = vpop.f32.mrf.mxu1  ;;  %vm8518_vm15 = vcmp.ge.f32.partialorder %v8454_v22, 0.0  ;;  %v8592_v58 = vmul.f32 %v17953_v20, %v8454_v22  ;;  %v8384_v42 = vadd.f32 %v8249_v0, %v7808_v4 }
 0x73a   :  { %v8251_v1 = vpop.f32.mrf.mxu0  ;;  %v7824_v50 = vadd.f32 %v7823_v2, %v17730_v52 }
 0x73b   :  { %v7825_v55 = vpop.f32.mrf.mxu1  ;;  %v8656_v10 = vsel %vm8518_vm15, %v8454_v22, %v8592_v58  ;;  %v8455_v54 = vadd.f32 %v17946_v9, %v8384_v42 }
 0x73c   :  { %8720 = vst.msk [vmem:[#allocation4 + $0x138] sm:$0xff] %vm6850_vm8, %v8656_v10  ;;  %v8252_v11 = vpop.f32.mrf.mxu0 }
 0x73d   :  { %v7826_v13 = vpop.f32.mrf.mxu1  ;;  %vm8519_vm0 = vcmp.ge.f32.partialorder %v8455_v54, 0.0  ;;  %v8593_v53 = vmul.f32 %v17953_v20, %v8455_v54  ;;  %v8385_v43 = vadd.f32 %v8252_v11, %v7811_v16 }
 0x73e   :  { %v8254_v59 = vpop.f32.mrf.mxu0  ;;  %v7827_v14 = vadd.f32 %v7826_v13, %v17735_v12 }
 0x73f   :  { %v7828_v40 = vpop.f32.mrf.mxu1  ;;  %v8657_v44 = vsel %vm8519_vm0, %v8455_v54, %v8593_v53  ;;  %v8456_v18 = vadd.f32 %v17946_v9, %v8385_v43 }
 0x740   :  { %8721 = vst.msk [vmem:[#allocation4 + $0x140] sm:$0xff] %vm6850_vm8, %v8657_v44  ;;  %v8257_v61 = vpop.f32.mrf.mxu0 }
 0x741   :  { %v7831_v46 = vpop.f32.mrf.mxu1  ;;  %vm8520_vm1 = vcmp.ge.f32.partialorder %v8456_v18, 0.0  ;;  %v8594_v63 = vmul.f32 %v17953_v20, %v8456_v18  ;;  %v8386_v27 = vadd.f32 %v8257_v61, %v7816_v38 }
 0x742   :  { %v8259_v24 = vpop.f32.mrf.mxu0  ;;  %v7832_v57 = vadd.f32 %v7831_v46, %v17745_v34 }
 0x743   :  { %v7833_v45 = vpop.f32.mrf.mxu1  ;;  %v8658_v51 = vsel %vm8520_vm1, %v8456_v18, %v8594_v63  ;;  %v8457_v39 = vadd.f32 %v17946_v9, %v8386_v27 }
 0x744   :  { %8722 = vst.msk [vmem:[#allocation4 + $0x148] sm:$0xff] %vm6850_vm8, %v8658_v51  ;;  %v8260_v3 = vpop.f32.mrf.mxu0 }
 0x745   :  { %v7834_v29 = vpop.f32.mrf.mxu1  ;;  %vm8521_vm2 = vcmp.ge.f32.partialorder %v8457_v39, 0.0  ;;  %v8595_v32 = vmul.f32 %v17953_v20, %v8457_v39  ;;  %v8387_v60 = vadd.f32 %v8260_v3, %v7819_v15 }
 0x746   :  { %v8262_v8 = vpop.f32.mrf.mxu0  ;;  %v7835_v55 = vadd.f32 %v7834_v29, %v17749_v49 }
 0x747   :  { %v7836_v33 = vpop.f32.mrf.mxu1  ;;  %v8659_v17 = vsel %vm8521_vm2, %v8457_v39, %v8595_v32  ;;  %v8458_v31 = vadd.f32 %v17946_v9, %v8387_v60 }
 0x748   :  { %8723 = vst.msk [vmem:[#allocation4 + $0x150] sm:$0xff] %vm6850_vm8, %v8659_v17  ;;  %v8265_v19 = vpop.f32.mrf.mxu0 }
 0x749   :  { %v7839_v21 = vpop.f32.mrf.mxu1  ;;  %vm8522_vm3 = vcmp.ge.f32.partialorder %v8458_v31, 0.0  ;;  %v8596_v47 = vmul.f32 %v17953_v20, %v8458_v31  ;;  %v8388_v5 = vadd.f32 %v8265_v19, %v7824_v50 }
 0x74a   :  { %v8267_v7 = vpop.f32.mrf.mxu0  ;;  %v7840_v43 = vadd.f32 %v7839_v21, %v17758_v30  ;;  %v18229_v30 = vld [vmem:[%s18302_s5] ss:$0 sm:$0xff]  ;;  %s10675_s5 = smov [#allocation4]  }
 0x74b   :  { %v7841_v35 = vpop.f32.mrf.mxu1  ;;  %v8660_v62 = vsel %vm8522_vm3, %v8458_v31, %v8596_v47  ;;  %v8459_v6 = vadd.f32 %v17946_v9, %v8388_v5  ;;  %s8750_s12 = sshll.u32 %s10675_s5, 4  ;;  %s8751_s12 = int_to_ptr.vmem [resolvable:$true] %s8750_s12 }
 0x74c   :  { %8724 = vst.msk [vmem:[#allocation4 + $0x158] sm:$0xff] %vm6850_vm8, %v8660_v62  ;;  %v8268_v28 = vpop.f32.mrf.mxu0  ;;  %s10651_s3 = scalar_lea.vmem %s8751_s12, 8192  ;;  %p10656_p1 = scmp.lt.s32.totalorder %s8751_s12, %s8751_s12 }
 0x74d   :  { %v7842_v52 = vpop.f32.mrf.mxu1  ;;  %vm8523_vm6 = vcmp.ge.f32.partialorder %v8459_v6, 0.0  ;;  %v8597_v23 = vmul.f32 %v17953_v20, %v8459_v6  ;;  %v8389_v41 = vadd.f32 %v8268_v28, %v7827_v14  ;;  %p10652_p0 = scmp.ne.s32.totalorder %s8751_s12, %s10651_s3  ;;  %p10657_p2 = scmp.lt.s32.totalorder %s10651_s3, %s10651_s3 }
 0x74e   :  { %v8270_v26 = vpop.f32.mrf.mxu0  ;;  %v7843_v63 = vadd.f32 %v7842_v52, %v17765_v56 }
 0x74f   :  { %v7844_v36 = vpop.f32.mrf.mxu1  ;;  %v8661_v4 = vsel %vm8523_vm6, %v8459_v6, %v8597_v23  ;;  %v8460_v37 = vadd.f32 %v17946_v9, %v8389_v41  ;;  %v19342_v6 = vld [vmem:[#allocation102_spill] sm:$0xff]  ;;  %p10658_p3 = por %p10657_p2, %p10656_p1 }
 0x750   :  { %8725 = vst.msk [vmem:[#allocation4 + $0x160] sm:$0xff] %vm6850_vm8, %v8661_v4  ;;  %v8273_v22 = vpop.f32.mrf.mxu0 }
 0x751   :  { %v7847_v12 = vpop.f32.mrf.mxu1  ;;  %vm8524_vm5 = vcmp.ge.f32.partialorder %v8460_v37, 0.0  ;;  %v8598_v2 = vmul.f32 %v17953_v20, %v8460_v37  ;;  %v8390_v0 = vadd.f32 %v8273_v22, %v7832_v57  ;;  %p10659_p4 = pnand %p10658_p3, %p10652_p0 }
 0x752   :  { %v8275_v42 = vpop.f32.mrf.mxu0  ;;  %v7848_v56 = vadd.f32 %v7847_v12, %v17781_v25 }
 0x753   :  { %v7849_v58 = vpop.f32.mrf.mxu1  ;;  %v8662_v1 = vsel %vm8524_vm5, %v8460_v37, %v8598_v2  ;;  %v8461_v16 = vadd.f32 %v17946_v9, %v8390_v0  ;;  %v19343_v37 = vld [vmem:[#allocation88_spill] sm:$0xff] }
 0x754   :  { %8726 = vst.msk [vmem:[#allocation4 + $0x168] sm:$0xff] %vm6850_vm8, %v8662_v1  ;;  %v8276_v10 = vpop.f32.mrf.mxu0 }
 0x755   :  { %v7850_v34 = vpop.f32.mrf.mxu1  ;;  %vm8525_vm7 = vcmp.ge.f32.partialorder %v8461_v16, 0.0  ;;  %v8599_v54 = vmul.f32 %v17953_v20, %v8461_v16  ;;  %v8391_v13 = vadd.f32 %v8276_v10, %v7835_v55 }
 0x756   :  { %v8278_v53 = vpop.f32.mrf.mxu0  ;;  %v7851_v21 = vadd.f32 %v7850_v34, %v17785_v48  ;;  %v19344_v34 = vld [vmem:[#allocation85_spill] sm:$0xff] }
 0x757   :  { %v7852_v11 = vpop.f32.mrf.mxu1  ;;  %v8663_v40 = vsel %vm8525_vm7, %v8461_v16, %v8599_v54  ;;  %v8462_v59 = vadd.f32 %v17946_v9, %v8391_v13 }
 0x758   :  { %8727 = vst.msk [vmem:[#allocation4 + $0x170] sm:$0xff] %vm6850_vm8, %v8663_v40  ;;  %v8281_v38 = vpop.f32.mrf.mxu0 }
 0x759   :  { %v7855_v49 = vpop.f32.mrf.mxu1  ;;  %vm8526_vm9 = vcmp.ge.f32.partialorder %v8462_v59, 0.0  ;;  %v8600_v44 = vmul.f32 %v17953_v20, %v8462_v59  ;;  %v8392_v18 = vadd.f32 %v8281_v38, %v7840_v43  ;;  %v19345_v38 = vld [vmem:[#allocation24_spill] sm:$0xff] }
 0x75a   :  { %v8283_v61 = vpop.f32.mrf.mxu0  ;;  %v7856_v52 = vadd.f32 %v7855_v49, %v19342_v6 }
 0x75b   :  { %v7857_v46 = vpop.f32.mrf.mxu1  ;;  %v8664_v27 = vsel %vm8526_vm9, %v8462_v59, %v8600_v44  ;;  %v8463_v9 = vadd.f32 %v18229_v30, %v8392_v18 }
 0x75c   :  { %8728 = vst.msk [vmem:[#allocation4 + $0x178] sm:$0xff] %vm6850_vm8, %v8664_v27  ;;  %v8284_v24 = vpop.f32.mrf.mxu0 }
 0x75d   :  { %v7858_v45 = vpop.f32.mrf.mxu1  ;;  %vm8527_vm10 = vcmp.ge.f32.partialorder %v8463_v9, 0.0  ;;  %v8601_v15 = vmul.f32 %v17953_v20, %v8463_v9  ;;  %v8393_v51 = vadd.f32 %v8284_v24, %v7843_v63 }
 0x75e   :  { %v8286_v29 = vpop.f32.mrf.mxu0  ;;  %v7859_v12 = vadd.f32 %v7858_v45, %v19343_v37  ;;  %v19349_v37 = vld [vmem:[#allocation108_spill] sm:$0xff] }
 0x75f   :  { %v7860_v39 = vpop.f32.mrf.mxu1  ;;  %v8665_v3 = vsel %vm8527_vm10, %v8463_v9, %v8601_v15  ;;  %v8464_v32 = vadd.f32 %v18229_v30, %v8393_v51 }
 0x760   :  { %8729 = vst.msk [vmem:[#allocation4 + $0x180] sm:$0xff] %vm6850_vm8, %v8665_v3  ;;  %v8289_v33 = vpop.f32.mrf.mxu0 }
 0x761   :  { %v7863_v60 = vpop.f32.mrf.mxu1  ;;  %vm8528_vm4 = vcmp.ge.f32.partialorder %v8464_v32, 0.0  ;;  %v8602_v8 = vmul.f32 %v17953_v20, %v8464_v32  ;;  %v8394_v50 = vadd.f32 %v8289_v33, %v7848_v56 }
 0x762   :  { %v8291_v31 = vpop.f32.mrf.mxu0  ;;  %v7864_v10 = vadd.f32 %v7863_v60, %v19344_v34 }
 0x763   :  { %v7865_v17 = vpop.f32.mrf.mxu1  ;;  %v8666_v19 = vsel %vm8528_vm4, %v8464_v32, %v8602_v8  ;;  %v8465_v47 = vadd.f32 %v18229_v30, %v8394_v50  ;;  %v19346_v31 = vld [vmem:[#allocation81_spill] sm:$0xff] }
 0x764   :  { %8730 = vst.msk [vmem:[#allocation4 + $0x188] sm:$0xff] %vm6850_vm8, %v8666_v19  ;;  %v8292_v5 = vpop.f32.mrf.mxu0 }
 0x765   :  { %v7866_v25 = vpop.f32.mrf.mxu1  ;;  %vm8529_vm11 = vcmp.ge.f32.partialorder %v8465_v47, 0.0  ;;  %v8603_v35 = vmul.f32 %v17953_v20, %v8465_v47  ;;  %v8395_v7 = vadd.f32 %v8292_v5, %v7851_v21  ;;  %v19347_v5 = vld [vmem:[#allocation28_spill] sm:$0xff] }
 0x766   :  { %v8294_v62 = vpop.f32.mrf.mxu0  ;;  %v7867_v44 = vadd.f32 %v7866_v25, %v19345_v38 }
 0x767   :  { %v7868_v14 = vpop.f32.mrf.mxu1  ;;  %v8667_v28 = vsel %vm8529_vm11, %v8465_v47, %v8603_v35  ;;  %v8466_v23 = vadd.f32 %v18229_v30, %v8395_v7 }
 0x768   :  { %8731 = vst.msk [vmem:[#allocation4 + $0x190] sm:$0xff] %vm6850_vm8, %v8667_v28  ;;  %v8297_v41 = vpop.f32.mrf.mxu0  ;;  %v19348_v28 = vld [vmem:[#allocation45_spill] sm:$0xff] }
 0x769   :  { %v7871_v48 = vpop.f32.mrf.mxu1  ;;  %vm8530_vm12 = vcmp.ge.f32.partialorder %v8466_v23, 0.0  ;;  %v8604_v36 = vmul.f32 %v17953_v20, %v8466_v23  ;;  %v8396_v26 = vadd.f32 %v8297_v41, %v7856_v52 }
 0x76a   :  { %v8299_v4 = vpop.f32.mrf.mxu0  ;;  %v7872_v21 = vadd.f32 %v7871_v48, %v19346_v31 }
 0x76b   :  { %v7873_v57 = vpop.f32.mrf.mxu1  ;;  %v8668_v22 = vsel %vm8530_vm12, %v8466_v23, %v8604_v36  ;;  %v8467_v2 = vadd.f32 %v18229_v30, %v8396_v26 }
 0x76c   :  { %8732 = vst.msk [vmem:[#allocation4 + $0x198] sm:$0xff] %vm6850_vm8, %v8668_v22  ;;  %v8300_v58 = vpop.f32.mrf.mxu0 }
 0x76d   :  { %v7874_v0 = vpop.f32.mrf.mxu1  ;;  %vm8531_vm13 = vcmp.ge.f32.partialorder %v8467_v2, 0.0  ;;  %v8605_v42 = vmul.f32 %v17953_v20, %v8467_v2  ;;  %v8397_v55 = vadd.f32 %v8300_v58, %v7859_v12 }
 0x76e   :  { %v8302_v16 = vpop.f32.mrf.mxu0  ;;  %v7875_v35 = vadd.f32 %v7874_v0, %v19347_v5 }
 0x76f   :  { %v7876_v1 = vpop.f32.mrf.mxu1  ;;  %v8669_v54 = vsel %vm8531_vm13, %v8467_v2, %v8605_v42  ;;  %v8468_v13 = vadd.f32 %v18229_v30, %v8397_v55 }
 0x770   :  { %8733 = vst.msk [vmem:[#allocation4 + $0x1a0] sm:$0xff] %vm6850_vm8, %v8669_v54  ;;  %v8305_v53 = vpop.f32.mrf.mxu0  ;;  %v19350_v1 = vld [vmem:[#allocation117_spill] sm:$0xff] }
 0x771   :  { %v7879_v11 = vpop.f32.mrf.mxu1  ;;  %vm8532_vm14 = vcmp.ge.f32.partialorder %v8468_v13, 0.0  ;;  %v8606_v43 = vmul.f32 %v17953_v20, %v8468_v13  ;;  %v8398_v40 = vadd.f32 %v8305_v53, %v7864_v10 }
 0x772   :  { %v8307_v49 = vpop.f32.mrf.mxu0  ;;  %v7880_v23 = vadd.f32 %v7879_v11, %v19348_v28 }
 0x773   :  { %v7881_v59 = vpop.f32.mrf.mxu1  ;;  %v8670_v18 = vsel %vm8532_vm14, %v8468_v13, %v8606_v43  ;;  %v8469_v46 = vadd.f32 %v18229_v30, %v8398_v40  ;;  %v19351_v43 = vld [vmem:[#allocation114_spill] sm:$0xff] }
 0x774   :  { %8734 = vst.msk [vmem:[#allocation4 + $0x1a8] sm:$0xff] %vm6850_vm8, %v8670_v18  ;;  %v8308_v63 = vpop.f32.mrf.mxu0 }
 0x775   :  { %v7882_v61 = vpop.f32.mrf.mxu1  ;;  %vm8533_vm15 = vcmp.ge.f32.partialorder %v8469_v46, 0.0  ;;  %v8607_v27 = vmul.f32 %v17953_v20, %v8469_v46  ;;  %v8399_v9 = vadd.f32 %v8308_v63, %v7867_v44 }
 0x776   :  { %v8310_v24 = vpop.f32.mrf.mxu0  ;;  %v7883_v12 = vadd.f32 %v7882_v61, %v19349_v37  ;;  %v19352_v61 = vld [vmem:[#allocation46_spill] sm:$0xff] }
 0x777   :  { %v7884_v45 = vpop.f32.mrf.mxu1  ;;  %v8671_v15 = vsel %vm8533_vm15, %v8469_v46, %v8607_v27  ;;  %v8470_v51 = vadd.f32 %v18229_v30, %v8399_v9 }
 0x778   :  { %8735 = vst.msk [vmem:[#allocation4 + $0x1b0] sm:$0xff] %vm6850_vm8, %v8671_v15 }
 0x779   :  { %v7887_v39 = vpop.f32.mrf.mxu1  ;;  %vm8534_vm0 = vcmp.ge.f32.partialorder %v8470_v51, 0.0  ;;  %v8608_v29 = vmul.f32 %v17953_v20, %v8470_v51 }
 0x77a   :  { %v7888_v16 = vadd.f32 %v7887_v39, %v19350_v1  ;;  %v19353_v39 = vld [vmem:[#allocation44_spill] sm:$0xff] }
 0x77b   :  { %v7889_v56 = vpop.f32.mrf.mxu1  ;;  %v8672_v3 = vsel %vm8534_vm0, %v8470_v51, %v8608_v29 }
 0x77c   :  { %8736 = vst.msk [vmem:[#allocation4 + $0x1b8] sm:$0xff] %vm6850_vm8, %v8672_v3 }
 0x77d   :  { %v7890_v32 = vpop.f32.mrf.mxu1 }
 0x77e   :  { %v7891_v40 = vadd.f32 %v7890_v32, %v19351_v43 }
 0x77f   :  { %v7892_v60 = vpop.f32.mrf.mxu1 }
 0x781   :  { %v7895_v33 = vpop.f32.mrf.mxu1 }
 0x782   :  { %v7896_v63 = vadd.f32 %v7895_v33, %v19352_v61 }
 0x783   :  { %v7897_v8 = vpop.f32.mrf.mxu1 }
 0x785   :  { %v7898_v50 = vpop.f32.mrf.mxu1 }
 0x786   :  { %v7899_v29 = vadd.f32 %v7898_v50, %v19353_v39 }
 0x787   :  { %v7900_v17 = vpop.f32.mrf.mxu1 }
 0x789   :  { %v8313_v19 = vpop.f32.mrf.mxu1 }
 0x78a   :  { %v8400_v47 = vadd.f32 %v8313_v19, %v7872_v21 }
 0x78b   :  { %v8315_v25 = vpop.f32.mrf.mxu1 }
 0x78c   :  { %v8471_v7 = vadd.f32 %v18229_v30, %v8400_v47 }
 0x78d   :  { %v8316_v14 = vpop.f32.mrf.mxu1 }
 0x78e   :  { %vm8535_vm1 = vcmp.ge.f32.partialorder %v8471_v7, 0.0  ;;  %v8609_v62 = vmul.f32 %v17953_v20, %v8471_v7  ;;  %v8401_v6 = vadd.f32 %v8316_v14, %v7875_v35 }
 0x78f   :  { %v8318_v52 = vpop.f32.mrf.mxu1 }
 0x790   :  { %v8673_v41 = vsel %vm8535_vm1, %v8471_v7, %v8609_v62  ;;  %v8472_v36 = vadd.f32 %v18229_v30, %v8401_v6 }
 0x791   :  { %8737 = vst.msk [vmem:[#allocation4 + $0x1c0] sm:$0xff] %vm6850_vm8, %v8673_v41  ;;  %v8321_v48 = vpop.f32.mrf.mxu1 }
 0x792   :  { %vm8536_vm2 = vcmp.ge.f32.partialorder %v8472_v36, 0.0  ;;  %v8610_v26 = vmul.f32 %v17953_v20, %v8472_v36  ;;  %v8402_v57 = vadd.f32 %v8321_v48, %v7880_v23 }
 0x793   :  { %v8323_v4 = vpop.f32.mrf.mxu1 }
 0x794   :  { %v8674_v22 = vsel %vm8536_vm2, %v8472_v36, %v8610_v26  ;;  %v8473_v2 = vadd.f32 %v18229_v30, %v8402_v57 }
 0x795   :  { %8738 = vst.msk [vmem:[#allocation4 + $0x1c8] sm:$0xff] %vm6850_vm8, %v8674_v22  ;;  %v8324_v0 = vpop.f32.mrf.mxu1 }
 0x796   :  { %vm8537_vm3 = vcmp.ge.f32.partialorder %v8473_v2, 0.0  ;;  %v8611_v58 = vmul.f32 %v17953_v20, %v8473_v2  ;;  %v8403_v42 = vadd.f32 %v8324_v0, %v7883_v12 }
 0x797   :  { %v8326_v55 = vpop.f32.mrf.mxu1 }
 0x798   :  { %v8675_v34 = vsel %vm8537_vm3, %v8473_v2, %v8611_v58  ;;  %v8474_v10 = vadd.f32 %v18229_v30, %v8403_v42 }
 0x799   :  { %8739 = vst.msk [vmem:[#allocation4 + $0x1d0] sm:$0xff] %vm6850_vm8, %v8675_v34  ;;  %v8329_v54 = vpop.f32.mrf.mxu1 }
 0x79a   :  { %vm8538_vm6 = vcmp.ge.f32.partialorder %v8474_v10, 0.0  ;;  %v8612_v13 = vmul.f32 %v17953_v20, %v8474_v10  ;;  %v8404_v11 = vadd.f32 %v8329_v54, %v7888_v16 }
 0x79b   :  { %v8331_v53 = vpop.f32.mrf.mxu1 }
 0x79c   :  { %v8676_v59 = vsel %vm8538_vm6, %v8474_v10, %v8612_v13  ;;  %v8475_v49 = vadd.f32 %v18229_v30, %v8404_v11 }
 0x79d   :  { %8740 = vst.msk [vmem:[#allocation4 + $0x1d8] sm:$0xff] %vm6850_vm8, %v8676_v59  ;;  %v8332_v38 = vpop.f32.mrf.mxu1 }
 0x79e   :  { %vm8539_vm5 = vcmp.ge.f32.partialorder %v8475_v49, 0.0  ;;  %v8613_v44 = vmul.f32 %v17953_v20, %v8475_v49  ;;  %v8405_v18 = vadd.f32 %v8332_v38, %v7891_v40 }
 0x79f   :  { %v8334_v46 = vpop.f32.mrf.mxu1 }
 0x7a0   :  { %v8677_v27 = vsel %vm8539_vm5, %v8475_v49, %v8613_v44  ;;  %v8476_v9 = vadd.f32 %v18229_v30, %v8405_v18 }
 0x7a1   :  { %8741 = vst.msk [vmem:[#allocation4 + $0x1e0] sm:$0xff] %vm6850_vm8, %v8677_v27  ;;  %v8337_v45 = vpop.f32.mrf.mxu1 }
 0x7a2   :  { %vm8540_vm7 = vcmp.ge.f32.partialorder %v8476_v9, 0.0  ;;  %v8614_v24 = vmul.f32 %v17953_v20, %v8476_v9  ;;  %v8406_v15 = vadd.f32 %v8337_v45, %v7896_v63 }
 0x7a3   :  { %v8339_v51 = vpop.f32.mrf.mxu1 }
 0x7a4   :  { %v8678_v56 = vsel %vm8540_vm7, %v8476_v9, %v8614_v24  ;;  %v8477_v3 = vadd.f32 %v18229_v30, %v8406_v15 }
 0x7a5   :  { %8742 = vst.msk [vmem:[#allocation4 + $0x1e8] sm:$0xff] %vm6850_vm8, %v8678_v56  ;;  %v8340_v32 = vpop.f32.mrf.mxu1 }
 0x7a6   :  { %vm8541_vm9 = vcmp.ge.f32.partialorder %v8477_v3, 0.0  ;;  %v8615_v60 = vmul.f32 %v17953_v20, %v8477_v3  ;;  %v8407_v33 = vadd.f32 %v8340_v32, %v7899_v29 }
 0x7a7   :  { %v8342_v8 = vpop.f32.mrf.mxu1 }
 0x7a8   :  { %v8679_v17 = vsel %vm8541_vm9, %v8477_v3, %v8615_v60  ;;  %v8478_v31 = vadd.f32 %v18229_v30, %v8407_v33 }
 0x7a9   :  { %8743 = vst.msk [vmem:[#allocation4 + $0x1f0] sm:$0xff] %vm6850_vm8, %v8679_v17 }
 0x7aa   :  { %vm8542_vm10 = vcmp.ge.f32.partialorder %v8478_v31, 0.0  ;;  %v8616_v50 = vmul.f32 %v17953_v20, %v8478_v31 }
 0x7ac   :  { %v8680_v21 = vsel %vm8542_vm10, %v8478_v31, %v8616_v50 }
 0x7ad   :  { %8744 = vst.msk [vmem:[#allocation4 + $0x1f8] sm:$0xff] %vm6850_vm8, %v8680_v21 }
 0x7ae   :  { %10662 = shalt.err (!%p10659_p4)
}
 0x7af   :  { %s10676_s13 = smov 128   ;;  %s10677_s6 = smov 8  }
 0x7b0   :  { %8756 = dma.vmem_to_hbm [thread:$0]  %s8751_s12, 8192, %s18304_s8, [#allocation5], %s10676_s13, %s10676_s13, %s10677_s6  }
 0x7b1   :  { %10671 = dma.done.wait [#allocation5], 8192  }
 0x7b2   :  { %10672 = vsyncadd [#allocation5], 4294959104 }
 0x7b3   :  { %8760 = vsyncpa [#allocation5], 1 }

</bundles_post_ra>
